<compile_context>
chip_gen: v5e
topology: v5e:2x2
jax: 0.10.0
libtpu: 0.0.40
codegen_flags: <defaults>
</compile_context>

<pallas_src>
import jax
import jax.numpy as jnp
from jax.experimental import pallas as pl
from jax.experimental.pallas import tpu as pltpu


# Segment layout of the merged shift vector (all starts are multiples of 128).
_S1 = (0, 64)          # conv1 shift (64)
_S2 = (128, 256)       # conv2 shift (128)
_S3 = (256, 1280)      # conv3 shift (1024)
_SF1 = (1280, 1792)    # fc1 shift (512)
_SF2 = (1792, 2048)    # fc2 shift (256)
_BF3 = (2048, 2176)    # fc3 bias + identity, padded 9 -> 128
_SHIFT_LEN = 2176


# ----------------------------------------------------------------------------
# Fused kernel: conv1/2/3 (+BN fold, ReLU) -> running max over point tiles
#               -> fc1/fc2/fc3 (+identity fold) on the last tile.
# ----------------------------------------------------------------------------

def _stn3d_kernel(x_ref,                  # (1, TN, 8)   bf16 point tile
                  w1_ref, w2_ref, w3_ref,  # (8,64) (64,128) (128,1024) bf16
                  wf1_ref, wf2_ref, wf3_ref,  # (1024,512) (512,256) (256,128) bf16
                  sh_ref,                 # (1, 2176) f32 merged shifts
                  o_ref,                  # (1, 1, 128) f32
                  gmax_ref):              # (1, 1024) f32 running max scratch
    t = pl.program_id(1)

    @pl.when(t == 0)
    def _():
        gmax_ref[...] = jnp.full((1, 1024), -jnp.inf, dtype=jnp.float32)

    x = x_ref[0]                                                  # (TN, 8) bf16

    # Point-wise conv stack (BN scale folded into bf16 weights), f32 accum.
    h = jnp.dot(x, w1_ref[...], preferred_element_type=jnp.float32)
    h = jnp.maximum(h + sh_ref[:, _S1[0]:_S1[1]], 0.0)            # (TN, 64)
    h = jnp.dot(h.astype(jnp.bfloat16), w2_ref[...],
                preferred_element_type=jnp.float32)
    h = jnp.maximum(h + sh_ref[:, _S2[0]:_S2[1]], 0.0)            # (TN, 128)
    h = jnp.dot(h.astype(jnp.bfloat16), w3_ref[...],
                preferred_element_type=jnp.float32)
    h = jnp.maximum(h + sh_ref[:, _S3[0]:_S3[1]], 0.0)            # (TN, 1024)

    # Running max over the point axis (sublane reduce per tile).
    gmax_ref[...] = jnp.maximum(gmax_ref[...],
                                jnp.max(h, axis=0, keepdims=True))

    @pl.when(t == pl.num_programs(1) - 1)
    def _():
        g = gmax_ref[...].astype(jnp.bfloat16)                    # (1, 1024)
        g = jnp.dot(g, wf1_ref[...], preferred_element_type=jnp.float32)
        g = jnp.maximum(g + sh_ref[:, _SF1[0]:_SF1[1]], 0.0)      # (1, 512)
        g = jnp.dot(g.astype(jnp.bfloat16), wf2_ref[...],
                    preferred_element_type=jnp.float32)
        g = jnp.maximum(g + sh_ref[:, _SF2[0]:_SF2[1]], 0.0)      # (1, 256)
        out = jnp.dot(g.astype(jnp.bfloat16), wf3_ref[...],
                      preferred_element_type=jnp.float32)
        o_ref[0] = out + sh_ref[:, _BF3[0]:_BF3[1]]               # (1, 128)


def _pick_tile_n(n):
    # Prefer MXU-friendly multiples of 256 (v6e/v7x), fall back to 128, else
    # take the whole axis as one block.
    for t in (512, 256, 128):
        if n % t == 0:
            return t
    return n


def stn3d_forward(params, x, *, single_buffer_weights=True):
    """x: (B, channel, N) float32 -> (B, 3, 3) transform matrices."""
    B, C, N = x.shape
    assert C <= 8, "channel dim is padded to 8"
    tile_n = _pick_tile_n(N)
    n_tiles = N // tile_n

    # Single small prep pass (XLA fuses pad + transpose + cast): channels
    # padded 3 -> 8 (lane/sublane-aligned K for conv1) and cast to bf16.
    xt = jnp.transpose(jnp.pad(x, ((0, 0), (0, 8 - C), (0, 0))),
                       (0, 2, 1)).astype(jnp.bfloat16)            # (B, N, 8)

    pipeline_mode = pl.Buffered(1) if single_buffer_weights else None

    def _w_spec(arr):
        # Full-array block, constant index map -> fetched once.
        return pl.BlockSpec(arr.shape, lambda b, t: (0, 0),
                            pipeline_mode=pipeline_mode)

    out = pl.pallas_call(
        _stn3d_kernel,
        out_shape=jax.ShapeDtypeStruct((B, 1, 128), jnp.float32),
        grid=(B, n_tiles),
        in_specs=[
            pl.BlockSpec((1, tile_n, 8), lambda b, t: (b, t, 0)),
            _w_spec(params["w1"]),
            _w_spec(params["w2"]),
            _w_spec(params["w3"]),
            _w_spec(params["wf1"]),
            _w_spec(params["wf2"]),
            _w_spec(params["wf3"]),
            _w_spec(params["shifts"]),
        ],
        out_specs=pl.BlockSpec((1, 1, 128), lambda b, t: (b, 0, 0)),
        scratch_shapes=[pltpu.VMEM((1, 1024), jnp.float32)],
        compiler_params=pltpu.CompilerParams(
            dimension_semantics=("parallel", "arbitrary"),
            vmem_limit_bytes=48 * 1024 * 1024),
    )(xt, params["w1"], params["w2"], params["w3"],
      params["wf1"], params["wf2"], params["wf3"], params["shifts"])

    return out.reshape(B, 128)[:, :9].reshape(B, 3, 3)


# ----------------------------------------------------------------------------
# Deterministic parameter init: BN folded into weights, identity into fc3 bias,
# bf16 weights, merged f32 shift vector.
# ----------------------------------------------------------------------------

def init_params(key, channel=3):
    layer_defs = [
        # name, cout, cin, has_bn
        ("conv1",   64, channel, True),
        ("conv2",  128,      64, True),
        ("conv3", 1024,     128, True),
        ("fc1",    512,    1024, True),
        ("fc2",    256,     512, True),
        ("fc3",      9,     256, False),
    ]
    eps = 1e-5
    keys = jax.random.split(key, len(layer_defs))
    weights, shifts = {}, {}
    for (name, cout, cin, has_bn), k in zip(layer_defs, keys):
        k1, k2, k3, k4 = jax.random.split(k, 4)
        w = (jax.random.normal(k1, (cout, cin)) * 0.05).astype(jnp.float32)
        b = (jax.random.normal(k2, (cout,)) * 0.05).astype(jnp.float32)
        if has_bn:
            gamma = (1.0 + 0.05 * jax.random.normal(k3, (cout,))).astype(jnp.float32)
            beta = (0.05 * jax.random.normal(k4, (cout,))).astype(jnp.float32)
            # eval-mode BN (running_mean=0, running_var=1) folded into W/shift.
            scale = gamma / jnp.sqrt(1.0 + eps)
            w = w * scale[:, None]
            shift = b * scale + beta
        else:
            shift = b
        weights[name] = w
        shifts[name] = shift

    # Fold the identity matrix added after fc3 into its bias.
    iden = jnp.array([1, 0, 0, 0, 1, 0, 0, 0, 1], dtype=jnp.float32)
    shifts["fc3"] = shifts["fc3"] + iden

    # Transpose to (Cin, Cout); pad conv1 Cin -> 8 and fc3 Cout -> 128.
    w1 = jnp.zeros((8, 64), jnp.float32).at[:channel].set(weights["conv1"].T)
    wf3 = jnp.zeros((256, 128), jnp.float32).at[:, :9].set(weights["fc3"].T)

    params = {
        "w1":  w1.astype(jnp.bfloat16),
        "w2":  weights["conv2"].T.astype(jnp.bfloat16),
        "w3":  weights["conv3"].T.astype(jnp.bfloat16),
        "wf1": weights["fc1"].T.astype(jnp.bfloat16),
        "wf2": weights["fc2"].T.astype(jnp.bfloat16),
        "wf3": wf3.astype(jnp.bfloat16),
    }

    sh = jnp.zeros((1, _SHIFT_LEN), jnp.float32)
    sh = sh.at[0, _S1[0]:_S1[0] + 64].set(shifts["conv1"])
    sh = sh.at[0, _S2[0]:_S2[1]].set(shifts["conv2"])
    sh = sh.at[0, _S3[0]:_S3[1]].set(shifts["conv3"])
    sh = sh.at[0, _SF1[0]:_SF1[1]].set(shifts["fc1"])
    sh = sh.at[0, _SF2[0]:_SF2[1]].set(shifts["fc2"])
    sh = sh.at[0, _BF3[0]:_BF3[0] + 9].set(shifts["fc3"])
    params["shifts"] = sh
    return params


# ----------------------------------------------------------------------------
# Pure-JAX reference with the same bf16/f32 cast pattern (sanity check).
# ----------------------------------------------------------------------------

def stn3d_reference(params, x):
    B, C, N = x.shape
    xb = jnp.pad(x, ((0, 0), (0, 8 - C), (0, 0))).astype(jnp.bfloat16)
    sh = params["shifts"]

    def seg(a, b):
        return sh[:, a:b]

    h = jnp.einsum("bcn,cd->bnd", xb, params["w1"],
                   preferred_element_type=jnp.float32)
    h = jnp.maximum(h + seg(*_S1)[None], 0.0)
    h = jnp.einsum("bnc,cd->bnd", h.astype(jnp.bfloat16), params["w2"],
                   preferred_element_type=jnp.float32)
    h = jnp.maximum(h + seg(*_S2)[None], 0.0)
    h = jnp.einsum("bnc,cd->bnd", h.astype(jnp.bfloat16), params["w3"],
                   preferred_element_type=jnp.float32)
    h = jnp.maximum(h + seg(*_S3)[None], 0.0)                     # (B, N, 1024)
    g = jnp.max(h, axis=1)                                        # (B, 1024)

    g = jnp.dot(g.astype(jnp.bfloat16), params["wf1"],
                preferred_element_type=jnp.float32)
    g = jnp.maximum(g + seg(*_SF1), 0.0)
    g = jnp.dot(g.astype(jnp.bfloat16), params["wf2"],
                preferred_element_type=jnp.float32)
    g = jnp.maximum(g + seg(*_SF2), 0.0)
    out = jnp.dot(g.astype(jnp.bfloat16), params["wf3"],
                  preferred_element_type=jnp.float32) + seg(*_BF3)
    return out[:, :9].reshape(B, 3, 3)


# ----------------------------------------------------------------------------
# Main
# ----------------------------------------------------------------------------

if __name__ == "__main__":
    key = jax.random.PRNGKey(0)
    kp, kx = jax.random.split(key)

    B, C, N = 2, 3, 128
    params = init_params(kp, channel=C)
    x = (jax.random.normal(kx, (B, C, N)) * 0.3).astype(jnp.float32)

    def run(single_buffer):
        fn = jax.jit(
            lambda p, xx: stn3d_forward(p, xx,
                                        single_buffer_weights=single_buffer))
        return jax.block_until_ready(fn(params, x))

    try:
        out = run(True)
    except Exception:
        # This jax version does not accept pipeline_mode=pl.Buffered(1) on
        # pallas_call input specs; fall back to default double buffering.
        out = run(False)

    assert out.shape == (B, 3, 3)
    assert bool(jnp.all(jnp.isfinite(out)))

    ref = stn3d_reference(params, x)
    assert bool(jnp.allclose(out, ref, rtol=1e-2, atol=1e-2)), (
        f"max abs diff {float(jnp.max(jnp.abs(out - ref)))}")

    print("KERNEL_OK")
</pallas_src>

<mosaic_0001>
module attributes {stable_mosaic.version = 11 : i64} {
  func.func @_stn3d_kernel(%arg0: i32, %arg1: i32, %arg2: memref<1x128x8xbf16, #tpu.memory_space<vmem>>, %arg3: memref<8x64xbf16, #tpu.memory_space<vmem>>, %arg4: memref<64x128xbf16, #tpu.memory_space<vmem>>, %arg5: memref<128x1024xbf16, #tpu.memory_space<vmem>>, %arg6: memref<1024x512xbf16, #tpu.memory_space<vmem>>, %arg7: memref<512x256xbf16, #tpu.memory_space<vmem>>, %arg8: memref<256x128xbf16, #tpu.memory_space<vmem>>, %arg9: memref<1x2176xf32, #tpu.memory_space<vmem>>, %arg10: memref<1x1x128xf32, #tpu.memory_space<vmem>>, %arg11: memref<1x1024xf32, #tpu.memory_space<vmem>>) attributes {dimension_semantics = [#tpu.dimension_semantics<parallel>, #tpu.dimension_semantics<arbitrary>], iteration_bounds = array<i64: 2, 1>, scalar_prefetch = 0 : i64, scratch_operands = 1 : i64, tpu.core_type = #tpu.core_type<tc>, window_params = [{transform_indices = @transform_0, window_bounds = array<i64: 1, 128, 8>}, {pipeline_mode = #tpu.pipeline_mode<synchronous>, transform_indices = @transform_1, window_bounds = array<i64: 8, 64>}, {pipeline_mode = #tpu.pipeline_mode<synchronous>, transform_indices = @transform_2, window_bounds = array<i64: 64, 128>}, {pipeline_mode = #tpu.pipeline_mode<synchronous>, transform_indices = @transform_3, window_bounds = array<i64: 128, 1024>}, {pipeline_mode = #tpu.pipeline_mode<synchronous>, transform_indices = @transform_4, window_bounds = array<i64: 1024, 512>}, {pipeline_mode = #tpu.pipeline_mode<synchronous>, transform_indices = @transform_5, window_bounds = array<i64: 512, 256>}, {pipeline_mode = #tpu.pipeline_mode<synchronous>, transform_indices = @transform_6, window_bounds = array<i64: 256, 128>}, {pipeline_mode = #tpu.pipeline_mode<synchronous>, transform_indices = @transform_7, window_bounds = array<i64: 1, 2176>}, {transform_indices = @transform_8, window_bounds = array<i64: 1, 1, 128>}]} {
    %c0_i32 = arith.constant 0 : i32
    %0 = arith.cmpi eq, %arg1, %c0_i32 : i32
    %1 = arith.extui %0 : i1 to i32
    %c0_i32_0 = arith.constant 0 : i32
    %2 = arith.cmpi ne, %1, %c0_i32_0 : i32
    scf.if %2 {
      %cst_25 = arith.constant 0xFF800000 : f32
      %36 = vector.broadcast %cst_25 : f32 to vector<1x1024xf32>
      %c0_26 = arith.constant 0 : index
      %c0_27 = arith.constant 0 : index
      %37 = vector.load %arg11[%c0_26, %c0_27] : memref<1x1024xf32, #tpu.memory_space<vmem>>, vector<1x1024xf32>
      tpu.vector_store %arg11[%c0_26, %c0_27], %36 {strides = array<i32>} : memref<1x1024xf32, #tpu.memory_space<vmem>>, vector<1x1024xf32>,
    } else {
    }
    %c0 = arith.constant 0 : index
    %c0_1 = arith.constant 0 : index
    %c0_2 = arith.constant 0 : index
    %3 = vector.load %arg2[%c0, %c0_1, %c0_2] : memref<1x128x8xbf16, #tpu.memory_space<vmem>>, vector<1x128x8xbf16>
    %4 = vector.shape_cast %3 : vector<1x128x8xbf16> to vector<128x8xbf16>
    %c0_3 = arith.constant 0 : index
    %c0_4 = arith.constant 0 : index
    %5 = vector.load %arg3[%c0_3, %c0_4] : memref<8x64xbf16, #tpu.memory_space<vmem>>, vector<8x64xbf16>
    %cst = arith.constant dense<0.000000e+00> : vector<128x64xf32>
    %6 = tpu.matmul %4, %5, %cst {dimension_numbers = #tpu.dot_dimension_numbers<[1], [0], [0], [1], [0, 0, 1, 1], [], []>} : vector<128x8xbf16>, vector<8x64xbf16>, vector<128x64xf32> -> vector<128x64xf32>
    %c0_5 = arith.constant 0 : index
    %c0_6 = arith.constant 0 : index
    %7 = vector.load %arg9[%c0_5, %c0_6] : memref<1x2176xf32, #tpu.memory_space<vmem>>, vector<1x64xf32>
    %8 = vector.broadcast %7 : vector<1x64xf32> to vector<128x64xf32>
    %9 = arith.addf %6, %8 : vector<128x64xf32>
    %cst_7 = arith.constant 0.000000e+00 : f32
    %10 = vector.broadcast %cst_7 : f32 to vector<128x64xf32>
    %11 = arith.maximumf %9, %10 : vector<128x64xf32>
    %12 = arith.truncf %11 : vector<128x64xf32> to vector<128x64xbf16>
    %c0_8 = arith.constant 0 : index
    %c0_9 = arith.constant 0 : index
    %13 = vector.load %arg4[%c0_8, %c0_9] : memref<64x128xbf16, #tpu.memory_space<vmem>>, vector<64x128xbf16>
    %cst_10 = arith.constant dense<0.000000e+00> : vector<128x128xf32>
    %14 = tpu.matmul %12, %13, %cst_10 {dimension_numbers = #tpu.dot_dimension_numbers<[1], [0], [0], [1], [0, 0, 1, 1], [], []>} : vector<128x64xbf16>, vector<64x128xbf16>, vector<128x128xf32> -> vector<128x128xf32>
    %c0_11 = arith.constant 0 : index
    %c128 = arith.constant 128 : index
    %15 = vector.load %arg9[%c0_11, %c128] : memref<1x2176xf32, #tpu.memory_space<vmem>>, vector<1x128xf32>
    %16 = vector.broadcast %15 : vector<1x128xf32> to vector<128x128xf32>
    %17 = arith.addf %14, %16 : vector<128x128xf32>
    %cst_12 = arith.constant 0.000000e+00 : f32
    %18 = vector.broadcast %cst_12 : f32 to vector<128x128xf32>
    %19 = arith.maximumf %17, %18 : vector<128x128xf32>
    %20 = arith.truncf %19 : vector<128x128xf32> to vector<128x128xbf16>
    %c0_13 = arith.constant 0 : index
    %c0_14 = arith.constant 0 : index
    %21 = vector.load %arg5[%c0_13, %c0_14] : memref<128x1024xbf16, #tpu.memory_space<vmem>>, vector<128x1024xbf16>
    %cst_15 = arith.constant dense<0.000000e+00> : vector<128x1024xf32>
    %22 = tpu.matmul %20, %21, %cst_15 {dimension_numbers = #tpu.dot_dimension_numbers<[1], [0], [0], [1], [0, 0, 1, 1], [], []>} : vector<128x128xbf16>, vector<128x1024xbf16>, vector<128x1024xf32> -> vector<128x1024xf32>
    %c0_16 = arith.constant 0 : index
    %c256 = arith.constant 256 : index
    %23 = vector.load %arg9[%c0_16, %c256] : memref<1x2176xf32, #tpu.memory_space<vmem>>, vector<1x1024xf32>
    %24 = vector.broadcast %23 : vector<1x1024xf32> to vector<128x1024xf32>
    %25 = arith.addf %22, %24 : vector<128x1024xf32>
    %cst_17 = arith.constant 0.000000e+00 : f32
    %26 = vector.broadcast %cst_17 : f32 to vector<128x1024xf32>
    %27 = arith.maximumf %25, %26 : vector<128x1024xf32>
    %c0_18 = arith.constant 0 : index
    %c0_19 = arith.constant 0 : index
    %28 = vector.load %arg11[%c0_18, %c0_19] : memref<1x1024xf32, #tpu.memory_space<vmem>>, vector<1x1024xf32>
    %cst_20 = arith.constant dense<0xFF800000> : vector<1024xf32>
    %29 = vector.multi_reduction <maximumf>, %27, %cst_20 [0] : vector<128x1024xf32> to vector<1024xf32>
    %30 = vector.shape_cast %29 : vector<1024xf32> to vector<1x1024xf32>
    %31 = arith.maximumf %28, %30 : vector<1x1024xf32>
    %c0_21 = arith.constant 0 : index
    %c0_22 = arith.constant 0 : index
    %32 = vector.load %arg11[%c0_21, %c0_22] : memref<1x1024xf32, #tpu.memory_space<vmem>>, vector<1x1024xf32>
    tpu.vector_store %arg11[%c0_21, %c0_22], %31 {strides = array<i32>} : memref<1x1024xf32, #tpu.memory_space<vmem>>, vector<1x1024xf32>,
    %c0_i32_23 = arith.constant 0 : i32
    %33 = arith.cmpi eq, %arg1, %c0_i32_23 : i32
    %34 = arith.extui %33 : i1 to i32
    %c0_i32_24 = arith.constant 0 : i32
    %35 = arith.cmpi ne, %34, %c0_i32_24 : i32
    scf.if %35 {
      %c0_25 = arith.constant 0 : index
      %c0_26 = arith.constant 0 : index
      %36 = vector.load %arg11[%c0_25, %c0_26] : memref<1x1024xf32, #tpu.memory_space<vmem>>, vector<1x1024xf32>
      %37 = arith.truncf %36 : vector<1x1024xf32> to vector<1x1024xbf16>
      %c0_27 = arith.constant 0 : index
      %c0_28 = arith.constant 0 : index
      %38 = vector.load %arg6[%c0_27, %c0_28] : memref<1024x512xbf16, #tpu.memory_space<vmem>>, vector<1024x512xbf16>
      %cst_29 = arith.constant dense<0.000000e+00> : vector<1x512xf32>
      %39 = tpu.matmul %37, %38, %cst_29 {dimension_numbers = #tpu.dot_dimension_numbers<[1], [0], [0], [1], [0, 0, 1, 1], [], []>} : vector<1x1024xbf16>, vector<1024x512xbf16>, vector<1x512xf32> -> vector<1x512xf32>
      %c0_30 = arith.constant 0 : index
      %c1280 = arith.constant 1280 : index
      %40 = vector.load %arg9[%c0_30, %c1280] : memref<1x2176xf32, #tpu.memory_space<vmem>>, vector<1x512xf32>
      %41 = arith.addf %39, %40 : vector<1x512xf32>
      %cst_31 = arith.constant 0.000000e+00 : f32
      %42 = vector.broadcast %cst_31 : f32 to vector<1x512xf32>
      %43 = arith.maximumf %41, %42 : vector<1x512xf32>
      %44 = arith.truncf %43 : vector<1x512xf32> to vector<1x512xbf16>
      %c0_32 = arith.constant 0 : index
      %c0_33 = arith.constant 0 : index
      %45 = vector.load %arg7[%c0_32, %c0_33] : memref<512x256xbf16, #tpu.memory_space<vmem>>, vector<512x256xbf16>
      %cst_34 = arith.constant dense<0.000000e+00> : vector<1x256xf32>
      %46 = tpu.matmul %44, %45, %cst_34 {dimension_numbers = #tpu.dot_dimension_numbers<[1], [0], [0], [1], [0, 0, 1, 1], [], []>} : vector<1x512xbf16>, vector<512x256xbf16>, vector<1x256xf32> -> vector<1x256xf32>
      %c0_35 = arith.constant 0 : index
      %c1792 = arith.constant 1792 : index
      %47 = vector.load %arg9[%c0_35, %c1792] : memref<1x2176xf32, #tpu.memory_space<vmem>>, vector<1x256xf32>
      %48 = arith.addf %46, %47 : vector<1x256xf32>
      %cst_36 = arith.constant 0.000000e+00 : f32
      %49 = vector.broadcast %cst_36 : f32 to vector<1x256xf32>
      %50 = arith.maximumf %48, %49 : vector<1x256xf32>
      %51 = arith.truncf %50 : vector<1x256xf32> to vector<1x256xbf16>
      %c0_37 = arith.constant 0 : index
      %c0_38 = arith.constant 0 : index
      %52 = vector.load %arg8[%c0_37, %c0_38] : memref<256x128xbf16, #tpu.memory_space<vmem>>, vector<256x128xbf16>
      %cst_39 = arith.constant dense<0.000000e+00> : vector<1x128xf32>
      %53 = tpu.matmul %51, %52, %cst_39 {dimension_numbers = #tpu.dot_dimension_numbers<[1], [0], [0], [1], [0, 0, 1, 1], [], []>} : vector<1x256xbf16>, vector<256x128xbf16>, vector<1x128xf32> -> vector<1x128xf32>
      %c0_40 = arith.constant 0 : index
      %c2048 = arith.constant 2048 : index
      %54 = vector.load %arg9[%c0_40, %c2048] : memref<1x2176xf32, #tpu.memory_space<vmem>>, vector<1x128xf32>
      %55 = arith.addf %53, %54 : vector<1x128xf32>
      %c0_41 = arith.constant 0 : index
      %c0_42 = arith.constant 0 : index
      %c0_43 = arith.constant 0 : index
      %56 = vector.load %arg10[%c0_41, %c0_42, %c0_43] : memref<1x1x128xf32, #tpu.memory_space<vmem>>, vector<1x1x128xf32>
      %57 = vector.shape_cast %56 : vector<1x1x128xf32> to vector<1x128xf32>
      %58 = vector.shape_cast %55 : vector<1x128xf32> to vector<1x1x128xf32>
      tpu.vector_store %arg10[%c0_41, %c0_42, %c0_43], %58 {strides = array<i32>} : memref<1x1x128xf32, #tpu.memory_space<vmem>>, vector<1x1x128xf32>,
    } else {
    }
    return
  }
  func.func @transform_0(%arg0: i32, %arg1: i32) -> (i32, i32, i32) {
    %c0_i32 = arith.constant 0 : i32
    %c0_i32_0 = arith.constant 0 : i32
    return %arg0, %arg1, %c0_i32 : i32, i32, i32
  }
  func.func @transform_1(%arg0: i32, %arg1: i32) -> (i32, i32) {
    %c0_i32 = arith.constant 0 : i32
    %c0_i32_0 = arith.constant 0 : i32
    %c0_i32_1 = arith.constant 0 : i32
    return %c0_i32, %c0_i32_0 : i32, i32
  }
  func.func @transform_2(%arg0: i32, %arg1: i32) -> (i32, i32) {
    %c0_i32 = arith.constant 0 : i32
    %c0_i32_0 = arith.constant 0 : i32
    %c0_i32_1 = arith.constant 0 : i32
    return %c0_i32, %c0_i32_0 : i32, i32
  }
  func.func @transform_3(%arg0: i32, %arg1: i32) -> (i32, i32) {
    %c0_i32 = arith.constant 0 : i32
    %c0_i32_0 = arith.constant 0 : i32
    %c0_i32_1 = arith.constant 0 : i32
    return %c0_i32, %c0_i32_0 : i32, i32
  }
  func.func @transform_4(%arg0: i32, %arg1: i32) -> (i32, i32) {
    %c0_i32 = arith.constant 0 : i32
    %c0_i32_0 = arith.constant 0 : i32
    %c0_i32_1 = arith.constant 0 : i32
    return %c0_i32, %c0_i32_0 : i32, i32
  }
  func.func @transform_5(%arg0: i32, %arg1: i32) -> (i32, i32) {
    %c0_i32 = arith.constant 0 : i32
    %c0_i32_0 = arith.constant 0 : i32
    %c0_i32_1 = arith.constant 0 : i32
    return %c0_i32, %c0_i32_0 : i32, i32
  }
  func.func @transform_6(%arg0: i32, %arg1: i32) -> (i32, i32) {
    %c0_i32 = arith.constant 0 : i32
    %c0_i32_0 = arith.constant 0 : i32
    %c0_i32_1 = arith.constant 0 : i32
    return %c0_i32, %c0_i32_0 : i32, i32
  }
  func.func @transform_7(%arg0: i32, %arg1: i32) -> (i32, i32) {
    %c0_i32 = arith.constant 0 : i32
    %c0_i32_0 = arith.constant 0 : i32
    %c0_i32_1 = arith.constant 0 : i32
    return %c0_i32, %c0_i32_0 : i32, i32
  }
  func.func @transform_8(%arg0: i32, %arg1: i32) -> (i32, i32, i32) {
    %c0_i32 = arith.constant 0 : i32
    %c0_i32_0 = arith.constant 0 : i32
    %c0_i32_1 = arith.constant 0 : i32
    return %arg0, %c0_i32, %c0_i32_0 : i32, i32, i32
  }
}

module attributes {stable_mosaic.version = 11 : i64} {
  func.func @_stn3d_kernel(%arg0: i32, %arg1: i32, %arg2: memref<1x128x8xbf16, #tpu.memory_space<vmem>>, %arg3: memref<8x64xbf16, #tpu.memory_space<vmem>>, %arg4: memref<64x128xbf16, #tpu.memory_space<vmem>>, %arg5: memref<128x1024xbf16, #tpu.memory_space<vmem>>, %arg6: memref<1024x512xbf16, #tpu.memory_space<vmem>>, %arg7: memref<512x256xbf16, #tpu.memory_space<vmem>>, %arg8: memref<256x128xbf16, #tpu.memory_space<vmem>>, %arg9: memref<1x2176xf32, #tpu.memory_space<vmem>>, %arg10: memref<1x1x128xf32, #tpu.memory_space<vmem>>, %arg11: memref<1x1024xf32, #tpu.memory_space<vmem>>) attributes {dimension_semantics = [#tpu.dimension_semantics<parallel>, #tpu.dimension_semantics<arbitrary>], iteration_bounds = array<i64: 2, 1>, scalar_prefetch = 0 : i64, scratch_operands = 1 : i64, tpu.core_type = #tpu.core_type<tc>, window_params = [{transform_indices = @transform_0, window_bounds = array<i64: 1, 128, 8>}, {pipeline_mode = #tpu.pipeline_mode<synchronous>, transform_indices = @transform_1, window_bounds = array<i64: 8, 64>}, {pipeline_mode = #tpu.pipeline_mode<synchronous>, transform_indices = @transform_2, window_bounds = array<i64: 64, 128>}, {pipeline_mode = #tpu.pipeline_mode<synchronous>, transform_indices = @transform_3, window_bounds = array<i64: 128, 1024>}, {pipeline_mode = #tpu.pipeline_mode<synchronous>, transform_indices = @transform_4, window_bounds = array<i64: 1024, 512>}, {pipeline_mode = #tpu.pipeline_mode<synchronous>, transform_indices = @transform_5, window_bounds = array<i64: 512, 256>}, {pipeline_mode = #tpu.pipeline_mode<synchronous>, transform_indices = @transform_6, window_bounds = array<i64: 256, 128>}, {pipeline_mode = #tpu.pipeline_mode<synchronous>, transform_indices = @transform_7, window_bounds = array<i64: 1, 2176>}, {transform_indices = @transform_8, window_bounds = array<i64: 1, 1, 128>}]} {
    %c0_i32 = arith.constant 0 : i32
    %0 = arith.cmpi eq, %arg1, %c0_i32 : i32
    %1 = arith.extui %0 : i1 to i32
    %c0_i32_0 = arith.constant 0 : i32
    %2 = arith.cmpi ne, %1, %c0_i32_0 : i32
    scf.if %2 {
      %cst_25 = arith.constant 0xFF800000 : f32
      %36 = vector.broadcast %cst_25 : f32 to vector<1x1024xf32>
      %c0_26 = arith.constant 0 : index
      %c0_27 = arith.constant 0 : index
      %37 = vector.load %arg11[%c0_26, %c0_27] : memref<1x1024xf32, #tpu.memory_space<vmem>>, vector<1x1024xf32>
      tpu.vector_store %arg11[%c0_26, %c0_27], %36 {strides = array<i32>} : memref<1x1024xf32, #tpu.memory_space<vmem>>, vector<1x1024xf32>,
    } else {
    }
    %c0 = arith.constant 0 : index
    %c0_1 = arith.constant 0 : index
    %c0_2 = arith.constant 0 : index
    %3 = vector.load %arg2[%c0, %c0_1, %c0_2] : memref<1x128x8xbf16, #tpu.memory_space<vmem>>, vector<1x128x8xbf16>
    %4 = vector.shape_cast %3 : vector<1x128x8xbf16> to vector<128x8xbf16>
    %c0_3 = arith.constant 0 : index
    %c0_4 = arith.constant 0 : index
    %5 = vector.load %arg3[%c0_3, %c0_4] : memref<8x64xbf16, #tpu.memory_space<vmem>>, vector<8x64xbf16>
    %cst = arith.constant dense<0.000000e+00> : vector<128x64xf32>
    %6 = tpu.matmul %4, %5, %cst {dimension_numbers = #tpu.dot_dimension_numbers<[1], [0], [0], [1], [0, 0, 1, 1], [], []>} : vector<128x8xbf16>, vector<8x64xbf16>, vector<128x64xf32> -> vector<128x64xf32>
    %c0_5 = arith.constant 0 : index
    %c0_6 = arith.constant 0 : index
    %7 = vector.load %arg9[%c0_5, %c0_6] : memref<1x2176xf32, #tpu.memory_space<vmem>>, vector<1x64xf32>
    %8 = vector.broadcast %7 : vector<1x64xf32> to vector<128x64xf32>
    %9 = arith.addf %6, %8 : vector<128x64xf32>
    %cst_7 = arith.constant 0.000000e+00 : f32
    %10 = vector.broadcast %cst_7 : f32 to vector<128x64xf32>
    %11 = arith.maximumf %9, %10 : vector<128x64xf32>
    %12 = arith.truncf %11 : vector<128x64xf32> to vector<128x64xbf16>
    %c0_8 = arith.constant 0 : index
    %c0_9 = arith.constant 0 : index
    %13 = vector.load %arg4[%c0_8, %c0_9] : memref<64x128xbf16, #tpu.memory_space<vmem>>, vector<64x128xbf16>
    %cst_10 = arith.constant dense<0.000000e+00> : vector<128x128xf32>
    %14 = tpu.matmul %12, %13, %cst_10 {dimension_numbers = #tpu.dot_dimension_numbers<[1], [0], [0], [1], [0, 0, 1, 1], [], []>} : vector<128x64xbf16>, vector<64x128xbf16>, vector<128x128xf32> -> vector<128x128xf32>
    %c0_11 = arith.constant 0 : index
    %c128 = arith.constant 128 : index
    %15 = vector.load %arg9[%c0_11, %c128] : memref<1x2176xf32, #tpu.memory_space<vmem>>, vector<1x128xf32>
    %16 = vector.broadcast %15 : vector<1x128xf32> to vector<128x128xf32>
    %17 = arith.addf %14, %16 : vector<128x128xf32>
    %cst_12 = arith.constant 0.000000e+00 : f32
    %18 = vector.broadcast %cst_12 : f32 to vector<128x128xf32>
    %19 = arith.maximumf %17, %18 : vector<128x128xf32>
    %20 = arith.truncf %19 : vector<128x128xf32> to vector<128x128xbf16>
    %c0_13 = arith.constant 0 : index
    %c0_14 = arith.constant 0 : index
    %21 = vector.load %arg5[%c0_13, %c0_14] : memref<128x1024xbf16, #tpu.memory_space<vmem>>, vector<128x1024xbf16>
    %cst_15 = arith.constant dense<0.000000e+00> : vector<128x1024xf32>
    %22 = tpu.matmul %20, %21, %cst_15 {dimension_numbers = #tpu.dot_dimension_numbers<[1], [0], [0], [1], [0, 0, 1, 1], [], []>} : vector<128x128xbf16>, vector<128x1024xbf16>, vector<128x1024xf32> -> vector<128x1024xf32>
    %c0_16 = arith.constant 0 : index
    %c256 = arith.constant 256 : index
    %23 = vector.load %arg9[%c0_16, %c256] : memref<1x2176xf32, #tpu.memory_space<vmem>>, vector<1x1024xf32>
    %24 = vector.broadcast %23 : vector<1x1024xf32> to vector<128x1024xf32>
    %25 = arith.addf %22, %24 : vector<128x1024xf32>
    %cst_17 = arith.constant 0.000000e+00 : f32
    %26 = vector.broadcast %cst_17 : f32 to vector<128x1024xf32>
    %27 = arith.maximumf %25, %26 : vector<128x1024xf32>
    %c0_18 = arith.constant 0 : index
    %c0_19 = arith.constant 0 : index
    %28 = vector.load %arg11[%c0_18, %c0_19] : memref<1x1024xf32, #tpu.memory_space<vmem>>, vector<1x1024xf32>
    %cst_20 = arith.constant dense<0xFF800000> : vector<1024xf32>
    %29 = vector.multi_reduction <maximumf>, %27, %cst_20 [0] : vector<128x1024xf32> to vector<1024xf32>
    %30 = vector.shape_cast %29 : vector<1024xf32> to vector<1x1024xf32>
    %31 = arith.maximumf %28, %30 : vector<1x1024xf32>
    %c0_21 = arith.constant 0 : index
    %c0_22 = arith.constant 0 : index
    %32 = vector.load %arg11[%c0_21, %c0_22] : memref<1x1024xf32, #tpu.memory_space<vmem>>, vector<1x1024xf32>
    tpu.vector_store %arg11[%c0_21, %c0_22], %31 {strides = array<i32>} : memref<1x1024xf32, #tpu.memory_space<vmem>>, vector<1x1024xf32>,
    %c0_i32_23 = arith.constant 0 : i32
    %33 = arith.cmpi eq, %arg1, %c0_i32_23 : i32
    %34 = arith.extui %33 : i1 to i32
    %c0_i32_24 = arith.constant 0 : i32
    %35 = arith.cmpi ne, %34, %c0_i32_24 : i32
    scf.if %35 {
      %c0_25 = arith.constant 0 : index
      %c0_26 = arith.constant 0 : index
      %36 = vector.load %arg11[%c0_25, %c0_26] : memref<1x1024xf32, #tpu.memory_space<vmem>>, vector<1x1024xf32>
      %37 = arith.truncf %36 : vector<1x1024xf32> to vector<1x1024xbf16>
      %c0_27 = arith.constant 0 : index
      %c0_28 = arith.constant 0 : index
      %38 = vector.load %arg6[%c0_27, %c0_28] : memref<1024x512xbf16, #tpu.memory_space<vmem>>, vector<1024x512xbf16>
      %cst_29 = arith.constant dense<0.000000e+00> : vector<1x512xf32>
      %39 = tpu.matmul %37, %38, %cst_29 {dimension_numbers = #tpu.dot_dimension_numbers<[1], [0], [0], [1], [0, 0, 1, 1], [], []>} : vector<1x1024xbf16>, vector<1024x512xbf16>, vector<1x512xf32> -> vector<1x512xf32>
      %c0_30 = arith.constant 0 : index
      %c1280 = arith.constant 1280 : index
      %40 = vector.load %arg9[%c0_30, %c1280] : memref<1x2176xf32, #tpu.memory_space<vmem>>, vector<1x512xf32>
      %41 = arith.addf %39, %40 : vector<1x512xf32>
      %cst_31 = arith.constant 0.000000e+00 : f32
      %42 = vector.broadcast %cst_31 : f32 to vector<1x512xf32>
      %43 = arith.maximumf %41, %42 : vector<1x512xf32>
      %44 = arith.truncf %43 : vector<1x512xf32> to vector<1x512xbf16>
      %c0_32 = arith.constant 0 : index
      %c0_33 = arith.constant 0 : index
      %45 = vector.load %arg7[%c0_32, %c0_33] : memref<512x256xbf16, #tpu.memory_space<vmem>>, vector<512x256xbf16>
      %cst_34 = arith.constant dense<0.000000e+00> : vector<1x256xf32>
      %46 = tpu.matmul %44, %45, %cst_34 {dimension_numbers = #tpu.dot_dimension_numbers<[1], [0], [0], [1], [0, 0, 1, 1], [], []>} : vector<1x512xbf16>, vector<512x256xbf16>, vector<1x256xf32> -> vector<1x256xf32>
      %c0_35 = arith.constant 0 : index
      %c1792 = arith.constant 1792 : index
      %47 = vector.load %arg9[%c0_35, %c1792] : memref<1x2176xf32, #tpu.memory_space<vmem>>, vector<1x256xf32>
      %48 = arith.addf %46, %47 : vector<1x256xf32>
      %cst_36 = arith.constant 0.000000e+00 : f32
      %49 = vector.broadcast %cst_36 : f32 to vector<1x256xf32>
      %50 = arith.maximumf %48, %49 : vector<1x256xf32>
      %51 = arith.truncf %50 : vector<1x256xf32> to vector<1x256xbf16>
      %c0_37 = arith.constant 0 : index
      %c0_38 = arith.constant 0 : index
      %52 = vector.load %arg8[%c0_37, %c0_38] : memref<256x128xbf16, #tpu.memory_space<vmem>>, vector<256x128xbf16>
      %cst_39 = arith.constant dense<0.000000e+00> : vector<1x128xf32>
      %53 = tpu.matmul %51, %52, %cst_39 {dimension_numbers = #tpu.dot_dimension_numbers<[1], [0], [0], [1], [0, 0, 1, 1], [], []>} : vector<1x256xbf16>, vector<256x128xbf16>, vector<1x128xf32> -> vector<1x128xf32>
      %c0_40 = arith.constant 0 : index
      %c2048 = arith.constant 2048 : index
      %54 = vector.load %arg9[%c0_40, %c2048] : memref<1x2176xf32, #tpu.memory_space<vmem>>, vector<1x128xf32>
      %55 = arith.addf %53, %54 : vector<1x128xf32>
      %c0_41 = arith.constant 0 : index
      %c0_42 = arith.constant 0 : index
      %c0_43 = arith.constant 0 : index
      %56 = vector.load %arg10[%c0_41, %c0_42, %c0_43] : memref<1x1x128xf32, #tpu.memory_space<vmem>>, vector<1x1x128xf32>
      %57 = vector.shape_cast %56 : vector<1x1x128xf32> to vector<1x128xf32>
      %58 = vector.shape_cast %55 : vector<1x128xf32> to vector<1x1x128xf32>
      tpu.vector_store %arg10[%c0_41, %c0_42, %c0_43], %58 {strides = array<i32>} : memref<1x1x128xf32, #tpu.memory_space<vmem>>, vector<1x1x128xf32>,
    } else {
    }
    return
  }
  func.func @transform_0(%arg0: i32, %arg1: i32) -> (i32, i32, i32) {
    %c0_i32 = arith.constant 0 : i32
    %c0_i32_0 = arith.constant 0 : i32
    return %arg0, %arg1, %c0_i32 : i32, i32, i32
  }
  func.func @transform_1(%arg0: i32, %arg1: i32) -> (i32, i32) {
    %c0_i32 = arith.constant 0 : i32
    %c0_i32_0 = arith.constant 0 : i32
    %c0_i32_1 = arith.constant 0 : i32
    return %c0_i32, %c0_i32_0 : i32, i32
  }
  func.func @transform_2(%arg0: i32, %arg1: i32) -> (i32, i32) {
    %c0_i32 = arith.constant 0 : i32
    %c0_i32_0 = arith.constant 0 : i32
    %c0_i32_1 = arith.constant 0 : i32
    return %c0_i32, %c0_i32_0 : i32, i32
  }
  func.func @transform_3(%arg0: i32, %arg1: i32) -> (i32, i32) {
    %c0_i32 = arith.constant 0 : i32
    %c0_i32_0 = arith.constant 0 : i32
    %c0_i32_1 = arith.constant 0 : i32
    return %c0_i32, %c0_i32_0 : i32, i32
  }
  func.func @transform_4(%arg0: i32, %arg1: i32) -> (i32, i32) {
    %c0_i32 = arith.constant 0 : i32
    %c0_i32_0 = arith.constant 0 : i32
    %c0_i32_1 = arith.constant 0 : i32
    return %c0_i32, %c0_i32_0 : i32, i32
  }
  func.func @transform_5(%arg0: i32, %arg1: i32) -> (i32, i32) {
    %c0_i32 = arith.constant 0 : i32
    %c0_i32_0 = arith.constant 0 : i32
    %c0_i32_1 = arith.constant 0 : i32
    return %c0_i32, %c0_i32_0 : i32, i32
  }
  func.func @transform_6(%arg0: i32, %arg1: i32) -> (i32, i32) {
    %c0_i32 = arith.constant 0 : i32
    %c0_i32_0 = arith.constant 0 : i32
    %c0_i32_1 = arith.constant 0 : i32
    return %c0_i32, %c0_i32_0 : i32, i32
  }
  func.func @transform_7(%arg0: i32, %arg1: i32) -> (i32, i32) {
    %c0_i32 = arith.constant 0 : i32
    %c0_i32_0 = arith.constant 0 : i32
    %c0_i32_1 = arith.constant 0 : i32
    return %c0_i32, %c0_i32_0 : i32, i32
  }
  func.func @transform_8(%arg0: i32, %arg1: i32) -> (i32, i32, i32) {
    %c0_i32 = arith.constant 0 : i32
    %c0_i32_0 = arith.constant 0 : i32
    %c0_i32_1 = arith.constant 0 : i32
    return %arg0, %c0_i32, %c0_i32_0 : i32, i32, i32
  }
}

</mosaic_0001>

<bundles_post_ra>
// kernel: _lambda_.1
= control target key start
LH: loop header
LB: loop body
LE: loop exit
PB: predicated region body
PF: predicated region fallthrough
CT: control target
= control target key end

     0   :  { %13 = vsyncpa [#allocation4], 0  ;;  %s7713_s0 = inlined_call_operand.vmem [shape: bf16[2,128,8], index: 0, kind: input, shape index: {}]   ;;  %s7714_s1 = inlined_call_operand.vmem [shape: bf16[8,64], index: 1, kind: input, shape index: {}]   ;;  %s7715_s2 = inlined_call_operand.vmem [shape: bf16[64,128], index: 2, kind: input, shape index: {}]   ;;  %s7716_s3 = inlined_call_operand.hbm [shape: bf16[128,1024], index: 3, kind: input, shape index: {}]   ;;  %s7717_s4 = inlined_call_operand.hbm [shape: bf16[1024,512], index: 4, kind: input, shape index: {}]   ;;  %s7718_s5 = inlined_call_operand.hbm [shape: bf16[512,256], index: 5, kind: input, shape index: {}]   ;;  %s7719_s6 = inlined_call_operand.vmem [shape: bf16[256,128], index: 6, kind: input, shape index: {}]   ;;  %s7720_s7 = inlined_call_operand.vmem [shape: f32[1,2176], index: 7, kind: input, shape index: {}]   ;;  %s7721_s8 = inlined_call_operand.vmem [shape: f32[2,1,128], index: 8, kind: output, shape index: {}]  }
   0x1   :  { %14 = vsyncpa [#allocation6], 0  ;;  %s6882_s27 = smov 0   ;;  %s6884_s28 = smov 0  }
   0x2   :  { %s6886_s29 = smov 0  }
   0x3 LB: > { %s269_s10 = sshll.u32 %s7717_s4, 4  ;;  %s4551_s11 = sadd.s32 4294967295, %s6826_s29   ;;  %s6826_s29 = sphi %s6886_s29, %s20_s29   ;;  %s6822_s28 = sphi %s6884_s28, %s7727_s28   ;;  %s6818_s27 = sphi %s6882_s27, %s7726_s27   ;;  %s270_s10 = int_to_ptr.hbm [resolvable:$true] %s269_s10 }
   0x4   : > { %p4553_p0 = scmp.ge.s32.totalorder %s6826_s29, 1  ;;  %p238_p1 = scmp.lt.s32.totalorder %s6826_s29, 3 }
   0x5   : > { %p6903_p2 = scmp.eq.s32.totalorder %s4551_s11, 0  ;;  %s6828_s14 = smov [#allocation5]  }
   0x6   : > { %p6907_p3 = pnand %p4553_p0, %p238_p1  ;;  %s271_s15 = sshll.u32 %s6828_s14, 4  ;;  %s272_s15 = int_to_ptr.vmem [resolvable:$true] %s271_s15 }
   0x7   : > { %s32_s17 = sadd.s32 1, %s6822_s28  ;;  %s6829_s18 = smov 256  }
   0x8   : > { %p6655_p4 = pneg %p6907_p3  ;;  %p34_p6 = scmp.ge.s32.totalorder %s32_s17, 2 }
   0x9   : > { %s6830_s19 = smov 16   ;;  %s255_s22 = sshll.u32 %s7716_s3, 4  ;;  %s256_s22 = int_to_ptr.hbm [resolvable:$true] %s255_s22 }
   0xa   : > { %p6915_p5 = pnand %p6903_p2, %p6655_p4  ;;  %s7729_s17 = smov (%p34_p6, %s32_s17), 0 }
   0xb   : > { %s6831_s23 = smov [#allocation3]   ;;  %s283_s30 = sshll.u32 %s7718_s5, 4  ;;  %s284_s30 = int_to_ptr.hbm [resolvable:$true] %s283_s30 }
   0xc   : > { %6661 = dma.hbm_to_vmem [thread:$0]  (!%p6915_p5), %s270_s10, 32768, %s272_s15, [#allocation6], %s6829_s18, %s6829_s18, %s6830_s19  }
   0xd   : > { %s257_s24 = sshll.u32 %s6831_s23, 4  ;;  %s6832_s9 = smov 512   ;;  %s258_s24 = int_to_ptr.vmem [resolvable:$true] %s257_s24 }
   0xe   : > { %s6833_s11 = smov 32   ;;  %s6834_s10 = smov [#allocation7]  }
   0xf   : > { %6658 = dma.hbm_to_vmem [thread:$0]  (!%p6915_p5), %s256_s22, 8192, %s258_s24, [#allocation4], %s6832_s9, %s6832_s9, %s6833_s11  }
  0x10   : > { %s285_s14 = sshll.u32 %s6834_s10, 4  ;;  %s6835_s15 = smov 128   ;;  %s286_s14 = int_to_ptr.vmem [resolvable:$true] %s285_s14 }
  0x11   : > { %s6836_s18 = smov 8   ;;  %320 = sbr.rel (%p6907_p3) target bundleno = 1402 (0x57a), region = 52 }
  0x12   : > { %6664 = dma.hbm_to_vmem [thread:$0]  (!%p6915_p5), %s284_s30, 8192, %s286_s14, [#allocation6], %s6835_s15, %s6835_s15, %s6836_s18  }
  0x16   : > { %6809 = dma.done.wait (%p6903_p2), [#allocation4], 8192  }
  0x17   : > { %6811 = vsyncadd (%p6903_p2), [#allocation4], 4294959104 }
  0x18   : > { %6813 = dma.done.wait (%p6903_p2), [#allocation6], 40960  }
  0x19   : > { %6815 = vsyncadd (%p6903_p2), [#allocation6], 4294926336  ;;  %p368_p7 = scmp.lt.s32.totalorder %s6818_s27, 1  ;;  %vm472_vm0 = vcmask 1043456   ;;  %v402_v0 = vld [vmem:[%s7714_s1] sm:$0xf] }
  0x1a   : > { %v474_v1 = vsel %vm472_vm0, %v402_v0, 0  ;;  %vm447_vm1 = vcmask 64512   ;;  %v6242_v8 = vld [vmem:[%s7715_s2 + $0x18] sm:$0xff]  ;;  %v6241_v10 = vld [vmem:[%s7715_s2 + $0x10] sm:$0xff]  ;;  %v6240_v11 = vld [vmem:[%s7715_s2 + $0x8] sm:$0xff]  ;;  %vm585_vm2 = vcmask 523264  }
  0x1b   : > { %s7731_s27 = smov (!%p368_p7, %s6818_s27), 1  ;;  %483 = vmatpush.bf16.msra.mxu0 %v474_v1  ;;  %614 = vmatpush.bf16.msra.mxu1 %v6242_v8  ;;  %v6239_v12 = vld [vmem:[%s7715_s2] sm:$0xff]  ;;  %v4862_v54 = vld [vmem:[#allocation3 + $0x1c8] sm:$0xf]  ;;  %v6300_v56 = vld [vmem:[#allocation3 + $0x1cc] sm:$0xf] }
  0x1c   : > { %s6230_s13 = sshll.u32 %s7731_s27, 6  ;;  %v6979_v15 = vld [vmem:[%s7720_s7] ss:$0 sm:$0xff]  ;;  %v6304_v55 = vld [vmem:[#allocation3 + $0x1e4] sm:$0xf0]  ;;  %vm1791_vm3 = vcmask 1042434   ;;  %s379_s12 = scalar_lea.vmem %s7721_s8, %s7731_s27 }
  0x1d   : > { %s375_s20 = scalar_lea.vmem %s7713_s0, %s6230_s13  ;;  %v4863_v57 = vor.u32 %v6304_v55, %v4862_v54  ;;  %v4864_v58 = vld [vmem:[#allocation3 + $0x1e8] sm:$0xf0]  ;;  %v4854_v59 = vld [vmem:[#allocation3 + $0x1c0] sm:$0xf]  ;;  %v6299_v1 = vld [vmem:[#allocation3 + $0x1c4] sm:$0xf] }
  0x1e   : > { %v6231_v2 = vld [vmem:[%s375_s20] sm:$0xff]  ;;  %v6232_v3 = vld [vmem:[%s375_s20 + $0x8] sm:$0xff]  ;;  %v6233_v4 = vld [vmem:[%s375_s20 + $0x10] sm:$0xff]  ;;  %v4867_v63 = vor.u32 %v6300_v56, %v4864_v58  ;;  %vm1789_vm4 = vcmask 1040384   ;;  %vm1793_vm5 = vcmask 1041408   ;;  %vm1797_vm6 = vcmask 1046534  }
  0x1f   : > { %4596 = vmatmul.msk.bf16.vlgmr.msra.gmra.mxu0 %vm447_vm1, %v6231_v2  ;;  %v6234_v5 = vld [vmem:[%s375_s20 + $0x18] sm:$0xff]  ;;  %v6235_v6 = vld [vmem:[%s375_s20 + $0x20] sm:$0xff]  ;;  %v6236_v7 = vld [vmem:[%s375_s20 + $0x28] sm:$0xff]  ;;  %615 = vmatpush.bf16.msra.mxu1 %v6241_v10  ;;  %vm1795_vm7 = vcmask 1044484   ;;  %vm1799_vm8 = vcmask 1045508  }
  0x20   : > { %v6237_v9 = vld [vmem:[%s375_s20 + $0x30] sm:$0xff]  ;;  %v6238_v13 = vld [vmem:[%s375_s20 + $0x38] sm:$0xff]  ;;  %v6303_v60 = vld [vmem:[#allocation3 + $0x1dc] sm:$0xf0]  ;;  %1183 = vmatpush.bf16.msrb.mxu0 %v4863_v57 }
  0x21   : > { %v4855_v0 = vor.u32 %v6303_v60, %v4854_v59  ;;  %v4856_v2 = vld [vmem:[#allocation3 + $0x1e0] sm:$0xf0]  ;;  %v4830_v10 = vld [vmem:[#allocation3 + $0x188] sm:$0xf]  ;;  %v6268_v57 = vld [vmem:[#allocation3 + $0xcc] sm:$0xf] }
  0x22   : > { %v4736_v58 = vld [vmem:[#allocation3 + $0xe8] sm:$0xf0] }
  0x23   : > { %616 = vmatpush.bf16.msra.mxu1 %v6240_v11  ;;  %1085 = vmatpush.bf16.msra.mxu2 %v4855_v0  ;;  %v6296_v11 = vld [vmem:[#allocation3 + $0x1a4] sm:$0xf0]  ;;  %v4739_v59 = vor.u32 %v6268_v57, %v4736_v58 }
  0x27   : > { %617 = vmatpush.bf16.msra.mxu1 %v6239_v12 }
  0x2b   : > { %1232 = vmatpush.bf16.msrb.mxu1 %v4867_v63  ;;  %v6259_v63 = vld [vmem:[#allocation3 + $0x84] sm:$0xf] }
  0x2f   : > { %4597 = vmatmul.msk.bf16.gmra.mxu0 %vm447_vm1, %v6232_v3  ;;  %v4859_v3 = vor.u32 %v6299_v1, %v4856_v2  ;;  %v4696_v1 = vld [vmem:[#allocation3 + $0xa0] sm:$0xf0]  ;;  %v4702_v2 = vld [vmem:[#allocation3 + $0x88] sm:$0xf] }
  0x31   : > { %1134 = vmatpush.bf16.msra.mxu3 %v4859_v3  ;;  %v6264_v3 = vld [vmem:[#allocation3 + $0xa4] sm:$0xf0] }
  0x3f   : > { %4598 = vmatmul.msk.bf16.gmra.mxu0 %vm447_vm1, %v6233_v4 }
  0x4f   : > { %4599 = vmatmul.msk.bf16.gmra.mxu0 %vm447_vm1, %v6234_v5  ;;  %v4822_v5 = vld [vmem:[#allocation3 + $0x180] sm:$0xf] }
  0x5f   : > { %4600 = vmatmul.msk.bf16.gmra.mxu0 %vm447_vm1, %v6235_v6  ;;  %v6295_v6 = vld [vmem:[#allocation3 + $0x19c] sm:$0xf0] }
  0x60   : > { %v4823_v8 = vor.u32 %v6295_v6, %v4822_v5  ;;  %v4703_v5 = vor.u32 %v6264_v3, %v4702_v2  ;;  %v6260_v6 = vld [vmem:[#allocation3 + $0x8c] sm:$0xf] }
  0x62   : > { %1086 = vmatpush.bf16.msra.mxu2 %v4823_v8 }
  0x6f   : > { %4601 = vmatmul.msk.bf16.gmra.mxu0 %vm447_vm1, %v6236_v7  ;;  %v6291_v7 = vld [vmem:[#allocation3 + $0x184] sm:$0xf] }
  0x7f   : > { %4602 = vmatmul.msk.bf16.gmra.mxu0 %vm447_vm1, %v6237_v9  ;;  %v4824_v9 = vld [vmem:[#allocation3 + $0x1a0] sm:$0xf0] }
  0x80   : > { %v4827_v12 = vor.u32 %v6291_v7, %v4824_v9  ;;  %v4704_v7 = vld [vmem:[#allocation3 + $0xa8] sm:$0xf0] }
  0x81   : > { %v4707_v9 = vor.u32 %v6260_v6, %v4704_v7 }
  0x82   : > { %1135 = vmatpush.bf16.msra.mxu3 %v4827_v12  ;;  %v6251_v12 = vld [vmem:[#allocation3 + $0x44] sm:$0xf] }
  0x8f   : > { %4603 = vmatmul.msk.bf16.gmra.mxu0 %vm447_vm1, %v6238_v13  ;;  %v4831_v13 = vor.u32 %v6296_v11, %v4830_v10  ;;  %v4662_v10 = vld [vmem:[#allocation3 + $0x40] sm:$0xf] }
  0x90   : > { %v6255_v11 = vld [vmem:[#allocation3 + $0x5c] sm:$0xf0] }
  0x91   : > { %1184 = vmatpush.bf16.msrb.mxu0 %v4831_v13  ;;  %v4663_v13 = vor.u32 %v6255_v11, %v4662_v10 }
  0x9c   : > { %v485_v14 = vpop.f32.mrf.mxu0 }
  0x9d   : > { %v486_v16 = vadd.f32 %v6979_v15, %v485_v14  ;;  %v6292_v14 = vld [vmem:[#allocation3 + $0x18c] sm:$0xf] }
  0x9f   : > { %v525_v19 = vmax.f32 %v486_v16, 0.0  ;;  %v4832_v16 = vld [vmem:[#allocation3 + $0x1a8] sm:$0xf0] }
  0xa4   : > { %v487_v17 = vpop.f32.mrf.mxu0 }
  0xa5   : > { %v488_v18 = vadd.f32 %v6979_v15, %v487_v17  ;;  %v4790_v17 = vld [vmem:[#allocation3 + $0x140] sm:$0xf] }
  0xa7   : > { %v526_v20 = vmax.f32 %v488_v18, 0.0 }
  0xa9   : > { %v541_v21 = vpack.c.bf16 %v526_v20, %v525_v19  ;;  %v4835_v19 = vor.u32 %v6292_v14, %v4832_v16  ;;  %v6287_v20 = vld [vmem:[#allocation3 + $0x15c] sm:$0xf0]  ;;  %v4664_v14 = vld [vmem:[#allocation3 + $0x60] sm:$0xf0]  ;;  %v4670_v16 = vld [vmem:[#allocation3 + $0x48] sm:$0xf] }
  0xab   : > { %4620 = vmatmul.msk.bf16.vlgmr.msra.gmra.mxu1 %vm585_vm2, %v541_v21  ;;  %v6283_v21 = vld [vmem:[#allocation3 + $0x144] sm:$0xf] }
  0xac   : > { %v490_v22 = vpop.f32.mrf.mxu0  ;;  %1233 = vmatpush.bf16.msrb.mxu1 %v4835_v19 }
  0xad   : > { %v491_v23 = vadd.f32 %v6979_v15, %v490_v22  ;;  %v4792_v22 = vld [vmem:[#allocation3 + $0x160] sm:$0xf0] }
  0xaf   : > { %v527_v26 = vmax.f32 %v491_v23, 0.0  ;;  %v4791_v23 = vor.u32 %v6287_v20, %v4790_v17  ;;  %v6256_v17 = vld [vmem:[#allocation3 + $0x64] sm:$0xf0]  ;;  %v6252_v20 = vld [vmem:[#allocation3 + $0x4c] sm:$0xf] }
  0xb0   : > { %v4671_v19 = vor.u32 %v6256_v17, %v4670_v16  ;;  %v4872_v17 = vld [vmem:[#allocation3 + $0x1f0] sm:$0xf0] }
  0xb1   : > { %1087 = vmatpush.bf16.msra.mxu2 %v4791_v23  ;;  %v4630_v23 = vld [vmem:[#allocation3] sm:$0xf] }
  0xb4   : > { %v492_v24 = vpop.f32.mrf.mxu0 }
  0xb5   : > { %v493_v25 = vadd.f32 %v6979_v15, %v492_v24  ;;  %v4798_v24 = vld [vmem:[#allocation3 + $0x148] sm:$0xf] }
  0xb7   : > { %v528_v27 = vmax.f32 %v493_v25, 0.0  ;;  %v6288_v25 = vld [vmem:[#allocation3 + $0x164] sm:$0xf0] }
  0xb9   : > { %v542_v28 = vpack.c.bf16 %v528_v27, %v527_v26  ;;  %v6284_v26 = vld [vmem:[#allocation3 + $0x14c] sm:$0xf]  ;;  %v4795_v27 = vor.u32 %v6283_v21, %v4792_v22 }
  0xba   : > { %v4672_v21 = vld [vmem:[#allocation3 + $0x68] sm:$0xf0] }
  0xbb   : > { %4621 = vmatmul.msk.bf16.gmra.mxu1 %vm585_vm2, %v542_v28  ;;  %v4799_v28 = vor.u32 %v6288_v25, %v4798_v24  ;;  %1136 = vmatpush.bf16.msra.mxu3 %v4795_v27  ;;  %v4675_v22 = vor.u32 %v6252_v20, %v4672_v21  ;;  %v6247_v24 = vld [vmem:[#allocation3 + $0x1c] sm:$0xf0]  ;;  %v6243_v25 = vld [vmem:[#allocation3 + $0x4] sm:$0xf] }
  0xbc   : > { %v495_v29 = vpop.f32.mrf.mxu0  ;;  %v4632_v27 = vld [vmem:[#allocation3 + $0x20] sm:$0xf0] }
  0xbd   : > { %v496_v30 = vadd.f32 %v6979_v15, %v495_v29  ;;  %v4800_v29 = vld [vmem:[#allocation3 + $0x168] sm:$0xf0]  ;;  %1185 = vmatpush.bf16.msrb.mxu0 %v4799_v28  ;;  %v4638_v28 = vld [vmem:[#allocation3 + $0x8] sm:$0xf] }
  0xbf   : > { %v529_v33 = vmax.f32 %v496_v30, 0.0  ;;  %v4758_v30 = vld [vmem:[#allocation3 + $0x100] sm:$0xf] }
  0xc4   : > { %v497_v31 = vpop.f32.mrf.mxu0 }
  0xc5   : > { %v498_v32 = vadd.f32 %v6979_v15, %v497_v31  ;;  %v6279_v31 = vld [vmem:[#allocation3 + $0x11c] sm:$0xf0] }
  0xc7   : > { %v530_v34 = vmax.f32 %v498_v32, 0.0  ;;  %v4803_v32 = vor.u32 %v6284_v26, %v4800_v29  ;;  %v4631_v26 = vor.u32 %v6247_v24, %v4630_v23  ;;  %v6248_v29 = vld [vmem:[#allocation3 + $0x24] sm:$0xf0]  ;;  %v4880_v23 = vld [vmem:[#allocation3 + $0x1f8] sm:$0xf0] }
  0xc9   : > { %v543_v35 = vpack.c.bf16 %v530_v34, %v529_v33  ;;  %v6275_v33 = vld [vmem:[#allocation3 + $0x104] sm:$0xf]  ;;  %1234 = vmatpush.bf16.msrb.mxu1 %v4803_v32  ;;  %v4639_v32 = vor.u32 %v6248_v29, %v4638_v28  ;;  %v6293_v28 = vld [vmem:[#allocation3 + $0x194] sm:$0xf] }
  0xca   : > { %v4760_v34 = vld [vmem:[#allocation3 + $0x120] sm:$0xf0] }
  0xcb   : > { %4622 = vmatmul.msk.bf16.gmra.mxu1 %vm585_vm2, %v543_v35  ;;  %v4766_v35 = vld [vmem:[#allocation3 + $0x108] sm:$0xf] }
  0xcc   : > { %v500_v36 = vpop.f32.mrf.mxu0 }
  0xcd   : > { %v501_v37 = vadd.f32 %v6979_v15, %v500_v36  ;;  %v6280_v36 = vld [vmem:[#allocation3 + $0x124] sm:$0xf0] }
  0xcf   : > { %v531_v40 = vmax.f32 %v501_v37, 0.0  ;;  %v6276_v37 = vld [vmem:[#allocation3 + $0x10c] sm:$0xf] }
  0xd4   : > { %v502_v38 = vpop.f32.mrf.mxu0 }
  0xd5   : > { %v503_v39 = vadd.f32 %v6979_v15, %v502_v38  ;;  %v4759_v38 = vor.u32 %v6279_v31, %v4758_v30  ;;  %v4635_v31 = vor.u32 %v6243_v25, %v4632_v27  ;;  %v6297_v27 = vld [vmem:[#allocation3 + $0x1ac] sm:$0xf0] }
  0xd7   : > { %v532_v41 = vmax.f32 %v503_v39, 0.0  ;;  %v4767_v39 = vor.u32 %v6280_v36, %v4766_v35  ;;  %1088 = vmatpush.bf16.msra.mxu2 %v4759_v38 }
  0xd9   : > { %v544_v42 = vpack.c.bf16 %v532_v41, %v531_v40  ;;  %v4768_v40 = vld [vmem:[#allocation3 + $0x128] sm:$0xf0]  ;;  %v4763_v41 = vor.u32 %v6275_v33, %v4760_v34  ;;  %1186 = vmatpush.bf16.msrb.mxu0 %v4767_v39 }
  0xda   : > { %v6244_v33 = vld [vmem:[#allocation3 + $0xc] sm:$0xf] }
  0xdb   : > { %4623 = vmatmul.msk.bf16.gmra.mxu1 %vm585_vm2, %v544_v42  ;;  %v4771_v42 = vor.u32 %v6276_v37, %v4768_v40  ;;  %1137 = vmatpush.bf16.msra.mxu3 %v4763_v41  ;;  %v4640_v34 = vld [vmem:[#allocation3 + $0x28] sm:$0xf0] }
  0xdc   : > { %v505_v43 = vpop.f32.mrf.mxu0  ;;  %v4643_v36 = vor.u32 %v6244_v33, %v4640_v34  ;;  %v6298_v33 = vld [vmem:[#allocation3 + $0x1b4] sm:$0xf0]  ;;  %v6294_v34 = vld [vmem:[#allocation3 + $0x19c] sm:$0xf] }
  0xdd   : > { %v506_v44 = vadd.f32 %v6979_v15, %v505_v43  ;;  %1235 = vmatpush.bf16.msrb.mxu1 %v4771_v42  ;;  %v7008_v42 = vld [vmem:[%s7720_s7 + $0x1] ss:$0 sm:$0xff] }
  0xdf   : > { %v533_v47 = vmax.f32 %v506_v44, 0.0 }
  0xe1   : > { %1236 = vmatpush.bf16.msrb.mxu1 %v4739_v59 }
  0xe4   : > { %v507_v45 = vpop.f32.mrf.mxu0 }
  0xe5   : > { %v508_v46 = vadd.f32 %v6979_v15, %v507_v45  ;;  %1237 = vmatpush.bf16.msrb.mxu1 %v4707_v9 }
  0xe7   : > { %v534_v48 = vmax.f32 %v508_v46, 0.0  ;;  %v4726_v46 = vld [vmem:[#allocation3 + $0xc0] sm:$0xf] }
  0xe9   : > { %v545_v49 = vpack.c.bf16 %v534_v48, %v533_v47  ;;  %v6271_v47 = vld [vmem:[#allocation3 + $0xdc] sm:$0xf0]  ;;  %v6267_v48 = vld [vmem:[#allocation3 + $0xc4] sm:$0xf]  ;;  %1238 = vmatpush.bf16.msrb.mxu1 %v4675_v22  ;;  %v6302_v22 = vld [vmem:[#allocation3 + $0x1dc] sm:$0xf] }
  0xea   : > { %v4883_v25 = vor.u32 %v6302_v22, %v4880_v23 }
  0xeb   : > { %4624 = vmatmul.msk.bf16.gmra.mxu1 %vm585_vm2, %v545_v49  ;;  %v4727_v49 = vor.u32 %v6271_v47, %v4726_v46 }
  0xec   : > { %v510_v50 = vpop.f32.mrf.mxu0 }
  0xed   : > { %v511_v51 = vadd.f32 %v6979_v15, %v510_v50  ;;  %v4728_v50 = vld [vmem:[#allocation3 + $0xe0] sm:$0xf0]  ;;  %1089 = vmatpush.bf16.msra.mxu2 %v4727_v49  ;;  %1239 = vmatpush.bf16.msrb.mxu1 %v4643_v36 }
  0xee   : > { %v4731_v55 = vor.u32 %v6267_v48, %v4728_v50 }
  0xef   : > { %v535_v61 = vmax.f32 %v511_v51, 0.0  ;;  %v4734_v51 = vld [vmem:[#allocation3 + $0xc8] sm:$0xf] }
  0xf0   : > { %1138 = vmatpush.bf16.msra.mxu3 %v4731_v55 }
  0xf1   : > { %1428 = vmatpush.bf16.msra.mxu1 %v4883_v25  ;;  %v6261_v25 = vld [vmem:[#allocation3 + $0x94] sm:$0xf] }
  0xf4   : > { %v512_v52 = vpop.f32.mrf.mxu0 }
  0xf5   : > { %v513_v53 = vadd.f32 %v6979_v15, %v512_v52  ;;  %v6272_v52 = vld [vmem:[#allocation3 + $0xe4] sm:$0xf0] }
  0xf6   : > { %v4735_v56 = vor.u32 %v6272_v52, %v4734_v51 }
  0xf7   : > { %v536_v62 = vmax.f32 %v513_v53, 0.0 }
  0xf8   : > { %1187 = vmatpush.bf16.msrb.mxu0 %v4735_v56 }
  0xf9   : > { %v546_v4 = vpack.c.bf16 %v536_v62, %v535_v61  ;;  %v4694_v61 = vld [vmem:[#allocation3 + $0x80] sm:$0xf] }
  0xfa   : > { %v6263_v62 = vld [vmem:[#allocation3 + $0x9c] sm:$0xf0] }
  0xfb   : > { %4625 = vmatmul.msk.bf16.gmra.mxu1 %vm585_vm2, %v546_v4  ;;  %v4695_v0 = vor.u32 %v6263_v62, %v4694_v61  ;;  %v4699_v4 = vor.u32 %v6259_v63, %v4696_v1 }
  0xfc   : > { %v515_v18 = vpop.f32.mrf.mxu0  ;;  %1188 = vmatpush.bf16.msrb.mxu0 %v4703_v5 }
  0xfd   : > { %v516_v43 = vadd.f32 %v6979_v15, %v515_v18  ;;  %1090 = vmatpush.bf16.msra.mxu2 %v4695_v0  ;;  %1139 = vmatpush.bf16.msra.mxu3 %v4699_v4  ;;  %v4667_v18 = vor.u32 %v6251_v12, %v4664_v14  ;;  %v4870_v12 = vld [vmem:[#allocation3 + $0x1d0] sm:$0xf]  ;;  %v6301_v14 = vld [vmem:[#allocation3 + $0x1d4] sm:$0xf] }
  0xfe   : > { %v4875_v20 = vor.u32 %v6301_v14, %v4872_v17  ;;  %v4750_v14 = vld [vmem:[#allocation3 + $0xd8] sm:$0xf] }
  0xff   : > { %v537_v53 = vmax.f32 %v516_v43, 0.0 }
 0x100   : > { %1189 = vmatpush.bf16.msrb.mxu0 %v4671_v19  ;;  %v6306_v19 = vld [vmem:[#allocation3 + $0x1f4] sm:$0xf0] }
 0x101   : > { %1091 = vmatpush.bf16.msra.mxu2 %v4663_v13  ;;  %1140 = vmatpush.bf16.msra.mxu3 %v4667_v18  ;;  %v6305_v13 = vld [vmem:[#allocation3 + $0x1ec] sm:$0xf0]  ;;  %v4878_v18 = vld [vmem:[#allocation3 + $0x1d8] sm:$0xf] }
 0x102   : > { %v4871_v16 = vor.u32 %v6305_v13, %v4870_v12  ;;  %v4879_v21 = vor.u32 %v6306_v19, %v4878_v18  ;;  %v4744_v13 = vld [vmem:[#allocation3 + $0xf0] sm:$0xf0]  ;;  %v6270_v19 = vld [vmem:[#allocation3 + $0xdc] sm:$0xf] }
 0x104   : > { %v517_v44 = vpop.f32.mrf.mxu0  ;;  %1190 = vmatpush.bf16.msrb.mxu0 %v4639_v32 }
 0x105   : > { %v518_v45 = vadd.f32 %v6979_v15, %v517_v44  ;;  %1092 = vmatpush.bf16.msra.mxu2 %v4631_v26  ;;  %1141 = vmatpush.bf16.msra.mxu3 %v4635_v31  ;;  %v4838_v26 = vld [vmem:[#allocation3 + $0x190] sm:$0xf]  ;;  %v4846_v31 = vld [vmem:[#allocation3 + $0x198] sm:$0xf] }
 0x106   : > { %v4839_v29 = vor.u32 %v6297_v27, %v4838_v26  ;;  %v4847_v36 = vor.u32 %v6298_v33, %v4846_v31  ;;  %v4712_v26 = vld [vmem:[#allocation3 + $0xb0] sm:$0xf0]  ;;  %v6262_v31 = vld [vmem:[#allocation3 + $0x9c] sm:$0xf]  ;;  %v4678_v33 = vld [vmem:[#allocation3 + $0x50] sm:$0xf] }
 0x107   : > { %v538_v54 = vmax.f32 %v518_v45, 0.0 }
 0x108   : > { %1379 = vmatpush.bf16.msra.mxu0 %v4879_v21  ;;  %v4710_v21 = vld [vmem:[#allocation3 + $0x90] sm:$0xf] }
 0x109   : > { %v547_v60 = vpack.c.bf16 %v538_v54, %v537_v53  ;;  %1281 = vmatpush.bf16.msrb.mxu2 %v4871_v16  ;;  %1330 = vmatpush.bf16.msrb.mxu3 %v4875_v20  ;;  %v6274_v16 = vld [vmem:[#allocation3 + $0xf4] sm:$0xf0]  ;;  %v4752_v20 = vld [vmem:[#allocation3 + $0xf8] sm:$0xf0] }
 0x10a   : > { %v4751_v22 = vor.u32 %v6274_v16, %v4750_v14  ;;  %v4755_v23 = vor.u32 %v6270_v19, %v4752_v20  ;;  %v7077_v14 = vld [vmem:[%s7720_s7 + $0x2] sm:$0xff] }
 0x10b   : > { %4626 = vmatmul.msk.bf16.gmra.mxu1 %vm585_vm2, %v547_v60 }
 0x10c   : > { %v520_v8 = vpop.f32.mrf.mxu0  ;;  %1380 = vmatpush.bf16.msra.mxu0 %v4847_v36  ;;  %v4680_v36 = vld [vmem:[#allocation3 + $0x70] sm:$0xf0] }
 0x10d   : > { %v521_v30 = vadd.f32 %v6979_v15, %v520_v8  ;;  %1282 = vmatpush.bf16.msrb.mxu2 %v4839_v29  ;;  %v4718_v29 = vld [vmem:[#allocation3 + $0x98] sm:$0xf] }
 0x10f   : > { %v539_v38 = vmax.f32 %v521_v30, 0.0  ;;  %v4840_v30 = vld [vmem:[#allocation3 + $0x1b0] sm:$0xf0] }
 0x110   : > { %v4843_v32 = vor.u32 %v6293_v28, %v4840_v30  ;;  %v4715_v28 = vor.u32 %v6261_v25, %v4712_v26  ;;  %v6266_v30 = vld [vmem:[#allocation3 + $0xb4] sm:$0xf0] }
 0x112   : > { %1331 = vmatpush.bf16.msrb.mxu3 %v4843_v32  ;;  %v4720_v32 = vld [vmem:[#allocation3 + $0xb8] sm:$0xf0] }
 0x114   : > { %v522_v35 = vpop.f32.mrf.mxu0 }
 0x115   : > { %v523_v37 = vadd.f32 %v6979_v15, %v522_v35  ;;  %v4848_v35 = vld [vmem:[#allocation3 + $0x1b8] sm:$0xf0] }
 0x117   : > { %v540_v39 = vmax.f32 %v523_v37, 0.0  ;;  %v4851_v37 = vor.u32 %v6294_v34, %v4848_v35  ;;  %v6257_v34 = vld [vmem:[#allocation3 + $0x6c] sm:$0xf0]  ;;  %v6253_v35 = vld [vmem:[#allocation3 + $0x54] sm:$0xf] }
 0x119   : > { %v548_v40 = vpack.c.bf16 %v540_v39, %v539_v38  ;;  %v4806_v38 = vld [vmem:[#allocation3 + $0x150] sm:$0xf]  ;;  %1429 = vmatpush.bf16.msra.mxu1 %v4851_v37  ;;  %v4719_v37 = vor.u32 %v6266_v30, %v4718_v29 }
 0x11a   : > { %v6289_v39 = vld [vmem:[#allocation3 + $0x16c] sm:$0xf0] }
 0x11b   : > { %4627 = vmatmul.msk.bf16.gmra.mxu1 %vm585_vm2, %v548_v40  ;;  %v6285_v40 = vld [vmem:[#allocation3 + $0x154] sm:$0xf] }
 0x128   : > { %v619_v41 = vpop.f32.mrf.mxu1 }
 0x129   : > { %v620_v43 = vadd.f32 %v7008_v42, %v619_v41 }
 0x12b   : > { %v659_v45 = vmax.f32 %v620_v43, 0.0  ;;  %v4807_v43 = vor.u32 %v6289_v39, %v4806_v38  ;;  %v4723_v38 = vor.u32 %v6262_v31, %v4720_v32  ;;  %v4686_v39 = vld [vmem:[#allocation3 + $0x58] sm:$0xf] }
 0x12d   : > { %1283 = vmatpush.bf16.msrb.mxu2 %v4807_v43  ;;  %v6258_v43 = vld [vmem:[#allocation3 + $0x74] sm:$0xf0] }
 0x130   : > { %v621_v44 = vpop.f32.mrf.mxu1 }
 0x131   : > { %v622_v15 = vadd.f32 %v7008_v42, %v621_v44  ;;  %v4808_v44 = vld [vmem:[#allocation3 + $0x170] sm:$0xf0] }
 0x133   : > { %v660_v46 = vmax.f32 %v622_v15, 0.0  ;;  %v4814_v15 = vld [vmem:[#allocation3 + $0x158] sm:$0xf] }
 0x135   : > { %v7012_v47 = vpack.c.bf16 %v660_v46, %v659_v45  ;;  %v6290_v45 = vld [vmem:[#allocation3 + $0x174] sm:$0xf0] }
 0x137   : > { %1093 = vmatmul.bf16.vlgmr.msra.gmra.mxu2 %v7012_v47  ;;  %1142 = vmatmul.bf16.vlgmr.msra.gmra.mxu3 %v7012_v47 }
 0x138   : > { %1191 = vmatmul.bf16.vlgmr.msrb.gmra.mxu0 %v7012_v47  ;;  %1240 = vmatmul.bf16.vlgmr.msrb.gmra.mxu1 %v7012_v47  ;;  %v624_v48 = vpop.f32.mrf.mxu1 }
 0x139   : > { %v625_v49 = vadd.f32 %v7008_v42, %v624_v48  ;;  %v4811_v48 = vor.u32 %v6285_v40, %v4808_v44  ;;  %v4679_v40 = vor.u32 %v6257_v34, %v4678_v33  ;;  %v6254_v44 = vld [vmem:[#allocation3 + $0x5c] sm:$0xf] }
 0x13b   : > { %v661_v52 = vmax.f32 %v625_v49, 0.0  ;;  %v4815_v49 = vor.u32 %v6290_v45, %v4814_v15  ;;  %1332 = vmatpush.bf16.msrb.mxu3 %v4811_v48  ;;  %v4688_v15 = vld [vmem:[#allocation3 + $0x78] sm:$0xf0] }
 0x13d   : > { %1381 = vmatpush.bf16.msra.mxu0 %v4815_v49  ;;  %v4687_v49 = vor.u32 %v6258_v43, %v4686_v39 }
 0x140   : > { %v626_v50 = vpop.f32.mrf.mxu1 }
 0x141   : > { %v627_v51 = vadd.f32 %v7008_v42, %v626_v50  ;;  %v6286_v50 = vld [vmem:[#allocation3 + $0x15c] sm:$0xf] }
 0x143   : > { %v662_v53 = vmax.f32 %v627_v51, 0.0  ;;  %v4816_v51 = vld [vmem:[#allocation3 + $0x178] sm:$0xf0] }
 0x145   : > { %v7020_v54 = vpack.c.bf16 %v662_v53, %v661_v52  ;;  %v4819_v53 = vor.u32 %v6286_v50, %v4816_v51  ;;  %v4691_v50 = vor.u32 %v6254_v44, %v4688_v15  ;;  %v4646_v51 = vld [vmem:[#allocation3 + $0x10] sm:$0xf] }
 0x147   : > { %1098 = vmatmul.bf16.gmra.mxu2 %v7020_v54  ;;  %1147 = vmatmul.bf16.gmra.mxu3 %v7020_v54 }
 0x148   : > { %1196 = vmatmul.bf16.gmra.mxu0 %v7020_v54  ;;  %1245 = vmatmul.bf16.gmra.mxu1 %v7020_v54  ;;  %v629_v55 = vpop.f32.mrf.mxu1 }
 0x149   : > { %v630_v56 = vadd.f32 %v7008_v42, %v629_v55  ;;  %v4774_v55 = vld [vmem:[#allocation3 + $0x110] sm:$0xf]  ;;  %1430 = vmatpush.bf16.msra.mxu1 %v4819_v53  ;;  %v6245_v53 = vld [vmem:[#allocation3 + $0x14] sm:$0xf] }
 0x14b   : > { %v663_v59 = vmax.f32 %v630_v56, 0.0  ;;  %v6281_v56 = vld [vmem:[#allocation3 + $0x12c] sm:$0xf0] }
 0x150   : > { %v631_v57 = vpop.f32.mrf.mxu1 }
 0x151   : > { %v632_v58 = vadd.f32 %v7008_v42, %v631_v57  ;;  %v6277_v57 = vld [vmem:[#allocation3 + $0x114] sm:$0xf] }
 0x153   : > { %v664_v60 = vmax.f32 %v632_v58, 0.0 }
 0x155   : > { %v7028_v61 = vpack.c.bf16 %v664_v60, %v663_v59  ;;  %v4775_v60 = vor.u32 %v6281_v56, %v4774_v55 }
 0x157   : > { %1103 = vmatmul.bf16.gmra.mxu2 %v7028_v61  ;;  %1152 = vmatmul.bf16.gmra.mxu3 %v7028_v61 }
 0x158   : > { %1201 = vmatmul.bf16.gmra.mxu0 %v7028_v61  ;;  %1250 = vmatmul.bf16.gmra.mxu1 %v7028_v61  ;;  %v634_v62 = vpop.f32.mrf.mxu1 }
 0x159   : > { %v635_v63 = vadd.f32 %v7008_v42, %v634_v62  ;;  %v4776_v62 = vld [vmem:[#allocation3 + $0x130] sm:$0xf0]  ;;  %1284 = vmatpush.bf16.msrb.mxu2 %v4775_v60 }
 0x15b   : > { %v665_v2 = vmax.f32 %v635_v63, 0.0  ;;  %v4782_v63 = vld [vmem:[#allocation3 + $0x118] sm:$0xf] }
 0x160   : > { %v636_v0 = vpop.f32.mrf.mxu1 }
 0x161   : > { %v637_v1 = vadd.f32 %v7008_v42, %v636_v0  ;;  %v4779_v0 = vor.u32 %v6277_v57, %v4776_v62  ;;  %v6250_v62 = vld [vmem:[#allocation3 + $0x34] sm:$0xf0] }
 0x163   : > { %v666_v3 = vmax.f32 %v637_v1, 0.0  ;;  %v6282_v1 = vld [vmem:[#allocation3 + $0x134] sm:$0xf0]  ;;  %1333 = vmatpush.bf16.msrb.mxu3 %v4779_v0 }
 0x165   : > { %v7036_v4 = vpack.c.bf16 %v666_v3, %v665_v2  ;;  %v6278_v2 = vld [vmem:[#allocation3 + $0x11c] sm:$0xf] }
 0x166   : > { %v4784_v3 = vld [vmem:[#allocation3 + $0x138] sm:$0xf0] }
 0x167   : > { %1108 = vmatmul.bf16.gmra.mxu2 %v7036_v4  ;;  %1157 = vmatmul.bf16.gmra.mxu3 %v7036_v4 }
 0x168   : > { %1206 = vmatmul.bf16.gmra.mxu0 %v7036_v4  ;;  %1255 = vmatmul.bf16.gmra.mxu1 %v7036_v4  ;;  %v639_v5 = vpop.f32.mrf.mxu1 }
 0x169   : > { %v640_v6 = vadd.f32 %v7008_v42, %v639_v5 }
 0x16b   : > { %v667_v9 = vmax.f32 %v640_v6, 0.0  ;;  %v4783_v6 = vor.u32 %v6282_v1, %v4782_v63  ;;  %v6246_v63 = vld [vmem:[#allocation3 + $0x1c] sm:$0xf] }
 0x16d   : > { %1382 = vmatpush.bf16.msra.mxu0 %v4783_v6 }
 0x170   : > { %v641_v7 = vpop.f32.mrf.mxu1 }
 0x171   : > { %v642_v8 = vadd.f32 %v7008_v42, %v641_v7  ;;  %v4787_v7 = vor.u32 %v6278_v2, %v4784_v3  ;;  %1383 = vmatpush.bf16.msra.mxu0 %v4751_v22  ;;  %v4656_v2 = vld [vmem:[#allocation3 + $0x38] sm:$0xf0] }
 0x172   : > { %v4659_v3 = vor.u32 %v6246_v63, %v4656_v2 }
 0x173   : > { %v668_v10 = vmax.f32 %v642_v8, 0.0  ;;  %v4742_v8 = vld [vmem:[#allocation3 + $0xd0] sm:$0xf]  ;;  %1431 = vmatpush.bf16.msra.mxu1 %v4787_v7 }
 0x175   : > { %v7044_v11 = vpack.c.bf16 %v668_v10, %v667_v9  ;;  %v6273_v9 = vld [vmem:[#allocation3 + $0xec] sm:$0xf0]  ;;  %v6269_v10 = vld [vmem:[#allocation3 + $0xd4] sm:$0xf]  ;;  %1384 = vmatpush.bf16.msra.mxu0 %v4719_v37 }
 0x176   : > { %v4743_v12 = vor.u32 %v6273_v9, %v4742_v8  ;;  %v4747_v18 = vor.u32 %v6269_v10, %v4744_v13 }
 0x177   : > { %1113 = vmatmul.bf16.gmra.mxu2 %v7044_v11  ;;  %1162 = vmatmul.bf16.gmra.mxu3 %v7044_v11 }
 0x178   : > { %1211 = vmatmul.bf16.gmra.mxu0 %v7044_v11  ;;  %1260 = vmatmul.bf16.gmra.mxu1 %v7044_v11  ;;  %v644_v24 = vpop.f32.mrf.mxu1 }
 0x179   : > { %v645_v41 = vadd.f32 %v7008_v42, %v644_v24  ;;  %v6265_v24 = vld [vmem:[#allocation3 + $0xac] sm:$0xf0]  ;;  %1285 = vmatpush.bf16.msrb.mxu2 %v4743_v12  ;;  %1334 = vmatpush.bf16.msrb.mxu3 %v4747_v18  ;;  %v7085_v18 = vperm.slane %v7077_v14, 3 }
 0x17a   : > { %v4711_v27 = vor.u32 %v6265_v24, %v4710_v21  ;;  %1432 = vmatpush.bf16.msra.mxu1 %v4755_v23  ;;  %1385 = vmatpush.bf16.msra.mxu0 %v4687_v49  ;;  %v7092_v23 = vperm.slane %v7077_v14, 0  ;;  %v7095_v24 = vperm.slane %v7077_v14, 1 }
 0x17b   : > { %v669_v58 = vmax.f32 %v645_v41, 0.0  ;;  %v4683_v41 = vor.u32 %v6253_v35, %v4680_v36 }
 0x17d   : > { %1286 = vmatpush.bf16.msrb.mxu2 %v4711_v27  ;;  %1335 = vmatpush.bf16.msrb.mxu3 %v4715_v28 }
 0x17e   : > { %1433 = vmatpush.bf16.msra.mxu1 %v4723_v38 }
 0x180   : > { %v646_v46 = vpop.f32.mrf.mxu1 }
 0x181   : > { %v647_v52 = vadd.f32 %v7008_v42, %v646_v46  ;;  %1287 = vmatpush.bf16.msrb.mxu2 %v4679_v40  ;;  %1336 = vmatpush.bf16.msrb.mxu3 %v4683_v41 }
 0x182   : > { %1434 = vmatpush.bf16.msra.mxu1 %v4691_v50 }
 0x183   : > { %v670_v59 = vmax.f32 %v647_v52, 0.0  ;;  %v6249_v52 = vld [vmem:[#allocation3 + $0x2c] sm:$0xf0] }
 0x184   : > { %v4647_v57 = vor.u32 %v6249_v52, %v4646_v51 }
 0x185   : > { %v7052_v5 = vpack.c.bf16 %v670_v59, %v669_v58  ;;  %v4648_v58 = vld [vmem:[#allocation3 + $0x30] sm:$0xf0]  ;;  %v4654_v59 = vld [vmem:[#allocation3 + $0x18] sm:$0xf] }
 0x186   : > { %v4651_v60 = vor.u32 %v6245_v53, %v4648_v58  ;;  %v4655_v1 = vor.u32 %v6250_v62, %v4654_v59  ;;  %1288 = vmatpush.bf16.msrb.mxu2 %v4647_v57  ;;  %1435 = vmatpush.bf16.msra.mxu1 %v4659_v3 }
 0x187   : > { %1118 = vmatmul.bf16.gmra.mxu2 %v7052_v5  ;;  %1167 = vmatmul.bf16.gmra.mxu3 %v7052_v5 }
 0x188   : > { %1216 = vmatmul.bf16.gmra.mxu0 %v7052_v5  ;;  %1265 = vmatmul.bf16.gmra.mxu1 %v7052_v5  ;;  %v649_v17 = vpop.f32.mrf.mxu1 }
 0x189   : > { %v650_v45 = vadd.f32 %v7008_v42, %v649_v17  ;;  %1337 = vmatpush.bf16.msrb.mxu3 %v4651_v60  ;;  %1386 = vmatpush.bf16.msra.mxu0 %v4655_v1 }
 0x18b   : > { %v671_v55 = vmax.f32 %v650_v45, 0.0 }
 0x190   : > { %v651_v46 = vpop.f32.mrf.mxu1 }
 0x191   : > { %v652_v48 = vadd.f32 %v7008_v42, %v651_v46 }
 0x193   : > { %v672_v56 = vmax.f32 %v652_v48, 0.0 }
 0x195   : > { %v7060_v0 = vpack.c.bf16 %v672_v56, %v671_v55 }
 0x197   : > { %1123 = vmatmul.bf16.gmra.mxu2 %v7060_v0  ;;  %1172 = vmatmul.bf16.gmra.mxu3 %v7060_v0 }
 0x198   : > { %1221 = vmatmul.bf16.gmra.mxu0 %v7060_v0  ;;  %1270 = vmatmul.bf16.gmra.mxu1 %v7060_v0  ;;  %v654_v6 = vpop.f32.mrf.mxu1 }
 0x199   : > { %v655_v7 = vadd.f32 %v7008_v42, %v654_v6 }
 0x19b   : > { %v673_v10 = vmax.f32 %v655_v7, 0.0 }
 0x1a0   : > { %v656_v8 = vpop.f32.mrf.mxu1 }
 0x1a1   : > { %v657_v9 = vadd.f32 %v7008_v42, %v656_v8  ;;  %v7082_v42 = vperm.slane %v7077_v14, 2 }
 0x1a3   : > { %v674_v12 = vmax.f32 %v657_v9, 0.0 }
 0x1a5   : > { %v7068_v13 = vpack.c.bf16 %v674_v12, %v673_v10 }
 0x1a7   : > { %1128 = vmatmul.bf16.gmra.mxu2 %v7068_v13  ;;  %1177 = vmatmul.bf16.gmra.mxu3 %v7068_v13 }
 0x1a8   : > { %1226 = vmatmul.bf16.gmra.mxu0 %v7068_v13  ;;  %1275 = vmatmul.bf16.gmra.mxu1 %v7068_v13 }
 0x1b5   : > { %v1192_v16 = vpop.f32.mrf.mxu0  ;;  %v1241_v17 = vpop.f32.mrf.mxu1 }
 0x1b6   : > { %v1193_v21 = vadd.f32 %v1192_v16, %v7082_v42  ;;  %v1242_v22 = vadd.f32 %v1241_v17, %v7085_v18 }
 0x1b7   : > { %1289 = vmatmul.bf16.vlgmr.msrb.gmra.mxu2 %v7012_v47  ;;  %1338 = vmatmul.bf16.vlgmr.msrb.gmra.mxu3 %v7012_v47 }
 0x1b8   : > { %1387 = vmatmul.bf16.vlgmr.msra.gmra.mxu0 %v7012_v47  ;;  %1436 = vmatmul.bf16.vlgmr.msra.gmra.mxu1 %v7012_v47  ;;  %v1479_v29 = vmax.f32 %v1193_v21, 0.0  ;;  %v1480_v47 = vmax.f32 %v1242_v22, 0.0 }
 0x1ba   : > { %v1094_v19 = vpop.f32.mrf.mxu2  ;;  %v1143_v20 = vpop.f32.mrf.mxu3 }
 0x1bb   : > { %v1095_v32 = vadd.f32 %v1094_v19, %v7092_v23  ;;  %v1144_v33 = vadd.f32 %v1143_v20, %v7095_v24 }
 0x1bd   : > { %v1194_v25 = vpop.f32.mrf.mxu0  ;;  %v1243_v26 = vpop.f32.mrf.mxu1  ;;  %v1477_v40 = vmax.f32 %v1095_v32, 0.0  ;;  %v1478_v41 = vmax.f32 %v1144_v33, 0.0 }
 0x1be   : > { %v1195_v27 = vadd.f32 %v1194_v25, %v7082_v42  ;;  %v1244_v28 = vadd.f32 %v1243_v26, %v7085_v18 }
 0x1c0   : > { %v1487_v30 = vmax.f32 %v1195_v27, 0.0  ;;  %v1488_v31 = vmax.f32 %v1244_v28, 0.0 }
 0x1c2   : > { %v1648_v34 = vmax.f32 %v1479_v29, %v1487_v30  ;;  %v1669_v35 = vmax.f32 %v1480_v47, %v1488_v31  ;;  %v1096_v36 = vpop.f32.mrf.mxu2  ;;  %v1145_v37 = vpop.f32.mrf.mxu3 }
 0x1c3   : > { %v1097_v38 = vadd.f32 %v1096_v36, %v7092_v23  ;;  %v1146_v39 = vadd.f32 %v1145_v37, %v7095_v24 }
 0x1c5   : > { %v1485_v43 = vmax.f32 %v1097_v38, 0.0  ;;  %v1486_v44 = vmax.f32 %v1146_v39, 0.0  ;;  %v1197_v15 = vpop.f32.mrf.mxu0  ;;  %v1246_v45 = vpop.f32.mrf.mxu1 }
 0x1c6   : > { %v1198_v46 = vadd.f32 %v1197_v15, %v7082_v42  ;;  %v1247_v48 = vadd.f32 %v1246_v45, %v7085_v18 }
 0x1c7   : > { %v1606_v49 = vmax.f32 %v1477_v40, %v1485_v43  ;;  %v1627_v50 = vmax.f32 %v1478_v41, %v1486_v44  ;;  %1294 = vmatmul.bf16.gmra.mxu2 %v7020_v54  ;;  %1343 = vmatmul.bf16.gmra.mxu3 %v7020_v54 }
 0x1c8   : > { %v1495_v51 = vmax.f32 %v1198_v46, 0.0  ;;  %v1496_v52 = vmax.f32 %v1247_v48, 0.0  ;;  %1392 = vmatmul.bf16.gmra.mxu0 %v7020_v54  ;;  %1441 = vmatmul.bf16.gmra.mxu1 %v7020_v54 }
 0x1ca   : > { %v1649_v53 = vmax.f32 %v1648_v34, %v1495_v51  ;;  %v1670_v55 = vmax.f32 %v1669_v35, %v1496_v52  ;;  %v1099_v56 = vpop.f32.mrf.mxu2  ;;  %v1148_v57 = vpop.f32.mrf.mxu3 }
 0x1cb   : > { %v1100_v58 = vadd.f32 %v1099_v56, %v7092_v23  ;;  %v1149_v59 = vadd.f32 %v1148_v57, %v7095_v24 }
 0x1cd   : > { %v1493_v60 = vmax.f32 %v1100_v58, 0.0  ;;  %v1494_v62 = vmax.f32 %v1149_v59, 0.0  ;;  %v1199_v63 = vpop.f32.mrf.mxu0  ;;  %v1248_v1 = vpop.f32.mrf.mxu1 }
 0x1ce   : > { %v1200_v2 = vadd.f32 %v1199_v63, %v7082_v42  ;;  %v1249_v3 = vadd.f32 %v1248_v1, %v7085_v18 }
 0x1cf   : > { %v1607_v6 = vmax.f32 %v1606_v49, %v1493_v60  ;;  %v1628_v7 = vmax.f32 %v1627_v50, %v1494_v62 }
 0x1d0   : > { %v1503_v8 = vmax.f32 %v1200_v2, 0.0  ;;  %v1504_v54 = vmax.f32 %v1249_v3, 0.0 }
 0x1d2   : > { %v1650_v9 = vmax.f32 %v1649_v53, %v1503_v8  ;;  %v1671_v10 = vmax.f32 %v1670_v55, %v1504_v54  ;;  %v1101_v12 = vpop.f32.mrf.mxu2  ;;  %v1150_v16 = vpop.f32.mrf.mxu3 }
 0x1d3   : > { %v1102_v17 = vadd.f32 %v1101_v12, %v7092_v23  ;;  %v1151_v19 = vadd.f32 %v1150_v16, %v7095_v24 }
 0x1d5   : > { %v1501_v20 = vmax.f32 %v1102_v17, 0.0  ;;  %v1502_v21 = vmax.f32 %v1151_v19, 0.0  ;;  %v1202_v22 = vpop.f32.mrf.mxu0  ;;  %v1251_v25 = vpop.f32.mrf.mxu1 }
 0x1d6   : > { %v1203_v26 = vadd.f32 %v1202_v22, %v7082_v42  ;;  %v1252_v27 = vadd.f32 %v1251_v25, %v7085_v18 }
 0x1d7   : > { %v1608_v28 = vmax.f32 %v1607_v6, %v1501_v20  ;;  %v1629_v29 = vmax.f32 %v1628_v7, %v1502_v21  ;;  %1299 = vmatmul.bf16.gmra.mxu2 %v7028_v61  ;;  %1348 = vmatmul.bf16.gmra.mxu3 %v7028_v61 }
 0x1d8   : > { %v1511_v47 = vmax.f32 %v1203_v26, 0.0  ;;  %v1512_v30 = vmax.f32 %v1252_v27, 0.0  ;;  %1397 = vmatmul.bf16.gmra.mxu0 %v7028_v61  ;;  %1446 = vmatmul.bf16.gmra.mxu1 %v7028_v61 }
 0x1da   : > { %v1651_v31 = vmax.f32 %v1650_v9, %v1511_v47  ;;  %v1672_v32 = vmax.f32 %v1671_v10, %v1512_v30  ;;  %v1104_v33 = vpop.f32.mrf.mxu2  ;;  %v1153_v34 = vpop.f32.mrf.mxu3 }
 0x1db   : > { %v1105_v35 = vadd.f32 %v1104_v33, %v7092_v23  ;;  %v1154_v36 = vadd.f32 %v1153_v34, %v7095_v24 }
 0x1dd   : > { %v1509_v37 = vmax.f32 %v1105_v35, 0.0  ;;  %v1510_v38 = vmax.f32 %v1154_v36, 0.0  ;;  %v1204_v39 = vpop.f32.mrf.mxu0  ;;  %v1253_v40 = vpop.f32.mrf.mxu1 }
 0x1de   : > { %v1205_v41 = vadd.f32 %v1204_v39, %v7082_v42  ;;  %v1254_v43 = vadd.f32 %v1253_v40, %v7085_v18 }
 0x1df   : > { %v1609_v44 = vmax.f32 %v1608_v28, %v1509_v37  ;;  %v1630_v15 = vmax.f32 %v1629_v29, %v1510_v38 }
 0x1e0   : > { %v1519_v45 = vmax.f32 %v1205_v41, 0.0  ;;  %v1520_v61 = vmax.f32 %v1254_v43, 0.0 }
 0x1e2   : > { %v1652_v46 = vmax.f32 %v1651_v31, %v1519_v45  ;;  %v1673_v48 = vmax.f32 %v1672_v32, %v1520_v61  ;;  %v1106_v49 = vpop.f32.mrf.mxu2  ;;  %v1155_v50 = vpop.f32.mrf.mxu3 }
 0x1e3   : > { %v1107_v51 = vadd.f32 %v1106_v49, %v7092_v23  ;;  %v1156_v52 = vadd.f32 %v1155_v50, %v7095_v24 }
 0x1e5   : > { %v1517_v53 = vmax.f32 %v1107_v51, 0.0  ;;  %v1518_v55 = vmax.f32 %v1156_v52, 0.0  ;;  %v1207_v56 = vpop.f32.mrf.mxu0  ;;  %v1256_v57 = vpop.f32.mrf.mxu1 }
 0x1e6   : > { %v1208_v58 = vadd.f32 %v1207_v56, %v7082_v42  ;;  %v1257_v59 = vadd.f32 %v1256_v57, %v7085_v18 }
 0x1e7   : > { %v1610_v60 = vmax.f32 %v1609_v44, %v1517_v53  ;;  %v1631_v62 = vmax.f32 %v1630_v15, %v1518_v55  ;;  %1304 = vmatmul.bf16.gmra.mxu2 %v7036_v4  ;;  %1353 = vmatmul.bf16.gmra.mxu3 %v7036_v4 }
 0x1e8   : > { %v1527_v63 = vmax.f32 %v1208_v58, 0.0  ;;  %v1528_v1 = vmax.f32 %v1257_v59, 0.0  ;;  %1402 = vmatmul.bf16.gmra.mxu0 %v7036_v4  ;;  %1451 = vmatmul.bf16.gmra.mxu1 %v7036_v4 }
 0x1ea   : > { %v1653_v2 = vmax.f32 %v1652_v46, %v1527_v63  ;;  %v1674_v3 = vmax.f32 %v1673_v48, %v1528_v1  ;;  %v1109_v6 = vpop.f32.mrf.mxu2  ;;  %v1158_v7 = vpop.f32.mrf.mxu3 }
 0x1eb   : > { %v1110_v8 = vadd.f32 %v1109_v6, %v7092_v23  ;;  %v1159_v54 = vadd.f32 %v1158_v7, %v7095_v24 }
 0x1ed   : > { %v1525_v9 = vmax.f32 %v1110_v8, 0.0  ;;  %v1526_v10 = vmax.f32 %v1159_v54, 0.0  ;;  %v1209_v12 = vpop.f32.mrf.mxu0  ;;  %v1258_v16 = vpop.f32.mrf.mxu1 }
 0x1ee   : > { %v1210_v17 = vadd.f32 %v1209_v12, %v7082_v42  ;;  %v1259_v19 = vadd.f32 %v1258_v16, %v7085_v18 }
 0x1ef   : > { %v1611_v20 = vmax.f32 %v1610_v60, %v1525_v9  ;;  %v1632_v21 = vmax.f32 %v1631_v62, %v1526_v10 }
 0x1f0   : > { %v1535_v22 = vmax.f32 %v1210_v17, 0.0  ;;  %v1536_v4 = vmax.f32 %v1259_v19, 0.0 }
 0x1f2   : > { %v1654_v25 = vmax.f32 %v1653_v2, %v1535_v22  ;;  %v1675_v26 = vmax.f32 %v1674_v3, %v1536_v4  ;;  %v1111_v27 = vpop.f32.mrf.mxu2  ;;  %v1160_v28 = vpop.f32.mrf.mxu3 }
 0x1f3   : > { %v1112_v29 = vadd.f32 %v1111_v27, %v7092_v23  ;;  %v1161_v47 = vadd.f32 %v1160_v28, %v7095_v24 }
 0x1f5   : > { %v1533_v30 = vmax.f32 %v1112_v29, 0.0  ;;  %v1534_v31 = vmax.f32 %v1161_v47, 0.0  ;;  %v1212_v32 = vpop.f32.mrf.mxu0  ;;  %v1261_v33 = vpop.f32.mrf.mxu1 }
 0x1f6   : > { %v1213_v34 = vadd.f32 %v1212_v32, %v7082_v42  ;;  %v1262_v35 = vadd.f32 %v1261_v33, %v7085_v18 }
 0x1f7   : > { %v1612_v36 = vmax.f32 %v1611_v20, %v1533_v30  ;;  %v1633_v37 = vmax.f32 %v1632_v21, %v1534_v31  ;;  %1309 = vmatmul.bf16.gmra.mxu2 %v7044_v11  ;;  %1358 = vmatmul.bf16.gmra.mxu3 %v7044_v11 }
 0x1f8   : > { %v1543_v38 = vmax.f32 %v1213_v34, 0.0  ;;  %v1544_v39 = vmax.f32 %v1262_v35, 0.0  ;;  %1407 = vmatmul.bf16.gmra.mxu0 %v7044_v11  ;;  %1456 = vmatmul.bf16.gmra.mxu1 %v7044_v11 }
 0x1fa   : > { %v1655_v40 = vmax.f32 %v1654_v25, %v1543_v38  ;;  %v1676_v41 = vmax.f32 %v1675_v26, %v1544_v39  ;;  %v1114_v43 = vpop.f32.mrf.mxu2  ;;  %v1163_v44 = vpop.f32.mrf.mxu3 }
 0x1fb   : > { %v1115_v15 = vadd.f32 %v1114_v43, %v7092_v23  ;;  %v1164_v45 = vadd.f32 %v1163_v44, %v7095_v24 }
 0x1fd   : > { %v1541_v61 = vmax.f32 %v1115_v15, 0.0  ;;  %v1542_v46 = vmax.f32 %v1164_v45, 0.0  ;;  %v1214_v48 = vpop.f32.mrf.mxu0  ;;  %v1263_v49 = vpop.f32.mrf.mxu1 }
 0x1fe   : > { %v1215_v52 = vadd.f32 %v1214_v48, %v7082_v42  ;;  %v1264_v53 = vadd.f32 %v1263_v49, %v7085_v18 }
 0x1ff   : > { %v1613_v50 = vmax.f32 %v1612_v36, %v1541_v61  ;;  %v1634_v51 = vmax.f32 %v1633_v37, %v1542_v46 }
 0x200   : > { %v1551_v56 = vmax.f32 %v1215_v52, 0.0  ;;  %v1552_v57 = vmax.f32 %v1264_v53, 0.0 }
 0x202   : > { %v1116_v55 = vpop.f32.mrf.mxu2  ;;  %v1165_v11 = vpop.f32.mrf.mxu3  ;;  %v1656_v2 = vmax.f32 %v1655_v40, %v1551_v56  ;;  %v1677_v3 = vmax.f32 %v1676_v41, %v1552_v57 }
 0x203   : > { %v1117_v58 = vadd.f32 %v1116_v55, %v7092_v23  ;;  %v1166_v59 = vadd.f32 %v1165_v11, %v7095_v24 }
 0x205   : > { %v1217_v60 = vpop.f32.mrf.mxu0  ;;  %v1266_v62 = vpop.f32.mrf.mxu1  ;;  %v1549_v8 = vmax.f32 %v1117_v58, 0.0  ;;  %v1550_v54 = vmax.f32 %v1166_v59, 0.0 }
 0x206   : > { %v1218_v63 = vadd.f32 %v1217_v60, %v7082_v42  ;;  %v1267_v1 = vadd.f32 %v1266_v62, %v7085_v18 }
 0x207   : > { %1314 = vmatmul.bf16.gmra.mxu2 %v7052_v5  ;;  %1363 = vmatmul.bf16.gmra.mxu3 %v7052_v5  ;;  %v1614_v20 = vmax.f32 %v1613_v50, %v1549_v8  ;;  %v1635_v21 = vmax.f32 %v1634_v51, %v1550_v54 }
 0x208   : > { %v1559_v6 = vmax.f32 %v1218_v63, 0.0  ;;  %v1560_v7 = vmax.f32 %v1267_v1, 0.0  ;;  %1412 = vmatmul.bf16.gmra.mxu0 %v7052_v5  ;;  %1461 = vmatmul.bf16.gmra.mxu1 %v7052_v5 }
 0x20a   : > { %v1657_v9 = vmax.f32 %v1656_v2, %v1559_v6  ;;  %v1678_v10 = vmax.f32 %v1677_v3, %v1560_v7  ;;  %v1119_v12 = vpop.f32.mrf.mxu2  ;;  %v1168_v16 = vpop.f32.mrf.mxu3 }
 0x20b   : > { %v1120_v17 = vadd.f32 %v1119_v12, %v7092_v23  ;;  %v1169_v19 = vadd.f32 %v1168_v16, %v7095_v24 }
 0x20d   : > { %v1557_v22 = vmax.f32 %v1120_v17, 0.0  ;;  %v1558_v4 = vmax.f32 %v1169_v19, 0.0  ;;  %v1219_v25 = vpop.f32.mrf.mxu0  ;;  %v1268_v26 = vpop.f32.mrf.mxu1 }
 0x20e   : > { %v1220_v5 = vadd.f32 %v1219_v25, %v7082_v42  ;;  %v1269_v29 = vadd.f32 %v1268_v26, %v7085_v18 }
 0x20f   : > { %v1615_v27 = vmax.f32 %v1614_v20, %v1557_v22  ;;  %v1636_v28 = vmax.f32 %v1635_v21, %v1558_v4 }
 0x210   : > { %v1567_v31 = vmax.f32 %v1220_v5, 0.0  ;;  %v1568_v32 = vmax.f32 %v1269_v29, 0.0 }
 0x212   : > { %v1121_v47 = vpop.f32.mrf.mxu2  ;;  %v1170_v30 = vpop.f32.mrf.mxu3  ;;  %v1658_v39 = vmax.f32 %v1657_v9, %v1567_v31  ;;  %v1679_v40 = vmax.f32 %v1678_v10, %v1568_v32 }
 0x213   : > { %v1122_v33 = vadd.f32 %v1121_v47, %v7092_v23  ;;  %v1171_v34 = vadd.f32 %v1170_v30, %v7095_v24 }
 0x215   : > { %v1222_v35 = vpop.f32.mrf.mxu0  ;;  %v1271_v36 = vpop.f32.mrf.mxu1  ;;  %v1565_v44 = vmax.f32 %v1122_v33, 0.0  ;;  %v1566_v15 = vmax.f32 %v1171_v34, 0.0 }
 0x216   : > { %v1223_v37 = vadd.f32 %v1222_v35, %v7082_v42  ;;  %v1272_v38 = vadd.f32 %v1271_v36, %v7085_v18 }
 0x217   : > { %1319 = vmatmul.bf16.gmra.mxu2 %v7060_v0  ;;  %1368 = vmatmul.bf16.gmra.mxu3 %v7060_v0  ;;  %v1616_v51 = vmax.f32 %v1615_v27, %v1565_v44  ;;  %v1637_v52 = vmax.f32 %v1636_v28, %v1566_v15 }
 0x218   : > { %v1575_v41 = vmax.f32 %v1223_v37, 0.0  ;;  %v1576_v43 = vmax.f32 %v1272_v38, 0.0  ;;  %1417 = vmatmul.bf16.gmra.mxu0 %v7060_v0  ;;  %1466 = vmatmul.bf16.gmra.mxu1 %v7060_v0 }
 0x21a   : > { %v1659_v45 = vmax.f32 %v1658_v39, %v1575_v41  ;;  %v1680_v61 = vmax.f32 %v1679_v40, %v1576_v43  ;;  %v1124_v46 = vpop.f32.mrf.mxu2  ;;  %v1173_v48 = vpop.f32.mrf.mxu3 }
 0x21b   : > { %v1125_v49 = vadd.f32 %v1124_v46, %v7092_v23  ;;  %v1174_v50 = vadd.f32 %v1173_v48, %v7095_v24 }
 0x21d   : > { %v1573_v53 = vmax.f32 %v1125_v49, 0.0  ;;  %v1574_v55 = vmax.f32 %v1174_v50, 0.0  ;;  %v1224_v11 = vpop.f32.mrf.mxu0  ;;  %v1273_v56 = vpop.f32.mrf.mxu1 }
 0x21e   : > { %v1225_v0 = vadd.f32 %v1224_v11, %v7082_v42  ;;  %v1274_v59 = vadd.f32 %v1273_v56, %v7085_v18 }
 0x21f   : > { %v1617_v57 = vmax.f32 %v1616_v51, %v1573_v53  ;;  %v1638_v58 = vmax.f32 %v1637_v52, %v1574_v55 }
 0x220   : > { %v1583_v63 = vmax.f32 %v1225_v0, 0.0  ;;  %v1584_v1 = vmax.f32 %v1274_v59, 0.0  ;;  %v7188_v59 = vperm.slane %v7077_v14, 6 }
 0x222   : > { %v1126_v60 = vpop.f32.mrf.mxu2  ;;  %v1175_v62 = vpop.f32.mrf.mxu3  ;;  %v1660_v9 = vmax.f32 %v1659_v45, %v1583_v63  ;;  %v1681_v10 = vmax.f32 %v1680_v61, %v1584_v1 }
 0x223   : > { %v1127_v2 = vadd.f32 %v1126_v60, %v7092_v23  ;;  %v1176_v3 = vadd.f32 %v1175_v62, %v7095_v24 }
 0x225   : > { %v1227_v6 = vpop.f32.mrf.mxu0  ;;  %v1276_v7 = vpop.f32.mrf.mxu1  ;;  %v1581_v17 = vmax.f32 %v1127_v2, 0.0  ;;  %v1582_v19 = vmax.f32 %v1176_v3, 0.0 }
 0x226   : > { %v1228_v8 = vadd.f32 %v1227_v6, %v7082_v42  ;;  %v1277_v54 = vadd.f32 %v1276_v7, %v7085_v18  ;;  %v7191_v6 = vperm.slane %v7077_v14, 7 }
 0x227   : > { %1324 = vmatmul.bf16.gmra.mxu2 %v7068_v13  ;;  %1373 = vmatmul.bf16.gmra.mxu3 %v7068_v13  ;;  %v1618_v27 = vmax.f32 %v1617_v57, %v1581_v17  ;;  %v1639_v28 = vmax.f32 %v1638_v58, %v1582_v19 }
 0x228   : > { %v1591_v12 = vmax.f32 %v1228_v8, 0.0  ;;  %v1592_v16 = vmax.f32 %v1277_v54, 0.0  ;;  %1422 = vmatmul.bf16.gmra.mxu0 %v7068_v13  ;;  %1471 = vmatmul.bf16.gmra.mxu1 %v7068_v13 }
 0x22a   : > { %v1661_v20 = vmax.f32 %v1660_v9, %v1591_v12  ;;  %v1682_v21 = vmax.f32 %v1681_v10, %v1592_v16  ;;  %v1129_v22 = vpop.f32.mrf.mxu2  ;;  %v1178_v4 = vpop.f32.mrf.mxu3 }
 0x22b   : > { %v1130_v25 = vadd.f32 %v1129_v22, %v7092_v23  ;;  %v1179_v26 = vadd.f32 %v1178_v4, %v7095_v24 }
 0x22d   : > { %v1589_v5 = vmax.f32 %v1130_v25, 0.0  ;;  %v1590_v29 = vmax.f32 %v1179_v26, 0.0  ;;  %v1229_v47 = vpop.f32.mrf.mxu0  ;;  %v1278_v30 = vpop.f32.mrf.mxu1  ;;  %v7198_v26 = vperm.slane %v7077_v14, 4 }
 0x22e   : > { %v1230_v31 = vadd.f32 %v1229_v47, %v7082_v42  ;;  %v1279_v13 = vadd.f32 %v1278_v30, %v7085_v18 }
 0x22f   : > { %v1619_v32 = vmax.f32 %v1618_v27, %v1589_v5  ;;  %v1640_v33 = vmax.f32 %v1639_v28, %v1590_v29  ;;  %v7201_v27 = vperm.slane %v7077_v14, 5 }
 0x230   : > { %v1599_v34 = vmax.f32 %v1230_v31, 0.0  ;;  %v1600_v35 = vmax.f32 %v1279_v13, 0.0 }
 0x232   : > { %v1662_v36 = vmax.f32 %v1661_v20, %v1599_v34  ;;  %v1683_v37 = vmax.f32 %v1682_v21, %v1600_v35  ;;  %v1131_v38 = vpop.f32.mrf.mxu2  ;;  %v1180_v39 = vpop.f32.mrf.mxu3 }
 0x233   : > { %v1132_v40 = vadd.f32 %v1131_v38, %v7092_v23  ;;  %v1181_v41 = vadd.f32 %v1180_v39, %v7095_v24 }
 0x234   : > { %v1663_v43 = vrot.slane %v1662_v36, 4  ;;  %v1684_v44 = vrot.slane %v1683_v37, 4 }
 0x235   : > { %v1597_v15 = vmax.f32 %v1132_v40, 0.0  ;;  %v1598_v45 = vmax.f32 %v1181_v41, 0.0  ;;  %v1388_v61 = vpop.f32.mrf.mxu0  ;;  %v1437_v42 = vpop.f32.mrf.mxu1 }
 0x236   : > { %v1664_v46 = vmax.f32 %v1662_v36, %v1663_v43  ;;  %v1685_v18 = vmax.f32 %v1683_v37, %v1684_v44  ;;  %v1389_v12 = vadd.f32 %v1388_v61, %v7188_v59  ;;  %v1438_v21 = vadd.f32 %v1437_v42, %v7191_v6 }
 0x237   : > { %v1620_v48 = vmax.f32 %v1619_v32, %v1597_v15  ;;  %v1641_v49 = vmax.f32 %v1640_v33, %v1598_v45 }
 0x238   : > { %v1665_v50 = vrot.slane %v1664_v46, 2  ;;  %v1686_v51 = vrot.slane %v1685_v18, 2  ;;  %v1483_v5 = vmax.f32 %v1389_v12, 0.0  ;;  %v1484_v34 = vmax.f32 %v1438_v21, 0.0 }
 0x239   : > { %v1621_v52 = vrot.slane %v1620_v48, 4  ;;  %v1642_v53 = vrot.slane %v1641_v49, 4 }
 0x23a   : > { %v1666_v55 = vmax.f32 %v1664_v46, %v1665_v50  ;;  %v1687_v11 = vmax.f32 %v1685_v18, %v1686_v51  ;;  %v1290_v56 = vpop.f32.mrf.mxu2  ;;  %v1339_v23 = vpop.f32.mrf.mxu3 }
 0x23b   : > { %v1622_v57 = vmax.f32 %v1620_v48, %v1621_v52  ;;  %v1643_v24 = vmax.f32 %v1641_v49, %v1642_v53  ;;  %v1291_v37 = vadd.f32 %v1290_v56, %v7198_v26  ;;  %v1340_v38 = vadd.f32 %v1339_v23, %v7201_v27 }
 0x23c   : > { %v1667_v58 = vrot.slane %v1666_v55, 1  ;;  %v1688_v0 = vrot.slane %v1687_v11, 1 }
 0x23d   : > { %v1623_v60 = vrot.slane %v1622_v57, 2  ;;  %v1644_v62 = vrot.slane %v1643_v24, 2  ;;  %v1390_v63 = vpop.f32.mrf.mxu0  ;;  %v1439_v1 = vpop.f32.mrf.mxu1  ;;  %v1481_v48 = vmax.f32 %v1291_v37, 0.0  ;;  %v1482_v49 = vmax.f32 %v1340_v38, 0.0 }
 0x23e   : > { %v1668_v2 = vmax.f32 %v1666_v55, %v1667_v58  ;;  %v1689_v3 = vmax.f32 %v1687_v11, %v1688_v0  ;;  %v1391_v54 = vadd.f32 %v1390_v63, %v7188_v59  ;;  %v1440_v16 = vadd.f32 %v1439_v1, %v7191_v6 }
 0x23f   : > { %v1624_v7 = vmax.f32 %v1622_v57, %v1623_v60  ;;  %v1645_v8 = vmax.f32 %v1643_v24, %v1644_v62 }
 0x240   : > { %v1783_v9 = vrot.slane %v1668_v2, 6  ;;  %v1784_v10 = vrot.slane %v1689_v3, 5  ;;  %v1491_v28 = vmax.f32 %v1391_v54, 0.0  ;;  %v1492_v29 = vmax.f32 %v1440_v16, 0.0 }
 0x241   : > { %v1625_v17 = vrot.slane %v1624_v7, 1  ;;  %v1646_v19 = vrot.slane %v1645_v8, 1 }
 0x242   : > { %v1792_v20 = vsel %vm1791_vm3, %v1783_v9, %v1784_v10  ;;  %v1292_v22 = vpop.f32.mrf.mxu2  ;;  %v1341_v4 = vpop.f32.mrf.mxu3  ;;  %v1732_v39 = vmax.f32 %v1483_v5, %v1491_v28  ;;  %v1753_v41 = vmax.f32 %v1484_v34, %v1492_v29 }
 0x243   : > { %v1647_v25 = vmax.f32 %v1645_v8, %v1646_v19  ;;  %v1626_v47 = vmax.f32 %v1624_v7, %v1625_v17  ;;  %v1293_v31 = vadd.f32 %v1292_v22, %v7198_v26  ;;  %v1342_v13 = vadd.f32 %v1341_v4, %v7201_v27 }
 0x245   : > { %v1782_v30 = vrot.slane %v1647_v25, 7  ;;  %v1393_v32 = vpop.f32.mrf.mxu0  ;;  %v1442_v33 = vpop.f32.mrf.mxu1  ;;  %v1489_v15 = vmax.f32 %v1293_v31, 0.0  ;;  %v1490_v45 = vmax.f32 %v1342_v13, 0.0 }
 0x246   : > { %v1394_v35 = vadd.f32 %v1393_v32, %v7188_v59  ;;  %v1443_v36 = vadd.f32 %v1442_v33, %v7191_v6 }
 0x247   : > { %v1790_v14 = vsel %vm1789_vm4, %v1626_v47, %v1782_v30  ;;  %v1690_v52 = vmax.f32 %v1481_v48, %v1489_v15  ;;  %v1711_v53 = vmax.f32 %v1482_v49, %v1490_v45  ;;  %v4998_v45 = vld [vmem:[#allocation5 + $0xe0] sm:$0xf]  ;;  %v6335_v48 = vld [vmem:[#allocation5 + $0xe4] sm:$0xf]  ;;  %v5000_v49 = vld [vmem:[#allocation5 + $0xf0] sm:$0xf0] }
 0x248   : > { %v7210_v40 = vsel %vm1793_vm5, %v1790_v14, %v1792_v20  ;;  %v1499_v43 = vmax.f32 %v1394_v35, 0.0  ;;  %v1500_v44 = vmax.f32 %v1443_v36, 0.0 }
 0x24a   : > { %v1733_v61 = vmax.f32 %v1732_v39, %v1499_v43  ;;  %v1754_v42 = vmax.f32 %v1753_v41, %v1500_v44  ;;  %v1295_v46 = vpop.f32.mrf.mxu2  ;;  %v1344_v18 = vpop.f32.mrf.mxu3 }
 0x24b   : > { %v1296_v50 = vadd.f32 %v1295_v46, %v7198_v26  ;;  %v1345_v51 = vadd.f32 %v1344_v18, %v7201_v27  ;;  %v6369_v18 = vld [vmem:[#allocation5 + $0x1ec] sm:$0xf0] }
 0x24d   : > { %v1497_v55 = vmax.f32 %v1296_v50, 0.0  ;;  %v1498_v11 = vmax.f32 %v1345_v51, 0.0  ;;  %v1395_v56 = vpop.f32.mrf.mxu0  ;;  %v1444_v23 = vpop.f32.mrf.mxu1  ;;  %v5003_v51 = vor.u32 %v6335_v48, %v5000_v49  ;;  %v6357_v48 = vld [vmem:[#allocation5 + $0x18c] sm:$0xf0]  ;;  %v6323_v49 = vld [vmem:[#allocation5 + $0x84] sm:$0xf] }
 0x24e   : > { %v1396_v58 = vadd.f32 %v1395_v56, %v7188_v59  ;;  %v1445_v0 = vadd.f32 %v1444_v23, %v7191_v6  ;;  %v4982_v23 = vld [vmem:[#allocation5 + $0xc0] sm:$0xf] }
 0x24f   : > { %v1691_v57 = vmax.f32 %v1690_v52, %v1497_v55  ;;  %v1712_v24 = vmax.f32 %v1711_v53, %v1498_v11  ;;  %v6367_v52 = vld [vmem:[#allocation5 + $0x1e4] sm:$0xf]  ;;  %v5128_v53 = vld [vmem:[#allocation5 + $0x1f0] sm:$0xf0]  ;;  %3484 = vmatpush.bf16.msrb.mxu0 %v5003_v51 }
 0x250   : > { %v1507_v63 = vmax.f32 %v1396_v58, 0.0  ;;  %v1508_v1 = vmax.f32 %v1445_v0, 0.0  ;;  %v5131_v56 = vor.u32 %v6367_v52, %v5128_v53  ;;  %v6365_v0 = vld [vmem:[#allocation5 + $0x1cc] sm:$0xf0] }
 0x252   : > { %v1297_v60 = vpop.f32.mrf.mxu2  ;;  %v1346_v62 = vpop.f32.mrf.mxu3  ;;  %v1734_v10 = vmax.f32 %v1733_v61, %v1507_v63  ;;  %v1755_v12 = vmax.f32 %v1754_v42, %v1508_v1  ;;  %v6337_v61 = vld [vmem:[#allocation5 + $0xec] sm:$0xf0]  ;;  %v5126_v42 = vld [vmem:[#allocation5 + $0x1e0] sm:$0xf]  ;;  %3497 = vmatpush.bf16.msrb.mxu1 %v5131_v56  ;;  %v6355_v56 = vld [vmem:[#allocation5 + $0x184] sm:$0xf] }
 0x253   : > { %v1298_v2 = vadd.f32 %v1297_v60, %v7198_v26  ;;  %v1347_v3 = vadd.f32 %v1346_v62, %v7201_v27  ;;  %v4999_v46 = vor.u32 %v6337_v61, %v4998_v45  ;;  %v5127_v50 = vor.u32 %v6369_v18, %v5126_v42  ;;  %v6331_v60 = vld [vmem:[#allocation5 + $0xc4] sm:$0xf]  ;;  %v4984_v62 = vld [vmem:[#allocation5 + $0xd0] sm:$0xf0]  ;;  %v4950_v42 = vld [vmem:[#allocation5 + $0x80] sm:$0xf] }
 0x254   : > { %v4987_v1 = vor.u32 %v6331_v60, %v4984_v62  ;;  %v4934_v62 = vld [vmem:[#allocation5 + $0x60] sm:$0xf] }
 0x255   : > { %v1398_v7 = vpop.f32.mrf.mxu0  ;;  %v1447_v8 = vpop.f32.mrf.mxu1  ;;  %v1505_v19 = vmax.f32 %v1298_v2, 0.0  ;;  %v1506_v20 = vmax.f32 %v1347_v3, 0.0  ;;  %3380 = vmatpush.bf16.msra.mxu2 %v4999_v46  ;;  %3393 = vmatpush.bf16.msra.mxu3 %v5127_v50  ;;  %v6363_v2 = vld [vmem:[#allocation5 + $0x1c4] sm:$0xf]  ;;  %v5112_v3 = vld [vmem:[#allocation5 + $0x1d0] sm:$0xf0] }
 0x256   : > { %v1399_v54 = vadd.f32 %v1398_v7, %v7188_v59  ;;  %v1448_v9 = vadd.f32 %v1447_v8, %v7191_v6  ;;  %v5115_v8 = vor.u32 %v6363_v2, %v5112_v3  ;;  %3485 = vmatpush.bf16.msrb.mxu0 %v4987_v1  ;;  %v5078_v46 = vld [vmem:[#allocation5 + $0x180] sm:$0xf]  ;;  %v4952_v50 = vld [vmem:[#allocation5 + $0x90] sm:$0xf0]  ;;  %v6353_v3 = vld [vmem:[#allocation5 + $0x16c] sm:$0xf0] }
 0x257   : > { %v1692_v29 = vmax.f32 %v1691_v57, %v1505_v19  ;;  %v1713_v47 = vmax.f32 %v1712_v24, %v1506_v20  ;;  %v6333_v57 = vld [vmem:[#allocation5 + $0xcc] sm:$0xf0]  ;;  %v5110_v24 = vld [vmem:[#allocation5 + $0x1c0] sm:$0xf]  ;;  %v6327_v20 = vld [vmem:[#allocation5 + $0xa4] sm:$0xf]  ;;  %v5079_v52 = vor.u32 %v6357_v48, %v5078_v46  ;;  %v4955_v53 = vor.u32 %v6323_v49, %v4952_v50 }
 0x258   : > { %v1515_v16 = vmax.f32 %v1399_v54, 0.0  ;;  %v1516_v17 = vmax.f32 %v1448_v9, 0.0  ;;  %v4983_v58 = vor.u32 %v6333_v57, %v4982_v23  ;;  %v5111_v63 = vor.u32 %v6365_v0, %v5110_v24  ;;  %3498 = vmatpush.bf16.msrb.mxu1 %v5115_v8  ;;  %v6361_v19 = vld [vmem:[#allocation5 + $0x1ac] sm:$0xf0]  ;;  %v5080_v23 = vld [vmem:[#allocation5 + $0x190] sm:$0xf0] }
 0x259   : > { %v5083_v0 = vor.u32 %v6355_v56, %v5080_v23  ;;  %v5062_v1 = vld [vmem:[#allocation5 + $0x160] sm:$0xf]  ;;  %v4936_v8 = vld [vmem:[#allocation5 + $0x70] sm:$0xf0]  ;;  %v6315_v46 = vld [vmem:[#allocation5 + $0x44] sm:$0xf] }
 0x25a   : > { %v7220_v21 = vmax.f32 %v1734_v10, %v1515_v16  ;;  %v7222_v22 = vmax.f32 %v1755_v12, %v1516_v17  ;;  %v1300_v4 = vpop.f32.mrf.mxu2  ;;  %v1349_v25 = vpop.f32.mrf.mxu3  ;;  %3381 = vmatpush.bf16.msra.mxu2 %v4983_v58  ;;  %3394 = vmatpush.bf16.msra.mxu3 %v5111_v63  ;;  %v4966_v10 = vld [vmem:[#allocation5 + $0xa0] sm:$0xf]  ;;  %v6329_v12 = vld [vmem:[#allocation5 + $0xac] sm:$0xf0]  ;;  %v5048_v56 = vld [vmem:[#allocation5 + $0x150] sm:$0xf0] }
 0x25b   : > { %v1301_v28 = vadd.f32 %v1300_v4, %v7198_v26  ;;  %v1350_v5 = vadd.f32 %v1349_v25, %v7201_v27  ;;  %v5094_v16 = vld [vmem:[#allocation5 + $0x1a0] sm:$0xf]  ;;  %v4967_v17 = vor.u32 %v6329_v12, %v4966_v10  ;;  %v4968_v4 = vld [vmem:[#allocation5 + $0xb0] sm:$0xf0]  ;;  %v6321_v63 = vld [vmem:[#allocation5 + $0x6c] sm:$0xf0]  ;;  %v5063_v12 = vor.u32 %v6353_v3, %v5062_v1 }
 0x25c   : > { %v4935_v2 = vor.u32 %v6321_v63, %v4934_v62  ;;  %v4902_v3 = vld [vmem:[#allocation5 + $0x20] sm:$0xf] }
 0x25d   : > { %v1513_v30 = vmax.f32 %v1301_v28, 0.0  ;;  %v1514_v31 = vmax.f32 %v1350_v5, 0.0  ;;  %v1400_v13 = vpop.f32.mrf.mxu0  ;;  %v1449_v32 = vpop.f32.mrf.mxu1  ;;  %v5095_v28 = vor.u32 %v6361_v19, %v5094_v16  ;;  %v4971_v5 = vor.u32 %v6327_v20, %v4968_v4  ;;  %v5064_v19 = vld [vmem:[#allocation5 + $0x170] sm:$0xf0] }
 0x25e   : > { %v7253_v7 = vadd.f32 %v1400_v13, %v7188_v59  ;;  %v7260_v25 = vadd.f32 %v1449_v32, %v7191_v6  ;;  %3382 = vmatpush.bf16.msra.mxu2 %v4967_v17  ;;  %v6325_v32 = vld [vmem:[#allocation5 + $0x8c] sm:$0xf0]  ;;  %v6351_v17 = vld [vmem:[#allocation5 + $0x164] sm:$0xf] }
 0x25f   : > { %v7226_v33 = vmax.f32 %v1692_v29, %v1513_v30  ;;  %v7228_v34 = vmax.f32 %v1713_v47, %v1514_v31  ;;  %v6359_v29 = vld [vmem:[#allocation5 + $0x1a4] sm:$0xf]  ;;  %v5096_v47 = vld [vmem:[#allocation5 + $0x1b0] sm:$0xf0]  ;;  %3395 = vmatpush.bf16.msra.mxu3 %v5095_v28  ;;  %3486 = vmatpush.bf16.msrb.mxu0 %v4971_v5  ;;  %v4951_v18 = vor.u32 %v6325_v32, %v4950_v42  ;;  %v6349_v32 = vld [vmem:[#allocation5 + $0x14c] sm:$0xf0] }
 0x260   : > { %v1523_v30 = vmax.f32 %v7253_v7, 0.0  ;;  %v5099_v61 = vor.u32 %v6359_v29, %v5096_v47  ;;  %v1524_v51 = vmax.f32 %v7260_v25, 0.0  ;;  %v6317_v47 = vld [vmem:[#allocation5 + $0x4c] sm:$0xf0] }
 0x262   : > { %v1302_v35 = vpop.f32.mrf.mxu2  ;;  %v7230_v36 = vpop.f32.mrf.mxu3  ;;  %3499 = vmatpush.bf16.msrb.mxu1 %v5099_v61  ;;  %3383 = vmatpush.bf16.msra.mxu2 %v4951_v18  ;;  %v5046_v61 = vld [vmem:[#allocation5 + $0x140] sm:$0xf]  ;;  %v4920_v18 = vld [vmem:[#allocation5 + $0x50] sm:$0xf0] }
 0x263   : > { %v7264_v31 = vadd.f32 %v1302_v35, %v7198_v26  ;;  %v7273_v35 = vadd.f32 %v7230_v36, %v7201_v27  ;;  %3396 = vmatpush.bf16.msra.mxu3 %v5079_v52  ;;  %3487 = vmatpush.bf16.msrb.mxu0 %v4955_v53  ;;  %v5047_v50 = vor.u32 %v6349_v32, %v5046_v61  ;;  %v6347_v53 = vld [vmem:[#allocation5 + $0x144] sm:$0xf]  ;;  %v5016_v32 = vld [vmem:[#allocation5 + $0x110] sm:$0xf0] }
 0x264   : > { %v4923_v52 = vor.u32 %v6315_v46, %v4920_v18  ;;  %v5051_v63 = vor.u32 %v6347_v53, %v5048_v56  ;;  %v6341_v56 = vld [vmem:[#allocation5 + $0x10c] sm:$0xf0] }
 0x265   : > { %v7232_v14 = vpop.f32.mrf.mxu0  ;;  %v7234_v37 = vpop.f32.mrf.mxu1  ;;  %v1521_v57 = vmax.f32 %v7264_v31, 0.0  ;;  %v1522_v20 = vmax.f32 %v7273_v35, 0.0  ;;  %v5366_v31 = vld [vmem:[#allocation5 + $0x3c0] sm:$0xf] }
 0x266   : > { %v7278_v24 = vadd.f32 %v7232_v14, %v7188_v59  ;;  %v7282_v58 = vadd.f32 %v7234_v37, %v7191_v6  ;;  %3500 = vmatpush.bf16.msrb.mxu1 %v5083_v0  ;;  %v6319_v14 = vld [vmem:[#allocation5 + $0x64] sm:$0xf]  ;;  %3384 = vmatpush.bf16.msra.mxu2 %v4935_v2 }
 0x267   : > { %v4939_v16 = vor.u32 %v6319_v14, %v4936_v8  ;;  %3397 = vmatpush.bf16.msra.mxu3 %v5063_v12  ;;  %v6313_v14 = vld [vmem:[#allocation5 + $0x2c] sm:$0xf0] }
 0x268   : > { %v1531_v4 = vmax.f32 %v7278_v24, 0.0  ;;  %v1532_v28 = vmax.f32 %v7282_v58, 0.0  ;;  %v4903_v8 = vor.u32 %v6313_v14, %v4902_v3  ;;  %v6345_v12 = vld [vmem:[#allocation5 + $0x12c] sm:$0xf0]  ;;  %v4888_v3 = vld [vmem:[#allocation5 + $0x10] sm:$0xf0] }
 0x269   : > { %3488 = vmatpush.bf16.msrb.mxu0 %v4939_v16  ;;  %v4904_v16 = vld [vmem:[#allocation5 + $0x30] sm:$0xf0] }
 0x26a   : > { %v7236_v38 = vpop.f32.mrf.mxu2  ;;  %v7238_v39 = vpop.f32.mrf.mxu3 }
 0x26b   : > { %v7290_v37 = vadd.f32 %v7236_v38, %v7198_v26  ;;  %v7294_v10 = vadd.f32 %v7238_v39, %v7201_v27  ;;  %v5067_v38 = vor.u32 %v6351_v17, %v5064_v19  ;;  %v4918_v39 = vld [vmem:[#allocation5 + $0x40] sm:$0xf]  ;;  %3398 = vmatpush.bf16.msra.mxu3 %v5047_v50  ;;  %v6309_v50 = vld [vmem:[#allocation5 + $0xc] sm:$0xf0] }
 0x26c   : > { %v4919_v42 = vor.u32 %v6317_v47, %v4918_v39  ;;  %v6343_v39 = vld [vmem:[#allocation5 + $0x124] sm:$0xf]  ;;  %v5032_v47 = vld [vmem:[#allocation5 + $0x130] sm:$0xf0] }
 0x26d   : > { %v7240_v41 = vpop.f32.mrf.mxu0  ;;  %v7242_v43 = vpop.f32.mrf.mxu1  ;;  %3501 = vmatpush.bf16.msrb.mxu1 %v5067_v38  ;;  %v1529_v48 = vmax.f32 %v7290_v37, 0.0  ;;  %v1530_v49 = vmax.f32 %v7294_v10, 0.0  ;;  %3489 = vmatpush.bf16.msrb.mxu0 %v4923_v52  ;;  %v5014_v52 = vld [vmem:[#allocation5 + $0x100] sm:$0xf] }
 0x26e   : > { %v7307_v23 = vadd.f32 %v7240_v41, %v7188_v59  ;;  %v7311_v0 = vadd.f32 %v7242_v43, %v7191_v6  ;;  %3385 = vmatpush.bf16.msra.mxu2 %v4919_v42  ;;  %v5030_v41 = vld [vmem:[#allocation5 + $0x120] sm:$0xf]  ;;  %v6311_v43 = vld [vmem:[#allocation5 + $0x24] sm:$0xf] }
 0x26f   : > { %v5031_v19 = vor.u32 %v6345_v12, %v5030_v41  ;;  %v4907_v38 = vor.u32 %v6311_v43, %v4904_v16  ;;  %v5015_v12 = vor.u32 %v6341_v56, %v5014_v52  ;;  %v6339_v16 = vld [vmem:[#allocation5 + $0x104] sm:$0xf]  ;;  %v5512_v52 = vld [vmem:[#allocation5 + $0x4f0] sm:$0xf0] }
 0x270   : > { %v1539_v61 = vmax.f32 %v7307_v23, 0.0  ;;  %v1540_v42 = vmax.f32 %v7311_v0, 0.0  ;;  %v6487_v23 = vld [vmem:[#allocation5 + $0x5a4] sm:$0xf]  ;;  %v6421_v0 = vld [vmem:[#allocation5 + $0x38c] sm:$0xf0] }
 0x271   : > { %3502 = vmatpush.bf16.msrb.mxu1 %v5051_v63  ;;  %3399 = vmatpush.bf16.msra.mxu3 %v5031_v19  ;;  %v6307_v63 = vld [vmem:[#allocation5 + $0x4] sm:$0xf] }
 0x272   : > { %v7244_v44 = vpop.f32.mrf.mxu2  ;;  %v7246_v15 = vpop.f32.mrf.mxu3  ;;  %3386 = vmatpush.bf16.msra.mxu2 %v4903_v8  ;;  %3490 = vmatpush.bf16.msrb.mxu0 %v4907_v38  ;;  %v4891_v43 = vor.u32 %v6307_v63, %v4888_v3  ;;  %v1736_v8 = vmax.f32 %v7220_v21, %v1523_v30  ;;  %v6433_v30 = vld [vmem:[#allocation5 + $0x3ec] sm:$0xf0]  ;;  %v6495_v63 = vld [vmem:[#allocation5 + $0x5e4] sm:$0xf]  ;;  %v5640_v3 = vld [vmem:[#allocation5 + $0x5f0] sm:$0xf0] }
 0x273   : > { %v7315_v62 = vadd.f32 %v7244_v44, %v7198_v26  ;;  %v7323_v44 = vadd.f32 %v7246_v15, %v7201_v27  ;;  %v5035_v15 = vor.u32 %v6343_v39, %v5032_v47  ;;  %v5019_v39 = vor.u32 %v6339_v16, %v5016_v32  ;;  %v5254_v47 = vld [vmem:[#allocation5 + $0x2e0] sm:$0xf]  ;;  %v6463_v32 = vld [vmem:[#allocation5 + $0x4e4] sm:$0xf] }
 0x274   : > { %v5515_v56 = vor.u32 %v6463_v32, %v5512_v52  ;;  %v5238_v16 = vld [vmem:[#allocation5 + $0x2c0] sm:$0xf]  ;;  %v5643_v25 = vor.u32 %v6495_v63, %v5640_v3  ;;  %v6491_v32 = vld [vmem:[#allocation5 + $0x5c4] sm:$0xf]  ;;  %v5624_v52 = vld [vmem:[#allocation5 + $0x5d0] sm:$0xf0] }
 0x275   : > { %v7248_v55 = vpop.f32.mrf.mxu0  ;;  %v7250_v11 = vpop.f32.mrf.mxu1  ;;  %3503 = vmatpush.bf16.msrb.mxu1 %v5035_v15  ;;  %v1538_v14 = vmax.f32 %v7323_v44, 0.0  ;;  %v6401_v15 = vld [vmem:[#allocation5 + $0x2ec] sm:$0xf0]  ;;  %3400 = vmatpush.bf16.msra.mxu3 %v5015_v12  ;;  %v1737_v12 = vmax.f32 %v1736_v8, %v1531_v4  ;;  %v6459_v8 = vld [vmem:[#allocation5 + $0x4c4] sm:$0xf]  ;;  %v5627_v3 = vor.u32 %v6491_v32, %v5624_v52 }
 0x276   : > { %v7327_v17 = vadd.f32 %v7248_v55, %v7188_v59  ;;  %v4886_v55 = vld [vmem:[#allocation5] sm:$0xf]  ;;  %v7343_v19 = vadd.f32 %v7250_v11, %v7191_v6  ;;  %3491 = vmatpush.bf16.msrb.mxu0 %v4891_v43  ;;  %v6389_v52 = vld [vmem:[#allocation5 + $0x28c] sm:$0xf0] }
 0x277   : > { %v4887_v53 = vor.u32 %v6309_v50, %v4886_v55  ;;  %v5382_v55 = vld [vmem:[#allocation5 + $0x3e0] sm:$0xf] }
 0x278   : > { %v1547_v41 = vmax.f32 %v7327_v17, 0.0  ;;  %v5206_v32 = vld [vmem:[#allocation5 + $0x280] sm:$0xf] }
 0x279   : > { %3387 = vmatpush.bf16.msra.mxu2 %v4887_v53  ;;  %v1757_v53 = vmax.f32 %v7222_v22, %v1524_v51  ;;  %3504 = vmatpush.bf16.msrb.mxu1 %v5019_v39  ;;  %v6429_v51 = vld [vmem:[#allocation5 + $0x3cc] sm:$0xf0] }
 0x27a   : > { %v7255_v54 = vpop.f32.mrf.mxu2  ;;  %v7257_v9 = vpop.f32.mrf.mxu3  ;;  %3536 = vmatpush.bf16.msra.mxu0 %v5515_v56  ;;  %v5367_v4 = vor.u32 %v6429_v51, %v5366_v31  ;;  %v5350_v31 = vld [vmem:[#allocation5 + $0x3a0] sm:$0xf] }
 0x27b   : > { %v7347_v38 = vadd.f32 %v7255_v54, %v7198_v26  ;;  %v7351_v50 = vadd.f32 %v7257_v9, %v7201_v27  ;;  %v5255_v54 = vor.u32 %v6401_v15, %v5254_v47  ;;  %v1694_v9 = vmax.f32 %v7226_v33, %v1521_v57  ;;  %v6397_v33 = vld [vmem:[#allocation5 + $0x2cc] sm:$0xf0] }
 0x27c   : > { %v1548_v57 = vmax.f32 %v7343_v19, 0.0  ;;  %v1758_v56 = vmax.f32 %v1757_v53, %v1532_v28  ;;  %v6417_v19 = vld [vmem:[#allocation5 + $0x36c] sm:$0xf0] }
 0x27d   : > { %v7266_v13 = vpop.f32.mrf.mxu0  ;;  %v7268_v45 = vpop.f32.mrf.mxu1  ;;  %3406 = vmatpush.bf16.msrb.mxu2 %v5255_v54  ;;  %v1545_v39 = vmax.f32 %v7347_v38, 0.0  ;;  %v1546_v15 = vmax.f32 %v7351_v50, 0.0  ;;  %3549 = vmatpush.bf16.msra.mxu1 %v5643_v25  ;;  %v1695_v63 = vmax.f32 %v1694_v9, %v1529_v48  ;;  %v5480_v48 = vld [vmem:[#allocation5 + $0x4b0] sm:$0xf0] }
 0x27e   : > { %v7355_v21 = vadd.f32 %v7266_v13, %v7188_v59  ;;  %v5383_v13 = vor.u32 %v6433_v30, %v5382_v55  ;;  %v7371_v43 = vadd.f32 %v7268_v45, %v7191_v6  ;;  %v5239_v45 = vor.u32 %v6397_v33, %v5238_v16  ;;  %v5222_v16 = vld [vmem:[#allocation5 + $0x2a0] sm:$0xf]  ;;  %v6393_v33 = vld [vmem:[#allocation5 + $0x2ac] sm:$0xf0] }
 0x27f   : > { %v5223_v35 = vor.u32 %v6393_v33, %v5222_v16  ;;  %v5334_v16 = vld [vmem:[#allocation5 + $0x380] sm:$0xf]  ;;  %v6483_v33 = vld [vmem:[#allocation5 + $0x584] sm:$0xf] }
 0x280   : > { %3419 = vmatpush.bf16.msrb.mxu3 %v5383_v13  ;;  %v1555_v55 = vmax.f32 %v7355_v21, 0.0  ;;  %v1715_v13 = vmax.f32 %v7228_v34, %v1522_v20  ;;  %v1556_v25 = vmax.f32 %v7371_v43, 0.0  ;;  %v6425_v34 = vld [vmem:[#allocation5 + $0x3ac] sm:$0xf0]  ;;  %v6455_v20 = vld [vmem:[#allocation5 + $0x4a4] sm:$0xf] }
 0x281   : > { %3407 = vmatpush.bf16.msrb.mxu2 %v5239_v45  ;;  %v5351_v28 = vor.u32 %v6425_v34, %v5350_v31  ;;  %3550 = vmatpush.bf16.msra.mxu1 %v5627_v3  ;;  %v5592_v31 = vld [vmem:[#allocation5 + $0x590] sm:$0xf0] }
 0x282   : > { %v7284_v60 = vpop.f32.mrf.mxu2  ;;  %v7286_v36 = vpop.f32.mrf.mxu3  ;;  %v5595_v34 = vor.u32 %v6483_v33, %v5592_v31 }
 0x283   : > { %v7375_v22 = vadd.f32 %v7284_v60, %v7198_v26  ;;  %v5496_v60 = vld [vmem:[#allocation5 + $0x4d0] sm:$0xf0]  ;;  %v7387_v54 = vadd.f32 %v7286_v36, %v7201_v27  ;;  %v1738_v36 = vmax.f32 %v1737_v12, %v1539_v61 }
 0x284   : > { %v5499_v30 = vor.u32 %v6459_v8, %v5496_v60  ;;  %3420 = vmatpush.bf16.msrb.mxu3 %v5367_v4  ;;  %v5608_v61 = vld [vmem:[#allocation5 + $0x5b0] sm:$0xf0]  ;;  %v1759_v4 = vmax.f32 %v1758_v56, %v1540_v42  ;;  %v7725_v60 = vmax.f32 %v7315_v62, 0.0  ;;  %v6451_v42 = vld [vmem:[#allocation5 + $0x484] sm:$0xf] }
 0x285   : > { %v7299_v5 = vpop.f32.mrf.mxu0  ;;  %v7301_v29 = vpop.f32.mrf.mxu1  ;;  %v1553_v51 = vmax.f32 %v7375_v22, 0.0  ;;  %v1554_v53 = vmax.f32 %v7387_v54, 0.0  ;;  %v5611_v8 = vor.u32 %v6487_v23, %v5608_v61  ;;  %3408 = vmatpush.bf16.msrb.mxu2 %v5223_v35  ;;  %v5464_v62 = vld [vmem:[#allocation5 + $0x490] sm:$0xf0]  ;;  %v6385_v23 = vld [vmem:[#allocation5 + $0x26c] sm:$0xf0] }
 0x286   : > { %v7402_v58 = vadd.f32 %v7299_v5, %v7188_v59  ;;  %v7406_v37 = vadd.f32 %v7301_v29, %v7191_v6  ;;  %3537 = vmatpush.bf16.msra.mxu0 %v5499_v30  ;;  %v5483_v5 = vor.u32 %v6455_v20, %v5480_v48  ;;  %v1716_v29 = vmax.f32 %v1715_v13, %v1530_v49  ;;  %v5318_v61 = vld [vmem:[#allocation5 + $0x360] sm:$0xf]  ;;  %v5544_v54 = vld [vmem:[#allocation5 + $0x530] sm:$0xf0] }
 0x287   : > { %v1696_v30 = vmax.f32 %v1695_v63, %v7725_v60  ;;  %v5207_v49 = vor.u32 %v6389_v52, %v5206_v32  ;;  %3551 = vmatpush.bf16.msra.mxu1 %v5611_v8  ;;  %v6479_v8 = vld [vmem:[#allocation5 + $0x564] sm:$0xf] }
 0x288   : > { %v1563_v13 = vmax.f32 %v7402_v58, 0.0  ;;  %v1564_v56 = vmax.f32 %v7406_v37, 0.0  ;;  %3421 = vmatpush.bf16.msrb.mxu3 %v5351_v28  ;;  %v1717_v20 = vmax.f32 %v1716_v29, %v1538_v14  ;;  %v1760_v58 = vmax.f32 %v1759_v4, %v1548_v57 }
 0x289   : > { %v1697_v28 = vmax.f32 %v1696_v30, %v1545_v39  ;;  %3409 = vmatpush.bf16.msrb.mxu2 %v5207_v49  ;;  %v5319_v57 = vor.u32 %v6417_v19, %v5318_v61  ;;  %v6447_v39 = vld [vmem:[#allocation5 + $0x464] sm:$0xf]  ;;  %v5576_v30 = vld [vmem:[#allocation5 + $0x570] sm:$0xf0]  ;;  %v5302_v49 = vld [vmem:[#allocation5 + $0x340] sm:$0xf] }
 0x28a   : > { %v7317_v1 = vpop.f32.mrf.mxu2  ;;  %v7319_v2 = vpop.f32.mrf.mxu3  ;;  %3538 = vmatpush.bf16.msra.mxu0 %v5483_v5  ;;  %v1718_v32 = vmax.f32 %v1717_v20, %v1546_v15  ;;  %v6413_v15 = vld [vmem:[#allocation5 + $0x34c] sm:$0xf0]  ;;  %v5560_v20 = vld [vmem:[#allocation5 + $0x550] sm:$0xf0] }
 0x28b   : > { %v7411_v9 = vadd.f32 %v7317_v1, %v7198_v26  ;;  %v1739_v1 = vmax.f32 %v1738_v36, %v1547_v41  ;;  %v7425_v3 = vadd.f32 %v7319_v2, %v7201_v27  ;;  %v5335_v41 = vor.u32 %v6421_v0, %v5334_v16  ;;  %3552 = vmatpush.bf16.msra.mxu1 %v5595_v34  ;;  %v6377_v61 = vld [vmem:[#allocation5 + $0x22c] sm:$0xf0] }
 0x28c   : > { %v5467_v2 = vor.u32 %v6451_v42, %v5464_v62  ;;  %v1761_v0 = vmax.f32 %v1760_v58, %v1556_v25  ;;  %v1698_v42 = vmax.f32 %v1697_v28, %v1553_v51  ;;  %v5303_v43 = vor.u32 %v6413_v15, %v5302_v49  ;;  %v6475_v25 = vld [vmem:[#allocation5 + $0x544] sm:$0xf] }
 0x28d   : > { %v7332_v46 = vpop.f32.mrf.mxu0  ;;  %v7334_v18 = vpop.f32.mrf.mxu1  ;;  %v1740_v48 = vmax.f32 %v1739_v1, %v1555_v55  ;;  %3422 = vmatpush.bf16.msrb.mxu3 %v5335_v41  ;;  %v5448_v55 = vld [vmem:[#allocation5 + $0x470] sm:$0xf0]  ;;  %v5579_v1 = vor.u32 %v6479_v8, %v5576_v30  ;;  %v6443_v41 = vld [vmem:[#allocation5 + $0x444] sm:$0xf]  ;;  %v1719_v37 = vmax.f32 %v1718_v32, %v1554_v53  ;;  %v5142_v53 = vld [vmem:[#allocation5 + $0x200] sm:$0xf] }
 0x28e   : > { %v7429_v10 = vadd.f32 %v7332_v46, %v7188_v59  ;;  %v1561_v46 = vmax.f32 %v7411_v9, 0.0  ;;  %v7436_v36 = vadd.f32 %v7334_v18, %v7191_v6  ;;  %v5190_v18 = vld [vmem:[#allocation5 + $0x260] sm:$0xf]  ;;  %3539 = vmatpush.bf16.msra.mxu0 %v5467_v2  ;;  %v1762_v58 = vmax.f32 %v1761_v0, %v1564_v56  ;;  %v6439_v8 = vld [vmem:[#allocation5 + $0x424] sm:$0xf] }
 0x28f   : > { %v5191_v14 = vor.u32 %v6385_v23, %v5190_v18  ;;  %v1741_v62 = vmax.f32 %v1740_v48, %v1563_v13  ;;  %3553 = vmatpush.bf16.msra.mxu1 %v5579_v1  ;;  %v5563_v18 = vor.u32 %v6475_v25, %v5560_v20  ;;  %v5158_v23 = vld [vmem:[#allocation5 + $0x220] sm:$0xf]  ;;  %v6373_v32 = vld [vmem:[#allocation5 + $0x20c] sm:$0xf0] }
 0x290   : > { %v1571_v5 = vmax.f32 %v7429_v10, 0.0  ;;  %v5174_v10 = vld [vmem:[#allocation5 + $0x240] sm:$0xf]  ;;  %v1699_v30 = vmax.f32 %v1698_v42, %v1561_v46  ;;  %v6435_v42 = vld [vmem:[#allocation5 + $0x404] sm:$0xf] }
 0x291   : > { %3410 = vmatpush.bf16.msrb.mxu2 %v5191_v14  ;;  %3423 = vmatpush.bf16.msrb.mxu3 %v5319_v57  ;;  %v5286_v57 = vld [vmem:[#allocation5 + $0x320] sm:$0xf] }
 0x292   : > { %v7357_v7 = vpop.f32.mrf.mxu2  ;;  %v7359_v11 = vpop.f32.mrf.mxu3  ;;  %v1742_v14 = vmax.f32 %v1741_v62, %v1571_v5  ;;  %v6471_v5 = vld [vmem:[#allocation5 + $0x524] sm:$0xf]  ;;  %v5270_v46 = vld [vmem:[#allocation5 + $0x300] sm:$0xf] }
 0x293   : > { %v7440_v35 = vadd.f32 %v7357_v7, %v7198_v26  ;;  %v1562_v7 = vmax.f32 %v7425_v3, 0.0  ;;  %v7454_v44 = vadd.f32 %v7359_v11, %v7201_v27  ;;  %v1572_v11 = vmax.f32 %v7436_v36, 0.0  ;;  %3554 = vmatpush.bf16.msra.mxu1 %v5563_v18  ;;  %v5528_v3 = vld [vmem:[#allocation5 + $0x510] sm:$0xf0] }
 0x294   : > { %v5547_v9 = vor.u32 %v6471_v5, %v5544_v54 }
 0x295   : > { %v7379_v47 = vpop.f32.mrf.mxu0  ;;  %v7381_v24 = vpop.f32.mrf.mxu1  ;;  %v1569_v29 = vmax.f32 %v7440_v35, 0.0  ;;  %v1570_v2 = vmax.f32 %v7454_v44, 0.0  ;;  %3424 = vmatpush.bf16.msrb.mxu3 %v5303_v43 }
 0x296   : > { %v7458_v38 = vadd.f32 %v7379_v47, %v7188_v59  ;;  %v7462_v21 = vadd.f32 %v7381_v24, %v7191_v6  ;;  %v5451_v24 = vor.u32 %v6447_v39, %v5448_v55  ;;  %v6409_v39 = vld [vmem:[#allocation5 + $0x32c] sm:$0xf0] }
 0x297   : > { %v5287_v55 = vor.u32 %v6409_v39, %v5286_v57  ;;  %3555 = vmatpush.bf16.msra.mxu1 %v5547_v9 }
 0x298   : > { %v1580_v33 = vmax.f32 %v7462_v21, 0.0  ;;  %3540 = vmatpush.bf16.msra.mxu0 %v5451_v24  ;;  %v5159_v21 = vor.u32 %v6377_v61, %v5158_v23  ;;  %v5416_v24 = vld [vmem:[#allocation5 + $0x430] sm:$0xf0] }
 0x299   : > { %3425 = vmatpush.bf16.msrb.mxu3 %v5287_v55 }
 0x29a   : > { %v1320_v12 = vpop.f32.mrf.mxu2  ;;  %v7413_v45 = vpop.f32.mrf.mxu3 }
 0x29b   : > { %v7467_v4 = vadd.f32 %v1320_v12, %v7198_v26  ;;  %v6381_v12 = vld [vmem:[#allocation5 + $0x24c] sm:$0xf0]  ;;  %v1370_v56 = vadd.f32 %v7413_v45, %v7201_v27  ;;  %v1720_v45 = vmax.f32 %v1719_v37, %v1562_v7 }
 0x29c   : > { %v5175_v50 = vor.u32 %v6381_v12, %v5174_v10  ;;  %v5419_v12 = vor.u32 %v6439_v8, %v5416_v24 }
 0x29d   : > { %v1420_v63 = vpop.f32.mrf.mxu0  ;;  %v1469_v17 = vpop.f32.mrf.mxu1  ;;  %v1577_v22 = vmax.f32 %v7467_v4, 0.0  ;;  %v1578_v7 = vmax.f32 %v1370_v56, 0.0  ;;  %v1721_v20 = vmax.f32 %v1720_v45, %v1570_v2 }
 0x29e   : > { %v7476_v52 = vadd.f32 %v1420_v63, %v7188_v59  ;;  %v7479_v16 = vadd.f32 %v1469_v17, %v7191_v6  ;;  %v5432_v63 = vld [vmem:[#allocation5 + $0x450] sm:$0xf0]  ;;  %v1579_v17 = vmax.f32 %v7458_v38, 0.0  ;;  %3411 = vmatpush.bf16.msrb.mxu2 %v5175_v50 }
 0x29f   : > { %v5435_v34 = vor.u32 %v6443_v41, %v5432_v63  ;;  %v5143_v41 = vor.u32 %v6373_v32, %v5142_v53  ;;  %v5400_v63 = vld [vmem:[#allocation5 + $0x410] sm:$0xf0] }
 0x2a0   : > { %v1587_v28 = vmax.f32 %v7476_v52, 0.0  ;;  %v1588_v48 = vmax.f32 %v7479_v16, 0.0  ;;  %v1763_v52 = vmax.f32 %v1762_v58, %v1572_v11  ;;  %v1743_v16 = vmax.f32 %v1742_v14, %v1579_v17  ;;  %v6405_v11 = vld [vmem:[#allocation5 + $0x30c] sm:$0xf0]  ;;  %v6467_v17 = vld [vmem:[#allocation5 + $0x504] sm:$0xf] }
 0x2a1   : > { %3541 = vmatpush.bf16.msra.mxu0 %v5435_v34  ;;  %v5403_v43 = vor.u32 %v6435_v42, %v5400_v63  ;;  %v1700_v34 = vmax.f32 %v1699_v30, %v1569_v29 }
 0x2a2   : > { %v7469_v60 = vpop.f32.mrf.mxu2  ;;  %v7471_v47 = vpop.f32.mrf.mxu3  ;;  %v1764_v62 = vmax.f32 %v1763_v52, %v1580_v33  ;;  %v1744_v50 = vmax.f32 %v1743_v16, %v1587_v28  ;;  %3412 = vmatpush.bf16.msrb.mxu2 %v5159_v21 }
 0x2a3   : > { %v1323_v49 = vadd.f32 %v7469_v60, %v7198_v26  ;;  %v1372_v0 = vadd.f32 %v7471_v47, %v7201_v27  ;;  %v5271_v47 = vor.u32 %v6405_v11, %v5270_v46 }
 0x2a4   : > { %v1765_v25 = vmax.f32 %v1764_v62, %v1588_v48  ;;  %v1722_v48 = vmax.f32 %v1721_v20, %v1578_v7 }
 0x2a5   : > { %v1423_v31 = vpop.f32.mrf.mxu0  ;;  %v1472_v36 = vpop.f32.mrf.mxu1  ;;  %3542 = vmatpush.bf16.msra.mxu0 %v5419_v12  ;;  %v1585_v58 = vmax.f32 %v1323_v49, 0.0  ;;  %v1586_v28 = vmax.f32 %v1372_v0, 0.0  ;;  %3426 = vmatpush.bf16.msrb.mxu3 %v5271_v47 }
 0x2a6   : > { %v7490_v51 = vadd.f32 %v1423_v31, %v7188_v59  ;;  %v7493_v13 = vadd.f32 %v1472_v36, %v7191_v6  ;;  %3413 = vmatpush.bf16.msrb.mxu2 %v5143_v41 }
 0x2a7   : > { %v1723_v39 = vmax.f32 %v1722_v48, %v1586_v28  ;;  %v5134_v28 = vld [vmem:[#allocation5 + $0x1e8] sm:$0xf] }
 0x2a8   : > { %v1595_v19 = vmax.f32 %v7490_v51, 0.0  ;;  %v1596_v38 = vmax.f32 %v7493_v13, 0.0  ;;  %v5531_v13 = vor.u32 %v6467_v17, %v5528_v3 }
 0x2a9   : > { %3543 = vmatpush.bf16.msra.mxu0 %v5403_v43  ;;  %v6465_v43 = vld [vmem:[#allocation5 + $0x4ec] sm:$0xf0] }
 0x2aa   : > { %v1325_v1 = vpop.f32.mrf.mxu2  ;;  %v1374_v10 = vpop.f32.mrf.mxu3  ;;  %v1745_v18 = vmax.f32 %v1744_v50, %v1595_v19  ;;  %v1766_v23 = vmax.f32 %v1765_v25, %v1596_v38  ;;  %3556 = vmatpush.bf16.msra.mxu1 %v5531_v13  ;;  %v5638_v25 = vld [vmem:[#allocation5 + $0x5e0] sm:$0xf]  ;;  %v5006_v13 = vld [vmem:[#allocation5 + $0xe8] sm:$0xf] }
 0x2ab   : > { %v1326_v15 = vadd.f32 %v1325_v1, %v7198_v26  ;;  %v1375_v31 = vadd.f32 %v1374_v10, %v7201_v27 }
 0x2ad   : > { %v1425_v60 = vpop.f32.mrf.mxu0  ;;  %v1474_v36 = vpop.f32.mrf.mxu1  ;;  %v1594_v21 = vmax.f32 %v1375_v31, 0.0 }
 0x2ae   : > { %v1426_v33 = vadd.f32 %v1425_v60, %v7188_v59  ;;  %v1475_v51 = vadd.f32 %v1474_v36, %v7191_v6  ;;  %v1701_v59 = vmax.f32 %v1700_v34, %v1577_v22  ;;  %v1593_v6 = vmax.f32 %v1326_v15, 0.0  ;;  %v5510_v36 = vld [vmem:[#allocation5 + $0x4e0] sm:$0xf]  ;;  %v6338_v34 = vld [vmem:[#allocation5 + $0xf4] sm:$0xf0] }
 0x2af   : > { %v1724_v22 = vmax.f32 %v1723_v39, %v1594_v21  ;;  %v5622_v21 = vld [vmem:[#allocation5 + $0x5c0] sm:$0xf]  ;;  %v6366_v39 = vld [vmem:[#allocation5 + $0x1d4] sm:$0xf0] }
 0x2b0   : > { %v1603_v61 = vmax.f32 %v1426_v33, 0.0  ;;  %v1604_v14 = vmax.f32 %v1475_v51, 0.0  ;;  %v1702_v2 = vmax.f32 %v1701_v59, %v1585_v58  ;;  %v6497_v33 = vld [vmem:[#allocation5 + $0x5ec] sm:$0xf0] }
 0x2b2   : > { %v1746_v35 = vmax.f32 %v1745_v18, %v1603_v61  ;;  %v1767_v29 = vmax.f32 %v1766_v23, %v1604_v14  ;;  %v1327_v57 = vpop.f32.mrf.mxu2  ;;  %v1376_v44 = vpop.f32.mrf.mxu3  ;;  %v1703_v4 = vmax.f32 %v1702_v2, %v1593_v6  ;;  %v6370_v18 = vld [vmem:[#allocation5 + $0x1f4] sm:$0xf0]  ;;  %v5511_v23 = vor.u32 %v6465_v43, %v5510_v36  ;;  %v5494_v14 = vld [vmem:[#allocation5 + $0x4c0] sm:$0xf]  ;;  %v6461_v6 = vld [vmem:[#allocation5 + $0x4cc] sm:$0xf0] }
 0x2b3   : > { %v1328_v19 = vadd.f32 %v1327_v57, %v7198_v26  ;;  %v1377_v38 = vadd.f32 %v1376_v44, %v7201_v27  ;;  %v5639_v61 = vor.u32 %v6497_v33, %v5638_v25  ;;  %v4990_v57 = vld [vmem:[#allocation5 + $0xc8] sm:$0xf]  ;;  %v6334_v44 = vld [vmem:[#allocation5 + $0xd4] sm:$0xf0]  ;;  %v5430_v33 = vld [vmem:[#allocation5 + $0x440] sm:$0xf] }
 0x2b4   : > { %v1747_v37 = vrot.slane %v1746_v35, 4  ;;  %v1768_v56 = vrot.slane %v1767_v29, 4  ;;  %v5118_v2 = vld [vmem:[#allocation5 + $0x1c8] sm:$0xf] }
 0x2b5   : > { %v1601_v55 = vmax.f32 %v1328_v19, 0.0  ;;  %v1602_v8 = vmax.f32 %v1377_v38, 0.0  ;;  %v5495_v19 = vor.u32 %v6461_v6, %v5494_v14  ;;  %v5070_v36 = vld [vmem:[#allocation5 + $0x168] sm:$0xf] }
 0x2b6   : > { %v1748_v24 = vmax.f32 %v1746_v35, %v1747_v37  ;;  %v1769_v5 = vmax.f32 %v1767_v29, %v1768_v56  ;;  %v6493_v35 = vld [vmem:[#allocation5 + $0x5cc] sm:$0xf0]  ;;  %v5135_v29 = vor.u32 %v6370_v18, %v5134_v28  ;;  %v5478_v37 = vld [vmem:[#allocation5 + $0x4a0] sm:$0xf] }
 0x2b7   : > { %v1704_v30 = vmax.f32 %v1703_v4, %v1601_v55  ;;  %v1725_v52 = vmax.f32 %v1724_v22, %v1602_v8  ;;  %v5623_v38 = vor.u32 %v6493_v35, %v5622_v21  ;;  %v6457_v56 = vld [vmem:[#allocation5 + $0x4ac] sm:$0xf0]  ;;  %v5606_v4 = vld [vmem:[#allocation5 + $0x5a0] sm:$0xf]  ;;  %v4991_v55 = vor.u32 %v6334_v44, %v4990_v57  ;;  %v6318_v21 = vld [vmem:[#allocation5 + $0x54] sm:$0xf0] }
 0x2b8   : > { %v1749_v16 = vrot.slane %v1748_v24, 2  ;;  %v1770_v1 = vrot.slane %v1769_v5, 2  ;;  %v6489_v22 = vld [vmem:[#allocation5 + $0x5ac] sm:$0xf0]  ;;  %v5119_v8 = vor.u32 %v6366_v39, %v5118_v2  ;;  %v5054_v35 = vld [vmem:[#allocation5 + $0x148] sm:$0xf] }
 0x2b9   : > { %v1705_v10 = vrot.slane %v1704_v30, 4  ;;  %v1726_v12 = vrot.slane %v1725_v52, 4  ;;  %v6477_v28 = vld [vmem:[#allocation5 + $0x54c] sm:$0xf0]  ;;  %v5414_v44 = vld [vmem:[#allocation5 + $0x420] sm:$0xf] }
 0x2ba   : > { %v1750_v54 = vmax.f32 %v1748_v24, %v1749_v16  ;;  %v1771_v53 = vmax.f32 %v1769_v5, %v1770_v1  ;;  %v4974_v24 = vld [vmem:[#allocation5 + $0xa8] sm:$0xf]  ;;  %v6330_v5 = vld [vmem:[#allocation5 + $0xb4] sm:$0xf0]  ;;  %v5479_v16 = vor.u32 %v6457_v56, %v5478_v37  ;;  %v5607_v1 = vor.u32 %v6489_v22, %v5606_v4  ;;  %v6441_v2 = vld [vmem:[#allocation5 + $0x42c] sm:$0xf0] }
 0x2bb   : > { %v1706_v32 = vmax.f32 %v1704_v30, %v1705_v10  ;;  %v1727_v26 = vmax.f32 %v1725_v52, %v1726_v12  ;;  %v5102_v30 = vld [vmem:[#allocation5 + $0x1a8] sm:$0xf]  ;;  %v6362_v52 = vld [vmem:[#allocation5 + $0x1b4] sm:$0xf0]  ;;  %v5462_v10 = vld [vmem:[#allocation5 + $0x480] sm:$0xf] }
 0x2bc   : > { %v1751_v45 = vrot.slane %v1750_v54, 1  ;;  %v1772_v27 = vrot.slane %v1771_v53, 1  ;;  %v6453_v12 = vld [vmem:[#allocation5 + $0x48c] sm:$0xf0]  ;;  %v5542_v39 = vld [vmem:[#allocation5 + $0x520] sm:$0xf] }
 0x2bd   : > { %v1707_v49 = vrot.slane %v1706_v32, 2  ;;  %v1728_v0 = vrot.slane %v1727_v26, 2  ;;  %v4910_v56 = vld [vmem:[#allocation5 + $0x28] sm:$0xf]  ;;  %v6314_v4 = vld [vmem:[#allocation5 + $0x34] sm:$0xf0] }
 0x2be   : > { %v1752_v9 = vmax.f32 %v1750_v54, %v1751_v45  ;;  %v1773_v46 = vmax.f32 %v1771_v53, %v1772_v27  ;;  %v5590_v54 = vld [vmem:[#allocation5 + $0x580] sm:$0xf]  ;;  %v6485_v53 = vld [vmem:[#allocation5 + $0x58c] sm:$0xf0]  ;;  %v4958_v45 = vld [vmem:[#allocation5 + $0x88] sm:$0xf] }
 0x2bf   : > { %v1708_v11 = vmax.f32 %v1706_v32, %v1707_v49  ;;  %v1729_v42 = vmax.f32 %v1727_v26, %v1728_v0  ;;  %v4975_v32 = vor.u32 %v6330_v5, %v4974_v24  ;;  %v5103_v26 = vor.u32 %v6362_v52, %v5102_v30  ;;  %v6326_v27 = vld [vmem:[#allocation5 + $0x94] sm:$0xf0]  ;;  %v5086_v49 = vld [vmem:[#allocation5 + $0x188] sm:$0xf]  ;;  %v6437_v30 = vld [vmem:[#allocation5 + $0x40c] sm:$0xf0] }
 0x2c0   : > { %v1787_v62 = vrot.slane %v1752_v9, 2  ;;  %v1788_v50 = vrot.slane %v1773_v46, 1  ;;  %v6358_v0 = vld [vmem:[#allocation5 + $0x194] sm:$0xf0]  ;;  %v5463_v9 = vor.u32 %v6453_v12, %v5462_v10  ;;  %v5591_v46 = vor.u32 %v6485_v53, %v5590_v54  ;;  %v5038_v22 = vld [vmem:[#allocation5 + $0x128] sm:$0xf] }
 0x2c1   : > { %v1709_v15 = vrot.slane %v1708_v11, 1  ;;  %v1730_v41 = vrot.slane %v1729_v42, 1  ;;  %v5415_v24 = vor.u32 %v6441_v2, %v5414_v44  ;;  %v5526_v52 = vld [vmem:[#allocation5 + $0x500] sm:$0xf]  ;;  %v6310_v10 = vld [vmem:[#allocation5 + $0x14] sm:$0xf0]  ;;  %v4911_v54 = vor.u32 %v6314_v4, %v4910_v56 }
 0x2c2   : > { %v1798_v63 = vsel %vm1797_vm6, %v1787_v62, %v1788_v50  ;;  %v5766_v12 = vld [vmem:[#allocation5 + $0x6e0] sm:$0xf]  ;;  %v6490_v44 = vld [vmem:[#allocation5 + $0x5b4] sm:$0xf0] }
 0x2c3   : > { %v1710_v17 = vmax.f32 %v1708_v11, %v1709_v15  ;;  %v1731_v3 = vmax.f32 %v1729_v42, %v1730_v41  ;;  %v5446_v11 = vld [vmem:[#allocation5 + $0x460] sm:$0xf]  ;;  %v6449_v42 = vld [vmem:[#allocation5 + $0x46c] sm:$0xf0] }
 0x2c4   : > { %v5574_v15 = vld [vmem:[#allocation5 + $0x560] sm:$0xf]  ;;  %v6481_v41 = vld [vmem:[#allocation5 + $0x56c] sm:$0xf0]  ;;  %v5447_v43 = vor.u32 %v6449_v42, %v5446_v11  ;;  %v6466_v11 = vld [vmem:[#allocation5 + $0x4f4] sm:$0xf0] }
 0x2c5   : > { %v1785_v7 = vrot.slane %v1710_v17, 4  ;;  %v1786_v31 = vrot.slane %v1731_v3, 3  ;;  %v5087_v17 = vor.u32 %v6358_v0, %v5086_v49  ;;  %v4942_v3 = vld [vmem:[#allocation5 + $0x68] sm:$0xf]  ;;  %v5575_v25 = vor.u32 %v6481_v41, %v5574_v15  ;;  %v6342_v49 = vld [vmem:[#allocation5 + $0x114] sm:$0xf0] }
 0x2c6   : > { %v5518_v0 = vld [vmem:[#allocation5 + $0x4e8] sm:$0xf]  ;;  %v5846_v4 = vld [vmem:[#allocation5 + $0x780] sm:$0xf] }
 0x2c7   : > { %v1796_v60 = vsel %vm1795_vm7, %v1785_v7, %v1786_v31  ;;  %v6322_v7 = vld [vmem:[#allocation5 + $0x74] sm:$0xf0]  ;;  %v5646_v42 = vld [vmem:[#allocation5 + $0x5e8] sm:$0xf] }
 0x2c8   : > { %v1800_v47 = vsel %vm1799_vm8, %v1796_v60, %v1798_v63  ;;  %v4959_v63 = vor.u32 %v6326_v27, %v4958_v45  ;;  %v4943_v18 = vor.u32 %v6322_v7, %v4942_v3  ;;  %v6561_v45 = vld [vmem:[#allocation5 + $0x7ec] sm:$0xf0]  ;;  %v5022_v27 = vld [vmem:[#allocation5 + $0x108] sm:$0xf]  ;;  %v5519_v7 = vor.u32 %v6466_v11, %v5518_v0 }
 0x2c9   : > { %v7527_v51 = vsel %vm472_vm0, %v7210_v40, %v1800_v47  ;;  %v5007_v40 = vor.u32 %v6338_v34, %v5006_v13  ;;  %v6354_v47 = vld [vmem:[#allocation5 + $0x174] sm:$0xf0]  ;;  %v6525_v3 = vld [vmem:[#allocation5 + $0x6cc] sm:$0xf0] }
 0x2ca   : > { %v1810_v20 = vperm.slane %v7527_v51, 0  ;;  %v1811_v58 = vperm.slane %v7527_v51, 1  ;;  %v1812_v62 = vperm.slane %v7527_v51, 2  ;;  %v1813_v50 = vperm.slane %v7527_v51, 3 }
 0x2cb   : > { %v1814_v31 = vperm.slane %v7527_v51, 4  ;;  %v1815_v60 = vperm.slane %v7527_v51, 5 }
 0x2cc   : > { %v7531_v59 = vpack.c.bf16 %v1810_v20, %v1810_v20  ;;  %v7533_v48 = vpack.c.bf16 %v1811_v58, %v1811_v58  ;;  %v7543_v13 = vpack.c.bf16 %v1812_v62, %v1812_v62  ;;  %v7545_v34 = vpack.c.bf16 %v1813_v50, %v1813_v50  ;;  %v6445_v20 = vld [vmem:[#allocation5 + $0x44c] sm:$0xf0]  ;;  %v5558_v58 = vld [vmem:[#allocation5 + $0x540] sm:$0xf]  ;;  %v6498_v62 = vld [vmem:[#allocation5 + $0x5f4] sm:$0xf0] }
 0x2cd   : > { %v7549_v14 = vpack.c.bf16 %v1814_v31, %v1814_v31  ;;  %v7551_v6 = vpack.c.bf16 %v1815_v60, %v1815_v60  ;;  %v5559_v57 = vor.u32 %v6477_v28, %v5558_v58  ;;  %v5647_v31 = vor.u32 %v6498_v62, %v5646_v42  ;;  %v5878_v60 = vld [vmem:[#allocation5 + $0x7c0] sm:$0xf] }
 0x2ce   : > { %3388 = vmatmul.bf16.vlgmr.msra.gmra.mxu2 %v7531_v59  ;;  %3401 = vmatmul.bf16.vlgmr.msra.gmra.mxu3 %v7533_v48  ;;  %v5734_v28 = vld [vmem:[#allocation5 + $0x6a0] sm:$0xf] }
 0x2cf   : > { %3432 = vmatpush.bf16.msra.mxu2 %v5511_v23  ;;  %3445 = vmatpush.bf16.msra.mxu3 %v5639_v61  ;;  %v5071_v23 = vor.u32 %v6354_v47, %v5070_v36  ;;  %v4926_v61 = vld [vmem:[#allocation5 + $0x48] sm:$0xf]  ;;  %v6557_v36 = vld [vmem:[#allocation5 + $0x7cc] sm:$0xf0]  ;;  %v5814_v62 = vld [vmem:[#allocation5 + $0x740] sm:$0xf] }
 0x2d0   : > { %3492 = vmatmul.bf16.vlgmr.msrb.gmra.mxu0 %v7531_v59  ;;  %3505 = vmatmul.bf16.vlgmr.msrb.gmra.mxu1 %v7533_v48  ;;  %v5502_v47 = vld [vmem:[#allocation5 + $0x4c8] sm:$0xf]  ;;  %v5879_v58 = vor.u32 %v6557_v36, %v5878_v60  ;;  %v6505_v60 = vld [vmem:[#allocation5 + $0x62c] sm:$0xf0] }
 0x2d1   : > { %3588 = vmatpush.bf16.msrb.mxu0 %v5007_v40  ;;  %3601 = vmatpush.bf16.msrb.mxu1 %v5135_v29  ;;  %v6350_v40 = vld [vmem:[#allocation5 + $0x154] sm:$0xf0]  ;;  %v5431_v29 = vor.u32 %v6445_v20, %v5430_v33 }
 0x2d2   : > { %v5055_v37 = vor.u32 %v6350_v40, %v5054_v35  ;;  %v6494_v33 = vld [vmem:[#allocation5 + $0x5d4] sm:$0xf0]  ;;  %v6553_v35 = vld [vmem:[#allocation5 + $0x7ac] sm:$0xf0]  ;;  %v5486_v40 = vld [vmem:[#allocation5 + $0x4a8] sm:$0xf] }
 0x2d3   : > { %3433 = vmatpush.bf16.msra.mxu2 %v5495_v19  ;;  %3446 = vmatpush.bf16.msra.mxu3 %v5623_v38  ;;  %v6473_v19 = vld [vmem:[#allocation5 + $0x52c] sm:$0xf0]  ;;  %v4927_v38 = vor.u32 %v6318_v21, %v4926_v61  ;;  %v5862_v21 = vld [vmem:[#allocation5 + $0x7a0] sm:$0xf] }
 0x2d4   : > { %v5543_v5 = vor.u32 %v6473_v19, %v5542_v39  ;;  %v5863_v39 = vor.u32 %v6553_v35, %v5862_v21  ;;  %v5718_v19 = vld [vmem:[#allocation5 + $0x680] sm:$0xf]  ;;  %v6501_v21 = vld [vmem:[#allocation5 + $0x60c] sm:$0xf0] }
 0x2d5   : > { %3589 = vmatpush.bf16.msrb.mxu0 %v4991_v55  ;;  %3602 = vmatpush.bf16.msrb.mxu1 %v5119_v8  ;;  %v6346_v55 = vld [vmem:[#allocation5 + $0x134] sm:$0xf0]  ;;  %v5398_v8 = vld [vmem:[#allocation5 + $0x400] sm:$0xf] }
 0x2d6   : > { %v5039_v53 = vor.u32 %v6346_v55, %v5038_v22  ;;  %v6549_v22 = vld [vmem:[#allocation5 + $0x78c] sm:$0xf0]  ;;  %v5470_v55 = vld [vmem:[#allocation5 + $0x488] sm:$0xf]  ;;  %v5782_v35 = vld [vmem:[#allocation5 + $0x700] sm:$0xf] }
 0x2d7   : > { %3434 = vmatpush.bf16.msra.mxu2 %v5479_v16  ;;  %3447 = vmatpush.bf16.msra.mxu3 %v5607_v1  ;;  %v6469_v16 = vld [vmem:[#allocation5 + $0x50c] sm:$0xf0]  ;;  %v4894_v1 = vld [vmem:[#allocation5 + $0x8] sm:$0xf] }
 0x2d8   : > { %v4895_v41 = vor.u32 %v6310_v10, %v4894_v1  ;;  %v6513_v1 = vld [vmem:[#allocation5 + $0x66c] sm:$0xf0] }
 0x2d9   : > { %3590 = vmatpush.bf16.msrb.mxu0 %v4975_v32  ;;  %3603 = vmatpush.bf16.msrb.mxu1 %v5103_v26  ;;  %v6529_v32 = vld [vmem:[#allocation5 + $0x6ec] sm:$0xf0]  ;;  %v5894_v26 = vld [vmem:[#allocation5 + $0x7e0] sm:$0xf] }
 0x2da   : > { %v5767_v50 = vor.u32 %v6529_v32, %v5766_v12  ;;  %v5895_v15 = vor.u32 %v6561_v45, %v5894_v26  ;;  %v5454_v32 = vld [vmem:[#allocation5 + $0x468] sm:$0xf]  ;;  %v6450_v26 = vld [vmem:[#allocation5 + $0x474] sm:$0xf0] }
 0x2db   : > { %3435 = vmatpush.bf16.msra.mxu2 %v5463_v9  ;;  %3448 = vmatpush.bf16.msra.mxu3 %v5591_v46  ;;  %v5399_v9 = vor.u32 %v6437_v30, %v5398_v8  ;;  %v5527_v46 = vor.u32 %v6469_v16, %v5526_v52  ;;  %v6454_v8 = vld [vmem:[#allocation5 + $0x494] sm:$0xf0]  ;;  %v5847_v52 = vor.u32 %v6549_v22, %v5846_v4  ;;  %v5702_v16 = vld [vmem:[#allocation5 + $0x660] sm:$0xf]  ;;  %v5582_v45 = vld [vmem:[#allocation5 + $0x568] sm:$0xf] }
 0x2dc   : > { %v5471_v10 = vor.u32 %v6454_v8, %v5470_v55  ;;  %v5455_v11 = vor.u32 %v6450_v26, %v5454_v32  ;;  %v5384_v4 = vld [vmem:[#allocation5 + $0x3f0] sm:$0xf0]  ;;  %v6336_v22 = vld [vmem:[#allocation5 + $0xec] sm:$0xf] }
 0x2dd   : > { %3591 = vmatpush.bf16.msrb.mxu0 %v4959_v63  ;;  %3604 = vmatpush.bf16.msrb.mxu1 %v5087_v17  ;;  %v5023_v63 = vor.u32 %v6342_v49, %v5022_v27  ;;  %v5750_v17 = vld [vmem:[#allocation5 + $0x6c0] sm:$0xf]  ;;  %v6482_v27 = vld [vmem:[#allocation5 + $0x574] sm:$0xf0]  ;;  %v5703_v49 = vor.u32 %v6513_v1, %v5702_v16  ;;  %v1816_v1 = vperm.slane %v7527_v51, 6 }
 0x2de   : > { %3414 = vmatmul.bf16.vlgmr.msrb.gmra.mxu2 %v7543_v13  ;;  %3427 = vmatmul.bf16.vlgmr.msrb.gmra.mxu3 %v7545_v34  ;;  %v5751_v20 = vor.u32 %v6525_v3, %v5750_v17  ;;  %v5583_v42 = vor.u32 %v6482_v27, %v5582_v45  ;;  %v6478_v17 = vld [vmem:[#allocation5 + $0x554] sm:$0xf0]  ;;  %v5240_v32 = vld [vmem:[#allocation5 + $0x2d0] sm:$0xf0]  ;;  %v6427_v27 = vld [vmem:[#allocation5 + $0x3c4] sm:$0xf] }
 0x2df   : > { %3436 = vmatpush.bf16.msra.mxu2 %v5447_v43  ;;  %3449 = vmatpush.bf16.msra.mxu3 %v5575_v25  ;;  %v6462_v43 = vld [vmem:[#allocation5 + $0x4d4] sm:$0xf0]  ;;  %v5630_v25 = vld [vmem:[#allocation5 + $0x5c8] sm:$0xf] }
 0x2e0   : > { %3544 = vmatmul.bf16.vlgmr.msra.gmra.mxu0 %v7549_v14  ;;  %3557 = vmatmul.bf16.vlgmr.msra.gmra.mxu1 %v7551_v6  ;;  %v5631_v61 = vor.u32 %v6494_v33, %v5630_v25  ;;  %v6537_v25 = vld [vmem:[#allocation5 + $0x72c] sm:$0xf0]  ;;  %v5422_v33 = vld [vmem:[#allocation5 + $0x428] sm:$0xf] }
 0x2e1   : > { %3592 = vmatpush.bf16.msrb.mxu0 %v4943_v18  ;;  %3605 = vmatpush.bf16.msrb.mxu1 %v5071_v23  ;;  %v6521_v18 = vld [vmem:[#allocation5 + $0x6ac] sm:$0xf0]  ;;  %v5503_v23 = vor.u32 %v6462_v43, %v5502_v47  ;;  %v5798_v43 = vld [vmem:[#allocation5 + $0x720] sm:$0xf] }
 0x2e2   : > { %v5735_v2 = vor.u32 %v6521_v18, %v5734_v28  ;;  %v6474_v28 = vld [vmem:[#allocation5 + $0x534] sm:$0xf0]  ;;  %v5654_v18 = vld [vmem:[#allocation5 + $0x600] sm:$0xf] }
 0x2e3   : > { %3437 = vmatpush.bf16.msra.mxu2 %v5431_v29  ;;  %3450 = vmatpush.bf16.msra.mxu3 %v5559_v57  ;;  %v6458_v29 = vld [vmem:[#allocation5 + $0x4b4] sm:$0xf0]  ;;  %v5614_v57 = vld [vmem:[#allocation5 + $0x5a8] sm:$0xf]  ;;  %v5655_v55 = vor.u32 %v6501_v21, %v5654_v18  ;;  %v6419_v18 = vld [vmem:[#allocation5 + $0x384] sm:$0xf] }
 0x2e4   : > { %v5615_v56 = vor.u32 %v6490_v44, %v5614_v57  ;;  %v5406_v44 = vld [vmem:[#allocation5 + $0x408] sm:$0xf]  ;;  %v4960_v21 = vld [vmem:[#allocation5 + $0x98] sm:$0xf0] }
 0x2e5   : > { %3593 = vmatpush.bf16.msrb.mxu0 %v4927_v38  ;;  %3606 = vmatpush.bf16.msrb.mxu1 %v5055_v37  ;;  %v6517_v38 = vld [vmem:[#allocation5 + $0x68c] sm:$0xf0]  ;;  %v5487_v37 = vor.u32 %v6458_v29, %v5486_v40 }
 0x2e6   : > { %v5719_v30 = vor.u32 %v6517_v38, %v5718_v19  ;;  %v6533_v40 = vld [vmem:[#allocation5 + $0x70c] sm:$0xf0]  ;;  %v6470_v19 = vld [vmem:[#allocation5 + $0x514] sm:$0xf0]  ;;  %v6399_v38 = vld [vmem:[#allocation5 + $0x2e4] sm:$0xf] }
 0x2e7   : > { %3438 = vmatpush.bf16.msra.mxu2 %v5415_v24  ;;  %3451 = vmatpush.bf16.msra.mxu3 %v5543_v5  ;;  %v5598_v24 = vld [vmem:[#allocation5 + $0x588] sm:$0xf]  ;;  %v6486_v5 = vld [vmem:[#allocation5 + $0x594] sm:$0xf0]  ;;  %v5783_v8 = vor.u32 %v6533_v40, %v5782_v35  ;;  %v6356_v35 = vld [vmem:[#allocation5 + $0x18c] sm:$0xf] }
 0x2e8   : > { %v5599_v12 = vor.u32 %v6486_v5, %v5598_v24  ;;  %v5008_v24 = vld [vmem:[#allocation5 + $0xf8] sm:$0xf0]  ;;  %v6368_v5 = vld [vmem:[#allocation5 + $0x1ec] sm:$0xf] }
 0x2e9   : > { %3594 = vmatpush.bf16.msrb.mxu0 %v4911_v54  ;;  %3607 = vmatpush.bf16.msrb.mxu1 %v5039_v53  ;;  %v5830_v54 = vld [vmem:[#allocation5 + $0x760] sm:$0xf]  ;;  %v6545_v53 = vld [vmem:[#allocation5 + $0x76c] sm:$0xf0]  ;;  %v5011_v26 = vor.u32 %v6336_v22, %v5008_v24  ;;  %v5088_v40 = vld [vmem:[#allocation5 + $0x198] sm:$0xf0] }
 0x2ea   : > { %v5831_v0 = vor.u32 %v6545_v53, %v5830_v54  ;;  %v1817_v54 = vperm.slane %v7527_v51, 7  ;;  %v6395_v53 = vld [vmem:[#allocation5 + $0x2c4] sm:$0xf]  ;;  %v6352_v22 = vld [vmem:[#allocation5 + $0x16c] sm:$0xf] }
 0x2eb   : > { %3439 = vmatpush.bf16.msra.mxu2 %v5399_v9  ;;  %3452 = vmatpush.bf16.msra.mxu3 %v5527_v46  ;;  %v5686_v9 = vld [vmem:[#allocation5 + $0x640] sm:$0xf]  ;;  %v6509_v46 = vld [vmem:[#allocation5 + $0x64c] sm:$0xf0]  ;;  %v5243_v51 = vor.u32 %v6395_v53, %v5240_v32  ;;  %v6348_v53 = vld [vmem:[#allocation5 + $0x14c] sm:$0xf] }
 0x2ec   : > { %v5687_v3 = vor.u32 %v6509_v46, %v5686_v9  ;;  %v4992_v9 = vld [vmem:[#allocation5 + $0xd8] sm:$0xf0]  ;;  %v6364_v46 = vld [vmem:[#allocation5 + $0x1cc] sm:$0xf] }
 0x2ed   : > { %3595 = vmatpush.bf16.msrb.mxu0 %v4895_v41  ;;  %3608 = vmatpush.bf16.msrb.mxu1 %v5023_v63  ;;  %v6446_v41 = vld [vmem:[#allocation5 + $0x454] sm:$0xf0]  ;;  %v5566_v63 = vld [vmem:[#allocation5 + $0x548] sm:$0xf]  ;;  %v5056_v32 = vld [vmem:[#allocation5 + $0x158] sm:$0xf0] }
 0x2ee   : > { %3440 = vmatmul.bf16.vlgmr.msra.gmra.mxu2 %v7549_v14  ;;  %3453 = vmatmul.bf16.vlgmr.msra.gmra.mxu3 %v7551_v6  ;;  %v5567_v47 = vor.u32 %v6478_v17, %v5566_v63 }
 0x2ef   : > { %3458 = vmatpush.bf16.msrb.mxu2 %v5767_v50  ;;  %3471 = vmatpush.bf16.msrb.mxu3 %v5895_v15  ;;  %v6541_v50 = vld [vmem:[#allocation5 + $0x74c] sm:$0xf0]  ;;  %v5438_v15 = vld [vmem:[#allocation5 + $0x448] sm:$0xf] }
 0x2f0   : > { %3596 = vmatmul.bf16.vlgmr.msrb.gmra.mxu0 %v7531_v59  ;;  %3609 = vmatmul.bf16.vlgmr.msrb.gmra.mxu1 %v7533_v48  ;;  %v5439_v36 = vor.u32 %v6446_v41, %v5438_v15  ;;  %v6391_v15 = vld [vmem:[#allocation5 + $0x2a4] sm:$0xf]  ;;  %v5224_v41 = vld [vmem:[#allocation5 + $0x2b0] sm:$0xf0] }
 0x2f1   : > { %3640 = vmatpush.bf16.msra.mxu0 %v5519_v7  ;;  %3653 = vmatpush.bf16.msra.mxu1 %v5647_v31  ;;  %v5815_v7 = vor.u32 %v6541_v50, %v5814_v62  ;;  %v5670_v31 = vld [vmem:[#allocation5 + $0x620] sm:$0xf]  ;;  %v7563_v62 = vpack.c.bf16 %v1817_v54, %v1817_v54  ;;  %v4928_v54 = vld [vmem:[#allocation5 + $0x58] sm:$0xf0] }
 0x2f3   : > { %3459 = vmatpush.bf16.msrb.mxu2 %v5751_v20  ;;  %3472 = vmatpush.bf16.msrb.mxu3 %v5879_v58  ;;  %v6442_v20 = vld [vmem:[#allocation5 + $0x434] sm:$0xf0]  ;;  %v5550_v58 = vld [vmem:[#allocation5 + $0x528] sm:$0xf] }
 0x2f4   : > { %v5423_v29 = vor.u32 %v6442_v20, %v5422_v33  ;;  %v5551_v57 = vor.u32 %v6474_v28, %v5550_v58  ;;  %v6387_v33 = vld [vmem:[#allocation5 + $0x284] sm:$0xf]  ;;  %v5208_v20 = vld [vmem:[#allocation5 + $0x290] sm:$0xf0] }
 0x2f5   : > { %3641 = vmatpush.bf16.msra.mxu0 %v5503_v23  ;;  %3654 = vmatpush.bf16.msra.mxu1 %v5631_v61  ;;  %v5671_v23 = vor.u32 %v6505_v60, %v5670_v31  ;;  %v5799_v61 = vor.u32 %v6537_v25, %v5798_v43  ;;  %v6328_v31 = vld [vmem:[#allocation5 + $0xac] sm:$0xf]  ;;  %v4976_v60 = vld [vmem:[#allocation5 + $0xb8] sm:$0xf0]  ;;  %v5227_v43 = vor.u32 %v6391_v15, %v5224_v41 }
 0x2f6   : > { %v4979_v58 = vor.u32 %v6328_v31, %v4976_v60  ;;  %v6344_v15 = vld [vmem:[#allocation5 + $0x12c] sm:$0xf]  ;;  %v5040_v41 = vld [vmem:[#allocation5 + $0x138] sm:$0xf0]  ;;  %v6403_v31 = vld [vmem:[#allocation5 + $0x304] sm:$0xf] }
 0x2f7   : > { %3460 = vmatpush.bf16.msrb.mxu2 %v5735_v2  ;;  %3473 = vmatpush.bf16.msrb.mxu3 %v5863_v39  ;;  %v6438_v2 = vld [vmem:[#allocation5 + $0x414] sm:$0xf0]  ;;  %v5534_v39 = vld [vmem:[#allocation5 + $0x508] sm:$0xf]  ;;  %v5272_v60 = vld [vmem:[#allocation5 + $0x310] sm:$0xf0] }
 0x2f8   : > { %v5535_v16 = vor.u32 %v6470_v19, %v5534_v39  ;;  %v5091_v19 = vor.u32 %v6356_v35, %v5088_v40  ;;  %v5275_v35 = vor.u32 %v6403_v31, %v5272_v60  ;;  %v5520_v40 = vld [vmem:[#allocation5 + $0x4f8] sm:$0xf0]  ;;  %v6511_v31 = vld [vmem:[#allocation5 + $0x664] sm:$0xf]  ;;  %v5704_v60 = vld [vmem:[#allocation5 + $0x670] sm:$0xf0] }
 0x2f9   : > { %3642 = vmatpush.bf16.msra.mxu0 %v5487_v37  ;;  %3655 = vmatpush.bf16.msra.mxu1 %v5615_v56  ;;  %v5256_v37 = vld [vmem:[#allocation5 + $0x2f0] sm:$0xf0]  ;;  %v6431_v56 = vld [vmem:[#allocation5 + $0x3e4] sm:$0xf] }
 0x2fb   : > { %3461 = vmatpush.bf16.msrb.mxu2 %v5719_v30  ;;  %3474 = vmatpush.bf16.msrb.mxu3 %v5847_v52  ;;  %v5136_v30 = vld [vmem:[#allocation5 + $0x1f8] sm:$0xf0]  ;;  %v5407_v52 = vor.u32 %v6438_v2, %v5406_v44  ;;  %v6383_v44 = vld [vmem:[#allocation5 + $0x264] sm:$0xf]  ;;  %v5192_v2 = vld [vmem:[#allocation5 + $0x270] sm:$0xf0] }
 0x2fc   : > { %v5139_v45 = vor.u32 %v6368_v5, %v5136_v30  ;;  %v6379_v5 = vld [vmem:[#allocation5 + $0x244] sm:$0xf]  ;;  %v5176_v30 = vld [vmem:[#allocation5 + $0x250] sm:$0xf0] }
 0x2fd   : > { %3643 = vmatpush.bf16.msra.mxu0 %v5471_v10  ;;  %3656 = vmatpush.bf16.msra.mxu1 %v5599_v12  ;;  %v5259_v10 = vor.u32 %v6399_v38, %v5256_v37  ;;  %v5387_v12 = vor.u32 %v6431_v56, %v5384_v4  ;;  %v6415_v38 = vld [vmem:[#allocation5 + $0x364] sm:$0xf]  ;;  %v5320_v37 = vld [vmem:[#allocation5 + $0x370] sm:$0xf0]  ;;  %v6320_v56 = vld [vmem:[#allocation5 + $0x6c] sm:$0xf] }
 0x2fe   : > { %v4944_v4 = vld [vmem:[#allocation5 + $0x78] sm:$0xf0]  ;;  %v5323_v24 = vor.u32 %v6415_v38, %v5320_v37  ;;  %v6523_v38 = vld [vmem:[#allocation5 + $0x6c4] sm:$0xf]  ;;  %v5752_v37 = vld [vmem:[#allocation5 + $0x6d0] sm:$0xf0] }
 0x2ff   : > { %3462 = vmatpush.bf16.msrb.mxu2 %v5703_v49  ;;  %3475 = vmatpush.bf16.msrb.mxu3 %v5831_v0  ;;  %v5368_v49 = vld [vmem:[#allocation5 + $0x3d0] sm:$0xf0]  ;;  %v6332_v0 = vld [vmem:[#allocation5 + $0xcc] sm:$0xf] }
 0x300   : > { %v5371_v50 = vor.u32 %v6427_v27, %v5368_v49  ;;  %v4995_v63 = vor.u32 %v6332_v0, %v4992_v9  ;;  %v6375_v27 = vld [vmem:[#allocation5 + $0x224] sm:$0xf]  ;;  %v5160_v49 = vld [vmem:[#allocation5 + $0x230] sm:$0xf0]  ;;  %v5059_v9 = vor.u32 %v6348_v53, %v5056_v32 }
 0x301   : > { %3644 = vmatpush.bf16.msra.mxu0 %v5455_v11  ;;  %3657 = vmatpush.bf16.msra.mxu1 %v5583_v42  ;;  %v5120_v11 = vld [vmem:[#allocation5 + $0x1d8] sm:$0xf0]  ;;  %v7561_v42 = vpack.c.bf16 %v1816_v1, %v1816_v1  ;;  %v6411_v1 = vld [vmem:[#allocation5 + $0x344] sm:$0xf]  ;;  %v5864_v32 = vld [vmem:[#allocation5 + $0x7b0] sm:$0xf0] }
 0x302   : > { %v5123_v17 = vor.u32 %v6364_v46, %v5120_v11  ;;  %v6407_v46 = vld [vmem:[#allocation5 + $0x324] sm:$0xf]  ;;  %v5288_v11 = vld [vmem:[#allocation5 + $0x330] sm:$0xf0] }
 0x303   : > { %3463 = vmatpush.bf16.msrb.mxu2 %v5687_v3  ;;  %3476 = vmatpush.bf16.msrb.mxu3 %v5815_v7  ;;  %v6423_v3 = vld [vmem:[#allocation5 + $0x3a4] sm:$0xf]  ;;  %v5352_v7 = vld [vmem:[#allocation5 + $0x3b0] sm:$0xf0] }
 0x304   : > { %v5355_v25 = vor.u32 %v6423_v3, %v5352_v7  ;;  %v5291_v3 = vor.u32 %v6407_v46, %v5288_v11  ;;  %v5144_v7 = vld [vmem:[#allocation5 + $0x210] sm:$0xf0]  ;;  %v6551_v53 = vld [vmem:[#allocation5 + $0x7a4] sm:$0xf] }
 0x305   : > { %3645 = vmatpush.bf16.msra.mxu0 %v5439_v36  ;;  %3658 = vmatpush.bf16.msra.mxu1 %v5567_v47  ;;  %v6360_v36 = vld [vmem:[#allocation5 + $0x1ac] sm:$0xf]  ;;  %v5104_v47 = vld [vmem:[#allocation5 + $0x1b8] sm:$0xf0]  ;;  %v6515_v46 = vld [vmem:[#allocation5 + $0x684] sm:$0xf] }
 0x306   : > { %v5107_v28 = vor.u32 %v6360_v36, %v5104_v47  ;;  %v5043_v47 = vor.u32 %v6344_v15, %v5040_v41  ;;  %v5720_v11 = vld [vmem:[#allocation5 + $0x690] sm:$0xf0]  ;;  %v6547_v15 = vld [vmem:[#allocation5 + $0x784] sm:$0xf] }
 0x307   : > { %3464 = vmatpush.bf16.msrb.mxu2 %v5671_v23  ;;  %3477 = vmatpush.bf16.msrb.mxu3 %v5799_v61  ;;  %v5336_v23 = vld [vmem:[#allocation5 + $0x390] sm:$0xf0]  ;;  %v6324_v61 = vld [vmem:[#allocation5 + $0x8c] sm:$0xf] }
 0x308   : > { %v4963_v39 = vor.u32 %v6324_v61, %v4960_v21  ;;  %v6464_v61 = vld [vmem:[#allocation5 + $0x4ec] sm:$0xf]  ;;  %v5848_v41 = vld [vmem:[#allocation5 + $0x790] sm:$0xf0] }
 0x309   : > { %3646 = vmatpush.bf16.msra.mxu0 %v5423_v29  ;;  %3659 = vmatpush.bf16.msra.mxu1 %v5551_v57  ;;  %v5211_v29 = vor.u32 %v6387_v33, %v5208_v20  ;;  %v5339_v57 = vor.u32 %v6419_v18, %v5336_v23  ;;  %v6340_v33 = vld [vmem:[#allocation5 + $0x10c] sm:$0xf]  ;;  %v5024_v20 = vld [vmem:[#allocation5 + $0x118] sm:$0xf0]  ;;  %v6559_v18 = vld [vmem:[#allocation5 + $0x7e4] sm:$0xf] }
 0x30a   : > { %v5896_v23 = vld [vmem:[#allocation5 + $0x7f0] sm:$0xf0] }
 0x30b   : > { %3465 = vmatpush.bf16.msrb.mxu2 %v5655_v55  ;;  %3478 = vmatpush.bf16.msrb.mxu3 %v5783_v8  ;;  %v5072_v55 = vld [vmem:[#allocation5 + $0x178] sm:$0xf0]  ;;  %v5195_v8 = vor.u32 %v6383_v44, %v5192_v2  ;;  %v5027_v2 = vor.u32 %v6340_v33, %v5024_v20  ;;  %v6448_v33 = vld [vmem:[#allocation5 + $0x46c] sm:$0xf] }
 0x30c   : > { %v5456_v20 = vld [vmem:[#allocation5 + $0x478] sm:$0xf0] }
 0x30d   : > { %3647 = vmatpush.bf16.msra.mxu0 %v5407_v52  ;;  %3660 = vmatpush.bf16.msra.mxu1 %v5535_v16  ;;  %v4947_v52 = vor.u32 %v6320_v56, %v4944_v4  ;;  %v5075_v16 = vor.u32 %v6352_v22, %v5072_v55  ;;  %v5523_v56 = vor.u32 %v6464_v61, %v5520_v40  ;;  %v6555_v22 = vld [vmem:[#allocation5 + $0x7c4] sm:$0xf]  ;;  %v5880_v55 = vld [vmem:[#allocation5 + $0x7d0] sm:$0xf0] }
 0x30e   : > { %3466 = vmatmul.bf16.vlgmr.msrb.gmra.mxu2 %v7561_v42  ;;  %3479 = vmatmul.bf16.vlgmr.msrb.gmra.mxu3 %v7563_v62  ;;  %v6507_v61 = vld [vmem:[#allocation5 + $0x644] sm:$0xf] }
 0x30f   : > { %3510 = vmatpush.bf16.msra.mxu2 %v5259_v10  ;;  %3523 = vmatpush.bf16.msra.mxu3 %v5387_v12  ;;  %v5304_v10 = vld [vmem:[#allocation5 + $0x350] sm:$0xf0]  ;;  %v6316_v12 = vld [vmem:[#allocation5 + $0x4c] sm:$0xf] }
 0x310   : > { %3648 = vmatmul.bf16.vlgmr.msra.gmra.mxu0 %v7549_v14  ;;  %3661 = vmatmul.bf16.vlgmr.msra.gmra.mxu1 %v7551_v6  ;;  %v4931_v0 = vor.u32 %v6316_v12, %v4928_v54 }
 0x311   : > { %3692 = vmatpush.bf16.msrb.mxu0 %v5011_v26  ;;  %3705 = vmatpush.bf16.msrb.mxu1 %v5139_v45  ;;  %v5179_v26 = vor.u32 %v6379_v5, %v5176_v30  ;;  %v5307_v45 = vor.u32 %v6411_v1, %v5304_v10  ;;  %v6492_v5 = vld [vmem:[#allocation5 + $0x5cc] sm:$0xf]  ;;  %v5632_v30 = vld [vmem:[#allocation5 + $0x5d8] sm:$0xf0]  ;;  %v6519_v1 = vld [vmem:[#allocation5 + $0x6a4] sm:$0xf] }
 0x312   : > { %v5736_v10 = vld [vmem:[#allocation5 + $0x6b0] sm:$0xf0]  ;;  %v5635_v54 = vor.u32 %v6492_v5, %v5632_v30  ;;  %v6440_v5 = vld [vmem:[#allocation5 + $0x42c] sm:$0xf]  ;;  %v5424_v30 = vld [vmem:[#allocation5 + $0x438] sm:$0xf0] }
 0x313   : > { %3511 = vmatpush.bf16.msra.mxu2 %v5243_v51  ;;  %3524 = vmatpush.bf16.msra.mxu3 %v5371_v50  ;;  %v6312_v51 = vld [vmem:[#allocation5 + $0x2c] sm:$0xf]  ;;  %v4912_v50 = vld [vmem:[#allocation5 + $0x38] sm:$0xf0] }
 0x314   : > { %v4915_v36 = vor.u32 %v6312_v51, %v4912_v50 }
 0x315   : > { %3693 = vmatpush.bf16.msrb.mxu0 %v4995_v63  ;;  %3706 = vmatpush.bf16.msrb.mxu1 %v5123_v17  ;;  %v6371_v63 = vld [vmem:[#allocation5 + $0x204] sm:$0xf]  ;;  %v5163_v17 = vor.u32 %v6375_v27, %v5160_v49  ;;  %v6488_v27 = vld [vmem:[#allocation5 + $0x5ac] sm:$0xf]  ;;  %v5616_v49 = vld [vmem:[#allocation5 + $0x5b8] sm:$0xf0] }
 0x316   : > { %v5147_v21 = vor.u32 %v6371_v63, %v5144_v7  ;;  %v5619_v50 = vor.u32 %v6488_v27, %v5616_v49  ;;  %v6452_v63 = vld [vmem:[#allocation5 + $0x48c] sm:$0xf]  ;;  %v5600_v7 = vld [vmem:[#allocation5 + $0x598] sm:$0xf0] }
 0x317   : > { %3512 = vmatpush.bf16.msra.mxu2 %v5227_v43  ;;  %3525 = vmatpush.bf16.msra.mxu3 %v5355_v25  ;;  %v6308_v43 = vld [vmem:[#allocation5 + $0xc] sm:$0xf]  ;;  %v4896_v25 = vld [vmem:[#allocation5 + $0x18] sm:$0xf0] }
 0x318   : > { %v4899_v44 = vor.u32 %v6308_v43, %v4896_v25  ;;  %v6543_v43 = vld [vmem:[#allocation5 + $0x764] sm:$0xf]  ;;  %v5832_v25 = vld [vmem:[#allocation5 + $0x770] sm:$0xf0]  ;;  %v6436_v27 = vld [vmem:[#allocation5 + $0x40c] sm:$0xf] }
 0x319   : > { %3694 = vmatpush.bf16.msrb.mxu0 %v4979_v58  ;;  %3707 = vmatpush.bf16.msrb.mxu1 %v5107_v28  ;;  %v6527_v58 = vld [vmem:[#allocation5 + $0x6e4] sm:$0xf]  ;;  %v5768_v28 = vld [vmem:[#allocation5 + $0x6f0] sm:$0xf0]  ;;  %v5408_v49 = vld [vmem:[#allocation5 + $0x418] sm:$0xf0] }
 0x31b   : > { %3513 = vmatpush.bf16.msra.mxu2 %v5211_v29  ;;  %3526 = vmatpush.bf16.msra.mxu3 %v5339_v57  ;;  %v6496_v29 = vld [vmem:[#allocation5 + $0x5ec] sm:$0xf]  ;;  %v5648_v57 = vld [vmem:[#allocation5 + $0x5f8] sm:$0xf0] }
 0x31c   : > { %v5651_v4 = vor.u32 %v6496_v29, %v5648_v57  ;;  %v6539_v29 = vld [vmem:[#allocation5 + $0x744] sm:$0xf]  ;;  %v5816_v57 = vld [vmem:[#allocation5 + $0x750] sm:$0xf0] }
 0x31d   : > { %3695 = vmatpush.bf16.msrb.mxu0 %v4963_v39  ;;  %3708 = vmatpush.bf16.msrb.mxu1 %v5091_v19  ;;  %v5771_v39 = vor.u32 %v6527_v58, %v5768_v28  ;;  %v5899_v19 = vor.u32 %v6559_v18, %v5896_v23  ;;  %v6480_v58 = vld [vmem:[#allocation5 + $0x56c] sm:$0xf]  ;;  %v5584_v28 = vld [vmem:[#allocation5 + $0x578] sm:$0xf0]  ;;  %v5707_v18 = vor.u32 %v6511_v31, %v5704_v60  ;;  %v5374_v31 = vld [vmem:[#allocation5 + $0x3c8] sm:$0xf] }
 0x31e   : > { %v5835_v23 = vor.u32 %v6543_v43, %v5832_v25  ;;  %v5587_v40 = vor.u32 %v6480_v58, %v5584_v28  ;;  %v6430_v60 = vld [vmem:[#allocation5 + $0x3d4] sm:$0xf0]  ;;  %v5230_v43 = vld [vmem:[#allocation5 + $0x2a8] sm:$0xf] }
 0x31f   : > { %3514 = vmatpush.bf16.msra.mxu2 %v5195_v8  ;;  %3527 = vmatpush.bf16.msra.mxu3 %v5323_v24  ;;  %v6460_v8 = vld [vmem:[#allocation5 + $0x4cc] sm:$0xf]  ;;  %v5504_v24 = vld [vmem:[#allocation5 + $0x4d8] sm:$0xf0]  ;;  %v6426_v58 = vld [vmem:[#allocation5 + $0x3b4] sm:$0xf0] }
 0x320   : > { %v5507_v12 = vor.u32 %v6460_v8, %v5504_v24  ;;  %v6535_v8 = vld [vmem:[#allocation5 + $0x724] sm:$0xf]  ;;  %v5800_v24 = vld [vmem:[#allocation5 + $0x730] sm:$0xf0]  ;;  %v7576_v25 = vld [vmem:[%s7720_s7 + $0xa] sm:$0xf] }
 0x321   : > { %3696 = vmatpush.bf16.msrb.mxu0 %v4947_v52  ;;  %3709 = vmatpush.bf16.msrb.mxu1 %v5075_v16  ;;  %v5755_v52 = vor.u32 %v6523_v38, %v5752_v37  ;;  %v5883_v16 = vor.u32 %v6555_v22, %v5880_v55  ;;  %v5819_v37 = vor.u32 %v6539_v29, %v5816_v57  ;;  %v3373_v28 = vperm.slane %v7576_v25, 1  ;;  %v5966_v29 = vld [vmem:[#allocation7 + $0x70] sm:$0xf] }
 0x323   : > { %3515 = vmatpush.bf16.msra.mxu2 %v5179_v26  ;;  %3528 = vmatpush.bf16.msra.mxu3 %v5307_v45  ;;  %v6456_v26 = vld [vmem:[#allocation5 + $0x4ac] sm:$0xf]  ;;  %v5488_v45 = vld [vmem:[#allocation5 + $0x4b8] sm:$0xf0] }
 0x324   : > { %v5491_v51 = vor.u32 %v6456_v26, %v5488_v45  ;;  %v5784_v45 = vld [vmem:[#allocation5 + $0x710] sm:$0xf0] }
 0x325   : > { %3697 = vmatpush.bf16.msrb.mxu0 %v4931_v0  ;;  %3710 = vmatpush.bf16.msrb.mxu1 %v5059_v9  ;;  %v5739_v0 = vor.u32 %v6519_v1, %v5736_v10  ;;  %v5867_v9 = vor.u32 %v6551_v53, %v5864_v32  ;;  %v5803_v10 = vor.u32 %v6535_v8, %v5800_v24  ;;  %v6531_v53 = vld [vmem:[#allocation5 + $0x704] sm:$0xf]  ;;  %v5958_v24 = vld [vmem:[#allocation7 + $0x60] sm:$0xf] }
 0x326   : > { %v5427_v32 = vor.u32 %v6440_v5, %v5424_v30  ;;  %v6576_v5 = vld [vmem:[#allocation7 + $0x64] sm:$0xf0] }
 0x327   : > { %3516 = vmatpush.bf16.msra.mxu2 %v5163_v17  ;;  %3529 = vmatpush.bf16.msra.mxu3 %v5291_v3  ;;  %v5472_v17 = vld [vmem:[#allocation5 + $0x498] sm:$0xf0]  ;;  %v6484_v3 = vld [vmem:[#allocation5 + $0x58c] sm:$0xf]  ;;  %v5959_v30 = vor.u32 %v6576_v5, %v5958_v24 }
 0x329   : > { %3698 = vmatpush.bf16.msrb.mxu0 %v4915_v36  ;;  %3711 = vmatpush.bf16.msrb.mxu1 %v5043_v47  ;;  %v5475_v36 = vor.u32 %v6452_v63, %v5472_v17  ;;  %v5603_v47 = vor.u32 %v6484_v3, %v5600_v7  ;;  %v5411_v63 = vor.u32 %v6436_v27, %v5408_v49 }
 0x32b   : > { %3517 = vmatpush.bf16.msra.mxu2 %v5147_v21  ;;  %3530 = vmatpush.bf16.msra.mxu3 %v5275_v35  ;;  %v5688_v21 = vld [vmem:[#allocation5 + $0x650] sm:$0xf0]  ;;  %v5459_v35 = vor.u32 %v6448_v33, %v5456_v20  ;;  %v6394_v33 = vld [vmem:[#allocation5 + $0x2b4] sm:$0xf0]  ;;  %v5358_v20 = vld [vmem:[#allocation5 + $0x3a8] sm:$0xf] }
 0x32c   : > { %v5691_v38 = vor.u32 %v6507_v61, %v5688_v21  ;;  %v5214_v61 = vld [vmem:[#allocation5 + $0x288] sm:$0xf]  ;;  %v6390_v21 = vld [vmem:[#allocation5 + $0x294] sm:$0xf0] }
 0x32d   : > { %3699 = vmatpush.bf16.msrb.mxu0 %v4899_v44  ;;  %3712 = vmatpush.bf16.msrb.mxu1 %v5027_v2  ;;  %v6444_v44 = vld [vmem:[#allocation5 + $0x44c] sm:$0xf]  ;;  %v5440_v2 = vld [vmem:[#allocation5 + $0x458] sm:$0xf0] }
 0x32e   : > { %3518 = vmatmul.bf16.vlgmr.msra.gmra.mxu2 %v7543_v13  ;;  %3531 = vmatmul.bf16.vlgmr.msra.gmra.mxu3 %v7545_v34  ;;  %v5443_v22 = vor.u32 %v6444_v44, %v5440_v2  ;;  %v6578_v2 = vld [vmem:[#allocation7 + $0x74] sm:$0xf0] }
 0x32f   : > { %3562 = vmatpush.bf16.msrb.mxu2 %v5771_v39  ;;  %3575 = vmatpush.bf16.msrb.mxu3 %v5899_v19  ;;  %v6476_v39 = vld [vmem:[#allocation5 + $0x54c] sm:$0xf]  ;;  %v5568_v19 = vld [vmem:[#allocation5 + $0x558] sm:$0xf0] }
 0x330   : > { %3700 = vmatmul.bf16.vlgmr.msrb.gmra.mxu0 %v7531_v59  ;;  %3713 = vmatmul.bf16.vlgmr.msrb.gmra.mxu1 %v7533_v48  ;;  %v5723_v59 = vor.u32 %v6515_v46, %v5720_v11  ;;  %v5851_v48 = vor.u32 %v6547_v15, %v5848_v41  ;;  %v5571_v55 = vor.u32 %v6476_v39, %v5568_v19  ;;  %v5262_v46 = vld [vmem:[#allocation5 + $0x2e8] sm:$0xf]  ;;  %v6402_v11 = vld [vmem:[#allocation5 + $0x2f4] sm:$0xf0] }
 0x331   : > { %3744 = vmatpush.bf16.msra.mxu0 %v5523_v56  ;;  %3757 = vmatpush.bf16.msra.mxu1 %v5651_v4  ;;  %v6503_v56 = vld [vmem:[#allocation5 + $0x624] sm:$0xf]  ;;  %v5672_v4 = vld [vmem:[#allocation5 + $0x630] sm:$0xf0]  ;;  %v5787_v41 = vor.u32 %v6531_v53, %v5784_v45  ;;  %v5263_v3 = vor.u32 %v6402_v11, %v5262_v46  ;;  %v5967_v19 = vor.u32 %v6578_v2, %v5966_v29  ;;  %v6574_v45 = vld [vmem:[#allocation7 + $0x54] sm:$0xf0] }
 0x332   : > { %v5675_v1 = vor.u32 %v6503_v56, %v5672_v4  ;;  %v6386_v56 = vld [vmem:[#allocation5 + $0x274] sm:$0xf0]  ;;  %v5326_v4 = vld [vmem:[#allocation5 + $0x368] sm:$0xf] }
 0x333   : > { %3563 = vmatpush.bf16.msrb.mxu2 %v5755_v52  ;;  %3576 = vmatpush.bf16.msrb.mxu3 %v5883_v16  ;;  %v6472_v52 = vld [vmem:[#allocation5 + $0x52c] sm:$0xf]  ;;  %v5552_v16 = vld [vmem:[#allocation5 + $0x538] sm:$0xf0]  ;;  %v6378_v46 = vld [vmem:[#allocation5 + $0x234] sm:$0xf0] }
 0x334   : > { %v5555_v26 = vor.u32 %v6472_v52, %v5552_v16  ;;  %v5294_v11 = vld [vmem:[#allocation5 + $0x328] sm:$0xf]  ;;  %v6526_v2 = vld [vmem:[#allocation5 + $0x6d4] sm:$0xf0] }
 0x335   : > { %3745 = vmatpush.bf16.msra.mxu0 %v5507_v12  ;;  %3758 = vmatpush.bf16.msra.mxu1 %v5635_v54  ;;  %v6499_v12 = vld [vmem:[#allocation5 + $0x604] sm:$0xf]  ;;  %v5656_v54 = vld [vmem:[#allocation5 + $0x610] sm:$0xf0]  ;;  %v5758_v29 = vld [vmem:[#allocation5 + $0x6c8] sm:$0xf] }
 0x336   : > { %v5659_v15 = vor.u32 %v6499_v12, %v5656_v54  ;;  %v5310_v12 = vld [vmem:[#allocation5 + $0x348] sm:$0xf]  ;;  %v6414_v54 = vld [vmem:[#allocation5 + $0x354] sm:$0xf0] }
 0x337   : > { %3564 = vmatpush.bf16.msrb.mxu2 %v5739_v0  ;;  %3577 = vmatpush.bf16.msrb.mxu3 %v5867_v9  ;;  %v6468_v0 = vld [vmem:[#allocation5 + $0x50c] sm:$0xf]  ;;  %v5536_v9 = vld [vmem:[#allocation5 + $0x518] sm:$0xf0] }
 0x338   : > { %v5539_v17 = vor.u32 %v6468_v0, %v5536_v9  ;;  %v5311_v0 = vor.u32 %v6414_v54, %v5310_v12  ;;  %v5166_v9 = vld [vmem:[#allocation5 + $0x228] sm:$0xf] }
 0x339   : > { %3746 = vmatpush.bf16.msra.mxu0 %v5491_v51  ;;  %3759 = vmatpush.bf16.msra.mxu1 %v5619_v50  ;;  %v5390_v51 = vld [vmem:[#allocation5 + $0x3e8] sm:$0xf]  ;;  %v6434_v50 = vld [vmem:[#allocation5 + $0x3f4] sm:$0xf0] }
 0x33a   : > { %v5391_v7 = vor.u32 %v6434_v50, %v5390_v51  ;;  %v6410_v51 = vld [vmem:[#allocation5 + $0x334] sm:$0xf0]  ;;  %v5942_v50 = vld [vmem:[#allocation7 + $0x40] sm:$0xf] }
 0x33b   : > { %3565 = vmatpush.bf16.msrb.mxu2 %v5723_v59  ;;  %3578 = vmatpush.bf16.msrb.mxu3 %v5851_v48  ;;  %v5246_v59 = vld [vmem:[#allocation5 + $0x2c8] sm:$0xf]  ;;  %v6398_v48 = vld [vmem:[#allocation5 + $0x2d4] sm:$0xf0] }
 0x33d   : > { %3747 = vmatpush.bf16.msra.mxu0 %v5475_v36  ;;  %3760 = vmatpush.bf16.msra.mxu1 %v5603_v47  ;;  %v5247_v36 = vor.u32 %v6398_v48, %v5246_v59  ;;  %v5375_v47 = vor.u32 %v6430_v60, %v5374_v31  ;;  %v5295_v59 = vor.u32 %v6410_v51, %v5294_v11  ;;  %v6374_v48 = vld [vmem:[#allocation5 + $0x214] sm:$0xf0]  ;;  %v5278_v31 = vld [vmem:[#allocation5 + $0x308] sm:$0xf] }
 0x33e   : > { %v6406_v60 = vld [vmem:[#allocation5 + $0x314] sm:$0xf0]  ;;  %v6564_v11 = vld [vmem:[#allocation7 + $0x4] sm:$0xf0] }
 0x33f   : > { %3566 = vmatpush.bf16.msrb.mxu2 %v5707_v18  ;;  %3579 = vmatpush.bf16.msrb.mxu3 %v5835_v23  ;;  %v5231_v18 = vor.u32 %v6394_v33, %v5230_v43  ;;  %v5359_v23 = vor.u32 %v6426_v58, %v5358_v20  ;;  %v5934_v43 = vld [vmem:[#allocation7 + $0x30] sm:$0xf]  ;;  %v5902_v58 = vld [vmem:[#allocation5 + $0x7e8] sm:$0xf] }
 0x341   : > { %3748 = vmatpush.bf16.msra.mxu0 %v5459_v35  ;;  %3761 = vmatpush.bf16.msra.mxu1 %v5587_v40  ;;  %v5342_v35 = vld [vmem:[#allocation5 + $0x388] sm:$0xf]  ;;  %v6422_v40 = vld [vmem:[#allocation5 + $0x394] sm:$0xf0] }
 0x343   : > { %3567 = vmatpush.bf16.msrb.mxu2 %v5691_v38  ;;  %3580 = vmatpush.bf16.msrb.mxu3 %v5819_v37  ;;  %v5198_v38 = vld [vmem:[#allocation5 + $0x268] sm:$0xf] }
 0x344   : > { %v5199_v52 = vor.u32 %v6386_v56, %v5198_v38  ;;  %v5759_v38 = vor.u32 %v6526_v2, %v5758_v29 }
 0x345   : > { %3749 = vmatpush.bf16.msra.mxu0 %v5443_v22  ;;  %3762 = vmatpush.bf16.msra.mxu1 %v5571_v55  ;;  %v6418_v22 = vld [vmem:[#allocation5 + $0x374] sm:$0xf0] }
 0x346   : > { %v5327_v16 = vor.u32 %v6418_v22, %v5326_v4  ;;  %v5742_v4 = vld [vmem:[#allocation5 + $0x6a8] sm:$0xf]  ;;  %v6522_v22 = vld [vmem:[#allocation5 + $0x6b4] sm:$0xf0] }
 0x347   : > { %3568 = vmatpush.bf16.msrb.mxu2 %v5675_v1  ;;  %3581 = vmatpush.bf16.msrb.mxu3 %v5803_v10  ;;  %v5182_v1 = vld [vmem:[#allocation5 + $0x248] sm:$0xf]  ;;  %v6382_v10 = vld [vmem:[#allocation5 + $0x254] sm:$0xf0]  ;;  %v5743_v54 = vor.u32 %v6522_v22, %v5742_v4 }
 0x348   : > { %v5183_v49 = vor.u32 %v6382_v10, %v5182_v1  ;;  %v5918_v1 = vld [vmem:[#allocation7 + $0x10] sm:$0xf]  ;;  %v6566_v10 = vld [vmem:[#allocation7 + $0x14] sm:$0xf0]  ;;  %v5806_v4 = vld [vmem:[#allocation5 + $0x728] sm:$0xf] }
 0x349   : > { %3750 = vmatpush.bf16.msra.mxu0 %v5427_v32  ;;  %3763 = vmatpush.bf16.msra.mxu1 %v5555_v26  ;;  %v5950_v26 = vld [vmem:[#allocation7 + $0x50] sm:$0xf]  ;;  %v5919_v12 = vor.u32 %v6566_v10, %v5918_v1  ;;  %v6538_v22 = vld [vmem:[#allocation5 + $0x734] sm:$0xf0]  ;;  %v5790_v10 = vld [vmem:[#allocation5 + $0x708] sm:$0xf] }
 0x34a   : > { %v5951_v27 = vor.u32 %v6574_v45, %v5950_v26  ;;  %v6518_v26 = vld [vmem:[#allocation5 + $0x694] sm:$0xf0] }
 0x34b   : > { %3569 = vmatpush.bf16.msrb.mxu2 %v5659_v15  ;;  %3582 = vmatpush.bf16.msrb.mxu3 %v5787_v41  ;;  %v6502_v1 = vld [vmem:[#allocation5 + $0x614] sm:$0xf0] }
 0x34d   : > { %3751 = vmatpush.bf16.msra.mxu0 %v5411_v63  ;;  %3764 = vmatpush.bf16.msra.mxu1 %v5539_v17  ;;  %v3493_v57 = vpop.f32.mrf.mxu0  ;;  %v3506_v44 = vpop.f32.mrf.mxu1  ;;  %v6572_v63 = vld [vmem:[#allocation7 + $0x44] sm:$0xf0] }
 0x34e   : > { %3570 = vmatmul.bf16.vlgmr.msrb.gmra.mxu2 %v7561_v42  ;;  %3583 = vmatmul.bf16.vlgmr.msrb.gmra.mxu3 %v7563_v62  ;;  %v3494_v39 = vadd.f32 %v3493_v57, %v3373_v28  ;;  %v5150_v17 = vld [vmem:[#allocation5 + $0x208] sm:$0xf]  ;;  %v6562_v28 = vld [vmem:[#allocation5 + $0x7f4] sm:$0xf0] }
 0x34f   : > { %3614 = vmatpush.bf16.msra.mxu2 %v5263_v3  ;;  %3627 = vmatpush.bf16.msra.mxu3 %v5391_v7  ;;  %v5943_v3 = vor.u32 %v6572_v63, %v5942_v50  ;;  %v5167_v7 = vor.u32 %v6378_v46, %v5166_v9  ;;  %v5910_v9 = vld [vmem:[#allocation7] sm:$0xf]  ;;  %v3374_v46 = vperm.slane %v7576_v25, 2  ;;  %v6577_v50 = vld [vmem:[#allocation7 + $0x74] sm:$0xf] }
 0x350   : > { %3752 = vmatmul.bf16.vlgmr.msra.gmra.mxu0 %v7549_v14  ;;  %3765 = vmatmul.bf16.vlgmr.msra.gmra.mxu1 %v7551_v6  ;;  %v5215_v14 = vor.u32 %v6390_v21, %v5214_v61  ;;  %v5343_v6 = vor.u32 %v6422_v40, %v5342_v35  ;;  %v7583_v37 = vadd.f32 %v3506_v44, %v3494_v39  ;;  %v5886_v39 = vld [vmem:[#allocation5 + $0x7c8] sm:$0xf] }
 0x351   : > { %4194 = vmatpush.bf16.msrb.mxu0 %v5967_v19  ;;  %v7585_v55 = vpop.f32.mrf.mxu2  ;;  %v7587_v8 = vpop.f32.mrf.mxu3  ;;  %v5151_v61 = vor.u32 %v6374_v48, %v5150_v17  ;;  %v5279_v21 = vor.u32 %v6406_v60, %v5278_v31  ;;  %v5903_v40 = vor.u32 %v6562_v28, %v5902_v58  ;;  %v6558_v19 = vld [vmem:[#allocation5 + $0x7d4] sm:$0xf0]  ;;  %v5911_v51 = vor.u32 %v6564_v11, %v5910_v9  ;;  %v5710_v17 = vld [vmem:[#allocation5 + $0x668] sm:$0xf]  ;;  %v5392_v9 = vld [vmem:[#allocation5 + $0x3f8] sm:$0xf0] }
 0x352   : > { %v5887_v56 = vor.u32 %v6558_v19, %v5886_v39  ;;  %v5838_v48 = vld [vmem:[#allocation5 + $0x768] sm:$0xf]  ;;  %v6546_v31 = vld [vmem:[#allocation5 + $0x774] sm:$0xf0]  ;;  %v3372_v11 = vperm.slane %v7576_v25, 0 }
 0x353   : > { %3615 = vmatpush.bf16.msra.mxu2 %v5247_v36  ;;  %3628 = vmatpush.bf16.msra.mxu3 %v5375_v47  ;;  %v5774_v36 = vld [vmem:[#allocation5 + $0x6e8] sm:$0xf]  ;;  %v6530_v47 = vld [vmem:[#allocation5 + $0x6f4] sm:$0xf0] }
 0x354   : > { %v5775_v35 = vor.u32 %v6530_v47, %v5774_v36  ;;  %v6575_v47 = vld [vmem:[#allocation7 + $0x64] sm:$0xf] }
 0x355   : > { %4195 = vmatpush.bf16.msrb.mxu0 %v5959_v30  ;;  %v3495_v53 = vpop.f32.mrf.mxu0  ;;  %v3508_v32 = vpop.f32.mrf.mxu1 }
 0x356   : > { %v5726_v32 = vld [vmem:[#allocation5 + $0x688] sm:$0xf] }
 0x357   : > { %3616 = vmatpush.bf16.msra.mxu2 %v5231_v18  ;;  %3629 = vmatpush.bf16.msra.mxu3 %v5359_v23  ;;  %v6570_v18 = vld [vmem:[#allocation7 + $0x34] sm:$0xf0] }
 0x358   : > { %v5935_v23 = vor.u32 %v6570_v18, %v5934_v43  ;;  %v5960_v43 = vld [vmem:[#allocation7 + $0x68] sm:$0xf0]  ;;  %v5839_v18 = vor.u32 %v6546_v31, %v5838_v48  ;;  %v5376_v48 = vld [vmem:[#allocation5 + $0x3d8] sm:$0xf0] }
 0x359   : > { %4196 = vmatpush.bf16.msrb.mxu0 %v5951_v27  ;;  %v3391_v15 = vpop.f32.mrf.mxu2  ;;  %v3404_v41 = vpop.f32.mrf.mxu3 }
 0x35a   : > { %v5968_v15 = vld [vmem:[#allocation7 + $0x78] sm:$0xf0]  ;;  %v5727_v41 = vor.u32 %v6518_v26, %v5726_v32  ;;  %v6571_v32 = vld [vmem:[#allocation7 + $0x44] sm:$0xf]  ;;  %v5944_v26 = vld [vmem:[#allocation7 + $0x48] sm:$0xf0] }
 0x35b   : > { %3617 = vmatpush.bf16.msra.mxu2 %v5215_v14  ;;  %3630 = vmatpush.bf16.msra.mxu3 %v5343_v6  ;;  %v5926_v14 = vld [vmem:[#allocation7 + $0x20] sm:$0xf]  ;;  %v6568_v6 = vld [vmem:[#allocation7 + $0x24] sm:$0xf0]  ;;  %v5971_v60 = vor.u32 %v6577_v50, %v5968_v15  ;;  %v5936_v50 = vld [vmem:[#allocation7 + $0x38] sm:$0xf0] }
 0x35c   : > { %v5927_v24 = vor.u32 %v6568_v6, %v5926_v14  ;;  %v5678_v14 = vld [vmem:[#allocation5 + $0x628] sm:$0xf] }
 0x35d   : > { %4197 = vmatpush.bf16.msrb.mxu0 %v5943_v3  ;;  %v7589_v33 = vpop.f32.mrf.mxu0  ;;  %v7591_v20 = vpop.f32.mrf.mxu1 }
 0x35f   : > { %3618 = vmatpush.bf16.msra.mxu2 %v5199_v52  ;;  %3631 = vmatpush.bf16.msra.mxu3 %v5327_v16  ;;  %v5870_v52 = vld [vmem:[#allocation5 + $0x7a8] sm:$0xf]  ;;  %v6554_v16 = vld [vmem:[#allocation5 + $0x7b4] sm:$0xf0] }
 0x360   : > { %v5871_v53 = vor.u32 %v6554_v16, %v5870_v52  ;;  %v5807_v16 = vor.u32 %v6538_v22, %v5806_v4  ;;  %v6420_v4 = vld [vmem:[#allocation5 + $0x38c] sm:$0xf]  ;;  %v5344_v22 = vld [vmem:[#allocation5 + $0x398] sm:$0xf0] }
 0x361   : > { %4198 = vmatpush.bf16.msrb.mxu0 %v5935_v23  ;;  %v7593_v57 = vpop.f32.mrf.mxu2  ;;  %v7595_v44 = vpop.f32.mrf.mxu3  ;;  %v5694_v23 = vld [vmem:[#allocation5 + $0x648] sm:$0xf] }
 0x363   : > { %3619 = vmatpush.bf16.msra.mxu2 %v5183_v49  ;;  %3632 = vmatpush.bf16.msra.mxu3 %v5311_v0  ;;  %v5854_v49 = vld [vmem:[#allocation5 + $0x788] sm:$0xf]  ;;  %v6550_v0 = vld [vmem:[#allocation5 + $0x794] sm:$0xf0] }
 0x364   : > { %v5855_v63 = vor.u32 %v6550_v0, %v5854_v49  ;;  %v5264_v49 = vld [vmem:[#allocation5 + $0x2f8] sm:$0xf0]  ;;  %v6432_v0 = vld [vmem:[#allocation5 + $0x3ec] sm:$0xf] }
 0x365   : > { %v3547_v5 = vpop.f32.mrf.mxu0  ;;  %v3560_v30 = vpop.f32.mrf.mxu1  ;;  %4199 = vmatpush.bf16.msrb.mxu0 %v5927_v24  ;;  %v5662_v24 = vld [vmem:[#allocation5 + $0x608] sm:$0xf] }
 0x366   : > { %v6573_v5 = vld [vmem:[#allocation7 + $0x54] sm:$0xf]  ;;  %v5952_v30 = vld [vmem:[#allocation7 + $0x58] sm:$0xf0]  ;;  %v5663_v15 = vor.u32 %v6502_v1, %v5662_v24  ;;  %v6384_v1 = vld [vmem:[#allocation5 + $0x26c] sm:$0xf] }
 0x367   : > { %3620 = vmatpush.bf16.msra.mxu2 %v5167_v7  ;;  %3633 = vmatpush.bf16.msra.mxu3 %v5295_v59  ;;  %v6514_v59 = vld [vmem:[#allocation5 + $0x674] sm:$0xf0] }
 0x368   : > { %v5711_v28 = vor.u32 %v6514_v59, %v5710_v17  ;;  %v5395_v17 = vor.u32 %v6432_v0, %v5392_v9  ;;  %v6428_v59 = vld [vmem:[#allocation5 + $0x3cc] sm:$0xf]  ;;  %v5184_v9 = vld [vmem:[#allocation5 + $0x258] sm:$0xf0] }
 0x369   : > { %v3417_v45 = vpop.f32.mrf.mxu2  ;;  %v3430_v27 = vpop.f32.mrf.mxu3  ;;  %4200 = vmatpush.bf16.msrb.mxu0 %v5919_v12  ;;  %v6534_v12 = vld [vmem:[#allocation5 + $0x714] sm:$0xf0]  ;;  %v6380_v0 = vld [vmem:[#allocation5 + $0x24c] sm:$0xf] }
 0x36b   : > { %3621 = vmatpush.bf16.msra.mxu2 %v5151_v61  ;;  %3634 = vmatpush.bf16.msra.mxu3 %v5279_v21  ;;  %v6510_v61 = vld [vmem:[#allocation5 + $0x654] sm:$0xf0]  ;;  %v5822_v21 = vld [vmem:[#allocation5 + $0x748] sm:$0xf] }
 0x36c   : > { %v5695_v39 = vor.u32 %v6510_v61, %v5694_v23  ;;  %v5232_v23 = vld [vmem:[#allocation5 + $0x2b8] sm:$0xf0]  ;;  %v6424_v61 = vld [vmem:[#allocation5 + $0x3ac] sm:$0xf] }
 0x36d   : > { %v3597_v3 = vpop.f32.mrf.mxu0  ;;  %v3610_v7 = vpop.f32.mrf.mxu1  ;;  %4201 = vmatpush.bf16.msrb.mxu0 %v5911_v51  ;;  %v6569_v51 = vld [vmem:[#allocation7 + $0x34] sm:$0xf] }
 0x36e   : > { %3622 = vmatmul.bf16.vlgmr.msra.gmra.mxu2 %v7543_v13  ;;  %3635 = vmatmul.bf16.vlgmr.msra.gmra.mxu3 %v7545_v34  ;;  %v3598_v36 = vadd.f32 %v3597_v3, %v3374_v46  ;;  %v5947_v46 = vor.u32 %v6571_v32, %v5944_v26  ;;  %v6396_v3 = vld [vmem:[#allocation5 + $0x2cc] sm:$0xf]  ;;  %v5939_v31 = vor.u32 %v6569_v51, %v5936_v50  ;;  %v5312_v51 = vld [vmem:[#allocation5 + $0x358] sm:$0xf0]  ;;  %v6022_v50 = vld [vmem:[#allocation7 + $0xe0] sm:$0xf] }
 0x36f   : > { %3666 = vmatpush.bf16.msrb.mxu2 %v5775_v35  ;;  %3679 = vmatpush.bf16.msrb.mxu3 %v5903_v40  ;;  %v6542_v35 = vld [vmem:[#allocation5 + $0x754] sm:$0xf0]  ;;  %v5963_v40 = vor.u32 %v6575_v47, %v5960_v43  ;;  %v5928_v47 = vld [vmem:[#allocation7 + $0x28] sm:$0xf0] }
 0x370   : > { %v7600_v58 = vadd.f32 %v3610_v7, %v3598_v36  ;;  %v5823_v19 = vor.u32 %v6542_v35, %v5822_v21  ;;  %v5248_v7 = vld [vmem:[#allocation5 + $0x2d8] sm:$0xf0]  ;;  %v6567_v36 = vld [vmem:[#allocation7 + $0x24] sm:$0xf] }
 0x371   : > { %4246 = vmatpush.bf16.msra.mxu0 %v5971_v60  ;;  %v7602_v29 = vpop.f32.mrf.mxu2  ;;  %v7604_v2 = vpop.f32.mrf.mxu3  ;;  %v3390_v60 = vadd.f32 %v7585_v55, %v3372_v11  ;;  %v5251_v43 = vor.u32 %v6396_v3, %v5248_v7  ;;  %v5360_v21 = vld [vmem:[#allocation5 + $0x3b8] sm:$0xf0]  ;;  %v5931_v35 = vor.u32 %v6567_v36, %v5928_v47  ;;  %v6565_v55 = vld [vmem:[#allocation7 + $0x14] sm:$0xf]  ;;  %v5187_v7 = vor.u32 %v6380_v0, %v5184_v9  ;;  %v6584_v0 = vld [vmem:[#allocation7 + $0xa4] sm:$0xf0] }
 0x372   : > { %v5296_v36 = vld [vmem:[#allocation5 + $0x338] sm:$0xf0] }
 0x373   : > { %3667 = vmatpush.bf16.msrb.mxu2 %v5759_v38  ;;  %3680 = vmatpush.bf16.msrb.mxu3 %v5887_v56  ;;  %v6506_v56 = vld [vmem:[#allocation5 + $0x634] sm:$0xf0] }
 0x374   : > { %v5679_v52 = vor.u32 %v6506_v56, %v5678_v14  ;;  %v5216_v56 = vld [vmem:[#allocation5 + $0x298] sm:$0xf0] }
 0x375   : > { %v3599_v6 = vpop.f32.mrf.mxu0  ;;  %v3612_v38 = vpop.f32.mrf.mxu1  ;;  %4247 = vmatpush.bf16.msra.mxu0 %v5963_v40  ;;  %v3403_v40 = vadd.f32 %v7587_v8, %v3390_v60  ;;  %v5912_v8 = vld [vmem:[#allocation7 + $0x8] sm:$0xf0] }
 0x376   : > { %v5363_v6 = vor.u32 %v6424_v61, %v5360_v21  ;;  %v6388_v38 = vld [vmem:[#allocation5 + $0x28c] sm:$0xf]  ;;  %v5152_v61 = vld [vmem:[#allocation5 + $0x218] sm:$0xf0] }
 0x377   : > { %3668 = vmatpush.bf16.msrb.mxu2 %v5743_v54  ;;  %3681 = vmatpush.bf16.msrb.mxu3 %v5871_v53  ;;  %v5955_v54 = vor.u32 %v6573_v5, %v5952_v30  ;;  %v6400_v53 = vld [vmem:[#allocation5 + $0x2ec] sm:$0xf]  ;;  %v6563_v5 = vld [vmem:[#allocation7 + $0x4] sm:$0xf] }
 0x378   : > { %v6408_v60 = vld [vmem:[#allocation5 + $0x32c] sm:$0xf] }
 0x379   : > { %v3443_v45 = vpop.f32.mrf.mxu2  ;;  %v3456_v27 = vpop.f32.mrf.mxu3  ;;  %4248 = vmatpush.bf16.msra.mxu0 %v5955_v54  ;;  %v5915_v54 = vor.u32 %v6563_v5, %v5912_v8 }
 0x37a   : > { %v6030_v45 = vld [vmem:[#allocation7 + $0xf0] sm:$0xf]  ;;  %v6594_v27 = vld [vmem:[#allocation7 + $0xf4] sm:$0xf0] }
 0x37b   : > { %3669 = vmatpush.bf16.msrb.mxu2 %v5727_v41  ;;  %3682 = vmatpush.bf16.msrb.mxu3 %v5855_v63  ;;  %v5791_v41 = vor.u32 %v6534_v12, %v5790_v10  ;;  %v5267_v63 = vor.u32 %v6400_v53, %v5264_v49  ;;  %v6416_v10 = vld [vmem:[#allocation5 + $0x36c] sm:$0xf]  ;;  %v5328_v12 = vld [vmem:[#allocation5 + $0x378] sm:$0xf0]  ;;  %v6031_v11 = vor.u32 %v6594_v27, %v6030_v45 }
 0x37c   : > { %v5331_v49 = vor.u32 %v6416_v10, %v5328_v12  ;;  %v6556_v45 = vld [vmem:[#allocation5 + $0x7cc] sm:$0xf]  ;;  %v5888_v27 = vld [vmem:[#allocation5 + $0x7d8] sm:$0xf0] }
 0x37d   : > { %4249 = vmatpush.bf16.msra.mxu0 %v5947_v46  ;;  %v6412_v46 = vld [vmem:[#allocation5 + $0x34c] sm:$0xf]  ;;  %4207 = vmatpush.bf16.msrb.mxu1 %v6031_v11 }
 0x37e   : > { %v6520_v11 = vld [vmem:[#allocation5 + $0x6ac] sm:$0xf] }
 0x37f   : > { %3670 = vmatpush.bf16.msrb.mxu2 %v5711_v28  ;;  %3683 = vmatpush.bf16.msrb.mxu3 %v5839_v18  ;;  %v5379_v28 = vor.u32 %v6428_v59, %v5376_v48  ;;  %v6392_v18 = vld [vmem:[#allocation5 + $0x2ac] sm:$0xf]  ;;  %v5315_v59 = vor.u32 %v6412_v46, %v5312_v51  ;;  %v5891_v46 = vor.u32 %v6556_v45, %v5888_v27  ;;  %v5744_v51 = vld [vmem:[#allocation5 + $0x6b8] sm:$0xf0]  ;;  %v6589_v27 = vld [vmem:[#allocation7 + $0xd4] sm:$0xf] }
 0x380   : > { %v5235_v14 = vor.u32 %v6392_v18, %v5232_v23  ;;  %v6376_v48 = vld [vmem:[#allocation5 + $0x22c] sm:$0xf]  ;;  %v6014_v18 = vld [vmem:[#allocation7 + $0xd0] sm:$0xf]  ;;  %v6590_v23 = vld [vmem:[#allocation7 + $0xd4] sm:$0xf0] }
 0x381   : > { %4250 = vmatpush.bf16.msra.mxu0 %v5939_v31  ;;  %v5168_v31 = vld [vmem:[#allocation5 + $0x238] sm:$0xf0]  ;;  %v6015_v21 = vor.u32 %v6590_v23, %v6014_v18  ;;  %v6593_v18 = vld [vmem:[#allocation7 + $0xf4] sm:$0xf] }
 0x382   : > { %v6032_v23 = vld [vmem:[#allocation7 + $0xf8] sm:$0xf0] }
 0x383   : > { %3671 = vmatpush.bf16.msrb.mxu2 %v5695_v39  ;;  %3684 = vmatpush.bf16.msrb.mxu3 %v5823_v19  ;;  %v5920_v39 = vld [vmem:[#allocation7 + $0x18] sm:$0xf0]  ;;  %v3416_v19 = vadd.f32 %v7593_v57, %v3403_v40  ;;  %v5171_v40 = vor.u32 %v6376_v48, %v5168_v31  ;;  %v6548_v48 = vld [vmem:[#allocation5 + $0x78c] sm:$0xf] }
 0x384   : > { %v5923_v24 = vor.u32 %v6565_v55, %v5920_v39  ;;  %v5200_v57 = vld [vmem:[#allocation5 + $0x278] sm:$0xf0]  ;;  %v5299_v55 = vor.u32 %v6408_v60, %v5296_v36  ;;  %v6006_v39 = vld [vmem:[#allocation7 + $0xc0] sm:$0xf] }
 0x385   : > { %4251 = vmatpush.bf16.msra.mxu0 %v5931_v35  ;;  %v3429_v30 = vadd.f32 %v7595_v44, %v3416_v19  ;;  %v5203_v44 = vor.u32 %v6384_v1, %v5200_v57  ;;  %v6588_v19 = vld [vmem:[#allocation7 + $0xc4] sm:$0xf0]  ;;  %v5856_v31 = vld [vmem:[#allocation5 + $0x798] sm:$0xf0]  ;;  %v5974_v36 = vld [vmem:[#allocation7 + $0x80] sm:$0xf] }
 0x386   : > { %v6007_v5 = vor.u32 %v6588_v19, %v6006_v39  ;;  %v6591_v19 = vld [vmem:[#allocation7 + $0xe4] sm:$0xf] }
 0x387   : > { %3672 = vmatpush.bf16.msrb.mxu2 %v5679_v52  ;;  %3685 = vmatpush.bf16.msrb.mxu3 %v5807_v16  ;;  %v5219_v52 = vor.u32 %v6388_v38, %v5216_v56  ;;  %v5347_v16 = vor.u32 %v6420_v4, %v5344_v22  ;;  %v3442_v53 = vadd.f32 %v7602_v29, %v3429_v30  ;;  %v6528_v38 = vld [vmem:[#allocation5 + $0x6ec] sm:$0xf]  ;;  %v5776_v4 = vld [vmem:[#allocation5 + $0x6f8] sm:$0xf0] }
 0x388   : > { %v6560_v22 = vld [vmem:[#allocation5 + $0x7ec] sm:$0xf]  ;;  %v5779_v10 = vor.u32 %v6528_v38, %v5776_v4 }
 0x389   : > { %4252 = vmatpush.bf16.msra.mxu0 %v5923_v24  ;;  %v3455_v29 = vadd.f32 %v7604_v2, %v3442_v53  ;;  %v6372_v2 = vld [vmem:[#allocation5 + $0x20c] sm:$0xf]  ;;  %v5904_v24 = vld [vmem:[#allocation5 + $0x7f8] sm:$0xf0] }
 0x38a   : > { %v5155_v1 = vor.u32 %v6372_v2, %v5152_v61  ;;  %v5907_v12 = vor.u32 %v6560_v22, %v5904_v24  ;;  %v5760_v53 = vld [vmem:[#allocation5 + $0x6d8] sm:$0xf0]  ;;  %v6544_v61 = vld [vmem:[#allocation5 + $0x76c] sm:$0xf] }
 0x38b   : > { %3673 = vmatpush.bf16.msrb.mxu2 %v5663_v15  ;;  %3686 = vmatpush.bf16.msrb.mxu3 %v5791_v41  ;;  %v6592_v15 = vld [vmem:[#allocation7 + $0xe4] sm:$0xf0]  ;;  %v5712_v2 = vld [vmem:[#allocation5 + $0x678] sm:$0xf0]  ;;  %v6508_v4 = vld [vmem:[#allocation5 + $0x64c] sm:$0xf] }
 0x38c   : > { %v6023_v41 = vor.u32 %v6592_v15, %v6022_v50  ;;  %v6552_v50 = vld [vmem:[#allocation5 + $0x7ac] sm:$0xf]  ;;  %v5872_v15 = vld [vmem:[#allocation5 + $0x7b8] sm:$0xf0] }
 0x38d   : > { %v7614_v32 = vpop.f32.mrf.mxu0  ;;  %v7616_v26 = vpop.f32.mrf.mxu1  ;;  %4253 = vmatpush.bf16.msra.mxu0 %v5915_v54  ;;  %v6524_v54 = vld [vmem:[#allocation5 + $0x6cc] sm:$0xf]  ;;  %v5696_v22 = vld [vmem:[#allocation5 + $0x658] sm:$0xf0] }
 0x38e   : > { %3674 = vmatmul.bf16.vlgmr.msrb.gmra.mxu2 %v7561_v42  ;;  %3687 = vmatmul.bf16.vlgmr.msrb.gmra.mxu3 %v7563_v62  ;;  %v5763_v9 = vor.u32 %v6524_v54, %v5760_v53  ;;  %v6540_v24 = vld [vmem:[#allocation5 + $0x74c] sm:$0xf]  ;;  %v5808_v53 = vld [vmem:[#allocation5 + $0x738] sm:$0xf0] }
 0x38f   : > { %3718 = vmatpush.bf16.msra.mxu2 %v5267_v63  ;;  %3731 = vmatpush.bf16.msra.mxu3 %v5395_v17  ;;  %v6536_v54 = vld [vmem:[#allocation5 + $0x72c] sm:$0xf] }
 0x390   : > { %4208 = vmatpush.bf16.msrb.mxu1 %v6023_v41  ;;  %v5982_v41 = vld [vmem:[#allocation7 + $0x90] sm:$0xf] }
 0x391   : > { %v3467_v63 = vpop.f32.mrf.mxu2  ;;  %v3480_v17 = vpop.f32.mrf.mxu3 }
 0x392   : > { %v3468_v3 = vadd.f32 %v3467_v63, %v3455_v29  ;;  %v6582_v63 = vld [vmem:[#allocation7 + $0x94] sm:$0xf0] }
 0x393   : > { %3719 = vmatpush.bf16.msra.mxu2 %v5251_v43  ;;  %3732 = vmatpush.bf16.msra.mxu3 %v5379_v28  ;;  %v5983_v60 = vor.u32 %v6582_v63, %v5982_v41  ;;  %v6585_v63 = vld [vmem:[#allocation7 + $0xb4] sm:$0xf] }
 0x394   : > { %v3481_v47 = vadd.f32 %v3480_v17, %v3468_v3  ;;  %4209 = vmatpush.bf16.msrb.mxu1 %v6015_v21  ;;  %v5747_v17 = vor.u32 %v6520_v11, %v5744_v51  ;;  %v5875_v3 = vor.u32 %v6552_v50, %v5872_v15  ;;  %v5840_v21 = vld [vmem:[#allocation5 + $0x778] sm:$0xf0]  ;;  %v6587_v11 = vld [vmem:[#allocation7 + $0xc4] sm:$0xf]  ;;  %v6008_v51 = vld [vmem:[#allocation7 + $0xc8] sm:$0xf0] }
 0x395   : > { %v3651_v43 = vpop.f32.mrf.mxu0  ;;  %v3664_v28 = vpop.f32.mrf.mxu1  ;;  %v5843_v38 = vor.u32 %v6544_v61, %v5840_v21  ;;  %v5664_v50 = vld [vmem:[#allocation5 + $0x618] sm:$0xf0]  ;;  %v6532_v15 = vld [vmem:[#allocation5 + $0x70c] sm:$0xf]  ;;  %v6011_v41 = vor.u32 %v6587_v11, %v6008_v51  ;;  %v6579_v61 = vld [vmem:[#allocation7 + $0x84] sm:$0xf] }
 0x396   : > { %v3796_v35 = vmax.f32 %v3481_v47, 0.0  ;;  %v6580_v47 = vld [vmem:[#allocation7 + $0x84] sm:$0xf0]  ;;  %v3375_v43 = vperm.slane %v7576_v25, 3  ;;  %v6512_v28 = vld [vmem:[#allocation5 + $0x66c] sm:$0xf] }
 0x397   : > { %3720 = vmatpush.bf16.msra.mxu2 %v5235_v14  ;;  %3733 = vmatpush.bf16.msra.mxu3 %v5363_v6  ;;  %v6404_v14 = vld [vmem:[#allocation5 + $0x30c] sm:$0xf]  ;;  %v5280_v6 = vld [vmem:[#allocation5 + $0x318] sm:$0xf0]  ;;  %v5715_v25 = vor.u32 %v6512_v28, %v5712_v2  ;;  %v6581_v28 = vld [vmem:[#allocation7 + $0x94] sm:$0xf] }
 0x398   : > { %v7619_v56 = vpack.c.bf16 %v3796_v35, %v3796_v35  ;;  %v5283_v57 = vor.u32 %v6404_v14, %v5280_v6  ;;  %4210 = vmatpush.bf16.msrb.mxu1 %v6007_v5  ;;  %v5975_v35 = vor.u32 %v6580_v47, %v5974_v36  ;;  %v6024_v14 = vld [vmem:[#allocation7 + $0xe8] sm:$0xf0]  ;;  %v5824_v5 = vld [vmem:[#allocation5 + $0x758] sm:$0xf0]  ;;  %v6596_v11 = vld [vmem:[#allocation7 + $0x104] sm:$0xf0] }
 0x399   : > { %v3469_v8 = vpop.f32.mrf.mxu2  ;;  %v3482_v30 = vpop.f32.mrf.mxu3  ;;  %v5976_v21 = vld [vmem:[#allocation7 + $0x88] sm:$0xf0]  ;;  %v6609_v51 = vld [vmem:[#allocation7 + $0x174] sm:$0xf] }
 0x39a   : > { %4202 = vmatmul.bf16.vlgmr.msrb.gmra.mxu0 %v7619_v56  ;;  %v6027_v30 = vor.u32 %v6591_v19, %v6024_v14 }
 0x39b   : > { %3721 = vmatpush.bf16.msra.mxu2 %v5219_v52  ;;  %3734 = vmatpush.bf16.msra.mxu3 %v5347_v16  ;;  %v5998_v52 = vld [vmem:[#allocation7 + $0xb0] sm:$0xf]  ;;  %v6586_v16 = vld [vmem:[#allocation7 + $0xb4] sm:$0xf0] }
 0x39f   : > { %3722 = vmatpush.bf16.msra.mxu2 %v5203_v44  ;;  %3735 = vmatpush.bf16.msra.mxu3 %v5331_v49  ;;  %v5999_v44 = vor.u32 %v6586_v16, %v5998_v52  ;;  %v5990_v49 = vld [vmem:[#allocation7 + $0xa0] sm:$0xf] }
 0x3a0   : > { %v5991_v29 = vor.u32 %v6584_v0, %v5990_v49  ;;  %v5811_v0 = vor.u32 %v6536_v54, %v5808_v53  ;;  %v6602_v54 = vld [vmem:[#allocation7 + $0x134] sm:$0xf0] }
 0x3a1   : > { %4211 = vmatpush.bf16.msrb.mxu1 %v5999_v44  ;;  %v6016_v44 = vld [vmem:[#allocation7 + $0xd8] sm:$0xf0] }
 0x3a3   : > { %3723 = vmatpush.bf16.msra.mxu2 %v5187_v7  ;;  %3736 = vmatpush.bf16.msra.mxu3 %v5315_v59  ;;  %v6516_v7 = vld [vmem:[#allocation5 + $0x68c] sm:$0xf]  ;;  %v5728_v59 = vld [vmem:[#allocation5 + $0x698] sm:$0xf0] }
 0x3a5   : > { %4212 = vmatpush.bf16.msrb.mxu1 %v5991_v29  ;;  %v5792_v29 = vld [vmem:[#allocation5 + $0x718] sm:$0xf0] }
 0x3a7   : > { %3724 = vmatpush.bf16.msra.mxu2 %v5171_v40  ;;  %3737 = vmatpush.bf16.msra.mxu3 %v5299_v55  ;;  %v6035_v40 = vor.u32 %v6593_v18, %v6032_v23  ;;  %v5984_v18 = vld [vmem:[#allocation7 + $0x98] sm:$0xf0] }
 0x3a8   : > { %v5987_v2 = vor.u32 %v6581_v28, %v5984_v18 }
 0x3a9   : > { %4213 = vmatpush.bf16.msrb.mxu1 %v5983_v60  ;;  %v6610_v60 = vld [vmem:[#allocation7 + $0x174] sm:$0xf0] }
 0x3aa   : > { %4254 = vmatmul.bf16.vlgmr.msra.gmra.mxu0 %v7619_v56 }
 0x3ab   : > { %3725 = vmatpush.bf16.msra.mxu2 %v5155_v1  ;;  %3738 = vmatpush.bf16.msra.mxu3 %v5283_v57  ;;  %v5699_v1 = vor.u32 %v6508_v4, %v5696_v22  ;;  %v5827_v57 = vor.u32 %v6540_v24, %v5824_v5  ;;  %v6078_v5 = vld [vmem:[#allocation7 + $0x150] sm:$0xf] }
 0x3ad   : > { %v3701_v55 = vpop.f32.mrf.mxu0  ;;  %v3714_v39 = vpop.f32.mrf.mxu1  ;;  %4214 = vmatpush.bf16.msrb.mxu1 %v5975_v35 }
 0x3ae   : > { %3726 = vmatmul.bf16.vlgmr.msra.gmra.mxu2 %v7543_v13  ;;  %3739 = vmatmul.bf16.vlgmr.msra.gmra.mxu3 %v7545_v34  ;;  %v5731_v13 = vor.u32 %v6516_v7, %v5728_v59  ;;  %v5859_v34 = vor.u32 %v6548_v48, %v5856_v31  ;;  %v3702_v6 = vadd.f32 %v3701_v55, %v3375_v43  ;;  %v6094_v31 = vld [vmem:[#allocation7 + $0x170] sm:$0xf]  ;;  %v6583_v43 = vld [vmem:[#allocation7 + $0xa4] sm:$0xf]  ;;  %v6086_v55 = vld [vmem:[#allocation7 + $0x160] sm:$0xf] }
 0x3af   : > { %3770 = vmatpush.bf16.msrb.mxu2 %v5779_v10  ;;  %3783 = vmatpush.bf16.msrb.mxu3 %v5907_v12  ;;  %v6504_v10 = vld [vmem:[#allocation5 + $0x62c] sm:$0xf]  ;;  %v5680_v12 = vld [vmem:[#allocation5 + $0x638] sm:$0xf0]  ;;  %v5795_v48 = vor.u32 %v6532_v15, %v5792_v29  ;;  %v6095_v47 = vor.u32 %v6610_v60, %v6094_v31  ;;  %v6603_v60 = vld [vmem:[#allocation7 + $0x144] sm:$0xf] }
 0x3b0   : > { %v7626_v8 = vadd.f32 %v3714_v39, %v3702_v6  ;;  %v5683_v49 = vor.u32 %v6504_v10, %v5680_v12  ;;  %v6608_v39 = vld [vmem:[#allocation7 + $0x164] sm:$0xf0]  ;;  %v6062_v12 = vld [vmem:[#allocation7 + $0x130] sm:$0xf] }
 0x3b1   : > { %4259 = vmatpush.bf16.msra.mxu1 %v6035_v40  ;;  %v3519_v52 = vpop.f32.mrf.mxu2  ;;  %v3532_v16 = vpop.f32.mrf.mxu3  ;;  %v5979_v40 = vor.u32 %v6579_v61, %v5976_v21  ;;  %v6087_v19 = vor.u32 %v6608_v39, %v6086_v55  ;;  %v6597_v21 = vld [vmem:[#allocation7 + $0x114] sm:$0xf]  ;;  %v6158_v55 = vld [vmem:[#allocation7 + $0x1f0] sm:$0xf]  ;;  %v6626_v39 = vld [vmem:[#allocation7 + $0x1f4] sm:$0xf0] }
 0x3b2   : > { %v3520_v23 = vadd.f32 %v3519_v52, %v7583_v37  ;;  %v6070_v52 = vld [vmem:[#allocation7 + $0x140] sm:$0xf] }
 0x3b3   : > { %3771 = vmatpush.bf16.msrb.mxu2 %v5763_v9  ;;  %3784 = vmatpush.bf16.msrb.mxu3 %v5891_v46  ;;  %v6500_v9 = vld [vmem:[#allocation5 + $0x60c] sm:$0xf]  ;;  %v6019_v46 = vor.u32 %v6589_v27, %v6016_v44  ;;  %v6600_v27 = vld [vmem:[#allocation7 + $0x124] sm:$0xf0] }
 0x3b4   : > { %v5667_v59 = vor.u32 %v6500_v9, %v5664_v50  ;;  %v3533_v35 = vadd.f32 %v3532_v16, %v3520_v23  ;;  %v6096_v50 = vld [vmem:[#allocation7 + $0x178] sm:$0xf0]  ;;  %v6599_v23 = vld [vmem:[#allocation7 + $0x124] sm:$0xf] }
 0x3b5   : > { %4260 = vmatpush.bf16.msra.mxu1 %v6027_v30  ;;  %v3703_v56 = vpop.f32.mrf.mxu0  ;;  %v3716_v45 = vpop.f32.mrf.mxu1  ;;  %v6606_v30 = vld [vmem:[#allocation7 + $0x154] sm:$0xf0]  ;;  %v6099_v29 = vor.u32 %v6609_v51, %v6096_v50 }
 0x3b6   : > { %v3546_v14 = vadd.f32 %v7589_v33, %v3533_v35  ;;  %v6079_v16 = vor.u32 %v6606_v30, %v6078_v5  ;;  %v6054_v45 = vld [vmem:[#allocation7 + $0x120] sm:$0xf]  ;;  %v6048_v35 = vld [vmem:[#allocation7 + $0x118] sm:$0xf0] }
 0x3b7   : > { %3772 = vmatpush.bf16.msrb.mxu2 %v5747_v17  ;;  %3785 = vmatpush.bf16.msrb.mxu3 %v5875_v3  ;;  %v6000_v17 = vld [vmem:[#allocation7 + $0xb8] sm:$0xf0]  ;;  %v6055_v44 = vor.u32 %v6600_v27, %v6054_v45  ;;  %v6618_v45 = vld [vmem:[#allocation7 + $0x1b4] sm:$0xf0] }
 0x3b8   : > { %v6003_v36 = vor.u32 %v6585_v63, %v6000_v17  ;;  %v6088_v63 = vld [vmem:[#allocation7 + $0x168] sm:$0xf0] }
 0x3b9   : > { %4261 = vmatpush.bf16.msra.mxu1 %v6019_v46  ;;  %v3521_v3 = vpop.f32.mrf.mxu2  ;;  %v3534_v7 = vpop.f32.mrf.mxu3  ;;  %v6038_v46 = vld [vmem:[#allocation7 + $0x100] sm:$0xf] }
 0x3ba   : > { %v6039_v15 = vor.u32 %v6596_v11, %v6038_v46  ;;  %v6110_v46 = vld [vmem:[#allocation7 + $0x190] sm:$0xf]  ;;  %v6614_v11 = vld [vmem:[#allocation7 + $0x194] sm:$0xf0] }
 0x3bb   : > { %3773 = vmatpush.bf16.msrb.mxu2 %v5731_v13  ;;  %3786 = vmatpush.bf16.msrb.mxu3 %v5859_v34  ;;  %v5992_v13 = vld [vmem:[#allocation7 + $0xa8] sm:$0xf0]  ;;  %v6111_v50 = vor.u32 %v6614_v11, %v6110_v46  ;;  %v6641_v46 = vld [vmem:[%s7719_s6 + $0x70] sm:$0xff] }
 0x3bc   : > { %v5995_v34 = vor.u32 %v6583_v43, %v5992_v13  ;;  %v6601_v43 = vld [vmem:[#allocation7 + $0x134] sm:$0xf]  ;;  %v6064_v13 = vld [vmem:[#allocation7 + $0x138] sm:$0xf0]  ;;  %v6632_v11 = vld [vmem:[%s7719_s6 + $0x28] sm:$0xff] }
 0x3bd   : > { %4262 = vmatpush.bf16.msra.mxu1 %v6011_v41  ;;  %v6607_v41 = vld [vmem:[#allocation7 + $0x164] sm:$0xf]  ;;  %v6067_v18 = vor.u32 %v6601_v43, %v6064_v13  ;;  %v6144_v43 = vld [vmem:[#allocation7 + $0x1d8] sm:$0xf0] }
 0x3be   : > { %v6091_v17 = vor.u32 %v6607_v41, %v6088_v63  ;;  %v6625_v41 = vld [vmem:[#allocation7 + $0x1f4] sm:$0xf]  ;;  %v6160_v63 = vld [vmem:[#allocation7 + $0x1f8] sm:$0xf0] }
 0x3bf   : > { %3774 = vmatpush.bf16.msrb.mxu2 %v5715_v25  ;;  %3787 = vmatpush.bf16.msrb.mxu3 %v5843_v38 }
 0x3c1   : > { %4263 = vmatpush.bf16.msra.mxu1 %v6003_v36  ;;  %v6072_v36 = vld [vmem:[#allocation7 + $0x148] sm:$0xf0] }
 0x3c3   : > { %3775 = vmatpush.bf16.msrb.mxu2 %v5699_v1  ;;  %3788 = vmatpush.bf16.msrb.mxu3 %v5827_v57  ;;  %v6604_v1 = vld [vmem:[#allocation7 + $0x144] sm:$0xf0] }
 0x3c4   : > { %v6071_v57 = vor.u32 %v6604_v1, %v6070_v52  ;;  %v6142_v1 = vld [vmem:[#allocation7 + $0x1d0] sm:$0xf] }
 0x3c5   : > { %4264 = vmatpush.bf16.msra.mxu1 %v5995_v34 }
 0x3c7   : > { %3776 = vmatpush.bf16.msrb.mxu2 %v5683_v49  ;;  %3789 = vmatpush.bf16.msrb.mxu3 %v5811_v0  ;;  %v6046_v49 = vld [vmem:[#allocation7 + $0x110] sm:$0xf]  ;;  %v6598_v0 = vld [vmem:[#allocation7 + $0x114] sm:$0xf0] }
 0x3c8   : > { %v6047_v9 = vor.u32 %v6598_v0, %v6046_v49  ;;  %v6118_v49 = vld [vmem:[#allocation7 + $0x1a0] sm:$0xf]  ;;  %v6616_v0 = vld [vmem:[#allocation7 + $0x1a4] sm:$0xf0] }
 0x3c9   : > { %4265 = vmatpush.bf16.msra.mxu1 %v5987_v2  ;;  %v6056_v2 = vld [vmem:[#allocation7 + $0x128] sm:$0xf0] }
 0x3ca   : > { %v6059_v61 = vor.u32 %v6599_v23, %v6056_v2  ;;  %v6617_v2 = vld [vmem:[#allocation7 + $0x1b4] sm:$0xf] }
 0x3cb   : > { %3777 = vmatpush.bf16.msrb.mxu2 %v5667_v59  ;;  %3790 = vmatpush.bf16.msrb.mxu3 %v5795_v48  ;;  %v6605_v59 = vld [vmem:[#allocation7 + $0x154] sm:$0xf]  ;;  %v6080_v48 = vld [vmem:[#allocation7 + $0x158] sm:$0xf0] }
 0x3cc   : > { %v6083_v31 = vor.u32 %v6605_v59, %v6080_v48  ;;  %v6152_v59 = vld [vmem:[#allocation7 + $0x1e8] sm:$0xf0] }
 0x3cd   : > { %v7632_v6 = vpop.f32.mrf.mxu0  ;;  %4266 = vmatpush.bf16.msra.mxu1 %v5979_v40 }
 0x3ce   : > { %3778 = vmatmul.bf16.vlgmr.msrb.gmra.mxu2 %v7561_v42  ;;  %3791 = vmatmul.bf16.vlgmr.msrb.gmra.mxu3 %v7563_v62  ;;  %v7634_v42 = vpop.f32.mrf.mxu1  ;;  %v3559_v62 = vadd.f32 %v7591_v20, %v3546_v14  ;;  %v6063_v20 = vor.u32 %v6602_v54, %v6062_v12  ;;  %v6159_v14 = vor.u32 %v6626_v39, %v6158_v55  ;;  %v6134_v12 = vld [vmem:[#allocation7 + $0x1c0] sm:$0xf]  ;;  %v6620_v54 = vld [vmem:[#allocation7 + $0x1c4] sm:$0xf0]  ;;  %v6615_v55 = vld [vmem:[#allocation7 + $0x1a4] sm:$0xf] }
 0x3cf   : > { %4220 = vmatpush.bf16.msra.mxu2 %v6095_v47  ;;  %v6075_v47 = vor.u32 %v6603_v60, %v6072_v36  ;;  %v6120_v39 = vld [vmem:[#allocation7 + $0x1a8] sm:$0xf0] }
 0x3d0   : > { %4233 = vmatpush.bf16.msra.mxu3 %v6159_v14  ;;  %v6123_v14 = vor.u32 %v6615_v55, %v6120_v39 }
 0x3d1   : > { %v3571_v37 = vpop.f32.mrf.mxu2  ;;  %v3584_v25 = vpop.f32.mrf.mxu3 }
 0x3d2   : > { %v3572_v38 = vadd.f32 %v3571_v37, %v3559_v62  ;;  %v6595_v62 = vld [vmem:[#allocation7 + $0x104] sm:$0xf]  ;;  %v6040_v37 = vld [vmem:[#allocation7 + $0x108] sm:$0xf0] }
 0x3d3   : > { %4221 = vmatpush.bf16.msra.mxu2 %v6087_v19  ;;  %v6051_v19 = vor.u32 %v6597_v21, %v6048_v35 }
 0x3d4   : > { %v3585_v4 = vadd.f32 %v3584_v25, %v3572_v38  ;;  %v6043_v38 = vor.u32 %v6595_v62, %v6040_v37  ;;  %v6613_v62 = vld [vmem:[#allocation7 + $0x194] sm:$0xf]  ;;  %v6112_v37 = vld [vmem:[#allocation7 + $0x198] sm:$0xf0] }
 0x3d5   : > { %v3755_v22 = vpop.f32.mrf.mxu0 }
 0x3d6   : > { %v3768_v24 = vpop.f32.mrf.mxu1  ;;  %v3797_v33 = vmax.f32 %v3585_v4, 0.0  ;;  %v6150_v4 = vld [vmem:[#allocation7 + $0x1e0] sm:$0xf]  ;;  %v6624_v22 = vld [vmem:[#allocation7 + $0x1e4] sm:$0xf0] }
 0x3d7   : > { %4222 = vmatpush.bf16.msra.mxu2 %v6079_v16  ;;  %v6151_v24 = vor.u32 %v6624_v22, %v6150_v4  ;;  %v6611_v4 = vld [vmem:[#allocation7 + $0x184] sm:$0xf]  ;;  %v6104_v22 = vld [vmem:[#allocation7 + $0x188] sm:$0xf0] }
 0x3d8   : > { %v3801_v10 = vpack.c.bf16 %v3797_v33, %v3797_v33  ;;  %v6622_v33 = vld [vmem:[#allocation7 + $0x1d4] sm:$0xf0] }
 0x3d9   : > { %v3573_v53 = vpop.f32.mrf.mxu2  ;;  %v3586_v56 = vpop.f32.mrf.mxu3  ;;  %4234 = vmatpush.bf16.msra.mxu3 %v6151_v24 }
 0x3da   : > { %4215 = vmatmul.bf16.vlgmr.msrb.gmra.mxu1 %v3801_v10  ;;  %v6135_v56 = vor.u32 %v6620_v54, %v6134_v12  ;;  %v3868_v54 = vld [vmem:[%s7720_s7 + $0xe] sm:$0x3] }
 0x3db   : > { %4223 = vmatpush.bf16.msra.mxu2 %v6071_v57 }
 0x3df   : > { %4224 = vmatpush.bf16.msra.mxu2 %v6063_v20  ;;  %v6126_v20 = vld [vmem:[#allocation7 + $0x1b0] sm:$0xf] }
 0x3e3   : > { %4225 = vmatpush.bf16.msra.mxu2 %v6055_v44 }
 0x3e7   : > { %4226 = vmatpush.bf16.msra.mxu2 %v6047_v9  ;;  %v6119_v9 = vor.u32 %v6616_v0, %v6118_v49  ;;  %v6634_v49 = vld [vmem:[%s7719_s6 + $0x38] sm:$0xff] }
 0x3e8   : > { %v6642_v0 = vld [vmem:[%s7719_s6 + $0x78] sm:$0xff]  ;;  %4431 = vmatpush.bf16.msrb.mxu0 %v6634_v49 }
 0x3e9   : > { %4444 = vmatpush.bf16.msrb.mxu1 %v6642_v0 }
 0x3ea   : > { %4267 = vmatmul.bf16.vlgmr.msra.gmra.mxu1 %v3801_v10  ;;  %v6143_v10 = vor.u32 %v6622_v33, %v6142_v1 }
 0x3eb   : > { %4227 = vmatpush.bf16.msra.mxu2 %v6039_v15  ;;  %v6102_v15 = vld [vmem:[#allocation7 + $0x180] sm:$0xf] }
 0x3ec   : > { %4235 = vmatpush.bf16.msra.mxu3 %v6143_v10 }
 0x3ed   : > { %4445 = vmatpush.bf16.msrb.mxu1 %v6641_v46 }
 0x3ef   : > { %4272 = vmatpush.bf16.msrb.mxu2 %v6099_v29  ;;  %v6612_v29 = vld [vmem:[#allocation7 + $0x184] sm:$0xf0] }
 0x3f0   : > { %4236 = vmatpush.bf16.msra.mxu3 %v6135_v56 }
 0x3f1   : > { %v3623_v3 = vpop.f32.mrf.mxu2  ;;  %v3636_v7 = vpop.f32.mrf.mxu3 }
 0x3f2   : > { %v3624_v40 = vadd.f32 %v3623_v3, %v7600_v58  ;;  %v6163_v3 = vor.u32 %v6625_v41, %v6160_v63  ;;  %v6629_v41 = vld [vmem:[%s7719_s6 + $0x10] sm:$0xff] }
 0x3f3   : > { %4273 = vmatpush.bf16.msrb.mxu2 %v6091_v17  ;;  %v6103_v17 = vor.u32 %v6612_v29, %v6102_v15  ;;  %v6630_v15 = vld [vmem:[%s7719_s6 + $0x18] sm:$0xff] }
 0x3f4   : > { %v3637_v25 = vadd.f32 %v3636_v7, %v3624_v40  ;;  %v6623_v7 = vld [vmem:[#allocation7 + $0x1e4] sm:$0xf] }
 0x3f6   : > { %v3650_v5 = vadd.f32 %v7614_v32, %v3637_v25 }
 0x3f7   : > { %4274 = vmatpush.bf16.msrb.mxu2 %v6083_v31  ;;  %v6155_v31 = vor.u32 %v6623_v7, %v6152_v59  ;;  %v6640_v7 = vld [vmem:[%s7719_s6 + $0x68] sm:$0xff]  ;;  %v6627_v59 = vld [vmem:[%s7719_s6] sm:$0xff] }
 0x3f8   : > { %v3663_v58 = vadd.f32 %v7616_v26, %v3650_v5  ;;  %v6127_v26 = vor.u32 %v6618_v45, %v6126_v20  ;;  %v6107_v5 = vor.u32 %v6611_v4, %v6104_v22  ;;  %v4191_v45 = vperm.slane %v3868_v54, 1  ;;  %4446 = vmatpush.bf16.msrb.mxu1 %v6640_v7 }
 0x3f9   : > { %v3625_v34 = vpop.f32.mrf.mxu2  ;;  %v3638_v28 = vpop.f32.mrf.mxu3 }
 0x3fa   : > { %4237 = vmatpush.bf16.msra.mxu3 %v6127_v26  ;;  %v6619_v34 = vld [vmem:[#allocation7 + $0x1c4] sm:$0xf]  ;;  %v6136_v28 = vld [vmem:[#allocation7 + $0x1c8] sm:$0xf0] }
 0x3fb   : > { %4275 = vmatpush.bf16.msrb.mxu2 %v6075_v47  ;;  %v6621_v47 = vld [vmem:[#allocation7 + $0x1d4] sm:$0xf]  ;;  %v6139_v23 = vor.u32 %v6619_v34, %v6136_v28 }
 0x3fc   : > { %v6147_v13 = vor.u32 %v6621_v47, %v6144_v43  ;;  %v6635_v47 = vld [vmem:[%s7719_s6 + $0x40] sm:$0xff] }
 0x3fe   : > { %4238 = vmatpush.bf16.msra.mxu3 %v6119_v9  ;;  %v6633_v9 = vld [vmem:[%s7719_s6 + $0x30] sm:$0xff] }
 0x3ff   : > { %4276 = vmatpush.bf16.msrb.mxu2 %v6067_v18  ;;  %4432 = vmatpush.bf16.msrb.mxu0 %v6633_v9 }
 0x402   : > { %4239 = vmatpush.bf16.msra.mxu3 %v6111_v50  ;;  %v6631_v50 = vld [vmem:[%s7719_s6 + $0x20] sm:$0xff] }
 0x403   : > { %4277 = vmatpush.bf16.msrb.mxu2 %v6059_v61  ;;  %v6128_v61 = vld [vmem:[#allocation7 + $0x1b8] sm:$0xf0]  ;;  %4433 = vmatpush.bf16.msrb.mxu0 %v6632_v11 }
 0x404   : > { %v6131_v40 = vor.u32 %v6617_v2, %v6128_v61 }
 0x406   : > { %4240 = vmatpush.bf16.msra.mxu3 %v6103_v17 }
 0x407   : > { %4278 = vmatpush.bf16.msrb.mxu2 %v6051_v19  ;;  %4434 = vmatpush.bf16.msrb.mxu0 %v6631_v50 }
 0x40a   : > { %4285 = vmatpush.bf16.msrb.mxu3 %v6163_v3  ;;  %v6628_v3 = vld [vmem:[%s7719_s6 + $0x8] sm:$0xff] }
 0x40b   : > { %4279 = vmatpush.bf16.msrb.mxu2 %v6043_v38  ;;  %v6115_v38 = vor.u32 %v6613_v62, %v6112_v37  ;;  %4435 = vmatpush.bf16.msrb.mxu0 %v6630_v15 }
 0x40e   : > { %4286 = vmatpush.bf16.msrb.mxu3 %v6155_v31  ;;  %v6638_v31 = vld [vmem:[%s7719_s6 + $0x58] sm:$0xff] }
 0x40f   : > { %4436 = vmatpush.bf16.msrb.mxu0 %v6629_v41 }
 0x411   : > { %v3675_v30 = vpop.f32.mrf.mxu2  ;;  %v3688_v52 = vpop.f32.mrf.mxu3 }
 0x412   : > { %v3676_v16 = vadd.f32 %v3675_v30, %v3663_v58  ;;  %4287 = vmatpush.bf16.msrb.mxu3 %v6147_v13 }
 0x413   : > { %4437 = vmatpush.bf16.msrb.mxu0 %v6628_v3 }
 0x414   : > { %v3689_v57 = vadd.f32 %v3688_v52, %v3676_v16 }
 0x416   : > { %v3798_v53 = vmax.f32 %v3689_v57, 0.0  ;;  %4288 = vmatpush.bf16.msrb.mxu3 %v6139_v23 }
 0x417   : > { %v7640_v51 = vpop.f32.mrf.mxu0  ;;  %4438 = vmatpush.bf16.msrb.mxu0 %v6627_v59 }
 0x418   : > { %v3802_v27 = vpack.c.bf16 %v3798_v53, %v3798_v53  ;;  %v4190_v53 = vperm.slane %v3868_v54, 0 }
 0x419   : > { %v3677_v32 = vpop.f32.mrf.mxu2  ;;  %v3690_v44 = vpop.f32.mrf.mxu3 }
 0x41a   : > { %4228 = vmatmul.bf16.vlgmr.msra.gmra.mxu2 %v3802_v27  ;;  %4289 = vmatpush.bf16.msrb.mxu3 %v6131_v40  ;;  %v4204_v56 = vadd.f32 %v7640_v51, %v4190_v53 }
 0x41e   : > { %4290 = vmatpush.bf16.msrb.mxu3 %v6123_v14  ;;  %v4334_v14 = vld [vmem:[%s7720_s7 + $0x10] sm:$0x1] }
 0x41f   : > { %v4205_v48 = vpop.f32.mrf.mxu0 }
 0x420   : > { %v6639_v48 = vld [vmem:[%s7719_s6 + $0x60] sm:$0xff] }
 0x421   : > { %4447 = vmatpush.bf16.msrb.mxu1 %v6639_v48 }
 0x422   : > { %4291 = vmatpush.bf16.msrb.mxu3 %v6115_v38 }
 0x425   : > { %4448 = vmatpush.bf16.msrb.mxu1 %v6638_v31 }
 0x426   : > { %4292 = vmatpush.bf16.msrb.mxu3 %v6107_v5 }
 0x427   : > { %v4255_v18 = vpop.f32.mrf.mxu0 }
 0x42a   : > { %4280 = vmatmul.bf16.vlgmr.msrb.gmra.mxu2 %v3802_v27  ;;  %v4256_v27 = vadd.f32 %v4255_v18, %v4191_v45 }
 0x42f   : > { %v4257_v19 = vpop.f32.mrf.mxu0 }
 0x431   : > { %v3727_v60 = vpop.f32.mrf.mxu2  ;;  %v3740_v36 = vpop.f32.mrf.mxu3 }
 0x432   : > { %v3728_v25 = vadd.f32 %v3727_v60, %v7626_v8  ;;  %v6637_v60 = vld [vmem:[%s7719_s6 + $0x50] sm:$0xff] }
 0x433   : > { %4449 = vmatpush.bf16.msrb.mxu1 %v6637_v60 }
 0x434   : > { %v3741_v24 = vadd.f32 %v3740_v36, %v3728_v25  ;;  %v6636_v36 = vld [vmem:[%s7719_s6 + $0x48] sm:$0xff] }
 0x436   : > { %v3754_v58 = vadd.f32 %v7632_v6, %v3741_v24 }
 0x437   : > { %4450 = vmatpush.bf16.msrb.mxu1 %v6636_v36 }
 0x438   : > { %v3767_v30 = vadd.f32 %v7634_v42, %v3754_v58 }
 0x439   : > { %v3729_v21 = vpop.f32.mrf.mxu2  ;;  %v3742_v35 = vpop.f32.mrf.mxu3 }
 0x43b   : > { %4451 = vmatpush.bf16.msrb.mxu1 %v6635_v47 }
 0x451   : > { %v3779_v52 = vpop.f32.mrf.mxu2  ;;  %v3792_v16 = vpop.f32.mrf.mxu3 }
 0x452   : > { %v3780_v1 = vadd.f32 %v3779_v52, %v3767_v30 }
 0x454   : > { %v3793_v33 = vadd.f32 %v3792_v16, %v3780_v1 }
 0x456   : > { %v3799_v57 = vmax.f32 %v3793_v33, 0.0 }
 0x457   : > { %v4216_v6 = vpop.f32.mrf.mxu1 }
 0x458   : > { %v3803_v10 = vpack.c.bf16 %v3799_v57, %v3799_v57  ;;  %v4217_v20 = vadd.f32 %v4216_v6, %v4204_v56 }
 0x459   : > { %v3781_v12 = vpop.f32.mrf.mxu2  ;;  %v3794_v8 = vpop.f32.mrf.mxu3 }
 0x45a   : > { %4241 = vmatmul.bf16.vlgmr.msra.gmra.mxu3 %v3803_v10 }
 0x45f   : > { %v4218_v42 = vpop.f32.mrf.mxu1 }
 0x467   : > { %v4268_v32 = vpop.f32.mrf.mxu1 }
 0x468   : > { %v4269_v44 = vadd.f32 %v4268_v32, %v4256_v27 }
 0x46a   : > { %4293 = vmatmul.bf16.vlgmr.msrb.gmra.mxu3 %v3803_v10 }
 0x46f   : > { %v4270_v26 = vpop.f32.mrf.mxu1 }
 0x49d   : > { %v4229_v51 = vpop.f32.mrf.mxu2 }
 0x49e   : > { %v4230_v43 = vadd.f32 %v4229_v51, %v4217_v20 }
 0x4a5   : > { %v4231_v29 = vpop.f32.mrf.mxu2 }
 0x4ad   : > { %v4281_v63 = vpop.f32.mrf.mxu2 }
 0x4ae   : > { %v4282_v2 = vadd.f32 %v4281_v63, %v4269_v44 }
 0x4b5   : > { %v4283_v17 = vpop.f32.mrf.mxu2 }
 0x4dd   : > { %v4242_v13 = vpop.f32.mrf.mxu3 }
 0x4de   : > { %v4243_v34 = vadd.f32 %v4242_v13, %v4230_v43 }
 0x4e0   : > { %v4298_v28 = vmax.f32 %v4243_v34, 0.0 }
 0x4e2   : > { %v4300_v18 = vpack.c.bf16 %v4298_v28, %v4298_v28 }
 0x4e4   : > { %4439 = vmatmul.bf16.vlgmr.msrb.gmra.mxu0 %v4300_v18 }
 0x4e5   : > { %v4244_v23 = vpop.f32.mrf.mxu3 }
 0x4ed   : > { %v4294_v61 = vpop.f32.mrf.mxu3 }
 0x4ee   : > { %v4295_v21 = vadd.f32 %v4294_v61, %v4282_v2 }
 0x4f0   : > { %v4299_v35 = vmax.f32 %v4295_v21, 0.0 }
 0x4f2   : > { %v4301_v40 = vpack.c.bf16 %v4299_v35, %v4299_v35 }
 0x4f4   : > { %4452 = vmatmul.bf16.vlgmr.msrb.gmra.mxu1 %v4301_v40 }
 0x4f5   : > { %v4296_v55 = vpop.f32.mrf.mxu3 }
 0x561   : > { %v4440_v39 = vpop.f32.mrf.mxu0 }
 0x562   : > { %v4441_v62 = vadd.f32 %v4440_v39, %v4334_v14 }
 0x569   : > { %v4442_v19 = vpop.f32.mrf.mxu0 }
 0x571   : > { %v4453_v37 = vpop.f32.mrf.mxu1 }
 0x572   : > { %v4454_v25 = vadd.f32 %v4453_v37, %v4441_v62 }
 0x574   : > { %4457 = vst [vmem:[%s379_s12] sm:$0x1] %v4454_v25 }
 0x579   : > { %v4455_v38 = vpop.f32.mrf.mxu1 }
 0x57a PF: > { %s20_s29 = sadd.s32 1, %s6826_s29   ;;  %s7726_s27 = smov %s6822_s28 }
 0x57b   : > { %p17_p8 = scmp.ge.s32.totalorder %s20_s29, 4   ;;  %s7727_s28 = smov %s7729_s17 }
 0x57d   :  { %19 = sbr.rel (!%p17_p8) target bundleno = 3 (0x3), region = 103 }
 0x582   :  { %4475 = vsyncpa [#allocation4], 1 }
 0x583   :  { %4477 = vsyncpa [#allocation4 + $0x1], 1 }
 0x584   :  { %4478 = vsyncpa [#allocation6], 1 }

// kernel: _lambda_.1
= control target key start
LH: loop header
LB: loop body
LE: loop exit
PB: predicated region body
PF: predicated region fallthrough
CT: control target
= control target key end

     0   :  { %13 = vsyncpa [#allocation4], 0  ;;  %s7713_s0 = inlined_call_operand.vmem [shape: bf16[2,128,8], index: 0, kind: input, shape index: {}]   ;;  %s7714_s1 = inlined_call_operand.vmem [shape: bf16[8,64], index: 1, kind: input, shape index: {}]   ;;  %s7715_s2 = inlined_call_operand.vmem [shape: bf16[64,128], index: 2, kind: input, shape index: {}]   ;;  %s7716_s3 = inlined_call_operand.hbm [shape: bf16[128,1024], index: 3, kind: input, shape index: {}]   ;;  %s7717_s4 = inlined_call_operand.hbm [shape: bf16[1024,512], index: 4, kind: input, shape index: {}]   ;;  %s7718_s5 = inlined_call_operand.hbm [shape: bf16[512,256], index: 5, kind: input, shape index: {}]   ;;  %s7719_s6 = inlined_call_operand.vmem [shape: bf16[256,128], index: 6, kind: input, shape index: {}]   ;;  %s7720_s7 = inlined_call_operand.vmem [shape: f32[1,2176], index: 7, kind: input, shape index: {}]   ;;  %s7721_s8 = inlined_call_operand.vmem [shape: f32[2,1,128], index: 8, kind: output, shape index: {}]  }
   0x1   :  { %14 = vsyncpa [#allocation6], 0  ;;  %s6882_s27 = smov 0   ;;  %s6884_s28 = smov 0  }
   0x2   :  { %s6886_s29 = smov 0  }
   0x3 LB: > { %s269_s10 = sshll.u32 %s7717_s4, 4  ;;  %s4551_s11 = sadd.s32 4294967295, %s6826_s29   ;;  %s6826_s29 = sphi %s6886_s29, %s20_s29   ;;  %s6822_s28 = sphi %s6884_s28, %s7727_s28   ;;  %s6818_s27 = sphi %s6882_s27, %s7726_s27   ;;  %s270_s10 = int_to_ptr.hbm [resolvable:$true] %s269_s10 }
   0x4   : > { %p4553_p0 = scmp.ge.s32.totalorder %s6826_s29, 1  ;;  %p238_p1 = scmp.lt.s32.totalorder %s6826_s29, 3 }
   0x5   : > { %p6903_p2 = scmp.eq.s32.totalorder %s4551_s11, 0  ;;  %s6828_s14 = smov [#allocation5]  }
   0x6   : > { %p6907_p3 = pnand %p4553_p0, %p238_p1  ;;  %s271_s15 = sshll.u32 %s6828_s14, 4  ;;  %s272_s15 = int_to_ptr.vmem [resolvable:$true] %s271_s15 }
   0x7   : > { %s32_s17 = sadd.s32 1, %s6822_s28  ;;  %s6829_s18 = smov 256  }
   0x8   : > { %p6655_p4 = pneg %p6907_p3  ;;  %p34_p6 = scmp.ge.s32.totalorder %s32_s17, 2 }
   0x9   : > { %s6830_s19 = smov 16   ;;  %s255_s22 = sshll.u32 %s7716_s3, 4  ;;  %s256_s22 = int_to_ptr.hbm [resolvable:$true] %s255_s22 }
   0xa   : > { %p6915_p5 = pnand %p6903_p2, %p6655_p4  ;;  %s7729_s17 = smov (%p34_p6, %s32_s17), 0 }
   0xb   : > { %s6831_s23 = smov [#allocation3]   ;;  %s283_s30 = sshll.u32 %s7718_s5, 4  ;;  %s284_s30 = int_to_ptr.hbm [resolvable:$true] %s283_s30 }
   0xc   : > { %6661 = dma.hbm_to_vmem [thread:$0]  (!%p6915_p5), %s270_s10, 32768, %s272_s15, [#allocation6], %s6829_s18, %s6829_s18, %s6830_s19  }
   0xd   : > { %s257_s24 = sshll.u32 %s6831_s23, 4  ;;  %s6832_s9 = smov 512   ;;  %s258_s24 = int_to_ptr.vmem [resolvable:$true] %s257_s24 }
   0xe   : > { %s6833_s11 = smov 32   ;;  %s6834_s10 = smov [#allocation7]  }
   0xf   : > { %6658 = dma.hbm_to_vmem [thread:$0]  (!%p6915_p5), %s256_s22, 8192, %s258_s24, [#allocation4], %s6832_s9, %s6832_s9, %s6833_s11  }
  0x10   : > { %s285_s14 = sshll.u32 %s6834_s10, 4  ;;  %s6835_s15 = smov 128   ;;  %s286_s14 = int_to_ptr.vmem [resolvable:$true] %s285_s14 }
  0x11   : > { %s6836_s18 = smov 8   ;;  %320 = sbr.rel (%p6907_p3) target bundleno = 1402 (0x57a), region = 52 }
  0x12   : > { %6664 = dma.hbm_to_vmem [thread:$0]  (!%p6915_p5), %s284_s30, 8192, %s286_s14, [#allocation6], %s6835_s15, %s6835_s15, %s6836_s18  }
  0x16   : > { %6809 = dma.done.wait (%p6903_p2), [#allocation4], 8192  }
  0x17   : > { %6811 = vsyncadd (%p6903_p2), [#allocation4], 4294959104 }
  0x18   : > { %6813 = dma.done.wait (%p6903_p2), [#allocation6], 40960  }
  0x19   : > { %6815 = vsyncadd (%p6903_p2), [#allocation6], 4294926336  ;;  %p368_p7 = scmp.lt.s32.totalorder %s6818_s27, 1  ;;  %vm472_vm0 = vcmask 1043456   ;;  %v402_v0 = vld [vmem:[%s7714_s1] sm:$0xf] }
  0x1a   : > { %v474_v1 = vsel %vm472_vm0, %v402_v0, 0  ;;  %vm447_vm1 = vcmask 64512   ;;  %v6242_v8 = vld [vmem:[%s7715_s2 + $0x18] sm:$0xff]  ;;  %v6241_v10 = vld [vmem:[%s7715_s2 + $0x10] sm:$0xff]  ;;  %v6240_v11 = vld [vmem:[%s7715_s2 + $0x8] sm:$0xff]  ;;  %vm585_vm2 = vcmask 523264  }
  0x1b   : > { %s7731_s27 = smov (!%p368_p7, %s6818_s27), 1  ;;  %483 = vmatpush.bf16.msra.mxu0 %v474_v1  ;;  %614 = vmatpush.bf16.msra.mxu1 %v6242_v8  ;;  %v6239_v12 = vld [vmem:[%s7715_s2] sm:$0xff]  ;;  %v4862_v54 = vld [vmem:[#allocation3 + $0x1c8] sm:$0xf]  ;;  %v6300_v56 = vld [vmem:[#allocation3 + $0x1cc] sm:$0xf] }
  0x1c   : > { %s6230_s13 = sshll.u32 %s7731_s27, 6  ;;  %v6979_v15 = vld [vmem:[%s7720_s7] ss:$0 sm:$0xff]  ;;  %v6304_v55 = vld [vmem:[#allocation3 + $0x1e4] sm:$0xf0]  ;;  %vm1791_vm3 = vcmask 1042434   ;;  %s379_s12 = scalar_lea.vmem %s7721_s8, %s7731_s27 }
  0x1d   : > { %s375_s20 = scalar_lea.vmem %s7713_s0, %s6230_s13  ;;  %v4863_v57 = vor.u32 %v6304_v55, %v4862_v54  ;;  %v4864_v58 = vld [vmem:[#allocation3 + $0x1e8] sm:$0xf0]  ;;  %v4854_v59 = vld [vmem:[#allocation3 + $0x1c0] sm:$0xf]  ;;  %v6299_v1 = vld [vmem:[#allocation3 + $0x1c4] sm:$0xf] }
  0x1e   : > { %v6231_v2 = vld [vmem:[%s375_s20] sm:$0xff]  ;;  %v6232_v3 = vld [vmem:[%s375_s20 + $0x8] sm:$0xff]  ;;  %v6233_v4 = vld [vmem:[%s375_s20 + $0x10] sm:$0xff]  ;;  %v4867_v63 = vor.u32 %v6300_v56, %v4864_v58  ;;  %vm1789_vm4 = vcmask 1040384   ;;  %vm1793_vm5 = vcmask 1041408   ;;  %vm1797_vm6 = vcmask 1046534  }
  0x1f   : > { %4596 = vmatmul.msk.bf16.vlgmr.msra.gmra.mxu0 %vm447_vm1, %v6231_v2  ;;  %v6234_v5 = vld [vmem:[%s375_s20 + $0x18] sm:$0xff]  ;;  %v6235_v6 = vld [vmem:[%s375_s20 + $0x20] sm:$0xff]  ;;  %v6236_v7 = vld [vmem:[%s375_s20 + $0x28] sm:$0xff]  ;;  %615 = vmatpush.bf16.msra.mxu1 %v6241_v10  ;;  %vm1795_vm7 = vcmask 1044484   ;;  %vm1799_vm8 = vcmask 1045508  }
  0x20   : > { %v6237_v9 = vld [vmem:[%s375_s20 + $0x30] sm:$0xff]  ;;  %v6238_v13 = vld [vmem:[%s375_s20 + $0x38] sm:$0xff]  ;;  %v6303_v60 = vld [vmem:[#allocation3 + $0x1dc] sm:$0xf0]  ;;  %1183 = vmatpush.bf16.msrb.mxu0 %v4863_v57 }
  0x21   : > { %v4855_v0 = vor.u32 %v6303_v60, %v4854_v59  ;;  %v4856_v2 = vld [vmem:[#allocation3 + $0x1e0] sm:$0xf0]  ;;  %v4830_v10 = vld [vmem:[#allocation3 + $0x188] sm:$0xf]  ;;  %v6268_v57 = vld [vmem:[#allocation3 + $0xcc] sm:$0xf] }
  0x22   : > { %v4736_v58 = vld [vmem:[#allocation3 + $0xe8] sm:$0xf0] }
  0x23   : > { %616 = vmatpush.bf16.msra.mxu1 %v6240_v11  ;;  %1085 = vmatpush.bf16.msra.mxu2 %v4855_v0  ;;  %v6296_v11 = vld [vmem:[#allocation3 + $0x1a4] sm:$0xf0]  ;;  %v4739_v59 = vor.u32 %v6268_v57, %v4736_v58 }
  0x27   : > { %617 = vmatpush.bf16.msra.mxu1 %v6239_v12 }
  0x2b   : > { %1232 = vmatpush.bf16.msrb.mxu1 %v4867_v63  ;;  %v6259_v63 = vld [vmem:[#allocation3 + $0x84] sm:$0xf] }
  0x2f   : > { %4597 = vmatmul.msk.bf16.gmra.mxu0 %vm447_vm1, %v6232_v3  ;;  %v4859_v3 = vor.u32 %v6299_v1, %v4856_v2  ;;  %v4696_v1 = vld [vmem:[#allocation3 + $0xa0] sm:$0xf0]  ;;  %v4702_v2 = vld [vmem:[#allocation3 + $0x88] sm:$0xf] }
  0x31   : > { %1134 = vmatpush.bf16.msra.mxu3 %v4859_v3  ;;  %v6264_v3 = vld [vmem:[#allocation3 + $0xa4] sm:$0xf0] }
  0x3f   : > { %4598 = vmatmul.msk.bf16.gmra.mxu0 %vm447_vm1, %v6233_v4 }
  0x4f   : > { %4599 = vmatmul.msk.bf16.gmra.mxu0 %vm447_vm1, %v6234_v5  ;;  %v4822_v5 = vld [vmem:[#allocation3 + $0x180] sm:$0xf] }
  0x5f   : > { %4600 = vmatmul.msk.bf16.gmra.mxu0 %vm447_vm1, %v6235_v6  ;;  %v6295_v6 = vld [vmem:[#allocation3 + $0x19c] sm:$0xf0] }
  0x60   : > { %v4823_v8 = vor.u32 %v6295_v6, %v4822_v5  ;;  %v4703_v5 = vor.u32 %v6264_v3, %v4702_v2  ;;  %v6260_v6 = vld [vmem:[#allocation3 + $0x8c] sm:$0xf] }
  0x62   : > { %1086 = vmatpush.bf16.msra.mxu2 %v4823_v8 }
  0x6f   : > { %4601 = vmatmul.msk.bf16.gmra.mxu0 %vm447_vm1, %v6236_v7  ;;  %v6291_v7 = vld [vmem:[#allocation3 + $0x184] sm:$0xf] }
  0x7f   : > { %4602 = vmatmul.msk.bf16.gmra.mxu0 %vm447_vm1, %v6237_v9  ;;  %v4824_v9 = vld [vmem:[#allocation3 + $0x1a0] sm:$0xf0] }
  0x80   : > { %v4827_v12 = vor.u32 %v6291_v7, %v4824_v9  ;;  %v4704_v7 = vld [vmem:[#allocation3 + $0xa8] sm:$0xf0] }
  0x81   : > { %v4707_v9 = vor.u32 %v6260_v6, %v4704_v7 }
  0x82   : > { %1135 = vmatpush.bf16.msra.mxu3 %v4827_v12  ;;  %v6251_v12 = vld [vmem:[#allocation3 + $0x44] sm:$0xf] }
  0x8f   : > { %4603 = vmatmul.msk.bf16.gmra.mxu0 %vm447_vm1, %v6238_v13  ;;  %v4831_v13 = vor.u32 %v6296_v11, %v4830_v10  ;;  %v4662_v10 = vld [vmem:[#allocation3 + $0x40] sm:$0xf] }
  0x90   : > { %v6255_v11 = vld [vmem:[#allocation3 + $0x5c] sm:$0xf0] }
  0x91   : > { %1184 = vmatpush.bf16.msrb.mxu0 %v4831_v13  ;;  %v4663_v13 = vor.u32 %v6255_v11, %v4662_v10 }
  0x9c   : > { %v485_v14 = vpop.f32.mrf.mxu0 }
  0x9d   : > { %v486_v16 = vadd.f32 %v6979_v15, %v485_v14  ;;  %v6292_v14 = vld [vmem:[#allocation3 + $0x18c] sm:$0xf] }
  0x9f   : > { %v525_v19 = vmax.f32 %v486_v16, 0.0  ;;  %v4832_v16 = vld [vmem:[#allocation3 + $0x1a8] sm:$0xf0] }
  0xa4   : > { %v487_v17 = vpop.f32.mrf.mxu0 }
  0xa5   : > { %v488_v18 = vadd.f32 %v6979_v15, %v487_v17  ;;  %v4790_v17 = vld [vmem:[#allocation3 + $0x140] sm:$0xf] }
  0xa7   : > { %v526_v20 = vmax.f32 %v488_v18, 0.0 }
  0xa9   : > { %v541_v21 = vpack.c.bf16 %v526_v20, %v525_v19  ;;  %v4835_v19 = vor.u32 %v6292_v14, %v4832_v16  ;;  %v6287_v20 = vld [vmem:[#allocation3 + $0x15c] sm:$0xf0]  ;;  %v4664_v14 = vld [vmem:[#allocation3 + $0x60] sm:$0xf0]  ;;  %v4670_v16 = vld [vmem:[#allocation3 + $0x48] sm:$0xf] }
  0xab   : > { %4620 = vmatmul.msk.bf16.vlgmr.msra.gmra.mxu1 %vm585_vm2, %v541_v21  ;;  %v6283_v21 = vld [vmem:[#allocation3 + $0x144] sm:$0xf] }
  0xac   : > { %v490_v22 = vpop.f32.mrf.mxu0  ;;  %1233 = vmatpush.bf16.msrb.mxu1 %v4835_v19 }
  0xad   : > { %v491_v23 = vadd.f32 %v6979_v15, %v490_v22  ;;  %v4792_v22 = vld [vmem:[#allocation3 + $0x160] sm:$0xf0] }
  0xaf   : > { %v527_v26 = vmax.f32 %v491_v23, 0.0  ;;  %v4791_v23 = vor.u32 %v6287_v20, %v4790_v17  ;;  %v6256_v17 = vld [vmem:[#allocation3 + $0x64] sm:$0xf0]  ;;  %v6252_v20 = vld [vmem:[#allocation3 + $0x4c] sm:$0xf] }
  0xb0   : > { %v4671_v19 = vor.u32 %v6256_v17, %v4670_v16  ;;  %v4872_v17 = vld [vmem:[#allocation3 + $0x1f0] sm:$0xf0] }
  0xb1   : > { %1087 = vmatpush.bf16.msra.mxu2 %v4791_v23  ;;  %v4630_v23 = vld [vmem:[#allocation3] sm:$0xf] }
  0xb4   : > { %v492_v24 = vpop.f32.mrf.mxu0 }
  0xb5   : > { %v493_v25 = vadd.f32 %v6979_v15, %v492_v24  ;;  %v4798_v24 = vld [vmem:[#allocation3 + $0x148] sm:$0xf] }
  0xb7   : > { %v528_v27 = vmax.f32 %v493_v25, 0.0  ;;  %v6288_v25 = vld [vmem:[#allocation3 + $0x164] sm:$0xf0] }
  0xb9   : > { %v542_v28 = vpack.c.bf16 %v528_v27, %v527_v26  ;;  %v6284_v26 = vld [vmem:[#allocation3 + $0x14c] sm:$0xf]  ;;  %v4795_v27 = vor.u32 %v6283_v21, %v4792_v22 }
  0xba   : > { %v4672_v21 = vld [vmem:[#allocation3 + $0x68] sm:$0xf0] }
  0xbb   : > { %4621 = vmatmul.msk.bf16.gmra.mxu1 %vm585_vm2, %v542_v28  ;;  %v4799_v28 = vor.u32 %v6288_v25, %v4798_v24  ;;  %1136 = vmatpush.bf16.msra.mxu3 %v4795_v27  ;;  %v4675_v22 = vor.u32 %v6252_v20, %v4672_v21  ;;  %v6247_v24 = vld [vmem:[#allocation3 + $0x1c] sm:$0xf0]  ;;  %v6243_v25 = vld [vmem:[#allocation3 + $0x4] sm:$0xf] }
  0xbc   : > { %v495_v29 = vpop.f32.mrf.mxu0  ;;  %v4632_v27 = vld [vmem:[#allocation3 + $0x20] sm:$0xf0] }
  0xbd   : > { %v496_v30 = vadd.f32 %v6979_v15, %v495_v29  ;;  %v4800_v29 = vld [vmem:[#allocation3 + $0x168] sm:$0xf0]  ;;  %1185 = vmatpush.bf16.msrb.mxu0 %v4799_v28  ;;  %v4638_v28 = vld [vmem:[#allocation3 + $0x8] sm:$0xf] }
  0xbf   : > { %v529_v33 = vmax.f32 %v496_v30, 0.0  ;;  %v4758_v30 = vld [vmem:[#allocation3 + $0x100] sm:$0xf] }
  0xc4   : > { %v497_v31 = vpop.f32.mrf.mxu0 }
  0xc5   : > { %v498_v32 = vadd.f32 %v6979_v15, %v497_v31  ;;  %v6279_v31 = vld [vmem:[#allocation3 + $0x11c] sm:$0xf0] }
  0xc7   : > { %v530_v34 = vmax.f32 %v498_v32, 0.0  ;;  %v4803_v32 = vor.u32 %v6284_v26, %v4800_v29  ;;  %v4631_v26 = vor.u32 %v6247_v24, %v4630_v23  ;;  %v6248_v29 = vld [vmem:[#allocation3 + $0x24] sm:$0xf0]  ;;  %v4880_v23 = vld [vmem:[#allocation3 + $0x1f8] sm:$0xf0] }
  0xc9   : > { %v543_v35 = vpack.c.bf16 %v530_v34, %v529_v33  ;;  %v6275_v33 = vld [vmem:[#allocation3 + $0x104] sm:$0xf]  ;;  %1234 = vmatpush.bf16.msrb.mxu1 %v4803_v32  ;;  %v4639_v32 = vor.u32 %v6248_v29, %v4638_v28  ;;  %v6293_v28 = vld [vmem:[#allocation3 + $0x194] sm:$0xf] }
  0xca   : > { %v4760_v34 = vld [vmem:[#allocation3 + $0x120] sm:$0xf0] }
  0xcb   : > { %4622 = vmatmul.msk.bf16.gmra.mxu1 %vm585_vm2, %v543_v35  ;;  %v4766_v35 = vld [vmem:[#allocation3 + $0x108] sm:$0xf] }
  0xcc   : > { %v500_v36 = vpop.f32.mrf.mxu0 }
  0xcd   : > { %v501_v37 = vadd.f32 %v6979_v15, %v500_v36  ;;  %v6280_v36 = vld [vmem:[#allocation3 + $0x124] sm:$0xf0] }
  0xcf   : > { %v531_v40 = vmax.f32 %v501_v37, 0.0  ;;  %v6276_v37 = vld [vmem:[#allocation3 + $0x10c] sm:$0xf] }
  0xd4   : > { %v502_v38 = vpop.f32.mrf.mxu0 }
  0xd5   : > { %v503_v39 = vadd.f32 %v6979_v15, %v502_v38  ;;  %v4759_v38 = vor.u32 %v6279_v31, %v4758_v30  ;;  %v4635_v31 = vor.u32 %v6243_v25, %v4632_v27  ;;  %v6297_v27 = vld [vmem:[#allocation3 + $0x1ac] sm:$0xf0] }
  0xd7   : > { %v532_v41 = vmax.f32 %v503_v39, 0.0  ;;  %v4767_v39 = vor.u32 %v6280_v36, %v4766_v35  ;;  %1088 = vmatpush.bf16.msra.mxu2 %v4759_v38 }
  0xd9   : > { %v544_v42 = vpack.c.bf16 %v532_v41, %v531_v40  ;;  %v4768_v40 = vld [vmem:[#allocation3 + $0x128] sm:$0xf0]  ;;  %v4763_v41 = vor.u32 %v6275_v33, %v4760_v34  ;;  %1186 = vmatpush.bf16.msrb.mxu0 %v4767_v39 }
  0xda   : > { %v6244_v33 = vld [vmem:[#allocation3 + $0xc] sm:$0xf] }
  0xdb   : > { %4623 = vmatmul.msk.bf16.gmra.mxu1 %vm585_vm2, %v544_v42  ;;  %v4771_v42 = vor.u32 %v6276_v37, %v4768_v40  ;;  %1137 = vmatpush.bf16.msra.mxu3 %v4763_v41  ;;  %v4640_v34 = vld [vmem:[#allocation3 + $0x28] sm:$0xf0] }
  0xdc   : > { %v505_v43 = vpop.f32.mrf.mxu0  ;;  %v4643_v36 = vor.u32 %v6244_v33, %v4640_v34  ;;  %v6298_v33 = vld [vmem:[#allocation3 + $0x1b4] sm:$0xf0]  ;;  %v6294_v34 = vld [vmem:[#allocation3 + $0x19c] sm:$0xf] }
  0xdd   : > { %v506_v44 = vadd.f32 %v6979_v15, %v505_v43  ;;  %1235 = vmatpush.bf16.msrb.mxu1 %v4771_v42  ;;  %v7008_v42 = vld [vmem:[%s7720_s7 + $0x1] ss:$0 sm:$0xff] }
  0xdf   : > { %v533_v47 = vmax.f32 %v506_v44, 0.0 }
  0xe1   : > { %1236 = vmatpush.bf16.msrb.mxu1 %v4739_v59 }
  0xe4   : > { %v507_v45 = vpop.f32.mrf.mxu0 }
  0xe5   : > { %v508_v46 = vadd.f32 %v6979_v15, %v507_v45  ;;  %1237 = vmatpush.bf16.msrb.mxu1 %v4707_v9 }
  0xe7   : > { %v534_v48 = vmax.f32 %v508_v46, 0.0  ;;  %v4726_v46 = vld [vmem:[#allocation3 + $0xc0] sm:$0xf] }
  0xe9   : > { %v545_v49 = vpack.c.bf16 %v534_v48, %v533_v47  ;;  %v6271_v47 = vld [vmem:[#allocation3 + $0xdc] sm:$0xf0]  ;;  %v6267_v48 = vld [vmem:[#allocation3 + $0xc4] sm:$0xf]  ;;  %1238 = vmatpush.bf16.msrb.mxu1 %v4675_v22  ;;  %v6302_v22 = vld [vmem:[#allocation3 + $0x1dc] sm:$0xf] }
  0xea   : > { %v4883_v25 = vor.u32 %v6302_v22, %v4880_v23 }
  0xeb   : > { %4624 = vmatmul.msk.bf16.gmra.mxu1 %vm585_vm2, %v545_v49  ;;  %v4727_v49 = vor.u32 %v6271_v47, %v4726_v46 }
  0xec   : > { %v510_v50 = vpop.f32.mrf.mxu0 }
  0xed   : > { %v511_v51 = vadd.f32 %v6979_v15, %v510_v50  ;;  %v4728_v50 = vld [vmem:[#allocation3 + $0xe0] sm:$0xf0]  ;;  %1089 = vmatpush.bf16.msra.mxu2 %v4727_v49  ;;  %1239 = vmatpush.bf16.msrb.mxu1 %v4643_v36 }
  0xee   : > { %v4731_v55 = vor.u32 %v6267_v48, %v4728_v50 }
  0xef   : > { %v535_v61 = vmax.f32 %v511_v51, 0.0  ;;  %v4734_v51 = vld [vmem:[#allocation3 + $0xc8] sm:$0xf] }
  0xf0   : > { %1138 = vmatpush.bf16.msra.mxu3 %v4731_v55 }
  0xf1   : > { %1428 = vmatpush.bf16.msra.mxu1 %v4883_v25  ;;  %v6261_v25 = vld [vmem:[#allocation3 + $0x94] sm:$0xf] }
  0xf4   : > { %v512_v52 = vpop.f32.mrf.mxu0 }
  0xf5   : > { %v513_v53 = vadd.f32 %v6979_v15, %v512_v52  ;;  %v6272_v52 = vld [vmem:[#allocation3 + $0xe4] sm:$0xf0] }
  0xf6   : > { %v4735_v56 = vor.u32 %v6272_v52, %v4734_v51 }
  0xf7   : > { %v536_v62 = vmax.f32 %v513_v53, 0.0 }
  0xf8   : > { %1187 = vmatpush.bf16.msrb.mxu0 %v4735_v56 }
  0xf9   : > { %v546_v4 = vpack.c.bf16 %v536_v62, %v535_v61  ;;  %v4694_v61 = vld [vmem:[#allocation3 + $0x80] sm:$0xf] }
  0xfa   : > { %v6263_v62 = vld [vmem:[#allocation3 + $0x9c] sm:$0xf0] }
  0xfb   : > { %4625 = vmatmul.msk.bf16.gmra.mxu1 %vm585_vm2, %v546_v4  ;;  %v4695_v0 = vor.u32 %v6263_v62, %v4694_v61  ;;  %v4699_v4 = vor.u32 %v6259_v63, %v4696_v1 }
  0xfc   : > { %v515_v18 = vpop.f32.mrf.mxu0  ;;  %1188 = vmatpush.bf16.msrb.mxu0 %v4703_v5 }
  0xfd   : > { %v516_v43 = vadd.f32 %v6979_v15, %v515_v18  ;;  %1090 = vmatpush.bf16.msra.mxu2 %v4695_v0  ;;  %1139 = vmatpush.bf16.msra.mxu3 %v4699_v4  ;;  %v4667_v18 = vor.u32 %v6251_v12, %v4664_v14  ;;  %v4870_v12 = vld [vmem:[#allocation3 + $0x1d0] sm:$0xf]  ;;  %v6301_v14 = vld [vmem:[#allocation3 + $0x1d4] sm:$0xf] }
  0xfe   : > { %v4875_v20 = vor.u32 %v6301_v14, %v4872_v17  ;;  %v4750_v14 = vld [vmem:[#allocation3 + $0xd8] sm:$0xf] }
  0xff   : > { %v537_v53 = vmax.f32 %v516_v43, 0.0 }
 0x100   : > { %1189 = vmatpush.bf16.msrb.mxu0 %v4671_v19  ;;  %v6306_v19 = vld [vmem:[#allocation3 + $0x1f4] sm:$0xf0] }
 0x101   : > { %1091 = vmatpush.bf16.msra.mxu2 %v4663_v13  ;;  %1140 = vmatpush.bf16.msra.mxu3 %v4667_v18  ;;  %v6305_v13 = vld [vmem:[#allocation3 + $0x1ec] sm:$0xf0]  ;;  %v4878_v18 = vld [vmem:[#allocation3 + $0x1d8] sm:$0xf] }
 0x102   : > { %v4871_v16 = vor.u32 %v6305_v13, %v4870_v12  ;;  %v4879_v21 = vor.u32 %v6306_v19, %v4878_v18  ;;  %v4744_v13 = vld [vmem:[#allocation3 + $0xf0] sm:$0xf0]  ;;  %v6270_v19 = vld [vmem:[#allocation3 + $0xdc] sm:$0xf] }
 0x104   : > { %v517_v44 = vpop.f32.mrf.mxu0  ;;  %1190 = vmatpush.bf16.msrb.mxu0 %v4639_v32 }
 0x105   : > { %v518_v45 = vadd.f32 %v6979_v15, %v517_v44  ;;  %1092 = vmatpush.bf16.msra.mxu2 %v4631_v26  ;;  %1141 = vmatpush.bf16.msra.mxu3 %v4635_v31  ;;  %v4838_v26 = vld [vmem:[#allocation3 + $0x190] sm:$0xf]  ;;  %v4846_v31 = vld [vmem:[#allocation3 + $0x198] sm:$0xf] }
 0x106   : > { %v4839_v29 = vor.u32 %v6297_v27, %v4838_v26  ;;  %v4847_v36 = vor.u32 %v6298_v33, %v4846_v31  ;;  %v4712_v26 = vld [vmem:[#allocation3 + $0xb0] sm:$0xf0]  ;;  %v6262_v31 = vld [vmem:[#allocation3 + $0x9c] sm:$0xf]  ;;  %v4678_v33 = vld [vmem:[#allocation3 + $0x50] sm:$0xf] }
 0x107   : > { %v538_v54 = vmax.f32 %v518_v45, 0.0 }
 0x108   : > { %1379 = vmatpush.bf16.msra.mxu0 %v4879_v21  ;;  %v4710_v21 = vld [vmem:[#allocation3 + $0x90] sm:$0xf] }
 0x109   : > { %v547_v60 = vpack.c.bf16 %v538_v54, %v537_v53  ;;  %1281 = vmatpush.bf16.msrb.mxu2 %v4871_v16  ;;  %1330 = vmatpush.bf16.msrb.mxu3 %v4875_v20  ;;  %v6274_v16 = vld [vmem:[#allocation3 + $0xf4] sm:$0xf0]  ;;  %v4752_v20 = vld [vmem:[#allocation3 + $0xf8] sm:$0xf0] }
 0x10a   : > { %v4751_v22 = vor.u32 %v6274_v16, %v4750_v14  ;;  %v4755_v23 = vor.u32 %v6270_v19, %v4752_v20  ;;  %v7077_v14 = vld [vmem:[%s7720_s7 + $0x2] sm:$0xff] }
 0x10b   : > { %4626 = vmatmul.msk.bf16.gmra.mxu1 %vm585_vm2, %v547_v60 }
 0x10c   : > { %v520_v8 = vpop.f32.mrf.mxu0  ;;  %1380 = vmatpush.bf16.msra.mxu0 %v4847_v36  ;;  %v4680_v36 = vld [vmem:[#allocation3 + $0x70] sm:$0xf0] }
 0x10d   : > { %v521_v30 = vadd.f32 %v6979_v15, %v520_v8  ;;  %1282 = vmatpush.bf16.msrb.mxu2 %v4839_v29  ;;  %v4718_v29 = vld [vmem:[#allocation3 + $0x98] sm:$0xf] }
 0x10f   : > { %v539_v38 = vmax.f32 %v521_v30, 0.0  ;;  %v4840_v30 = vld [vmem:[#allocation3 + $0x1b0] sm:$0xf0] }
 0x110   : > { %v4843_v32 = vor.u32 %v6293_v28, %v4840_v30  ;;  %v4715_v28 = vor.u32 %v6261_v25, %v4712_v26  ;;  %v6266_v30 = vld [vmem:[#allocation3 + $0xb4] sm:$0xf0] }
 0x112   : > { %1331 = vmatpush.bf16.msrb.mxu3 %v4843_v32  ;;  %v4720_v32 = vld [vmem:[#allocation3 + $0xb8] sm:$0xf0] }
 0x114   : > { %v522_v35 = vpop.f32.mrf.mxu0 }
 0x115   : > { %v523_v37 = vadd.f32 %v6979_v15, %v522_v35  ;;  %v4848_v35 = vld [vmem:[#allocation3 + $0x1b8] sm:$0xf0] }
 0x117   : > { %v540_v39 = vmax.f32 %v523_v37, 0.0  ;;  %v4851_v37 = vor.u32 %v6294_v34, %v4848_v35  ;;  %v6257_v34 = vld [vmem:[#allocation3 + $0x6c] sm:$0xf0]  ;;  %v6253_v35 = vld [vmem:[#allocation3 + $0x54] sm:$0xf] }
 0x119   : > { %v548_v40 = vpack.c.bf16 %v540_v39, %v539_v38  ;;  %v4806_v38 = vld [vmem:[#allocation3 + $0x150] sm:$0xf]  ;;  %1429 = vmatpush.bf16.msra.mxu1 %v4851_v37  ;;  %v4719_v37 = vor.u32 %v6266_v30, %v4718_v29 }
 0x11a   : > { %v6289_v39 = vld [vmem:[#allocation3 + $0x16c] sm:$0xf0] }
 0x11b   : > { %4627 = vmatmul.msk.bf16.gmra.mxu1 %vm585_vm2, %v548_v40  ;;  %v6285_v40 = vld [vmem:[#allocation3 + $0x154] sm:$0xf] }
 0x128   : > { %v619_v41 = vpop.f32.mrf.mxu1 }
 0x129   : > { %v620_v43 = vadd.f32 %v7008_v42, %v619_v41 }
 0x12b   : > { %v659_v45 = vmax.f32 %v620_v43, 0.0  ;;  %v4807_v43 = vor.u32 %v6289_v39, %v4806_v38  ;;  %v4723_v38 = vor.u32 %v6262_v31, %v4720_v32  ;;  %v4686_v39 = vld [vmem:[#allocation3 + $0x58] sm:$0xf] }
 0x12d   : > { %1283 = vmatpush.bf16.msrb.mxu2 %v4807_v43  ;;  %v6258_v43 = vld [vmem:[#allocation3 + $0x74] sm:$0xf0] }
 0x130   : > { %v621_v44 = vpop.f32.mrf.mxu1 }
 0x131   : > { %v622_v15 = vadd.f32 %v7008_v42, %v621_v44  ;;  %v4808_v44 = vld [vmem:[#allocation3 + $0x170] sm:$0xf0] }
 0x133   : > { %v660_v46 = vmax.f32 %v622_v15, 0.0  ;;  %v4814_v15 = vld [vmem:[#allocation3 + $0x158] sm:$0xf] }
 0x135   : > { %v7012_v47 = vpack.c.bf16 %v660_v46, %v659_v45  ;;  %v6290_v45 = vld [vmem:[#allocation3 + $0x174] sm:$0xf0] }
 0x137   : > { %1093 = vmatmul.bf16.vlgmr.msra.gmra.mxu2 %v7012_v47  ;;  %1142 = vmatmul.bf16.vlgmr.msra.gmra.mxu3 %v7012_v47 }
 0x138   : > { %1191 = vmatmul.bf16.vlgmr.msrb.gmra.mxu0 %v7012_v47  ;;  %1240 = vmatmul.bf16.vlgmr.msrb.gmra.mxu1 %v7012_v47  ;;  %v624_v48 = vpop.f32.mrf.mxu1 }
 0x139   : > { %v625_v49 = vadd.f32 %v7008_v42, %v624_v48  ;;  %v4811_v48 = vor.u32 %v6285_v40, %v4808_v44  ;;  %v4679_v40 = vor.u32 %v6257_v34, %v4678_v33  ;;  %v6254_v44 = vld [vmem:[#allocation3 + $0x5c] sm:$0xf] }
 0x13b   : > { %v661_v52 = vmax.f32 %v625_v49, 0.0  ;;  %v4815_v49 = vor.u32 %v6290_v45, %v4814_v15  ;;  %1332 = vmatpush.bf16.msrb.mxu3 %v4811_v48  ;;  %v4688_v15 = vld [vmem:[#allocation3 + $0x78] sm:$0xf0] }
 0x13d   : > { %1381 = vmatpush.bf16.msra.mxu0 %v4815_v49  ;;  %v4687_v49 = vor.u32 %v6258_v43, %v4686_v39 }
 0x140   : > { %v626_v50 = vpop.f32.mrf.mxu1 }
 0x141   : > { %v627_v51 = vadd.f32 %v7008_v42, %v626_v50  ;;  %v6286_v50 = vld [vmem:[#allocation3 + $0x15c] sm:$0xf] }
 0x143   : > { %v662_v53 = vmax.f32 %v627_v51, 0.0  ;;  %v4816_v51 = vld [vmem:[#allocation3 + $0x178] sm:$0xf0] }
 0x145   : > { %v7020_v54 = vpack.c.bf16 %v662_v53, %v661_v52  ;;  %v4819_v53 = vor.u32 %v6286_v50, %v4816_v51  ;;  %v4691_v50 = vor.u32 %v6254_v44, %v4688_v15  ;;  %v4646_v51 = vld [vmem:[#allocation3 + $0x10] sm:$0xf] }
 0x147   : > { %1098 = vmatmul.bf16.gmra.mxu2 %v7020_v54  ;;  %1147 = vmatmul.bf16.gmra.mxu3 %v7020_v54 }
 0x148   : > { %1196 = vmatmul.bf16.gmra.mxu0 %v7020_v54  ;;  %1245 = vmatmul.bf16.gmra.mxu1 %v7020_v54  ;;  %v629_v55 = vpop.f32.mrf.mxu1 }
 0x149   : > { %v630_v56 = vadd.f32 %v7008_v42, %v629_v55  ;;  %v4774_v55 = vld [vmem:[#allocation3 + $0x110] sm:$0xf]  ;;  %1430 = vmatpush.bf16.msra.mxu1 %v4819_v53  ;;  %v6245_v53 = vld [vmem:[#allocation3 + $0x14] sm:$0xf] }
 0x14b   : > { %v663_v59 = vmax.f32 %v630_v56, 0.0  ;;  %v6281_v56 = vld [vmem:[#allocation3 + $0x12c] sm:$0xf0] }
 0x150   : > { %v631_v57 = vpop.f32.mrf.mxu1 }
 0x151   : > { %v632_v58 = vadd.f32 %v7008_v42, %v631_v57  ;;  %v6277_v57 = vld [vmem:[#allocation3 + $0x114] sm:$0xf] }
 0x153   : > { %v664_v60 = vmax.f32 %v632_v58, 0.0 }
 0x155   : > { %v7028_v61 = vpack.c.bf16 %v664_v60, %v663_v59  ;;  %v4775_v60 = vor.u32 %v6281_v56, %v4774_v55 }
 0x157   : > { %1103 = vmatmul.bf16.gmra.mxu2 %v7028_v61  ;;  %1152 = vmatmul.bf16.gmra.mxu3 %v7028_v61 }
 0x158   : > { %1201 = vmatmul.bf16.gmra.mxu0 %v7028_v61  ;;  %1250 = vmatmul.bf16.gmra.mxu1 %v7028_v61  ;;  %v634_v62 = vpop.f32.mrf.mxu1 }
 0x159   : > { %v635_v63 = vadd.f32 %v7008_v42, %v634_v62  ;;  %v4776_v62 = vld [vmem:[#allocation3 + $0x130] sm:$0xf0]  ;;  %1284 = vmatpush.bf16.msrb.mxu2 %v4775_v60 }
 0x15b   : > { %v665_v2 = vmax.f32 %v635_v63, 0.0  ;;  %v4782_v63 = vld [vmem:[#allocation3 + $0x118] sm:$0xf] }
 0x160   : > { %v636_v0 = vpop.f32.mrf.mxu1 }
 0x161   : > { %v637_v1 = vadd.f32 %v7008_v42, %v636_v0  ;;  %v4779_v0 = vor.u32 %v6277_v57, %v4776_v62  ;;  %v6250_v62 = vld [vmem:[#allocation3 + $0x34] sm:$0xf0] }
 0x163   : > { %v666_v3 = vmax.f32 %v637_v1, 0.0  ;;  %v6282_v1 = vld [vmem:[#allocation3 + $0x134] sm:$0xf0]  ;;  %1333 = vmatpush.bf16.msrb.mxu3 %v4779_v0 }
 0x165   : > { %v7036_v4 = vpack.c.bf16 %v666_v3, %v665_v2  ;;  %v6278_v2 = vld [vmem:[#allocation3 + $0x11c] sm:$0xf] }
 0x166   : > { %v4784_v3 = vld [vmem:[#allocation3 + $0x138] sm:$0xf0] }
 0x167   : > { %1108 = vmatmul.bf16.gmra.mxu2 %v7036_v4  ;;  %1157 = vmatmul.bf16.gmra.mxu3 %v7036_v4 }
 0x168   : > { %1206 = vmatmul.bf16.gmra.mxu0 %v7036_v4  ;;  %1255 = vmatmul.bf16.gmra.mxu1 %v7036_v4  ;;  %v639_v5 = vpop.f32.mrf.mxu1 }
 0x169   : > { %v640_v6 = vadd.f32 %v7008_v42, %v639_v5 }
 0x16b   : > { %v667_v9 = vmax.f32 %v640_v6, 0.0  ;;  %v4783_v6 = vor.u32 %v6282_v1, %v4782_v63  ;;  %v6246_v63 = vld [vmem:[#allocation3 + $0x1c] sm:$0xf] }
 0x16d   : > { %1382 = vmatpush.bf16.msra.mxu0 %v4783_v6 }
 0x170   : > { %v641_v7 = vpop.f32.mrf.mxu1 }
 0x171   : > { %v642_v8 = vadd.f32 %v7008_v42, %v641_v7  ;;  %v4787_v7 = vor.u32 %v6278_v2, %v4784_v3  ;;  %1383 = vmatpush.bf16.msra.mxu0 %v4751_v22  ;;  %v4656_v2 = vld [vmem:[#allocation3 + $0x38] sm:$0xf0] }
 0x172   : > { %v4659_v3 = vor.u32 %v6246_v63, %v4656_v2 }
 0x173   : > { %v668_v10 = vmax.f32 %v642_v8, 0.0  ;;  %v4742_v8 = vld [vmem:[#allocation3 + $0xd0] sm:$0xf]  ;;  %1431 = vmatpush.bf16.msra.mxu1 %v4787_v7 }
 0x175   : > { %v7044_v11 = vpack.c.bf16 %v668_v10, %v667_v9  ;;  %v6273_v9 = vld [vmem:[#allocation3 + $0xec] sm:$0xf0]  ;;  %v6269_v10 = vld [vmem:[#allocation3 + $0xd4] sm:$0xf]  ;;  %1384 = vmatpush.bf16.msra.mxu0 %v4719_v37 }
 0x176   : > { %v4743_v12 = vor.u32 %v6273_v9, %v4742_v8  ;;  %v4747_v18 = vor.u32 %v6269_v10, %v4744_v13 }
 0x177   : > { %1113 = vmatmul.bf16.gmra.mxu2 %v7044_v11  ;;  %1162 = vmatmul.bf16.gmra.mxu3 %v7044_v11 }
 0x178   : > { %1211 = vmatmul.bf16.gmra.mxu0 %v7044_v11  ;;  %1260 = vmatmul.bf16.gmra.mxu1 %v7044_v11  ;;  %v644_v24 = vpop.f32.mrf.mxu1 }
 0x179   : > { %v645_v41 = vadd.f32 %v7008_v42, %v644_v24  ;;  %v6265_v24 = vld [vmem:[#allocation3 + $0xac] sm:$0xf0]  ;;  %1285 = vmatpush.bf16.msrb.mxu2 %v4743_v12  ;;  %1334 = vmatpush.bf16.msrb.mxu3 %v4747_v18  ;;  %v7085_v18 = vperm.slane %v7077_v14, 3 }
 0x17a   : > { %v4711_v27 = vor.u32 %v6265_v24, %v4710_v21  ;;  %1432 = vmatpush.bf16.msra.mxu1 %v4755_v23  ;;  %1385 = vmatpush.bf16.msra.mxu0 %v4687_v49  ;;  %v7092_v23 = vperm.slane %v7077_v14, 0  ;;  %v7095_v24 = vperm.slane %v7077_v14, 1 }
 0x17b   : > { %v669_v58 = vmax.f32 %v645_v41, 0.0  ;;  %v4683_v41 = vor.u32 %v6253_v35, %v4680_v36 }
 0x17d   : > { %1286 = vmatpush.bf16.msrb.mxu2 %v4711_v27  ;;  %1335 = vmatpush.bf16.msrb.mxu3 %v4715_v28 }
 0x17e   : > { %1433 = vmatpush.bf16.msra.mxu1 %v4723_v38 }
 0x180   : > { %v646_v46 = vpop.f32.mrf.mxu1 }
 0x181   : > { %v647_v52 = vadd.f32 %v7008_v42, %v646_v46  ;;  %1287 = vmatpush.bf16.msrb.mxu2 %v4679_v40  ;;  %1336 = vmatpush.bf16.msrb.mxu3 %v4683_v41 }
 0x182   : > { %1434 = vmatpush.bf16.msra.mxu1 %v4691_v50 }
 0x183   : > { %v670_v59 = vmax.f32 %v647_v52, 0.0  ;;  %v6249_v52 = vld [vmem:[#allocation3 + $0x2c] sm:$0xf0] }
 0x184   : > { %v4647_v57 = vor.u32 %v6249_v52, %v4646_v51 }
 0x185   : > { %v7052_v5 = vpack.c.bf16 %v670_v59, %v669_v58  ;;  %v4648_v58 = vld [vmem:[#allocation3 + $0x30] sm:$0xf0]  ;;  %v4654_v59 = vld [vmem:[#allocation3 + $0x18] sm:$0xf] }
 0x186   : > { %v4651_v60 = vor.u32 %v6245_v53, %v4648_v58  ;;  %v4655_v1 = vor.u32 %v6250_v62, %v4654_v59  ;;  %1288 = vmatpush.bf16.msrb.mxu2 %v4647_v57  ;;  %1435 = vmatpush.bf16.msra.mxu1 %v4659_v3 }
 0x187   : > { %1118 = vmatmul.bf16.gmra.mxu2 %v7052_v5  ;;  %1167 = vmatmul.bf16.gmra.mxu3 %v7052_v5 }
 0x188   : > { %1216 = vmatmul.bf16.gmra.mxu0 %v7052_v5  ;;  %1265 = vmatmul.bf16.gmra.mxu1 %v7052_v5  ;;  %v649_v17 = vpop.f32.mrf.mxu1 }
 0x189   : > { %v650_v45 = vadd.f32 %v7008_v42, %v649_v17  ;;  %1337 = vmatpush.bf16.msrb.mxu3 %v4651_v60  ;;  %1386 = vmatpush.bf16.msra.mxu0 %v4655_v1 }
 0x18b   : > { %v671_v55 = vmax.f32 %v650_v45, 0.0 }
 0x190   : > { %v651_v46 = vpop.f32.mrf.mxu1 }
 0x191   : > { %v652_v48 = vadd.f32 %v7008_v42, %v651_v46 }
 0x193   : > { %v672_v56 = vmax.f32 %v652_v48, 0.0 }
 0x195   : > { %v7060_v0 = vpack.c.bf16 %v672_v56, %v671_v55 }
 0x197   : > { %1123 = vmatmul.bf16.gmra.mxu2 %v7060_v0  ;;  %1172 = vmatmul.bf16.gmra.mxu3 %v7060_v0 }
 0x198   : > { %1221 = vmatmul.bf16.gmra.mxu0 %v7060_v0  ;;  %1270 = vmatmul.bf16.gmra.mxu1 %v7060_v0  ;;  %v654_v6 = vpop.f32.mrf.mxu1 }
 0x199   : > { %v655_v7 = vadd.f32 %v7008_v42, %v654_v6 }
 0x19b   : > { %v673_v10 = vmax.f32 %v655_v7, 0.0 }
 0x1a0   : > { %v656_v8 = vpop.f32.mrf.mxu1 }
 0x1a1   : > { %v657_v9 = vadd.f32 %v7008_v42, %v656_v8  ;;  %v7082_v42 = vperm.slane %v7077_v14, 2 }
 0x1a3   : > { %v674_v12 = vmax.f32 %v657_v9, 0.0 }
 0x1a5   : > { %v7068_v13 = vpack.c.bf16 %v674_v12, %v673_v10 }
 0x1a7   : > { %1128 = vmatmul.bf16.gmra.mxu2 %v7068_v13  ;;  %1177 = vmatmul.bf16.gmra.mxu3 %v7068_v13 }
 0x1a8   : > { %1226 = vmatmul.bf16.gmra.mxu0 %v7068_v13  ;;  %1275 = vmatmul.bf16.gmra.mxu1 %v7068_v13 }
 0x1b5   : > { %v1192_v16 = vpop.f32.mrf.mxu0  ;;  %v1241_v17 = vpop.f32.mrf.mxu1 }
 0x1b6   : > { %v1193_v21 = vadd.f32 %v1192_v16, %v7082_v42  ;;  %v1242_v22 = vadd.f32 %v1241_v17, %v7085_v18 }
 0x1b7   : > { %1289 = vmatmul.bf16.vlgmr.msrb.gmra.mxu2 %v7012_v47  ;;  %1338 = vmatmul.bf16.vlgmr.msrb.gmra.mxu3 %v7012_v47 }
 0x1b8   : > { %1387 = vmatmul.bf16.vlgmr.msra.gmra.mxu0 %v7012_v47  ;;  %1436 = vmatmul.bf16.vlgmr.msra.gmra.mxu1 %v7012_v47  ;;  %v1479_v29 = vmax.f32 %v1193_v21, 0.0  ;;  %v1480_v47 = vmax.f32 %v1242_v22, 0.0 }
 0x1ba   : > { %v1094_v19 = vpop.f32.mrf.mxu2  ;;  %v1143_v20 = vpop.f32.mrf.mxu3 }
 0x1bb   : > { %v1095_v32 = vadd.f32 %v1094_v19, %v7092_v23  ;;  %v1144_v33 = vadd.f32 %v1143_v20, %v7095_v24 }
 0x1bd   : > { %v1194_v25 = vpop.f32.mrf.mxu0  ;;  %v1243_v26 = vpop.f32.mrf.mxu1  ;;  %v1477_v40 = vmax.f32 %v1095_v32, 0.0  ;;  %v1478_v41 = vmax.f32 %v1144_v33, 0.0 }
 0x1be   : > { %v1195_v27 = vadd.f32 %v1194_v25, %v7082_v42  ;;  %v1244_v28 = vadd.f32 %v1243_v26, %v7085_v18 }
 0x1c0   : > { %v1487_v30 = vmax.f32 %v1195_v27, 0.0  ;;  %v1488_v31 = vmax.f32 %v1244_v28, 0.0 }
 0x1c2   : > { %v1648_v34 = vmax.f32 %v1479_v29, %v1487_v30  ;;  %v1669_v35 = vmax.f32 %v1480_v47, %v1488_v31  ;;  %v1096_v36 = vpop.f32.mrf.mxu2  ;;  %v1145_v37 = vpop.f32.mrf.mxu3 }
 0x1c3   : > { %v1097_v38 = vadd.f32 %v1096_v36, %v7092_v23  ;;  %v1146_v39 = vadd.f32 %v1145_v37, %v7095_v24 }
 0x1c5   : > { %v1485_v43 = vmax.f32 %v1097_v38, 0.0  ;;  %v1486_v44 = vmax.f32 %v1146_v39, 0.0  ;;  %v1197_v15 = vpop.f32.mrf.mxu0  ;;  %v1246_v45 = vpop.f32.mrf.mxu1 }
 0x1c6   : > { %v1198_v46 = vadd.f32 %v1197_v15, %v7082_v42  ;;  %v1247_v48 = vadd.f32 %v1246_v45, %v7085_v18 }
 0x1c7   : > { %v1606_v49 = vmax.f32 %v1477_v40, %v1485_v43  ;;  %v1627_v50 = vmax.f32 %v1478_v41, %v1486_v44  ;;  %1294 = vmatmul.bf16.gmra.mxu2 %v7020_v54  ;;  %1343 = vmatmul.bf16.gmra.mxu3 %v7020_v54 }
 0x1c8   : > { %v1495_v51 = vmax.f32 %v1198_v46, 0.0  ;;  %v1496_v52 = vmax.f32 %v1247_v48, 0.0  ;;  %1392 = vmatmul.bf16.gmra.mxu0 %v7020_v54  ;;  %1441 = vmatmul.bf16.gmra.mxu1 %v7020_v54 }
 0x1ca   : > { %v1649_v53 = vmax.f32 %v1648_v34, %v1495_v51  ;;  %v1670_v55 = vmax.f32 %v1669_v35, %v1496_v52  ;;  %v1099_v56 = vpop.f32.mrf.mxu2  ;;  %v1148_v57 = vpop.f32.mrf.mxu3 }
 0x1cb   : > { %v1100_v58 = vadd.f32 %v1099_v56, %v7092_v23  ;;  %v1149_v59 = vadd.f32 %v1148_v57, %v7095_v24 }
 0x1cd   : > { %v1493_v60 = vmax.f32 %v1100_v58, 0.0  ;;  %v1494_v62 = vmax.f32 %v1149_v59, 0.0  ;;  %v1199_v63 = vpop.f32.mrf.mxu0  ;;  %v1248_v1 = vpop.f32.mrf.mxu1 }
 0x1ce   : > { %v1200_v2 = vadd.f32 %v1199_v63, %v7082_v42  ;;  %v1249_v3 = vadd.f32 %v1248_v1, %v7085_v18 }
 0x1cf   : > { %v1607_v6 = vmax.f32 %v1606_v49, %v1493_v60  ;;  %v1628_v7 = vmax.f32 %v1627_v50, %v1494_v62 }
 0x1d0   : > { %v1503_v8 = vmax.f32 %v1200_v2, 0.0  ;;  %v1504_v54 = vmax.f32 %v1249_v3, 0.0 }
 0x1d2   : > { %v1650_v9 = vmax.f32 %v1649_v53, %v1503_v8  ;;  %v1671_v10 = vmax.f32 %v1670_v55, %v1504_v54  ;;  %v1101_v12 = vpop.f32.mrf.mxu2  ;;  %v1150_v16 = vpop.f32.mrf.mxu3 }
 0x1d3   : > { %v1102_v17 = vadd.f32 %v1101_v12, %v7092_v23  ;;  %v1151_v19 = vadd.f32 %v1150_v16, %v7095_v24 }
 0x1d5   : > { %v1501_v20 = vmax.f32 %v1102_v17, 0.0  ;;  %v1502_v21 = vmax.f32 %v1151_v19, 0.0  ;;  %v1202_v22 = vpop.f32.mrf.mxu0  ;;  %v1251_v25 = vpop.f32.mrf.mxu1 }
 0x1d6   : > { %v1203_v26 = vadd.f32 %v1202_v22, %v7082_v42  ;;  %v1252_v27 = vadd.f32 %v1251_v25, %v7085_v18 }
 0x1d7   : > { %v1608_v28 = vmax.f32 %v1607_v6, %v1501_v20  ;;  %v1629_v29 = vmax.f32 %v1628_v7, %v1502_v21  ;;  %1299 = vmatmul.bf16.gmra.mxu2 %v7028_v61  ;;  %1348 = vmatmul.bf16.gmra.mxu3 %v7028_v61 }
 0x1d8   : > { %v1511_v47 = vmax.f32 %v1203_v26, 0.0  ;;  %v1512_v30 = vmax.f32 %v1252_v27, 0.0  ;;  %1397 = vmatmul.bf16.gmra.mxu0 %v7028_v61  ;;  %1446 = vmatmul.bf16.gmra.mxu1 %v7028_v61 }
 0x1da   : > { %v1651_v31 = vmax.f32 %v1650_v9, %v1511_v47  ;;  %v1672_v32 = vmax.f32 %v1671_v10, %v1512_v30  ;;  %v1104_v33 = vpop.f32.mrf.mxu2  ;;  %v1153_v34 = vpop.f32.mrf.mxu3 }
 0x1db   : > { %v1105_v35 = vadd.f32 %v1104_v33, %v7092_v23  ;;  %v1154_v36 = vadd.f32 %v1153_v34, %v7095_v24 }
 0x1dd   : > { %v1509_v37 = vmax.f32 %v1105_v35, 0.0  ;;  %v1510_v38 = vmax.f32 %v1154_v36, 0.0  ;;  %v1204_v39 = vpop.f32.mrf.mxu0  ;;  %v1253_v40 = vpop.f32.mrf.mxu1 }
 0x1de   : > { %v1205_v41 = vadd.f32 %v1204_v39, %v7082_v42  ;;  %v1254_v43 = vadd.f32 %v1253_v40, %v7085_v18 }
 0x1df   : > { %v1609_v44 = vmax.f32 %v1608_v28, %v1509_v37  ;;  %v1630_v15 = vmax.f32 %v1629_v29, %v1510_v38 }
 0x1e0   : > { %v1519_v45 = vmax.f32 %v1205_v41, 0.0  ;;  %v1520_v61 = vmax.f32 %v1254_v43, 0.0 }
 0x1e2   : > { %v1652_v46 = vmax.f32 %v1651_v31, %v1519_v45  ;;  %v1673_v48 = vmax.f32 %v1672_v32, %v1520_v61  ;;  %v1106_v49 = vpop.f32.mrf.mxu2  ;;  %v1155_v50 = vpop.f32.mrf.mxu3 }
 0x1e3   : > { %v1107_v51 = vadd.f32 %v1106_v49, %v7092_v23  ;;  %v1156_v52 = vadd.f32 %v1155_v50, %v7095_v24 }
 0x1e5   : > { %v1517_v53 = vmax.f32 %v1107_v51, 0.0  ;;  %v1518_v55 = vmax.f32 %v1156_v52, 0.0  ;;  %v1207_v56 = vpop.f32.mrf.mxu0  ;;  %v1256_v57 = vpop.f32.mrf.mxu1 }
 0x1e6   : > { %v1208_v58 = vadd.f32 %v1207_v56, %v7082_v42  ;;  %v1257_v59 = vadd.f32 %v1256_v57, %v7085_v18 }
 0x1e7   : > { %v1610_v60 = vmax.f32 %v1609_v44, %v1517_v53  ;;  %v1631_v62 = vmax.f32 %v1630_v15, %v1518_v55  ;;  %1304 = vmatmul.bf16.gmra.mxu2 %v7036_v4  ;;  %1353 = vmatmul.bf16.gmra.mxu3 %v7036_v4 }
 0x1e8   : > { %v1527_v63 = vmax.f32 %v1208_v58, 0.0  ;;  %v1528_v1 = vmax.f32 %v1257_v59, 0.0  ;;  %1402 = vmatmul.bf16.gmra.mxu0 %v7036_v4  ;;  %1451 = vmatmul.bf16.gmra.mxu1 %v7036_v4 }
 0x1ea   : > { %v1653_v2 = vmax.f32 %v1652_v46, %v1527_v63  ;;  %v1674_v3 = vmax.f32 %v1673_v48, %v1528_v1  ;;  %v1109_v6 = vpop.f32.mrf.mxu2  ;;  %v1158_v7 = vpop.f32.mrf.mxu3 }
 0x1eb   : > { %v1110_v8 = vadd.f32 %v1109_v6, %v7092_v23  ;;  %v1159_v54 = vadd.f32 %v1158_v7, %v7095_v24 }
 0x1ed   : > { %v1525_v9 = vmax.f32 %v1110_v8, 0.0  ;;  %v1526_v10 = vmax.f32 %v1159_v54, 0.0  ;;  %v1209_v12 = vpop.f32.mrf.mxu0  ;;  %v1258_v16 = vpop.f32.mrf.mxu1 }
 0x1ee   : > { %v1210_v17 = vadd.f32 %v1209_v12, %v7082_v42  ;;  %v1259_v19 = vadd.f32 %v1258_v16, %v7085_v18 }
 0x1ef   : > { %v1611_v20 = vmax.f32 %v1610_v60, %v1525_v9  ;;  %v1632_v21 = vmax.f32 %v1631_v62, %v1526_v10 }
 0x1f0   : > { %v1535_v22 = vmax.f32 %v1210_v17, 0.0  ;;  %v1536_v4 = vmax.f32 %v1259_v19, 0.0 }
 0x1f2   : > { %v1654_v25 = vmax.f32 %v1653_v2, %v1535_v22  ;;  %v1675_v26 = vmax.f32 %v1674_v3, %v1536_v4  ;;  %v1111_v27 = vpop.f32.mrf.mxu2  ;;  %v1160_v28 = vpop.f32.mrf.mxu3 }
 0x1f3   : > { %v1112_v29 = vadd.f32 %v1111_v27, %v7092_v23  ;;  %v1161_v47 = vadd.f32 %v1160_v28, %v7095_v24 }
 0x1f5   : > { %v1533_v30 = vmax.f32 %v1112_v29, 0.0  ;;  %v1534_v31 = vmax.f32 %v1161_v47, 0.0  ;;  %v1212_v32 = vpop.f32.mrf.mxu0  ;;  %v1261_v33 = vpop.f32.mrf.mxu1 }
 0x1f6   : > { %v1213_v34 = vadd.f32 %v1212_v32, %v7082_v42  ;;  %v1262_v35 = vadd.f32 %v1261_v33, %v7085_v18 }
 0x1f7   : > { %v1612_v36 = vmax.f32 %v1611_v20, %v1533_v30  ;;  %v1633_v37 = vmax.f32 %v1632_v21, %v1534_v31  ;;  %1309 = vmatmul.bf16.gmra.mxu2 %v7044_v11  ;;  %1358 = vmatmul.bf16.gmra.mxu3 %v7044_v11 }
 0x1f8   : > { %v1543_v38 = vmax.f32 %v1213_v34, 0.0  ;;  %v1544_v39 = vmax.f32 %v1262_v35, 0.0  ;;  %1407 = vmatmul.bf16.gmra.mxu0 %v7044_v11  ;;  %1456 = vmatmul.bf16.gmra.mxu1 %v7044_v11 }
 0x1fa   : > { %v1655_v40 = vmax.f32 %v1654_v25, %v1543_v38  ;;  %v1676_v41 = vmax.f32 %v1675_v26, %v1544_v39  ;;  %v1114_v43 = vpop.f32.mrf.mxu2  ;;  %v1163_v44 = vpop.f32.mrf.mxu3 }
 0x1fb   : > { %v1115_v15 = vadd.f32 %v1114_v43, %v7092_v23  ;;  %v1164_v45 = vadd.f32 %v1163_v44, %v7095_v24 }
 0x1fd   : > { %v1541_v61 = vmax.f32 %v1115_v15, 0.0  ;;  %v1542_v46 = vmax.f32 %v1164_v45, 0.0  ;;  %v1214_v48 = vpop.f32.mrf.mxu0  ;;  %v1263_v49 = vpop.f32.mrf.mxu1 }
 0x1fe   : > { %v1215_v52 = vadd.f32 %v1214_v48, %v7082_v42  ;;  %v1264_v53 = vadd.f32 %v1263_v49, %v7085_v18 }
 0x1ff   : > { %v1613_v50 = vmax.f32 %v1612_v36, %v1541_v61  ;;  %v1634_v51 = vmax.f32 %v1633_v37, %v1542_v46 }
 0x200   : > { %v1551_v56 = vmax.f32 %v1215_v52, 0.0  ;;  %v1552_v57 = vmax.f32 %v1264_v53, 0.0 }
 0x202   : > { %v1116_v55 = vpop.f32.mrf.mxu2  ;;  %v1165_v11 = vpop.f32.mrf.mxu3  ;;  %v1656_v2 = vmax.f32 %v1655_v40, %v1551_v56  ;;  %v1677_v3 = vmax.f32 %v1676_v41, %v1552_v57 }
 0x203   : > { %v1117_v58 = vadd.f32 %v1116_v55, %v7092_v23  ;;  %v1166_v59 = vadd.f32 %v1165_v11, %v7095_v24 }
 0x205   : > { %v1217_v60 = vpop.f32.mrf.mxu0  ;;  %v1266_v62 = vpop.f32.mrf.mxu1  ;;  %v1549_v8 = vmax.f32 %v1117_v58, 0.0  ;;  %v1550_v54 = vmax.f32 %v1166_v59, 0.0 }
 0x206   : > { %v1218_v63 = vadd.f32 %v1217_v60, %v7082_v42  ;;  %v1267_v1 = vadd.f32 %v1266_v62, %v7085_v18 }
 0x207   : > { %1314 = vmatmul.bf16.gmra.mxu2 %v7052_v5  ;;  %1363 = vmatmul.bf16.gmra.mxu3 %v7052_v5  ;;  %v1614_v20 = vmax.f32 %v1613_v50, %v1549_v8  ;;  %v1635_v21 = vmax.f32 %v1634_v51, %v1550_v54 }
 0x208   : > { %v1559_v6 = vmax.f32 %v1218_v63, 0.0  ;;  %v1560_v7 = vmax.f32 %v1267_v1, 0.0  ;;  %1412 = vmatmul.bf16.gmra.mxu0 %v7052_v5  ;;  %1461 = vmatmul.bf16.gmra.mxu1 %v7052_v5 }
 0x20a   : > { %v1657_v9 = vmax.f32 %v1656_v2, %v1559_v6  ;;  %v1678_v10 = vmax.f32 %v1677_v3, %v1560_v7  ;;  %v1119_v12 = vpop.f32.mrf.mxu2  ;;  %v1168_v16 = vpop.f32.mrf.mxu3 }
 0x20b   : > { %v1120_v17 = vadd.f32 %v1119_v12, %v7092_v23  ;;  %v1169_v19 = vadd.f32 %v1168_v16, %v7095_v24 }
 0x20d   : > { %v1557_v22 = vmax.f32 %v1120_v17, 0.0  ;;  %v1558_v4 = vmax.f32 %v1169_v19, 0.0  ;;  %v1219_v25 = vpop.f32.mrf.mxu0  ;;  %v1268_v26 = vpop.f32.mrf.mxu1 }
 0x20e   : > { %v1220_v5 = vadd.f32 %v1219_v25, %v7082_v42  ;;  %v1269_v29 = vadd.f32 %v1268_v26, %v7085_v18 }
 0x20f   : > { %v1615_v27 = vmax.f32 %v1614_v20, %v1557_v22  ;;  %v1636_v28 = vmax.f32 %v1635_v21, %v1558_v4 }
 0x210   : > { %v1567_v31 = vmax.f32 %v1220_v5, 0.0  ;;  %v1568_v32 = vmax.f32 %v1269_v29, 0.0 }
 0x212   : > { %v1121_v47 = vpop.f32.mrf.mxu2  ;;  %v1170_v30 = vpop.f32.mrf.mxu3  ;;  %v1658_v39 = vmax.f32 %v1657_v9, %v1567_v31  ;;  %v1679_v40 = vmax.f32 %v1678_v10, %v1568_v32 }
 0x213   : > { %v1122_v33 = vadd.f32 %v1121_v47, %v7092_v23  ;;  %v1171_v34 = vadd.f32 %v1170_v30, %v7095_v24 }
 0x215   : > { %v1222_v35 = vpop.f32.mrf.mxu0  ;;  %v1271_v36 = vpop.f32.mrf.mxu1  ;;  %v1565_v44 = vmax.f32 %v1122_v33, 0.0  ;;  %v1566_v15 = vmax.f32 %v1171_v34, 0.0 }
 0x216   : > { %v1223_v37 = vadd.f32 %v1222_v35, %v7082_v42  ;;  %v1272_v38 = vadd.f32 %v1271_v36, %v7085_v18 }
 0x217   : > { %1319 = vmatmul.bf16.gmra.mxu2 %v7060_v0  ;;  %1368 = vmatmul.bf16.gmra.mxu3 %v7060_v0  ;;  %v1616_v51 = vmax.f32 %v1615_v27, %v1565_v44  ;;  %v1637_v52 = vmax.f32 %v1636_v28, %v1566_v15 }
 0x218   : > { %v1575_v41 = vmax.f32 %v1223_v37, 0.0  ;;  %v1576_v43 = vmax.f32 %v1272_v38, 0.0  ;;  %1417 = vmatmul.bf16.gmra.mxu0 %v7060_v0  ;;  %1466 = vmatmul.bf16.gmra.mxu1 %v7060_v0 }
 0x21a   : > { %v1659_v45 = vmax.f32 %v1658_v39, %v1575_v41  ;;  %v1680_v61 = vmax.f32 %v1679_v40, %v1576_v43  ;;  %v1124_v46 = vpop.f32.mrf.mxu2  ;;  %v1173_v48 = vpop.f32.mrf.mxu3 }
 0x21b   : > { %v1125_v49 = vadd.f32 %v1124_v46, %v7092_v23  ;;  %v1174_v50 = vadd.f32 %v1173_v48, %v7095_v24 }
 0x21d   : > { %v1573_v53 = vmax.f32 %v1125_v49, 0.0  ;;  %v1574_v55 = vmax.f32 %v1174_v50, 0.0  ;;  %v1224_v11 = vpop.f32.mrf.mxu0  ;;  %v1273_v56 = vpop.f32.mrf.mxu1 }
 0x21e   : > { %v1225_v0 = vadd.f32 %v1224_v11, %v7082_v42  ;;  %v1274_v59 = vadd.f32 %v1273_v56, %v7085_v18 }
 0x21f   : > { %v1617_v57 = vmax.f32 %v1616_v51, %v1573_v53  ;;  %v1638_v58 = vmax.f32 %v1637_v52, %v1574_v55 }
 0x220   : > { %v1583_v63 = vmax.f32 %v1225_v0, 0.0  ;;  %v1584_v1 = vmax.f32 %v1274_v59, 0.0  ;;  %v7188_v59 = vperm.slane %v7077_v14, 6 }
 0x222   : > { %v1126_v60 = vpop.f32.mrf.mxu2  ;;  %v1175_v62 = vpop.f32.mrf.mxu3  ;;  %v1660_v9 = vmax.f32 %v1659_v45, %v1583_v63  ;;  %v1681_v10 = vmax.f32 %v1680_v61, %v1584_v1 }
 0x223   : > { %v1127_v2 = vadd.f32 %v1126_v60, %v7092_v23  ;;  %v1176_v3 = vadd.f32 %v1175_v62, %v7095_v24 }
 0x225   : > { %v1227_v6 = vpop.f32.mrf.mxu0  ;;  %v1276_v7 = vpop.f32.mrf.mxu1  ;;  %v1581_v17 = vmax.f32 %v1127_v2, 0.0  ;;  %v1582_v19 = vmax.f32 %v1176_v3, 0.0 }
 0x226   : > { %v1228_v8 = vadd.f32 %v1227_v6, %v7082_v42  ;;  %v1277_v54 = vadd.f32 %v1276_v7, %v7085_v18  ;;  %v7191_v6 = vperm.slane %v7077_v14, 7 }
 0x227   : > { %1324 = vmatmul.bf16.gmra.mxu2 %v7068_v13  ;;  %1373 = vmatmul.bf16.gmra.mxu3 %v7068_v13  ;;  %v1618_v27 = vmax.f32 %v1617_v57, %v1581_v17  ;;  %v1639_v28 = vmax.f32 %v1638_v58, %v1582_v19 }
 0x228   : > { %v1591_v12 = vmax.f32 %v1228_v8, 0.0  ;;  %v1592_v16 = vmax.f32 %v1277_v54, 0.0  ;;  %1422 = vmatmul.bf16.gmra.mxu0 %v7068_v13  ;;  %1471 = vmatmul.bf16.gmra.mxu1 %v7068_v13 }
 0x22a   : > { %v1661_v20 = vmax.f32 %v1660_v9, %v1591_v12  ;;  %v1682_v21 = vmax.f32 %v1681_v10, %v1592_v16  ;;  %v1129_v22 = vpop.f32.mrf.mxu2  ;;  %v1178_v4 = vpop.f32.mrf.mxu3 }
 0x22b   : > { %v1130_v25 = vadd.f32 %v1129_v22, %v7092_v23  ;;  %v1179_v26 = vadd.f32 %v1178_v4, %v7095_v24 }
 0x22d   : > { %v1589_v5 = vmax.f32 %v1130_v25, 0.0  ;;  %v1590_v29 = vmax.f32 %v1179_v26, 0.0  ;;  %v1229_v47 = vpop.f32.mrf.mxu0  ;;  %v1278_v30 = vpop.f32.mrf.mxu1  ;;  %v7198_v26 = vperm.slane %v7077_v14, 4 }
 0x22e   : > { %v1230_v31 = vadd.f32 %v1229_v47, %v7082_v42  ;;  %v1279_v13 = vadd.f32 %v1278_v30, %v7085_v18 }
 0x22f   : > { %v1619_v32 = vmax.f32 %v1618_v27, %v1589_v5  ;;  %v1640_v33 = vmax.f32 %v1639_v28, %v1590_v29  ;;  %v7201_v27 = vperm.slane %v7077_v14, 5 }
 0x230   : > { %v1599_v34 = vmax.f32 %v1230_v31, 0.0  ;;  %v1600_v35 = vmax.f32 %v1279_v13, 0.0 }
 0x232   : > { %v1662_v36 = vmax.f32 %v1661_v20, %v1599_v34  ;;  %v1683_v37 = vmax.f32 %v1682_v21, %v1600_v35  ;;  %v1131_v38 = vpop.f32.mrf.mxu2  ;;  %v1180_v39 = vpop.f32.mrf.mxu3 }
 0x233   : > { %v1132_v40 = vadd.f32 %v1131_v38, %v7092_v23  ;;  %v1181_v41 = vadd.f32 %v1180_v39, %v7095_v24 }
 0x234   : > { %v1663_v43 = vrot.slane %v1662_v36, 4  ;;  %v1684_v44 = vrot.slane %v1683_v37, 4 }
 0x235   : > { %v1597_v15 = vmax.f32 %v1132_v40, 0.0  ;;  %v1598_v45 = vmax.f32 %v1181_v41, 0.0  ;;  %v1388_v61 = vpop.f32.mrf.mxu0  ;;  %v1437_v42 = vpop.f32.mrf.mxu1 }
 0x236   : > { %v1664_v46 = vmax.f32 %v1662_v36, %v1663_v43  ;;  %v1685_v18 = vmax.f32 %v1683_v37, %v1684_v44  ;;  %v1389_v12 = vadd.f32 %v1388_v61, %v7188_v59  ;;  %v1438_v21 = vadd.f32 %v1437_v42, %v7191_v6 }
 0x237   : > { %v1620_v48 = vmax.f32 %v1619_v32, %v1597_v15  ;;  %v1641_v49 = vmax.f32 %v1640_v33, %v1598_v45 }
 0x238   : > { %v1665_v50 = vrot.slane %v1664_v46, 2  ;;  %v1686_v51 = vrot.slane %v1685_v18, 2  ;;  %v1483_v5 = vmax.f32 %v1389_v12, 0.0  ;;  %v1484_v34 = vmax.f32 %v1438_v21, 0.0 }
 0x239   : > { %v1621_v52 = vrot.slane %v1620_v48, 4  ;;  %v1642_v53 = vrot.slane %v1641_v49, 4 }
 0x23a   : > { %v1666_v55 = vmax.f32 %v1664_v46, %v1665_v50  ;;  %v1687_v11 = vmax.f32 %v1685_v18, %v1686_v51  ;;  %v1290_v56 = vpop.f32.mrf.mxu2  ;;  %v1339_v23 = vpop.f32.mrf.mxu3 }
 0x23b   : > { %v1622_v57 = vmax.f32 %v1620_v48, %v1621_v52  ;;  %v1643_v24 = vmax.f32 %v1641_v49, %v1642_v53  ;;  %v1291_v37 = vadd.f32 %v1290_v56, %v7198_v26  ;;  %v1340_v38 = vadd.f32 %v1339_v23, %v7201_v27 }
 0x23c   : > { %v1667_v58 = vrot.slane %v1666_v55, 1  ;;  %v1688_v0 = vrot.slane %v1687_v11, 1 }
 0x23d   : > { %v1623_v60 = vrot.slane %v1622_v57, 2  ;;  %v1644_v62 = vrot.slane %v1643_v24, 2  ;;  %v1390_v63 = vpop.f32.mrf.mxu0  ;;  %v1439_v1 = vpop.f32.mrf.mxu1  ;;  %v1481_v48 = vmax.f32 %v1291_v37, 0.0  ;;  %v1482_v49 = vmax.f32 %v1340_v38, 0.0 }
 0x23e   : > { %v1668_v2 = vmax.f32 %v1666_v55, %v1667_v58  ;;  %v1689_v3 = vmax.f32 %v1687_v11, %v1688_v0  ;;  %v1391_v54 = vadd.f32 %v1390_v63, %v7188_v59  ;;  %v1440_v16 = vadd.f32 %v1439_v1, %v7191_v6 }
 0x23f   : > { %v1624_v7 = vmax.f32 %v1622_v57, %v1623_v60  ;;  %v1645_v8 = vmax.f32 %v1643_v24, %v1644_v62 }
 0x240   : > { %v1783_v9 = vrot.slane %v1668_v2, 6  ;;  %v1784_v10 = vrot.slane %v1689_v3, 5  ;;  %v1491_v28 = vmax.f32 %v1391_v54, 0.0  ;;  %v1492_v29 = vmax.f32 %v1440_v16, 0.0 }
 0x241   : > { %v1625_v17 = vrot.slane %v1624_v7, 1  ;;  %v1646_v19 = vrot.slane %v1645_v8, 1 }
 0x242   : > { %v1792_v20 = vsel %vm1791_vm3, %v1783_v9, %v1784_v10  ;;  %v1292_v22 = vpop.f32.mrf.mxu2  ;;  %v1341_v4 = vpop.f32.mrf.mxu3  ;;  %v1732_v39 = vmax.f32 %v1483_v5, %v1491_v28  ;;  %v1753_v41 = vmax.f32 %v1484_v34, %v1492_v29 }
 0x243   : > { %v1647_v25 = vmax.f32 %v1645_v8, %v1646_v19  ;;  %v1626_v47 = vmax.f32 %v1624_v7, %v1625_v17  ;;  %v1293_v31 = vadd.f32 %v1292_v22, %v7198_v26  ;;  %v1342_v13 = vadd.f32 %v1341_v4, %v7201_v27 }
 0x245   : > { %v1782_v30 = vrot.slane %v1647_v25, 7  ;;  %v1393_v32 = vpop.f32.mrf.mxu0  ;;  %v1442_v33 = vpop.f32.mrf.mxu1  ;;  %v1489_v15 = vmax.f32 %v1293_v31, 0.0  ;;  %v1490_v45 = vmax.f32 %v1342_v13, 0.0 }
 0x246   : > { %v1394_v35 = vadd.f32 %v1393_v32, %v7188_v59  ;;  %v1443_v36 = vadd.f32 %v1442_v33, %v7191_v6 }
 0x247   : > { %v1790_v14 = vsel %vm1789_vm4, %v1626_v47, %v1782_v30  ;;  %v1690_v52 = vmax.f32 %v1481_v48, %v1489_v15  ;;  %v1711_v53 = vmax.f32 %v1482_v49, %v1490_v45  ;;  %v4998_v45 = vld [vmem:[#allocation5 + $0xe0] sm:$0xf]  ;;  %v6335_v48 = vld [vmem:[#allocation5 + $0xe4] sm:$0xf]  ;;  %v5000_v49 = vld [vmem:[#allocation5 + $0xf0] sm:$0xf0] }
 0x248   : > { %v7210_v40 = vsel %vm1793_vm5, %v1790_v14, %v1792_v20  ;;  %v1499_v43 = vmax.f32 %v1394_v35, 0.0  ;;  %v1500_v44 = vmax.f32 %v1443_v36, 0.0 }
 0x24a   : > { %v1733_v61 = vmax.f32 %v1732_v39, %v1499_v43  ;;  %v1754_v42 = vmax.f32 %v1753_v41, %v1500_v44  ;;  %v1295_v46 = vpop.f32.mrf.mxu2  ;;  %v1344_v18 = vpop.f32.mrf.mxu3 }
 0x24b   : > { %v1296_v50 = vadd.f32 %v1295_v46, %v7198_v26  ;;  %v1345_v51 = vadd.f32 %v1344_v18, %v7201_v27  ;;  %v6369_v18 = vld [vmem:[#allocation5 + $0x1ec] sm:$0xf0] }
 0x24d   : > { %v1497_v55 = vmax.f32 %v1296_v50, 0.0  ;;  %v1498_v11 = vmax.f32 %v1345_v51, 0.0  ;;  %v1395_v56 = vpop.f32.mrf.mxu0  ;;  %v1444_v23 = vpop.f32.mrf.mxu1  ;;  %v5003_v51 = vor.u32 %v6335_v48, %v5000_v49  ;;  %v6357_v48 = vld [vmem:[#allocation5 + $0x18c] sm:$0xf0]  ;;  %v6323_v49 = vld [vmem:[#allocation5 + $0x84] sm:$0xf] }
 0x24e   : > { %v1396_v58 = vadd.f32 %v1395_v56, %v7188_v59  ;;  %v1445_v0 = vadd.f32 %v1444_v23, %v7191_v6  ;;  %v4982_v23 = vld [vmem:[#allocation5 + $0xc0] sm:$0xf] }
 0x24f   : > { %v1691_v57 = vmax.f32 %v1690_v52, %v1497_v55  ;;  %v1712_v24 = vmax.f32 %v1711_v53, %v1498_v11  ;;  %v6367_v52 = vld [vmem:[#allocation5 + $0x1e4] sm:$0xf]  ;;  %v5128_v53 = vld [vmem:[#allocation5 + $0x1f0] sm:$0xf0]  ;;  %3484 = vmatpush.bf16.msrb.mxu0 %v5003_v51 }
 0x250   : > { %v1507_v63 = vmax.f32 %v1396_v58, 0.0  ;;  %v1508_v1 = vmax.f32 %v1445_v0, 0.0  ;;  %v5131_v56 = vor.u32 %v6367_v52, %v5128_v53  ;;  %v6365_v0 = vld [vmem:[#allocation5 + $0x1cc] sm:$0xf0] }
 0x252   : > { %v1297_v60 = vpop.f32.mrf.mxu2  ;;  %v1346_v62 = vpop.f32.mrf.mxu3  ;;  %v1734_v10 = vmax.f32 %v1733_v61, %v1507_v63  ;;  %v1755_v12 = vmax.f32 %v1754_v42, %v1508_v1  ;;  %v6337_v61 = vld [vmem:[#allocation5 + $0xec] sm:$0xf0]  ;;  %v5126_v42 = vld [vmem:[#allocation5 + $0x1e0] sm:$0xf]  ;;  %3497 = vmatpush.bf16.msrb.mxu1 %v5131_v56  ;;  %v6355_v56 = vld [vmem:[#allocation5 + $0x184] sm:$0xf] }
 0x253   : > { %v1298_v2 = vadd.f32 %v1297_v60, %v7198_v26  ;;  %v1347_v3 = vadd.f32 %v1346_v62, %v7201_v27  ;;  %v4999_v46 = vor.u32 %v6337_v61, %v4998_v45  ;;  %v5127_v50 = vor.u32 %v6369_v18, %v5126_v42  ;;  %v6331_v60 = vld [vmem:[#allocation5 + $0xc4] sm:$0xf]  ;;  %v4984_v62 = vld [vmem:[#allocation5 + $0xd0] sm:$0xf0]  ;;  %v4950_v42 = vld [vmem:[#allocation5 + $0x80] sm:$0xf] }
 0x254   : > { %v4987_v1 = vor.u32 %v6331_v60, %v4984_v62  ;;  %v4934_v62 = vld [vmem:[#allocation5 + $0x60] sm:$0xf] }
 0x255   : > { %v1398_v7 = vpop.f32.mrf.mxu0  ;;  %v1447_v8 = vpop.f32.mrf.mxu1  ;;  %v1505_v19 = vmax.f32 %v1298_v2, 0.0  ;;  %v1506_v20 = vmax.f32 %v1347_v3, 0.0  ;;  %3380 = vmatpush.bf16.msra.mxu2 %v4999_v46  ;;  %3393 = vmatpush.bf16.msra.mxu3 %v5127_v50  ;;  %v6363_v2 = vld [vmem:[#allocation5 + $0x1c4] sm:$0xf]  ;;  %v5112_v3 = vld [vmem:[#allocation5 + $0x1d0] sm:$0xf0] }
 0x256   : > { %v1399_v54 = vadd.f32 %v1398_v7, %v7188_v59  ;;  %v1448_v9 = vadd.f32 %v1447_v8, %v7191_v6  ;;  %v5115_v8 = vor.u32 %v6363_v2, %v5112_v3  ;;  %3485 = vmatpush.bf16.msrb.mxu0 %v4987_v1  ;;  %v5078_v46 = vld [vmem:[#allocation5 + $0x180] sm:$0xf]  ;;  %v4952_v50 = vld [vmem:[#allocation5 + $0x90] sm:$0xf0]  ;;  %v6353_v3 = vld [vmem:[#allocation5 + $0x16c] sm:$0xf0] }
 0x257   : > { %v1692_v29 = vmax.f32 %v1691_v57, %v1505_v19  ;;  %v1713_v47 = vmax.f32 %v1712_v24, %v1506_v20  ;;  %v6333_v57 = vld [vmem:[#allocation5 + $0xcc] sm:$0xf0]  ;;  %v5110_v24 = vld [vmem:[#allocation5 + $0x1c0] sm:$0xf]  ;;  %v6327_v20 = vld [vmem:[#allocation5 + $0xa4] sm:$0xf]  ;;  %v5079_v52 = vor.u32 %v6357_v48, %v5078_v46  ;;  %v4955_v53 = vor.u32 %v6323_v49, %v4952_v50 }
 0x258   : > { %v1515_v16 = vmax.f32 %v1399_v54, 0.0  ;;  %v1516_v17 = vmax.f32 %v1448_v9, 0.0  ;;  %v4983_v58 = vor.u32 %v6333_v57, %v4982_v23  ;;  %v5111_v63 = vor.u32 %v6365_v0, %v5110_v24  ;;  %3498 = vmatpush.bf16.msrb.mxu1 %v5115_v8  ;;  %v6361_v19 = vld [vmem:[#allocation5 + $0x1ac] sm:$0xf0]  ;;  %v5080_v23 = vld [vmem:[#allocation5 + $0x190] sm:$0xf0] }
 0x259   : > { %v5083_v0 = vor.u32 %v6355_v56, %v5080_v23  ;;  %v5062_v1 = vld [vmem:[#allocation5 + $0x160] sm:$0xf]  ;;  %v4936_v8 = vld [vmem:[#allocation5 + $0x70] sm:$0xf0]  ;;  %v6315_v46 = vld [vmem:[#allocation5 + $0x44] sm:$0xf] }
 0x25a   : > { %v7220_v21 = vmax.f32 %v1734_v10, %v1515_v16  ;;  %v7222_v22 = vmax.f32 %v1755_v12, %v1516_v17  ;;  %v1300_v4 = vpop.f32.mrf.mxu2  ;;  %v1349_v25 = vpop.f32.mrf.mxu3  ;;  %3381 = vmatpush.bf16.msra.mxu2 %v4983_v58  ;;  %3394 = vmatpush.bf16.msra.mxu3 %v5111_v63  ;;  %v4966_v10 = vld [vmem:[#allocation5 + $0xa0] sm:$0xf]  ;;  %v6329_v12 = vld [vmem:[#allocation5 + $0xac] sm:$0xf0]  ;;  %v5048_v56 = vld [vmem:[#allocation5 + $0x150] sm:$0xf0] }
 0x25b   : > { %v1301_v28 = vadd.f32 %v1300_v4, %v7198_v26  ;;  %v1350_v5 = vadd.f32 %v1349_v25, %v7201_v27  ;;  %v5094_v16 = vld [vmem:[#allocation5 + $0x1a0] sm:$0xf]  ;;  %v4967_v17 = vor.u32 %v6329_v12, %v4966_v10  ;;  %v4968_v4 = vld [vmem:[#allocation5 + $0xb0] sm:$0xf0]  ;;  %v6321_v63 = vld [vmem:[#allocation5 + $0x6c] sm:$0xf0]  ;;  %v5063_v12 = vor.u32 %v6353_v3, %v5062_v1 }
 0x25c   : > { %v4935_v2 = vor.u32 %v6321_v63, %v4934_v62  ;;  %v4902_v3 = vld [vmem:[#allocation5 + $0x20] sm:$0xf] }
 0x25d   : > { %v1513_v30 = vmax.f32 %v1301_v28, 0.0  ;;  %v1514_v31 = vmax.f32 %v1350_v5, 0.0  ;;  %v1400_v13 = vpop.f32.mrf.mxu0  ;;  %v1449_v32 = vpop.f32.mrf.mxu1  ;;  %v5095_v28 = vor.u32 %v6361_v19, %v5094_v16  ;;  %v4971_v5 = vor.u32 %v6327_v20, %v4968_v4  ;;  %v5064_v19 = vld [vmem:[#allocation5 + $0x170] sm:$0xf0] }
 0x25e   : > { %v7253_v7 = vadd.f32 %v1400_v13, %v7188_v59  ;;  %v7260_v25 = vadd.f32 %v1449_v32, %v7191_v6  ;;  %3382 = vmatpush.bf16.msra.mxu2 %v4967_v17  ;;  %v6325_v32 = vld [vmem:[#allocation5 + $0x8c] sm:$0xf0]  ;;  %v6351_v17 = vld [vmem:[#allocation5 + $0x164] sm:$0xf] }
 0x25f   : > { %v7226_v33 = vmax.f32 %v1692_v29, %v1513_v30  ;;  %v7228_v34 = vmax.f32 %v1713_v47, %v1514_v31  ;;  %v6359_v29 = vld [vmem:[#allocation5 + $0x1a4] sm:$0xf]  ;;  %v5096_v47 = vld [vmem:[#allocation5 + $0x1b0] sm:$0xf0]  ;;  %3395 = vmatpush.bf16.msra.mxu3 %v5095_v28  ;;  %3486 = vmatpush.bf16.msrb.mxu0 %v4971_v5  ;;  %v4951_v18 = vor.u32 %v6325_v32, %v4950_v42  ;;  %v6349_v32 = vld [vmem:[#allocation5 + $0x14c] sm:$0xf0] }
 0x260   : > { %v1523_v30 = vmax.f32 %v7253_v7, 0.0  ;;  %v5099_v61 = vor.u32 %v6359_v29, %v5096_v47  ;;  %v1524_v51 = vmax.f32 %v7260_v25, 0.0  ;;  %v6317_v47 = vld [vmem:[#allocation5 + $0x4c] sm:$0xf0] }
 0x262   : > { %v1302_v35 = vpop.f32.mrf.mxu2  ;;  %v7230_v36 = vpop.f32.mrf.mxu3  ;;  %3499 = vmatpush.bf16.msrb.mxu1 %v5099_v61  ;;  %3383 = vmatpush.bf16.msra.mxu2 %v4951_v18  ;;  %v5046_v61 = vld [vmem:[#allocation5 + $0x140] sm:$0xf]  ;;  %v4920_v18 = vld [vmem:[#allocation5 + $0x50] sm:$0xf0] }
 0x263   : > { %v7264_v31 = vadd.f32 %v1302_v35, %v7198_v26  ;;  %v7273_v35 = vadd.f32 %v7230_v36, %v7201_v27  ;;  %3396 = vmatpush.bf16.msra.mxu3 %v5079_v52  ;;  %3487 = vmatpush.bf16.msrb.mxu0 %v4955_v53  ;;  %v5047_v50 = vor.u32 %v6349_v32, %v5046_v61  ;;  %v6347_v53 = vld [vmem:[#allocation5 + $0x144] sm:$0xf]  ;;  %v5016_v32 = vld [vmem:[#allocation5 + $0x110] sm:$0xf0] }
 0x264   : > { %v4923_v52 = vor.u32 %v6315_v46, %v4920_v18  ;;  %v5051_v63 = vor.u32 %v6347_v53, %v5048_v56  ;;  %v6341_v56 = vld [vmem:[#allocation5 + $0x10c] sm:$0xf0] }
 0x265   : > { %v7232_v14 = vpop.f32.mrf.mxu0  ;;  %v7234_v37 = vpop.f32.mrf.mxu1  ;;  %v1521_v57 = vmax.f32 %v7264_v31, 0.0  ;;  %v1522_v20 = vmax.f32 %v7273_v35, 0.0  ;;  %v5366_v31 = vld [vmem:[#allocation5 + $0x3c0] sm:$0xf] }
 0x266   : > { %v7278_v24 = vadd.f32 %v7232_v14, %v7188_v59  ;;  %v7282_v58 = vadd.f32 %v7234_v37, %v7191_v6  ;;  %3500 = vmatpush.bf16.msrb.mxu1 %v5083_v0  ;;  %v6319_v14 = vld [vmem:[#allocation5 + $0x64] sm:$0xf]  ;;  %3384 = vmatpush.bf16.msra.mxu2 %v4935_v2 }
 0x267   : > { %v4939_v16 = vor.u32 %v6319_v14, %v4936_v8  ;;  %3397 = vmatpush.bf16.msra.mxu3 %v5063_v12  ;;  %v6313_v14 = vld [vmem:[#allocation5 + $0x2c] sm:$0xf0] }
 0x268   : > { %v1531_v4 = vmax.f32 %v7278_v24, 0.0  ;;  %v1532_v28 = vmax.f32 %v7282_v58, 0.0  ;;  %v4903_v8 = vor.u32 %v6313_v14, %v4902_v3  ;;  %v6345_v12 = vld [vmem:[#allocation5 + $0x12c] sm:$0xf0]  ;;  %v4888_v3 = vld [vmem:[#allocation5 + $0x10] sm:$0xf0] }
 0x269   : > { %3488 = vmatpush.bf16.msrb.mxu0 %v4939_v16  ;;  %v4904_v16 = vld [vmem:[#allocation5 + $0x30] sm:$0xf0] }
 0x26a   : > { %v7236_v38 = vpop.f32.mrf.mxu2  ;;  %v7238_v39 = vpop.f32.mrf.mxu3 }
 0x26b   : > { %v7290_v37 = vadd.f32 %v7236_v38, %v7198_v26  ;;  %v7294_v10 = vadd.f32 %v7238_v39, %v7201_v27  ;;  %v5067_v38 = vor.u32 %v6351_v17, %v5064_v19  ;;  %v4918_v39 = vld [vmem:[#allocation5 + $0x40] sm:$0xf]  ;;  %3398 = vmatpush.bf16.msra.mxu3 %v5047_v50  ;;  %v6309_v50 = vld [vmem:[#allocation5 + $0xc] sm:$0xf0] }
 0x26c   : > { %v4919_v42 = vor.u32 %v6317_v47, %v4918_v39  ;;  %v6343_v39 = vld [vmem:[#allocation5 + $0x124] sm:$0xf]  ;;  %v5032_v47 = vld [vmem:[#allocation5 + $0x130] sm:$0xf0] }
 0x26d   : > { %v7240_v41 = vpop.f32.mrf.mxu0  ;;  %v7242_v43 = vpop.f32.mrf.mxu1  ;;  %3501 = vmatpush.bf16.msrb.mxu1 %v5067_v38  ;;  %v1529_v48 = vmax.f32 %v7290_v37, 0.0  ;;  %v1530_v49 = vmax.f32 %v7294_v10, 0.0  ;;  %3489 = vmatpush.bf16.msrb.mxu0 %v4923_v52  ;;  %v5014_v52 = vld [vmem:[#allocation5 + $0x100] sm:$0xf] }
 0x26e   : > { %v7307_v23 = vadd.f32 %v7240_v41, %v7188_v59  ;;  %v7311_v0 = vadd.f32 %v7242_v43, %v7191_v6  ;;  %3385 = vmatpush.bf16.msra.mxu2 %v4919_v42  ;;  %v5030_v41 = vld [vmem:[#allocation5 + $0x120] sm:$0xf]  ;;  %v6311_v43 = vld [vmem:[#allocation5 + $0x24] sm:$0xf] }
 0x26f   : > { %v5031_v19 = vor.u32 %v6345_v12, %v5030_v41  ;;  %v4907_v38 = vor.u32 %v6311_v43, %v4904_v16  ;;  %v5015_v12 = vor.u32 %v6341_v56, %v5014_v52  ;;  %v6339_v16 = vld [vmem:[#allocation5 + $0x104] sm:$0xf]  ;;  %v5512_v52 = vld [vmem:[#allocation5 + $0x4f0] sm:$0xf0] }
 0x270   : > { %v1539_v61 = vmax.f32 %v7307_v23, 0.0  ;;  %v1540_v42 = vmax.f32 %v7311_v0, 0.0  ;;  %v6487_v23 = vld [vmem:[#allocation5 + $0x5a4] sm:$0xf]  ;;  %v6421_v0 = vld [vmem:[#allocation5 + $0x38c] sm:$0xf0] }
 0x271   : > { %3502 = vmatpush.bf16.msrb.mxu1 %v5051_v63  ;;  %3399 = vmatpush.bf16.msra.mxu3 %v5031_v19  ;;  %v6307_v63 = vld [vmem:[#allocation5 + $0x4] sm:$0xf] }
 0x272   : > { %v7244_v44 = vpop.f32.mrf.mxu2  ;;  %v7246_v15 = vpop.f32.mrf.mxu3  ;;  %3386 = vmatpush.bf16.msra.mxu2 %v4903_v8  ;;  %3490 = vmatpush.bf16.msrb.mxu0 %v4907_v38  ;;  %v4891_v43 = vor.u32 %v6307_v63, %v4888_v3  ;;  %v1736_v8 = vmax.f32 %v7220_v21, %v1523_v30  ;;  %v6433_v30 = vld [vmem:[#allocation5 + $0x3ec] sm:$0xf0]  ;;  %v6495_v63 = vld [vmem:[#allocation5 + $0x5e4] sm:$0xf]  ;;  %v5640_v3 = vld [vmem:[#allocation5 + $0x5f0] sm:$0xf0] }
 0x273   : > { %v7315_v62 = vadd.f32 %v7244_v44, %v7198_v26  ;;  %v7323_v44 = vadd.f32 %v7246_v15, %v7201_v27  ;;  %v5035_v15 = vor.u32 %v6343_v39, %v5032_v47  ;;  %v5019_v39 = vor.u32 %v6339_v16, %v5016_v32  ;;  %v5254_v47 = vld [vmem:[#allocation5 + $0x2e0] sm:$0xf]  ;;  %v6463_v32 = vld [vmem:[#allocation5 + $0x4e4] sm:$0xf] }
 0x274   : > { %v5515_v56 = vor.u32 %v6463_v32, %v5512_v52  ;;  %v5238_v16 = vld [vmem:[#allocation5 + $0x2c0] sm:$0xf]  ;;  %v5643_v25 = vor.u32 %v6495_v63, %v5640_v3  ;;  %v6491_v32 = vld [vmem:[#allocation5 + $0x5c4] sm:$0xf]  ;;  %v5624_v52 = vld [vmem:[#allocation5 + $0x5d0] sm:$0xf0] }
 0x275   : > { %v7248_v55 = vpop.f32.mrf.mxu0  ;;  %v7250_v11 = vpop.f32.mrf.mxu1  ;;  %3503 = vmatpush.bf16.msrb.mxu1 %v5035_v15  ;;  %v1538_v14 = vmax.f32 %v7323_v44, 0.0  ;;  %v6401_v15 = vld [vmem:[#allocation5 + $0x2ec] sm:$0xf0]  ;;  %3400 = vmatpush.bf16.msra.mxu3 %v5015_v12  ;;  %v1737_v12 = vmax.f32 %v1736_v8, %v1531_v4  ;;  %v6459_v8 = vld [vmem:[#allocation5 + $0x4c4] sm:$0xf]  ;;  %v5627_v3 = vor.u32 %v6491_v32, %v5624_v52 }
 0x276   : > { %v7327_v17 = vadd.f32 %v7248_v55, %v7188_v59  ;;  %v4886_v55 = vld [vmem:[#allocation5] sm:$0xf]  ;;  %v7343_v19 = vadd.f32 %v7250_v11, %v7191_v6  ;;  %3491 = vmatpush.bf16.msrb.mxu0 %v4891_v43  ;;  %v6389_v52 = vld [vmem:[#allocation5 + $0x28c] sm:$0xf0] }
 0x277   : > { %v4887_v53 = vor.u32 %v6309_v50, %v4886_v55  ;;  %v5382_v55 = vld [vmem:[#allocation5 + $0x3e0] sm:$0xf] }
 0x278   : > { %v1547_v41 = vmax.f32 %v7327_v17, 0.0  ;;  %v5206_v32 = vld [vmem:[#allocation5 + $0x280] sm:$0xf] }
 0x279   : > { %3387 = vmatpush.bf16.msra.mxu2 %v4887_v53  ;;  %v1757_v53 = vmax.f32 %v7222_v22, %v1524_v51  ;;  %3504 = vmatpush.bf16.msrb.mxu1 %v5019_v39  ;;  %v6429_v51 = vld [vmem:[#allocation5 + $0x3cc] sm:$0xf0] }
 0x27a   : > { %v7255_v54 = vpop.f32.mrf.mxu2  ;;  %v7257_v9 = vpop.f32.mrf.mxu3  ;;  %3536 = vmatpush.bf16.msra.mxu0 %v5515_v56  ;;  %v5367_v4 = vor.u32 %v6429_v51, %v5366_v31  ;;  %v5350_v31 = vld [vmem:[#allocation5 + $0x3a0] sm:$0xf] }
 0x27b   : > { %v7347_v38 = vadd.f32 %v7255_v54, %v7198_v26  ;;  %v7351_v50 = vadd.f32 %v7257_v9, %v7201_v27  ;;  %v5255_v54 = vor.u32 %v6401_v15, %v5254_v47  ;;  %v1694_v9 = vmax.f32 %v7226_v33, %v1521_v57  ;;  %v6397_v33 = vld [vmem:[#allocation5 + $0x2cc] sm:$0xf0] }
 0x27c   : > { %v1548_v57 = vmax.f32 %v7343_v19, 0.0  ;;  %v1758_v56 = vmax.f32 %v1757_v53, %v1532_v28  ;;  %v6417_v19 = vld [vmem:[#allocation5 + $0x36c] sm:$0xf0] }
 0x27d   : > { %v7266_v13 = vpop.f32.mrf.mxu0  ;;  %v7268_v45 = vpop.f32.mrf.mxu1  ;;  %3406 = vmatpush.bf16.msrb.mxu2 %v5255_v54  ;;  %v1545_v39 = vmax.f32 %v7347_v38, 0.0  ;;  %v1546_v15 = vmax.f32 %v7351_v50, 0.0  ;;  %3549 = vmatpush.bf16.msra.mxu1 %v5643_v25  ;;  %v1695_v63 = vmax.f32 %v1694_v9, %v1529_v48  ;;  %v5480_v48 = vld [vmem:[#allocation5 + $0x4b0] sm:$0xf0] }
 0x27e   : > { %v7355_v21 = vadd.f32 %v7266_v13, %v7188_v59  ;;  %v5383_v13 = vor.u32 %v6433_v30, %v5382_v55  ;;  %v7371_v43 = vadd.f32 %v7268_v45, %v7191_v6  ;;  %v5239_v45 = vor.u32 %v6397_v33, %v5238_v16  ;;  %v5222_v16 = vld [vmem:[#allocation5 + $0x2a0] sm:$0xf]  ;;  %v6393_v33 = vld [vmem:[#allocation5 + $0x2ac] sm:$0xf0] }
 0x27f   : > { %v5223_v35 = vor.u32 %v6393_v33, %v5222_v16  ;;  %v5334_v16 = vld [vmem:[#allocation5 + $0x380] sm:$0xf]  ;;  %v6483_v33 = vld [vmem:[#allocation5 + $0x584] sm:$0xf] }
 0x280   : > { %3419 = vmatpush.bf16.msrb.mxu3 %v5383_v13  ;;  %v1555_v55 = vmax.f32 %v7355_v21, 0.0  ;;  %v1715_v13 = vmax.f32 %v7228_v34, %v1522_v20  ;;  %v1556_v25 = vmax.f32 %v7371_v43, 0.0  ;;  %v6425_v34 = vld [vmem:[#allocation5 + $0x3ac] sm:$0xf0]  ;;  %v6455_v20 = vld [vmem:[#allocation5 + $0x4a4] sm:$0xf] }
 0x281   : > { %3407 = vmatpush.bf16.msrb.mxu2 %v5239_v45  ;;  %v5351_v28 = vor.u32 %v6425_v34, %v5350_v31  ;;  %3550 = vmatpush.bf16.msra.mxu1 %v5627_v3  ;;  %v5592_v31 = vld [vmem:[#allocation5 + $0x590] sm:$0xf0] }
 0x282   : > { %v7284_v60 = vpop.f32.mrf.mxu2  ;;  %v7286_v36 = vpop.f32.mrf.mxu3  ;;  %v5595_v34 = vor.u32 %v6483_v33, %v5592_v31 }
 0x283   : > { %v7375_v22 = vadd.f32 %v7284_v60, %v7198_v26  ;;  %v5496_v60 = vld [vmem:[#allocation5 + $0x4d0] sm:$0xf0]  ;;  %v7387_v54 = vadd.f32 %v7286_v36, %v7201_v27  ;;  %v1738_v36 = vmax.f32 %v1737_v12, %v1539_v61 }
 0x284   : > { %v5499_v30 = vor.u32 %v6459_v8, %v5496_v60  ;;  %3420 = vmatpush.bf16.msrb.mxu3 %v5367_v4  ;;  %v5608_v61 = vld [vmem:[#allocation5 + $0x5b0] sm:$0xf0]  ;;  %v1759_v4 = vmax.f32 %v1758_v56, %v1540_v42  ;;  %v7725_v60 = vmax.f32 %v7315_v62, 0.0  ;;  %v6451_v42 = vld [vmem:[#allocation5 + $0x484] sm:$0xf] }
 0x285   : > { %v7299_v5 = vpop.f32.mrf.mxu0  ;;  %v7301_v29 = vpop.f32.mrf.mxu1  ;;  %v1553_v51 = vmax.f32 %v7375_v22, 0.0  ;;  %v1554_v53 = vmax.f32 %v7387_v54, 0.0  ;;  %v5611_v8 = vor.u32 %v6487_v23, %v5608_v61  ;;  %3408 = vmatpush.bf16.msrb.mxu2 %v5223_v35  ;;  %v5464_v62 = vld [vmem:[#allocation5 + $0x490] sm:$0xf0]  ;;  %v6385_v23 = vld [vmem:[#allocation5 + $0x26c] sm:$0xf0] }
 0x286   : > { %v7402_v58 = vadd.f32 %v7299_v5, %v7188_v59  ;;  %v7406_v37 = vadd.f32 %v7301_v29, %v7191_v6  ;;  %3537 = vmatpush.bf16.msra.mxu0 %v5499_v30  ;;  %v5483_v5 = vor.u32 %v6455_v20, %v5480_v48  ;;  %v1716_v29 = vmax.f32 %v1715_v13, %v1530_v49  ;;  %v5318_v61 = vld [vmem:[#allocation5 + $0x360] sm:$0xf]  ;;  %v5544_v54 = vld [vmem:[#allocation5 + $0x530] sm:$0xf0] }
 0x287   : > { %v1696_v30 = vmax.f32 %v1695_v63, %v7725_v60  ;;  %v5207_v49 = vor.u32 %v6389_v52, %v5206_v32  ;;  %3551 = vmatpush.bf16.msra.mxu1 %v5611_v8  ;;  %v6479_v8 = vld [vmem:[#allocation5 + $0x564] sm:$0xf] }
 0x288   : > { %v1563_v13 = vmax.f32 %v7402_v58, 0.0  ;;  %v1564_v56 = vmax.f32 %v7406_v37, 0.0  ;;  %3421 = vmatpush.bf16.msrb.mxu3 %v5351_v28  ;;  %v1717_v20 = vmax.f32 %v1716_v29, %v1538_v14  ;;  %v1760_v58 = vmax.f32 %v1759_v4, %v1548_v57 }
 0x289   : > { %v1697_v28 = vmax.f32 %v1696_v30, %v1545_v39  ;;  %3409 = vmatpush.bf16.msrb.mxu2 %v5207_v49  ;;  %v5319_v57 = vor.u32 %v6417_v19, %v5318_v61  ;;  %v6447_v39 = vld [vmem:[#allocation5 + $0x464] sm:$0xf]  ;;  %v5576_v30 = vld [vmem:[#allocation5 + $0x570] sm:$0xf0]  ;;  %v5302_v49 = vld [vmem:[#allocation5 + $0x340] sm:$0xf] }
 0x28a   : > { %v7317_v1 = vpop.f32.mrf.mxu2  ;;  %v7319_v2 = vpop.f32.mrf.mxu3  ;;  %3538 = vmatpush.bf16.msra.mxu0 %v5483_v5  ;;  %v1718_v32 = vmax.f32 %v1717_v20, %v1546_v15  ;;  %v6413_v15 = vld [vmem:[#allocation5 + $0x34c] sm:$0xf0]  ;;  %v5560_v20 = vld [vmem:[#allocation5 + $0x550] sm:$0xf0] }
 0x28b   : > { %v7411_v9 = vadd.f32 %v7317_v1, %v7198_v26  ;;  %v1739_v1 = vmax.f32 %v1738_v36, %v1547_v41  ;;  %v7425_v3 = vadd.f32 %v7319_v2, %v7201_v27  ;;  %v5335_v41 = vor.u32 %v6421_v0, %v5334_v16  ;;  %3552 = vmatpush.bf16.msra.mxu1 %v5595_v34  ;;  %v6377_v61 = vld [vmem:[#allocation5 + $0x22c] sm:$0xf0] }
 0x28c   : > { %v5467_v2 = vor.u32 %v6451_v42, %v5464_v62  ;;  %v1761_v0 = vmax.f32 %v1760_v58, %v1556_v25  ;;  %v1698_v42 = vmax.f32 %v1697_v28, %v1553_v51  ;;  %v5303_v43 = vor.u32 %v6413_v15, %v5302_v49  ;;  %v6475_v25 = vld [vmem:[#allocation5 + $0x544] sm:$0xf] }
 0x28d   : > { %v7332_v46 = vpop.f32.mrf.mxu0  ;;  %v7334_v18 = vpop.f32.mrf.mxu1  ;;  %v1740_v48 = vmax.f32 %v1739_v1, %v1555_v55  ;;  %3422 = vmatpush.bf16.msrb.mxu3 %v5335_v41  ;;  %v5448_v55 = vld [vmem:[#allocation5 + $0x470] sm:$0xf0]  ;;  %v5579_v1 = vor.u32 %v6479_v8, %v5576_v30  ;;  %v6443_v41 = vld [vmem:[#allocation5 + $0x444] sm:$0xf]  ;;  %v1719_v37 = vmax.f32 %v1718_v32, %v1554_v53  ;;  %v5142_v53 = vld [vmem:[#allocation5 + $0x200] sm:$0xf] }
 0x28e   : > { %v7429_v10 = vadd.f32 %v7332_v46, %v7188_v59  ;;  %v1561_v46 = vmax.f32 %v7411_v9, 0.0  ;;  %v7436_v36 = vadd.f32 %v7334_v18, %v7191_v6  ;;  %v5190_v18 = vld [vmem:[#allocation5 + $0x260] sm:$0xf]  ;;  %3539 = vmatpush.bf16.msra.mxu0 %v5467_v2  ;;  %v1762_v58 = vmax.f32 %v1761_v0, %v1564_v56  ;;  %v6439_v8 = vld [vmem:[#allocation5 + $0x424] sm:$0xf] }
 0x28f   : > { %v5191_v14 = vor.u32 %v6385_v23, %v5190_v18  ;;  %v1741_v62 = vmax.f32 %v1740_v48, %v1563_v13  ;;  %3553 = vmatpush.bf16.msra.mxu1 %v5579_v1  ;;  %v5563_v18 = vor.u32 %v6475_v25, %v5560_v20  ;;  %v5158_v23 = vld [vmem:[#allocation5 + $0x220] sm:$0xf]  ;;  %v6373_v32 = vld [vmem:[#allocation5 + $0x20c] sm:$0xf0] }
 0x290   : > { %v1571_v5 = vmax.f32 %v7429_v10, 0.0  ;;  %v5174_v10 = vld [vmem:[#allocation5 + $0x240] sm:$0xf]  ;;  %v1699_v30 = vmax.f32 %v1698_v42, %v1561_v46  ;;  %v6435_v42 = vld [vmem:[#allocation5 + $0x404] sm:$0xf] }
 0x291   : > { %3410 = vmatpush.bf16.msrb.mxu2 %v5191_v14  ;;  %3423 = vmatpush.bf16.msrb.mxu3 %v5319_v57  ;;  %v5286_v57 = vld [vmem:[#allocation5 + $0x320] sm:$0xf] }
 0x292   : > { %v7357_v7 = vpop.f32.mrf.mxu2  ;;  %v7359_v11 = vpop.f32.mrf.mxu3  ;;  %v1742_v14 = vmax.f32 %v1741_v62, %v1571_v5  ;;  %v6471_v5 = vld [vmem:[#allocation5 + $0x524] sm:$0xf]  ;;  %v5270_v46 = vld [vmem:[#allocation5 + $0x300] sm:$0xf] }
 0x293   : > { %v7440_v35 = vadd.f32 %v7357_v7, %v7198_v26  ;;  %v1562_v7 = vmax.f32 %v7425_v3, 0.0  ;;  %v7454_v44 = vadd.f32 %v7359_v11, %v7201_v27  ;;  %v1572_v11 = vmax.f32 %v7436_v36, 0.0  ;;  %3554 = vmatpush.bf16.msra.mxu1 %v5563_v18  ;;  %v5528_v3 = vld [vmem:[#allocation5 + $0x510] sm:$0xf0] }
 0x294   : > { %v5547_v9 = vor.u32 %v6471_v5, %v5544_v54 }
 0x295   : > { %v7379_v47 = vpop.f32.mrf.mxu0  ;;  %v7381_v24 = vpop.f32.mrf.mxu1  ;;  %v1569_v29 = vmax.f32 %v7440_v35, 0.0  ;;  %v1570_v2 = vmax.f32 %v7454_v44, 0.0  ;;  %3424 = vmatpush.bf16.msrb.mxu3 %v5303_v43 }
 0x296   : > { %v7458_v38 = vadd.f32 %v7379_v47, %v7188_v59  ;;  %v7462_v21 = vadd.f32 %v7381_v24, %v7191_v6  ;;  %v5451_v24 = vor.u32 %v6447_v39, %v5448_v55  ;;  %v6409_v39 = vld [vmem:[#allocation5 + $0x32c] sm:$0xf0] }
 0x297   : > { %v5287_v55 = vor.u32 %v6409_v39, %v5286_v57  ;;  %3555 = vmatpush.bf16.msra.mxu1 %v5547_v9 }
 0x298   : > { %v1580_v33 = vmax.f32 %v7462_v21, 0.0  ;;  %3540 = vmatpush.bf16.msra.mxu0 %v5451_v24  ;;  %v5159_v21 = vor.u32 %v6377_v61, %v5158_v23  ;;  %v5416_v24 = vld [vmem:[#allocation5 + $0x430] sm:$0xf0] }
 0x299   : > { %3425 = vmatpush.bf16.msrb.mxu3 %v5287_v55 }
 0x29a   : > { %v1320_v12 = vpop.f32.mrf.mxu2  ;;  %v7413_v45 = vpop.f32.mrf.mxu3 }
 0x29b   : > { %v7467_v4 = vadd.f32 %v1320_v12, %v7198_v26  ;;  %v6381_v12 = vld [vmem:[#allocation5 + $0x24c] sm:$0xf0]  ;;  %v1370_v56 = vadd.f32 %v7413_v45, %v7201_v27  ;;  %v1720_v45 = vmax.f32 %v1719_v37, %v1562_v7 }
 0x29c   : > { %v5175_v50 = vor.u32 %v6381_v12, %v5174_v10  ;;  %v5419_v12 = vor.u32 %v6439_v8, %v5416_v24 }
 0x29d   : > { %v1420_v63 = vpop.f32.mrf.mxu0  ;;  %v1469_v17 = vpop.f32.mrf.mxu1  ;;  %v1577_v22 = vmax.f32 %v7467_v4, 0.0  ;;  %v1578_v7 = vmax.f32 %v1370_v56, 0.0  ;;  %v1721_v20 = vmax.f32 %v1720_v45, %v1570_v2 }
 0x29e   : > { %v7476_v52 = vadd.f32 %v1420_v63, %v7188_v59  ;;  %v7479_v16 = vadd.f32 %v1469_v17, %v7191_v6  ;;  %v5432_v63 = vld [vmem:[#allocation5 + $0x450] sm:$0xf0]  ;;  %v1579_v17 = vmax.f32 %v7458_v38, 0.0  ;;  %3411 = vmatpush.bf16.msrb.mxu2 %v5175_v50 }
 0x29f   : > { %v5435_v34 = vor.u32 %v6443_v41, %v5432_v63  ;;  %v5143_v41 = vor.u32 %v6373_v32, %v5142_v53  ;;  %v5400_v63 = vld [vmem:[#allocation5 + $0x410] sm:$0xf0] }
 0x2a0   : > { %v1587_v28 = vmax.f32 %v7476_v52, 0.0  ;;  %v1588_v48 = vmax.f32 %v7479_v16, 0.0  ;;  %v1763_v52 = vmax.f32 %v1762_v58, %v1572_v11  ;;  %v1743_v16 = vmax.f32 %v1742_v14, %v1579_v17  ;;  %v6405_v11 = vld [vmem:[#allocation5 + $0x30c] sm:$0xf0]  ;;  %v6467_v17 = vld [vmem:[#allocation5 + $0x504] sm:$0xf] }
 0x2a1   : > { %3541 = vmatpush.bf16.msra.mxu0 %v5435_v34  ;;  %v5403_v43 = vor.u32 %v6435_v42, %v5400_v63  ;;  %v1700_v34 = vmax.f32 %v1699_v30, %v1569_v29 }
 0x2a2   : > { %v7469_v60 = vpop.f32.mrf.mxu2  ;;  %v7471_v47 = vpop.f32.mrf.mxu3  ;;  %v1764_v62 = vmax.f32 %v1763_v52, %v1580_v33  ;;  %v1744_v50 = vmax.f32 %v1743_v16, %v1587_v28  ;;  %3412 = vmatpush.bf16.msrb.mxu2 %v5159_v21 }
 0x2a3   : > { %v1323_v49 = vadd.f32 %v7469_v60, %v7198_v26  ;;  %v1372_v0 = vadd.f32 %v7471_v47, %v7201_v27  ;;  %v5271_v47 = vor.u32 %v6405_v11, %v5270_v46 }
 0x2a4   : > { %v1765_v25 = vmax.f32 %v1764_v62, %v1588_v48  ;;  %v1722_v48 = vmax.f32 %v1721_v20, %v1578_v7 }
 0x2a5   : > { %v1423_v31 = vpop.f32.mrf.mxu0  ;;  %v1472_v36 = vpop.f32.mrf.mxu1  ;;  %3542 = vmatpush.bf16.msra.mxu0 %v5419_v12  ;;  %v1585_v58 = vmax.f32 %v1323_v49, 0.0  ;;  %v1586_v28 = vmax.f32 %v1372_v0, 0.0  ;;  %3426 = vmatpush.bf16.msrb.mxu3 %v5271_v47 }
 0x2a6   : > { %v7490_v51 = vadd.f32 %v1423_v31, %v7188_v59  ;;  %v7493_v13 = vadd.f32 %v1472_v36, %v7191_v6  ;;  %3413 = vmatpush.bf16.msrb.mxu2 %v5143_v41 }
 0x2a7   : > { %v1723_v39 = vmax.f32 %v1722_v48, %v1586_v28  ;;  %v5134_v28 = vld [vmem:[#allocation5 + $0x1e8] sm:$0xf] }
 0x2a8   : > { %v1595_v19 = vmax.f32 %v7490_v51, 0.0  ;;  %v1596_v38 = vmax.f32 %v7493_v13, 0.0  ;;  %v5531_v13 = vor.u32 %v6467_v17, %v5528_v3 }
 0x2a9   : > { %3543 = vmatpush.bf16.msra.mxu0 %v5403_v43  ;;  %v6465_v43 = vld [vmem:[#allocation5 + $0x4ec] sm:$0xf0] }
 0x2aa   : > { %v1325_v1 = vpop.f32.mrf.mxu2  ;;  %v1374_v10 = vpop.f32.mrf.mxu3  ;;  %v1745_v18 = vmax.f32 %v1744_v50, %v1595_v19  ;;  %v1766_v23 = vmax.f32 %v1765_v25, %v1596_v38  ;;  %3556 = vmatpush.bf16.msra.mxu1 %v5531_v13  ;;  %v5638_v25 = vld [vmem:[#allocation5 + $0x5e0] sm:$0xf]  ;;  %v5006_v13 = vld [vmem:[#allocation5 + $0xe8] sm:$0xf] }
 0x2ab   : > { %v1326_v15 = vadd.f32 %v1325_v1, %v7198_v26  ;;  %v1375_v31 = vadd.f32 %v1374_v10, %v7201_v27 }
 0x2ad   : > { %v1425_v60 = vpop.f32.mrf.mxu0  ;;  %v1474_v36 = vpop.f32.mrf.mxu1  ;;  %v1594_v21 = vmax.f32 %v1375_v31, 0.0 }
 0x2ae   : > { %v1426_v33 = vadd.f32 %v1425_v60, %v7188_v59  ;;  %v1475_v51 = vadd.f32 %v1474_v36, %v7191_v6  ;;  %v1701_v59 = vmax.f32 %v1700_v34, %v1577_v22  ;;  %v1593_v6 = vmax.f32 %v1326_v15, 0.0  ;;  %v5510_v36 = vld [vmem:[#allocation5 + $0x4e0] sm:$0xf]  ;;  %v6338_v34 = vld [vmem:[#allocation5 + $0xf4] sm:$0xf0] }
 0x2af   : > { %v1724_v22 = vmax.f32 %v1723_v39, %v1594_v21  ;;  %v5622_v21 = vld [vmem:[#allocation5 + $0x5c0] sm:$0xf]  ;;  %v6366_v39 = vld [vmem:[#allocation5 + $0x1d4] sm:$0xf0] }
 0x2b0   : > { %v1603_v61 = vmax.f32 %v1426_v33, 0.0  ;;  %v1604_v14 = vmax.f32 %v1475_v51, 0.0  ;;  %v1702_v2 = vmax.f32 %v1701_v59, %v1585_v58  ;;  %v6497_v33 = vld [vmem:[#allocation5 + $0x5ec] sm:$0xf0] }
 0x2b2   : > { %v1746_v35 = vmax.f32 %v1745_v18, %v1603_v61  ;;  %v1767_v29 = vmax.f32 %v1766_v23, %v1604_v14  ;;  %v1327_v57 = vpop.f32.mrf.mxu2  ;;  %v1376_v44 = vpop.f32.mrf.mxu3  ;;  %v1703_v4 = vmax.f32 %v1702_v2, %v1593_v6  ;;  %v6370_v18 = vld [vmem:[#allocation5 + $0x1f4] sm:$0xf0]  ;;  %v5511_v23 = vor.u32 %v6465_v43, %v5510_v36  ;;  %v5494_v14 = vld [vmem:[#allocation5 + $0x4c0] sm:$0xf]  ;;  %v6461_v6 = vld [vmem:[#allocation5 + $0x4cc] sm:$0xf0] }
 0x2b3   : > { %v1328_v19 = vadd.f32 %v1327_v57, %v7198_v26  ;;  %v1377_v38 = vadd.f32 %v1376_v44, %v7201_v27  ;;  %v5639_v61 = vor.u32 %v6497_v33, %v5638_v25  ;;  %v4990_v57 = vld [vmem:[#allocation5 + $0xc8] sm:$0xf]  ;;  %v6334_v44 = vld [vmem:[#allocation5 + $0xd4] sm:$0xf0]  ;;  %v5430_v33 = vld [vmem:[#allocation5 + $0x440] sm:$0xf] }
 0x2b4   : > { %v1747_v37 = vrot.slane %v1746_v35, 4  ;;  %v1768_v56 = vrot.slane %v1767_v29, 4  ;;  %v5118_v2 = vld [vmem:[#allocation5 + $0x1c8] sm:$0xf] }
 0x2b5   : > { %v1601_v55 = vmax.f32 %v1328_v19, 0.0  ;;  %v1602_v8 = vmax.f32 %v1377_v38, 0.0  ;;  %v5495_v19 = vor.u32 %v6461_v6, %v5494_v14  ;;  %v5070_v36 = vld [vmem:[#allocation5 + $0x168] sm:$0xf] }
 0x2b6   : > { %v1748_v24 = vmax.f32 %v1746_v35, %v1747_v37  ;;  %v1769_v5 = vmax.f32 %v1767_v29, %v1768_v56  ;;  %v6493_v35 = vld [vmem:[#allocation5 + $0x5cc] sm:$0xf0]  ;;  %v5135_v29 = vor.u32 %v6370_v18, %v5134_v28  ;;  %v5478_v37 = vld [vmem:[#allocation5 + $0x4a0] sm:$0xf] }
 0x2b7   : > { %v1704_v30 = vmax.f32 %v1703_v4, %v1601_v55  ;;  %v1725_v52 = vmax.f32 %v1724_v22, %v1602_v8  ;;  %v5623_v38 = vor.u32 %v6493_v35, %v5622_v21  ;;  %v6457_v56 = vld [vmem:[#allocation5 + $0x4ac] sm:$0xf0]  ;;  %v5606_v4 = vld [vmem:[#allocation5 + $0x5a0] sm:$0xf]  ;;  %v4991_v55 = vor.u32 %v6334_v44, %v4990_v57  ;;  %v6318_v21 = vld [vmem:[#allocation5 + $0x54] sm:$0xf0] }
 0x2b8   : > { %v1749_v16 = vrot.slane %v1748_v24, 2  ;;  %v1770_v1 = vrot.slane %v1769_v5, 2  ;;  %v6489_v22 = vld [vmem:[#allocation5 + $0x5ac] sm:$0xf0]  ;;  %v5119_v8 = vor.u32 %v6366_v39, %v5118_v2  ;;  %v5054_v35 = vld [vmem:[#allocation5 + $0x148] sm:$0xf] }
 0x2b9   : > { %v1705_v10 = vrot.slane %v1704_v30, 4  ;;  %v1726_v12 = vrot.slane %v1725_v52, 4  ;;  %v6477_v28 = vld [vmem:[#allocation5 + $0x54c] sm:$0xf0]  ;;  %v5414_v44 = vld [vmem:[#allocation5 + $0x420] sm:$0xf] }
 0x2ba   : > { %v1750_v54 = vmax.f32 %v1748_v24, %v1749_v16  ;;  %v1771_v53 = vmax.f32 %v1769_v5, %v1770_v1  ;;  %v4974_v24 = vld [vmem:[#allocation5 + $0xa8] sm:$0xf]  ;;  %v6330_v5 = vld [vmem:[#allocation5 + $0xb4] sm:$0xf0]  ;;  %v5479_v16 = vor.u32 %v6457_v56, %v5478_v37  ;;  %v5607_v1 = vor.u32 %v6489_v22, %v5606_v4  ;;  %v6441_v2 = vld [vmem:[#allocation5 + $0x42c] sm:$0xf0] }
 0x2bb   : > { %v1706_v32 = vmax.f32 %v1704_v30, %v1705_v10  ;;  %v1727_v26 = vmax.f32 %v1725_v52, %v1726_v12  ;;  %v5102_v30 = vld [vmem:[#allocation5 + $0x1a8] sm:$0xf]  ;;  %v6362_v52 = vld [vmem:[#allocation5 + $0x1b4] sm:$0xf0]  ;;  %v5462_v10 = vld [vmem:[#allocation5 + $0x480] sm:$0xf] }
 0x2bc   : > { %v1751_v45 = vrot.slane %v1750_v54, 1  ;;  %v1772_v27 = vrot.slane %v1771_v53, 1  ;;  %v6453_v12 = vld [vmem:[#allocation5 + $0x48c] sm:$0xf0]  ;;  %v5542_v39 = vld [vmem:[#allocation5 + $0x520] sm:$0xf] }
 0x2bd   : > { %v1707_v49 = vrot.slane %v1706_v32, 2  ;;  %v1728_v0 = vrot.slane %v1727_v26, 2  ;;  %v4910_v56 = vld [vmem:[#allocation5 + $0x28] sm:$0xf]  ;;  %v6314_v4 = vld [vmem:[#allocation5 + $0x34] sm:$0xf0] }
 0x2be   : > { %v1752_v9 = vmax.f32 %v1750_v54, %v1751_v45  ;;  %v1773_v46 = vmax.f32 %v1771_v53, %v1772_v27  ;;  %v5590_v54 = vld [vmem:[#allocation5 + $0x580] sm:$0xf]  ;;  %v6485_v53 = vld [vmem:[#allocation5 + $0x58c] sm:$0xf0]  ;;  %v4958_v45 = vld [vmem:[#allocation5 + $0x88] sm:$0xf] }
 0x2bf   : > { %v1708_v11 = vmax.f32 %v1706_v32, %v1707_v49  ;;  %v1729_v42 = vmax.f32 %v1727_v26, %v1728_v0  ;;  %v4975_v32 = vor.u32 %v6330_v5, %v4974_v24  ;;  %v5103_v26 = vor.u32 %v6362_v52, %v5102_v30  ;;  %v6326_v27 = vld [vmem:[#allocation5 + $0x94] sm:$0xf0]  ;;  %v5086_v49 = vld [vmem:[#allocation5 + $0x188] sm:$0xf]  ;;  %v6437_v30 = vld [vmem:[#allocation5 + $0x40c] sm:$0xf0] }
 0x2c0   : > { %v1787_v62 = vrot.slane %v1752_v9, 2  ;;  %v1788_v50 = vrot.slane %v1773_v46, 1  ;;  %v6358_v0 = vld [vmem:[#allocation5 + $0x194] sm:$0xf0]  ;;  %v5463_v9 = vor.u32 %v6453_v12, %v5462_v10  ;;  %v5591_v46 = vor.u32 %v6485_v53, %v5590_v54  ;;  %v5038_v22 = vld [vmem:[#allocation5 + $0x128] sm:$0xf] }
 0x2c1   : > { %v1709_v15 = vrot.slane %v1708_v11, 1  ;;  %v1730_v41 = vrot.slane %v1729_v42, 1  ;;  %v5415_v24 = vor.u32 %v6441_v2, %v5414_v44  ;;  %v5526_v52 = vld [vmem:[#allocation5 + $0x500] sm:$0xf]  ;;  %v6310_v10 = vld [vmem:[#allocation5 + $0x14] sm:$0xf0]  ;;  %v4911_v54 = vor.u32 %v6314_v4, %v4910_v56 }
 0x2c2   : > { %v1798_v63 = vsel %vm1797_vm6, %v1787_v62, %v1788_v50  ;;  %v5766_v12 = vld [vmem:[#allocation5 + $0x6e0] sm:$0xf]  ;;  %v6490_v44 = vld [vmem:[#allocation5 + $0x5b4] sm:$0xf0] }
 0x2c3   : > { %v1710_v17 = vmax.f32 %v1708_v11, %v1709_v15  ;;  %v1731_v3 = vmax.f32 %v1729_v42, %v1730_v41  ;;  %v5446_v11 = vld [vmem:[#allocation5 + $0x460] sm:$0xf]  ;;  %v6449_v42 = vld [vmem:[#allocation5 + $0x46c] sm:$0xf0] }
 0x2c4   : > { %v5574_v15 = vld [vmem:[#allocation5 + $0x560] sm:$0xf]  ;;  %v6481_v41 = vld [vmem:[#allocation5 + $0x56c] sm:$0xf0]  ;;  %v5447_v43 = vor.u32 %v6449_v42, %v5446_v11  ;;  %v6466_v11 = vld [vmem:[#allocation5 + $0x4f4] sm:$0xf0] }
 0x2c5   : > { %v1785_v7 = vrot.slane %v1710_v17, 4  ;;  %v1786_v31 = vrot.slane %v1731_v3, 3  ;;  %v5087_v17 = vor.u32 %v6358_v0, %v5086_v49  ;;  %v4942_v3 = vld [vmem:[#allocation5 + $0x68] sm:$0xf]  ;;  %v5575_v25 = vor.u32 %v6481_v41, %v5574_v15  ;;  %v6342_v49 = vld [vmem:[#allocation5 + $0x114] sm:$0xf0] }
 0x2c6   : > { %v5518_v0 = vld [vmem:[#allocation5 + $0x4e8] sm:$0xf]  ;;  %v5846_v4 = vld [vmem:[#allocation5 + $0x780] sm:$0xf] }
 0x2c7   : > { %v1796_v60 = vsel %vm1795_vm7, %v1785_v7, %v1786_v31  ;;  %v6322_v7 = vld [vmem:[#allocation5 + $0x74] sm:$0xf0]  ;;  %v5646_v42 = vld [vmem:[#allocation5 + $0x5e8] sm:$0xf] }
 0x2c8   : > { %v1800_v47 = vsel %vm1799_vm8, %v1796_v60, %v1798_v63  ;;  %v4959_v63 = vor.u32 %v6326_v27, %v4958_v45  ;;  %v4943_v18 = vor.u32 %v6322_v7, %v4942_v3  ;;  %v6561_v45 = vld [vmem:[#allocation5 + $0x7ec] sm:$0xf0]  ;;  %v5022_v27 = vld [vmem:[#allocation5 + $0x108] sm:$0xf]  ;;  %v5519_v7 = vor.u32 %v6466_v11, %v5518_v0 }
 0x2c9   : > { %v7527_v51 = vsel %vm472_vm0, %v7210_v40, %v1800_v47  ;;  %v5007_v40 = vor.u32 %v6338_v34, %v5006_v13  ;;  %v6354_v47 = vld [vmem:[#allocation5 + $0x174] sm:$0xf0]  ;;  %v6525_v3 = vld [vmem:[#allocation5 + $0x6cc] sm:$0xf0] }
 0x2ca   : > { %v1810_v20 = vperm.slane %v7527_v51, 0  ;;  %v1811_v58 = vperm.slane %v7527_v51, 1  ;;  %v1812_v62 = vperm.slane %v7527_v51, 2  ;;  %v1813_v50 = vperm.slane %v7527_v51, 3 }
 0x2cb   : > { %v1814_v31 = vperm.slane %v7527_v51, 4  ;;  %v1815_v60 = vperm.slane %v7527_v51, 5 }
 0x2cc   : > { %v7531_v59 = vpack.c.bf16 %v1810_v20, %v1810_v20  ;;  %v7533_v48 = vpack.c.bf16 %v1811_v58, %v1811_v58  ;;  %v7543_v13 = vpack.c.bf16 %v1812_v62, %v1812_v62  ;;  %v7545_v34 = vpack.c.bf16 %v1813_v50, %v1813_v50  ;;  %v6445_v20 = vld [vmem:[#allocation5 + $0x44c] sm:$0xf0]  ;;  %v5558_v58 = vld [vmem:[#allocation5 + $0x540] sm:$0xf]  ;;  %v6498_v62 = vld [vmem:[#allocation5 + $0x5f4] sm:$0xf0] }
 0x2cd   : > { %v7549_v14 = vpack.c.bf16 %v1814_v31, %v1814_v31  ;;  %v7551_v6 = vpack.c.bf16 %v1815_v60, %v1815_v60  ;;  %v5559_v57 = vor.u32 %v6477_v28, %v5558_v58  ;;  %v5647_v31 = vor.u32 %v6498_v62, %v5646_v42  ;;  %v5878_v60 = vld [vmem:[#allocation5 + $0x7c0] sm:$0xf] }
 0x2ce   : > { %3388 = vmatmul.bf16.vlgmr.msra.gmra.mxu2 %v7531_v59  ;;  %3401 = vmatmul.bf16.vlgmr.msra.gmra.mxu3 %v7533_v48  ;;  %v5734_v28 = vld [vmem:[#allocation5 + $0x6a0] sm:$0xf] }
 0x2cf   : > { %3432 = vmatpush.bf16.msra.mxu2 %v5511_v23  ;;  %3445 = vmatpush.bf16.msra.mxu3 %v5639_v61  ;;  %v5071_v23 = vor.u32 %v6354_v47, %v5070_v36  ;;  %v4926_v61 = vld [vmem:[#allocation5 + $0x48] sm:$0xf]  ;;  %v6557_v36 = vld [vmem:[#allocation5 + $0x7cc] sm:$0xf0]  ;;  %v5814_v62 = vld [vmem:[#allocation5 + $0x740] sm:$0xf] }
 0x2d0   : > { %3492 = vmatmul.bf16.vlgmr.msrb.gmra.mxu0 %v7531_v59  ;;  %3505 = vmatmul.bf16.vlgmr.msrb.gmra.mxu1 %v7533_v48  ;;  %v5502_v47 = vld [vmem:[#allocation5 + $0x4c8] sm:$0xf]  ;;  %v5879_v58 = vor.u32 %v6557_v36, %v5878_v60  ;;  %v6505_v60 = vld [vmem:[#allocation5 + $0x62c] sm:$0xf0] }
 0x2d1   : > { %3588 = vmatpush.bf16.msrb.mxu0 %v5007_v40  ;;  %3601 = vmatpush.bf16.msrb.mxu1 %v5135_v29  ;;  %v6350_v40 = vld [vmem:[#allocation5 + $0x154] sm:$0xf0]  ;;  %v5431_v29 = vor.u32 %v6445_v20, %v5430_v33 }
 0x2d2   : > { %v5055_v37 = vor.u32 %v6350_v40, %v5054_v35  ;;  %v6494_v33 = vld [vmem:[#allocation5 + $0x5d4] sm:$0xf0]  ;;  %v6553_v35 = vld [vmem:[#allocation5 + $0x7ac] sm:$0xf0]  ;;  %v5486_v40 = vld [vmem:[#allocation5 + $0x4a8] sm:$0xf] }
 0x2d3   : > { %3433 = vmatpush.bf16.msra.mxu2 %v5495_v19  ;;  %3446 = vmatpush.bf16.msra.mxu3 %v5623_v38  ;;  %v6473_v19 = vld [vmem:[#allocation5 + $0x52c] sm:$0xf0]  ;;  %v4927_v38 = vor.u32 %v6318_v21, %v4926_v61  ;;  %v5862_v21 = vld [vmem:[#allocation5 + $0x7a0] sm:$0xf] }
 0x2d4   : > { %v5543_v5 = vor.u32 %v6473_v19, %v5542_v39  ;;  %v5863_v39 = vor.u32 %v6553_v35, %v5862_v21  ;;  %v5718_v19 = vld [vmem:[#allocation5 + $0x680] sm:$0xf]  ;;  %v6501_v21 = vld [vmem:[#allocation5 + $0x60c] sm:$0xf0] }
 0x2d5   : > { %3589 = vmatpush.bf16.msrb.mxu0 %v4991_v55  ;;  %3602 = vmatpush.bf16.msrb.mxu1 %v5119_v8  ;;  %v6346_v55 = vld [vmem:[#allocation5 + $0x134] sm:$0xf0]  ;;  %v5398_v8 = vld [vmem:[#allocation5 + $0x400] sm:$0xf] }
 0x2d6   : > { %v5039_v53 = vor.u32 %v6346_v55, %v5038_v22  ;;  %v6549_v22 = vld [vmem:[#allocation5 + $0x78c] sm:$0xf0]  ;;  %v5470_v55 = vld [vmem:[#allocation5 + $0x488] sm:$0xf]  ;;  %v5782_v35 = vld [vmem:[#allocation5 + $0x700] sm:$0xf] }
 0x2d7   : > { %3434 = vmatpush.bf16.msra.mxu2 %v5479_v16  ;;  %3447 = vmatpush.bf16.msra.mxu3 %v5607_v1  ;;  %v6469_v16 = vld [vmem:[#allocation5 + $0x50c] sm:$0xf0]  ;;  %v4894_v1 = vld [vmem:[#allocation5 + $0x8] sm:$0xf] }
 0x2d8   : > { %v4895_v41 = vor.u32 %v6310_v10, %v4894_v1  ;;  %v6513_v1 = vld [vmem:[#allocation5 + $0x66c] sm:$0xf0] }
 0x2d9   : > { %3590 = vmatpush.bf16.msrb.mxu0 %v4975_v32  ;;  %3603 = vmatpush.bf16.msrb.mxu1 %v5103_v26  ;;  %v6529_v32 = vld [vmem:[#allocation5 + $0x6ec] sm:$0xf0]  ;;  %v5894_v26 = vld [vmem:[#allocation5 + $0x7e0] sm:$0xf] }
 0x2da   : > { %v5767_v50 = vor.u32 %v6529_v32, %v5766_v12  ;;  %v5895_v15 = vor.u32 %v6561_v45, %v5894_v26  ;;  %v5454_v32 = vld [vmem:[#allocation5 + $0x468] sm:$0xf]  ;;  %v6450_v26 = vld [vmem:[#allocation5 + $0x474] sm:$0xf0] }
 0x2db   : > { %3435 = vmatpush.bf16.msra.mxu2 %v5463_v9  ;;  %3448 = vmatpush.bf16.msra.mxu3 %v5591_v46  ;;  %v5399_v9 = vor.u32 %v6437_v30, %v5398_v8  ;;  %v5527_v46 = vor.u32 %v6469_v16, %v5526_v52  ;;  %v6454_v8 = vld [vmem:[#allocation5 + $0x494] sm:$0xf0]  ;;  %v5847_v52 = vor.u32 %v6549_v22, %v5846_v4  ;;  %v5702_v16 = vld [vmem:[#allocation5 + $0x660] sm:$0xf]  ;;  %v5582_v45 = vld [vmem:[#allocation5 + $0x568] sm:$0xf] }
 0x2dc   : > { %v5471_v10 = vor.u32 %v6454_v8, %v5470_v55  ;;  %v5455_v11 = vor.u32 %v6450_v26, %v5454_v32  ;;  %v5384_v4 = vld [vmem:[#allocation5 + $0x3f0] sm:$0xf0]  ;;  %v6336_v22 = vld [vmem:[#allocation5 + $0xec] sm:$0xf] }
 0x2dd   : > { %3591 = vmatpush.bf16.msrb.mxu0 %v4959_v63  ;;  %3604 = vmatpush.bf16.msrb.mxu1 %v5087_v17  ;;  %v5023_v63 = vor.u32 %v6342_v49, %v5022_v27  ;;  %v5750_v17 = vld [vmem:[#allocation5 + $0x6c0] sm:$0xf]  ;;  %v6482_v27 = vld [vmem:[#allocation5 + $0x574] sm:$0xf0]  ;;  %v5703_v49 = vor.u32 %v6513_v1, %v5702_v16  ;;  %v1816_v1 = vperm.slane %v7527_v51, 6 }
 0x2de   : > { %3414 = vmatmul.bf16.vlgmr.msrb.gmra.mxu2 %v7543_v13  ;;  %3427 = vmatmul.bf16.vlgmr.msrb.gmra.mxu3 %v7545_v34  ;;  %v5751_v20 = vor.u32 %v6525_v3, %v5750_v17  ;;  %v5583_v42 = vor.u32 %v6482_v27, %v5582_v45  ;;  %v6478_v17 = vld [vmem:[#allocation5 + $0x554] sm:$0xf0]  ;;  %v5240_v32 = vld [vmem:[#allocation5 + $0x2d0] sm:$0xf0]  ;;  %v6427_v27 = vld [vmem:[#allocation5 + $0x3c4] sm:$0xf] }
 0x2df   : > { %3436 = vmatpush.bf16.msra.mxu2 %v5447_v43  ;;  %3449 = vmatpush.bf16.msra.mxu3 %v5575_v25  ;;  %v6462_v43 = vld [vmem:[#allocation5 + $0x4d4] sm:$0xf0]  ;;  %v5630_v25 = vld [vmem:[#allocation5 + $0x5c8] sm:$0xf] }
 0x2e0   : > { %3544 = vmatmul.bf16.vlgmr.msra.gmra.mxu0 %v7549_v14  ;;  %3557 = vmatmul.bf16.vlgmr.msra.gmra.mxu1 %v7551_v6  ;;  %v5631_v61 = vor.u32 %v6494_v33, %v5630_v25  ;;  %v6537_v25 = vld [vmem:[#allocation5 + $0x72c] sm:$0xf0]  ;;  %v5422_v33 = vld [vmem:[#allocation5 + $0x428] sm:$0xf] }
 0x2e1   : > { %3592 = vmatpush.bf16.msrb.mxu0 %v4943_v18  ;;  %3605 = vmatpush.bf16.msrb.mxu1 %v5071_v23  ;;  %v6521_v18 = vld [vmem:[#allocation5 + $0x6ac] sm:$0xf0]  ;;  %v5503_v23 = vor.u32 %v6462_v43, %v5502_v47  ;;  %v5798_v43 = vld [vmem:[#allocation5 + $0x720] sm:$0xf] }
 0x2e2   : > { %v5735_v2 = vor.u32 %v6521_v18, %v5734_v28  ;;  %v6474_v28 = vld [vmem:[#allocation5 + $0x534] sm:$0xf0]  ;;  %v5654_v18 = vld [vmem:[#allocation5 + $0x600] sm:$0xf] }
 0x2e3   : > { %3437 = vmatpush.bf16.msra.mxu2 %v5431_v29  ;;  %3450 = vmatpush.bf16.msra.mxu3 %v5559_v57  ;;  %v6458_v29 = vld [vmem:[#allocation5 + $0x4b4] sm:$0xf0]  ;;  %v5614_v57 = vld [vmem:[#allocation5 + $0x5a8] sm:$0xf]  ;;  %v5655_v55 = vor.u32 %v6501_v21, %v5654_v18  ;;  %v6419_v18 = vld [vmem:[#allocation5 + $0x384] sm:$0xf] }
 0x2e4   : > { %v5615_v56 = vor.u32 %v6490_v44, %v5614_v57  ;;  %v5406_v44 = vld [vmem:[#allocation5 + $0x408] sm:$0xf]  ;;  %v4960_v21 = vld [vmem:[#allocation5 + $0x98] sm:$0xf0] }
 0x2e5   : > { %3593 = vmatpush.bf16.msrb.mxu0 %v4927_v38  ;;  %3606 = vmatpush.bf16.msrb.mxu1 %v5055_v37  ;;  %v6517_v38 = vld [vmem:[#allocation5 + $0x68c] sm:$0xf0]  ;;  %v5487_v37 = vor.u32 %v6458_v29, %v5486_v40 }
 0x2e6   : > { %v5719_v30 = vor.u32 %v6517_v38, %v5718_v19  ;;  %v6533_v40 = vld [vmem:[#allocation5 + $0x70c] sm:$0xf0]  ;;  %v6470_v19 = vld [vmem:[#allocation5 + $0x514] sm:$0xf0]  ;;  %v6399_v38 = vld [vmem:[#allocation5 + $0x2e4] sm:$0xf] }
 0x2e7   : > { %3438 = vmatpush.bf16.msra.mxu2 %v5415_v24  ;;  %3451 = vmatpush.bf16.msra.mxu3 %v5543_v5  ;;  %v5598_v24 = vld [vmem:[#allocation5 + $0x588] sm:$0xf]  ;;  %v6486_v5 = vld [vmem:[#allocation5 + $0x594] sm:$0xf0]  ;;  %v5783_v8 = vor.u32 %v6533_v40, %v5782_v35  ;;  %v6356_v35 = vld [vmem:[#allocation5 + $0x18c] sm:$0xf] }
 0x2e8   : > { %v5599_v12 = vor.u32 %v6486_v5, %v5598_v24  ;;  %v5008_v24 = vld [vmem:[#allocation5 + $0xf8] sm:$0xf0]  ;;  %v6368_v5 = vld [vmem:[#allocation5 + $0x1ec] sm:$0xf] }
 0x2e9   : > { %3594 = vmatpush.bf16.msrb.mxu0 %v4911_v54  ;;  %3607 = vmatpush.bf16.msrb.mxu1 %v5039_v53  ;;  %v5830_v54 = vld [vmem:[#allocation5 + $0x760] sm:$0xf]  ;;  %v6545_v53 = vld [vmem:[#allocation5 + $0x76c] sm:$0xf0]  ;;  %v5011_v26 = vor.u32 %v6336_v22, %v5008_v24  ;;  %v5088_v40 = vld [vmem:[#allocation5 + $0x198] sm:$0xf0] }
 0x2ea   : > { %v5831_v0 = vor.u32 %v6545_v53, %v5830_v54  ;;  %v1817_v54 = vperm.slane %v7527_v51, 7  ;;  %v6395_v53 = vld [vmem:[#allocation5 + $0x2c4] sm:$0xf]  ;;  %v6352_v22 = vld [vmem:[#allocation5 + $0x16c] sm:$0xf] }
 0x2eb   : > { %3439 = vmatpush.bf16.msra.mxu2 %v5399_v9  ;;  %3452 = vmatpush.bf16.msra.mxu3 %v5527_v46  ;;  %v5686_v9 = vld [vmem:[#allocation5 + $0x640] sm:$0xf]  ;;  %v6509_v46 = vld [vmem:[#allocation5 + $0x64c] sm:$0xf0]  ;;  %v5243_v51 = vor.u32 %v6395_v53, %v5240_v32  ;;  %v6348_v53 = vld [vmem:[#allocation5 + $0x14c] sm:$0xf] }
 0x2ec   : > { %v5687_v3 = vor.u32 %v6509_v46, %v5686_v9  ;;  %v4992_v9 = vld [vmem:[#allocation5 + $0xd8] sm:$0xf0]  ;;  %v6364_v46 = vld [vmem:[#allocation5 + $0x1cc] sm:$0xf] }
 0x2ed   : > { %3595 = vmatpush.bf16.msrb.mxu0 %v4895_v41  ;;  %3608 = vmatpush.bf16.msrb.mxu1 %v5023_v63  ;;  %v6446_v41 = vld [vmem:[#allocation5 + $0x454] sm:$0xf0]  ;;  %v5566_v63 = vld [vmem:[#allocation5 + $0x548] sm:$0xf]  ;;  %v5056_v32 = vld [vmem:[#allocation5 + $0x158] sm:$0xf0] }
 0x2ee   : > { %3440 = vmatmul.bf16.vlgmr.msra.gmra.mxu2 %v7549_v14  ;;  %3453 = vmatmul.bf16.vlgmr.msra.gmra.mxu3 %v7551_v6  ;;  %v5567_v47 = vor.u32 %v6478_v17, %v5566_v63 }
 0x2ef   : > { %3458 = vmatpush.bf16.msrb.mxu2 %v5767_v50  ;;  %3471 = vmatpush.bf16.msrb.mxu3 %v5895_v15  ;;  %v6541_v50 = vld [vmem:[#allocation5 + $0x74c] sm:$0xf0]  ;;  %v5438_v15 = vld [vmem:[#allocation5 + $0x448] sm:$0xf] }
 0x2f0   : > { %3596 = vmatmul.bf16.vlgmr.msrb.gmra.mxu0 %v7531_v59  ;;  %3609 = vmatmul.bf16.vlgmr.msrb.gmra.mxu1 %v7533_v48  ;;  %v5439_v36 = vor.u32 %v6446_v41, %v5438_v15  ;;  %v6391_v15 = vld [vmem:[#allocation5 + $0x2a4] sm:$0xf]  ;;  %v5224_v41 = vld [vmem:[#allocation5 + $0x2b0] sm:$0xf0] }
 0x2f1   : > { %3640 = vmatpush.bf16.msra.mxu0 %v5519_v7  ;;  %3653 = vmatpush.bf16.msra.mxu1 %v5647_v31  ;;  %v5815_v7 = vor.u32 %v6541_v50, %v5814_v62  ;;  %v5670_v31 = vld [vmem:[#allocation5 + $0x620] sm:$0xf]  ;;  %v7563_v62 = vpack.c.bf16 %v1817_v54, %v1817_v54  ;;  %v4928_v54 = vld [vmem:[#allocation5 + $0x58] sm:$0xf0] }
 0x2f3   : > { %3459 = vmatpush.bf16.msrb.mxu2 %v5751_v20  ;;  %3472 = vmatpush.bf16.msrb.mxu3 %v5879_v58  ;;  %v6442_v20 = vld [vmem:[#allocation5 + $0x434] sm:$0xf0]  ;;  %v5550_v58 = vld [vmem:[#allocation5 + $0x528] sm:$0xf] }
 0x2f4   : > { %v5423_v29 = vor.u32 %v6442_v20, %v5422_v33  ;;  %v5551_v57 = vor.u32 %v6474_v28, %v5550_v58  ;;  %v6387_v33 = vld [vmem:[#allocation5 + $0x284] sm:$0xf]  ;;  %v5208_v20 = vld [vmem:[#allocation5 + $0x290] sm:$0xf0] }
 0x2f5   : > { %3641 = vmatpush.bf16.msra.mxu0 %v5503_v23  ;;  %3654 = vmatpush.bf16.msra.mxu1 %v5631_v61  ;;  %v5671_v23 = vor.u32 %v6505_v60, %v5670_v31  ;;  %v5799_v61 = vor.u32 %v6537_v25, %v5798_v43  ;;  %v6328_v31 = vld [vmem:[#allocation5 + $0xac] sm:$0xf]  ;;  %v4976_v60 = vld [vmem:[#allocation5 + $0xb8] sm:$0xf0]  ;;  %v5227_v43 = vor.u32 %v6391_v15, %v5224_v41 }
 0x2f6   : > { %v4979_v58 = vor.u32 %v6328_v31, %v4976_v60  ;;  %v6344_v15 = vld [vmem:[#allocation5 + $0x12c] sm:$0xf]  ;;  %v5040_v41 = vld [vmem:[#allocation5 + $0x138] sm:$0xf0]  ;;  %v6403_v31 = vld [vmem:[#allocation5 + $0x304] sm:$0xf] }
 0x2f7   : > { %3460 = vmatpush.bf16.msrb.mxu2 %v5735_v2  ;;  %3473 = vmatpush.bf16.msrb.mxu3 %v5863_v39  ;;  %v6438_v2 = vld [vmem:[#allocation5 + $0x414] sm:$0xf0]  ;;  %v5534_v39 = vld [vmem:[#allocation5 + $0x508] sm:$0xf]  ;;  %v5272_v60 = vld [vmem:[#allocation5 + $0x310] sm:$0xf0] }
 0x2f8   : > { %v5535_v16 = vor.u32 %v6470_v19, %v5534_v39  ;;  %v5091_v19 = vor.u32 %v6356_v35, %v5088_v40  ;;  %v5275_v35 = vor.u32 %v6403_v31, %v5272_v60  ;;  %v5520_v40 = vld [vmem:[#allocation5 + $0x4f8] sm:$0xf0]  ;;  %v6511_v31 = vld [vmem:[#allocation5 + $0x664] sm:$0xf]  ;;  %v5704_v60 = vld [vmem:[#allocation5 + $0x670] sm:$0xf0] }
 0x2f9   : > { %3642 = vmatpush.bf16.msra.mxu0 %v5487_v37  ;;  %3655 = vmatpush.bf16.msra.mxu1 %v5615_v56  ;;  %v5256_v37 = vld [vmem:[#allocation5 + $0x2f0] sm:$0xf0]  ;;  %v6431_v56 = vld [vmem:[#allocation5 + $0x3e4] sm:$0xf] }
 0x2fb   : > { %3461 = vmatpush.bf16.msrb.mxu2 %v5719_v30  ;;  %3474 = vmatpush.bf16.msrb.mxu3 %v5847_v52  ;;  %v5136_v30 = vld [vmem:[#allocation5 + $0x1f8] sm:$0xf0]  ;;  %v5407_v52 = vor.u32 %v6438_v2, %v5406_v44  ;;  %v6383_v44 = vld [vmem:[#allocation5 + $0x264] sm:$0xf]  ;;  %v5192_v2 = vld [vmem:[#allocation5 + $0x270] sm:$0xf0] }
 0x2fc   : > { %v5139_v45 = vor.u32 %v6368_v5, %v5136_v30  ;;  %v6379_v5 = vld [vmem:[#allocation5 + $0x244] sm:$0xf]  ;;  %v5176_v30 = vld [vmem:[#allocation5 + $0x250] sm:$0xf0] }
 0x2fd   : > { %3643 = vmatpush.bf16.msra.mxu0 %v5471_v10  ;;  %3656 = vmatpush.bf16.msra.mxu1 %v5599_v12  ;;  %v5259_v10 = vor.u32 %v6399_v38, %v5256_v37  ;;  %v5387_v12 = vor.u32 %v6431_v56, %v5384_v4  ;;  %v6415_v38 = vld [vmem:[#allocation5 + $0x364] sm:$0xf]  ;;  %v5320_v37 = vld [vmem:[#allocation5 + $0x370] sm:$0xf0]  ;;  %v6320_v56 = vld [vmem:[#allocation5 + $0x6c] sm:$0xf] }
 0x2fe   : > { %v4944_v4 = vld [vmem:[#allocation5 + $0x78] sm:$0xf0]  ;;  %v5323_v24 = vor.u32 %v6415_v38, %v5320_v37  ;;  %v6523_v38 = vld [vmem:[#allocation5 + $0x6c4] sm:$0xf]  ;;  %v5752_v37 = vld [vmem:[#allocation5 + $0x6d0] sm:$0xf0] }
 0x2ff   : > { %3462 = vmatpush.bf16.msrb.mxu2 %v5703_v49  ;;  %3475 = vmatpush.bf16.msrb.mxu3 %v5831_v0  ;;  %v5368_v49 = vld [vmem:[#allocation5 + $0x3d0] sm:$0xf0]  ;;  %v6332_v0 = vld [vmem:[#allocation5 + $0xcc] sm:$0xf] }
 0x300   : > { %v5371_v50 = vor.u32 %v6427_v27, %v5368_v49  ;;  %v4995_v63 = vor.u32 %v6332_v0, %v4992_v9  ;;  %v6375_v27 = vld [vmem:[#allocation5 + $0x224] sm:$0xf]  ;;  %v5160_v49 = vld [vmem:[#allocation5 + $0x230] sm:$0xf0]  ;;  %v5059_v9 = vor.u32 %v6348_v53, %v5056_v32 }
 0x301   : > { %3644 = vmatpush.bf16.msra.mxu0 %v5455_v11  ;;  %3657 = vmatpush.bf16.msra.mxu1 %v5583_v42  ;;  %v5120_v11 = vld [vmem:[#allocation5 + $0x1d8] sm:$0xf0]  ;;  %v7561_v42 = vpack.c.bf16 %v1816_v1, %v1816_v1  ;;  %v6411_v1 = vld [vmem:[#allocation5 + $0x344] sm:$0xf]  ;;  %v5864_v32 = vld [vmem:[#allocation5 + $0x7b0] sm:$0xf0] }
 0x302   : > { %v5123_v17 = vor.u32 %v6364_v46, %v5120_v11  ;;  %v6407_v46 = vld [vmem:[#allocation5 + $0x324] sm:$0xf]  ;;  %v5288_v11 = vld [vmem:[#allocation5 + $0x330] sm:$0xf0] }
 0x303   : > { %3463 = vmatpush.bf16.msrb.mxu2 %v5687_v3  ;;  %3476 = vmatpush.bf16.msrb.mxu3 %v5815_v7  ;;  %v6423_v3 = vld [vmem:[#allocation5 + $0x3a4] sm:$0xf]  ;;  %v5352_v7 = vld [vmem:[#allocation5 + $0x3b0] sm:$0xf0] }
 0x304   : > { %v5355_v25 = vor.u32 %v6423_v3, %v5352_v7  ;;  %v5291_v3 = vor.u32 %v6407_v46, %v5288_v11  ;;  %v5144_v7 = vld [vmem:[#allocation5 + $0x210] sm:$0xf0]  ;;  %v6551_v53 = vld [vmem:[#allocation5 + $0x7a4] sm:$0xf] }
 0x305   : > { %3645 = vmatpush.bf16.msra.mxu0 %v5439_v36  ;;  %3658 = vmatpush.bf16.msra.mxu1 %v5567_v47  ;;  %v6360_v36 = vld [vmem:[#allocation5 + $0x1ac] sm:$0xf]  ;;  %v5104_v47 = vld [vmem:[#allocation5 + $0x1b8] sm:$0xf0]  ;;  %v6515_v46 = vld [vmem:[#allocation5 + $0x684] sm:$0xf] }
 0x306   : > { %v5107_v28 = vor.u32 %v6360_v36, %v5104_v47  ;;  %v5043_v47 = vor.u32 %v6344_v15, %v5040_v41  ;;  %v5720_v11 = vld [vmem:[#allocation5 + $0x690] sm:$0xf0]  ;;  %v6547_v15 = vld [vmem:[#allocation5 + $0x784] sm:$0xf] }
 0x307   : > { %3464 = vmatpush.bf16.msrb.mxu2 %v5671_v23  ;;  %3477 = vmatpush.bf16.msrb.mxu3 %v5799_v61  ;;  %v5336_v23 = vld [vmem:[#allocation5 + $0x390] sm:$0xf0]  ;;  %v6324_v61 = vld [vmem:[#allocation5 + $0x8c] sm:$0xf] }
 0x308   : > { %v4963_v39 = vor.u32 %v6324_v61, %v4960_v21  ;;  %v6464_v61 = vld [vmem:[#allocation5 + $0x4ec] sm:$0xf]  ;;  %v5848_v41 = vld [vmem:[#allocation5 + $0x790] sm:$0xf0] }
 0x309   : > { %3646 = vmatpush.bf16.msra.mxu0 %v5423_v29  ;;  %3659 = vmatpush.bf16.msra.mxu1 %v5551_v57  ;;  %v5211_v29 = vor.u32 %v6387_v33, %v5208_v20  ;;  %v5339_v57 = vor.u32 %v6419_v18, %v5336_v23  ;;  %v6340_v33 = vld [vmem:[#allocation5 + $0x10c] sm:$0xf]  ;;  %v5024_v20 = vld [vmem:[#allocation5 + $0x118] sm:$0xf0]  ;;  %v6559_v18 = vld [vmem:[#allocation5 + $0x7e4] sm:$0xf] }
 0x30a   : > { %v5896_v23 = vld [vmem:[#allocation5 + $0x7f0] sm:$0xf0] }
 0x30b   : > { %3465 = vmatpush.bf16.msrb.mxu2 %v5655_v55  ;;  %3478 = vmatpush.bf16.msrb.mxu3 %v5783_v8  ;;  %v5072_v55 = vld [vmem:[#allocation5 + $0x178] sm:$0xf0]  ;;  %v5195_v8 = vor.u32 %v6383_v44, %v5192_v2  ;;  %v5027_v2 = vor.u32 %v6340_v33, %v5024_v20  ;;  %v6448_v33 = vld [vmem:[#allocation5 + $0x46c] sm:$0xf] }
 0x30c   : > { %v5456_v20 = vld [vmem:[#allocation5 + $0x478] sm:$0xf0] }
 0x30d   : > { %3647 = vmatpush.bf16.msra.mxu0 %v5407_v52  ;;  %3660 = vmatpush.bf16.msra.mxu1 %v5535_v16  ;;  %v4947_v52 = vor.u32 %v6320_v56, %v4944_v4  ;;  %v5075_v16 = vor.u32 %v6352_v22, %v5072_v55  ;;  %v5523_v56 = vor.u32 %v6464_v61, %v5520_v40  ;;  %v6555_v22 = vld [vmem:[#allocation5 + $0x7c4] sm:$0xf]  ;;  %v5880_v55 = vld [vmem:[#allocation5 + $0x7d0] sm:$0xf0] }
 0x30e   : > { %3466 = vmatmul.bf16.vlgmr.msrb.gmra.mxu2 %v7561_v42  ;;  %3479 = vmatmul.bf16.vlgmr.msrb.gmra.mxu3 %v7563_v62  ;;  %v6507_v61 = vld [vmem:[#allocation5 + $0x644] sm:$0xf] }
 0x30f   : > { %3510 = vmatpush.bf16.msra.mxu2 %v5259_v10  ;;  %3523 = vmatpush.bf16.msra.mxu3 %v5387_v12  ;;  %v5304_v10 = vld [vmem:[#allocation5 + $0x350] sm:$0xf0]  ;;  %v6316_v12 = vld [vmem:[#allocation5 + $0x4c] sm:$0xf] }
 0x310   : > { %3648 = vmatmul.bf16.vlgmr.msra.gmra.mxu0 %v7549_v14  ;;  %3661 = vmatmul.bf16.vlgmr.msra.gmra.mxu1 %v7551_v6  ;;  %v4931_v0 = vor.u32 %v6316_v12, %v4928_v54 }
 0x311   : > { %3692 = vmatpush.bf16.msrb.mxu0 %v5011_v26  ;;  %3705 = vmatpush.bf16.msrb.mxu1 %v5139_v45  ;;  %v5179_v26 = vor.u32 %v6379_v5, %v5176_v30  ;;  %v5307_v45 = vor.u32 %v6411_v1, %v5304_v10  ;;  %v6492_v5 = vld [vmem:[#allocation5 + $0x5cc] sm:$0xf]  ;;  %v5632_v30 = vld [vmem:[#allocation5 + $0x5d8] sm:$0xf0]  ;;  %v6519_v1 = vld [vmem:[#allocation5 + $0x6a4] sm:$0xf] }
 0x312   : > { %v5736_v10 = vld [vmem:[#allocation5 + $0x6b0] sm:$0xf0]  ;;  %v5635_v54 = vor.u32 %v6492_v5, %v5632_v30  ;;  %v6440_v5 = vld [vmem:[#allocation5 + $0x42c] sm:$0xf]  ;;  %v5424_v30 = vld [vmem:[#allocation5 + $0x438] sm:$0xf0] }
 0x313   : > { %3511 = vmatpush.bf16.msra.mxu2 %v5243_v51  ;;  %3524 = vmatpush.bf16.msra.mxu3 %v5371_v50  ;;  %v6312_v51 = vld [vmem:[#allocation5 + $0x2c] sm:$0xf]  ;;  %v4912_v50 = vld [vmem:[#allocation5 + $0x38] sm:$0xf0] }
 0x314   : > { %v4915_v36 = vor.u32 %v6312_v51, %v4912_v50 }
 0x315   : > { %3693 = vmatpush.bf16.msrb.mxu0 %v4995_v63  ;;  %3706 = vmatpush.bf16.msrb.mxu1 %v5123_v17  ;;  %v6371_v63 = vld [vmem:[#allocation5 + $0x204] sm:$0xf]  ;;  %v5163_v17 = vor.u32 %v6375_v27, %v5160_v49  ;;  %v6488_v27 = vld [vmem:[#allocation5 + $0x5ac] sm:$0xf]  ;;  %v5616_v49 = vld [vmem:[#allocation5 + $0x5b8] sm:$0xf0] }
 0x316   : > { %v5147_v21 = vor.u32 %v6371_v63, %v5144_v7  ;;  %v5619_v50 = vor.u32 %v6488_v27, %v5616_v49  ;;  %v6452_v63 = vld [vmem:[#allocation5 + $0x48c] sm:$0xf]  ;;  %v5600_v7 = vld [vmem:[#allocation5 + $0x598] sm:$0xf0] }
 0x317   : > { %3512 = vmatpush.bf16.msra.mxu2 %v5227_v43  ;;  %3525 = vmatpush.bf16.msra.mxu3 %v5355_v25  ;;  %v6308_v43 = vld [vmem:[#allocation5 + $0xc] sm:$0xf]  ;;  %v4896_v25 = vld [vmem:[#allocation5 + $0x18] sm:$0xf0] }
 0x318   : > { %v4899_v44 = vor.u32 %v6308_v43, %v4896_v25  ;;  %v6543_v43 = vld [vmem:[#allocation5 + $0x764] sm:$0xf]  ;;  %v5832_v25 = vld [vmem:[#allocation5 + $0x770] sm:$0xf0]  ;;  %v6436_v27 = vld [vmem:[#allocation5 + $0x40c] sm:$0xf] }
 0x319   : > { %3694 = vmatpush.bf16.msrb.mxu0 %v4979_v58  ;;  %3707 = vmatpush.bf16.msrb.mxu1 %v5107_v28  ;;  %v6527_v58 = vld [vmem:[#allocation5 + $0x6e4] sm:$0xf]  ;;  %v5768_v28 = vld [vmem:[#allocation5 + $0x6f0] sm:$0xf0]  ;;  %v5408_v49 = vld [vmem:[#allocation5 + $0x418] sm:$0xf0] }
 0x31b   : > { %3513 = vmatpush.bf16.msra.mxu2 %v5211_v29  ;;  %3526 = vmatpush.bf16.msra.mxu3 %v5339_v57  ;;  %v6496_v29 = vld [vmem:[#allocation5 + $0x5ec] sm:$0xf]  ;;  %v5648_v57 = vld [vmem:[#allocation5 + $0x5f8] sm:$0xf0] }
 0x31c   : > { %v5651_v4 = vor.u32 %v6496_v29, %v5648_v57  ;;  %v6539_v29 = vld [vmem:[#allocation5 + $0x744] sm:$0xf]  ;;  %v5816_v57 = vld [vmem:[#allocation5 + $0x750] sm:$0xf0] }
 0x31d   : > { %3695 = vmatpush.bf16.msrb.mxu0 %v4963_v39  ;;  %3708 = vmatpush.bf16.msrb.mxu1 %v5091_v19  ;;  %v5771_v39 = vor.u32 %v6527_v58, %v5768_v28  ;;  %v5899_v19 = vor.u32 %v6559_v18, %v5896_v23  ;;  %v6480_v58 = vld [vmem:[#allocation5 + $0x56c] sm:$0xf]  ;;  %v5584_v28 = vld [vmem:[#allocation5 + $0x578] sm:$0xf0]  ;;  %v5707_v18 = vor.u32 %v6511_v31, %v5704_v60  ;;  %v5374_v31 = vld [vmem:[#allocation5 + $0x3c8] sm:$0xf] }
 0x31e   : > { %v5835_v23 = vor.u32 %v6543_v43, %v5832_v25  ;;  %v5587_v40 = vor.u32 %v6480_v58, %v5584_v28  ;;  %v6430_v60 = vld [vmem:[#allocation5 + $0x3d4] sm:$0xf0]  ;;  %v5230_v43 = vld [vmem:[#allocation5 + $0x2a8] sm:$0xf] }
 0x31f   : > { %3514 = vmatpush.bf16.msra.mxu2 %v5195_v8  ;;  %3527 = vmatpush.bf16.msra.mxu3 %v5323_v24  ;;  %v6460_v8 = vld [vmem:[#allocation5 + $0x4cc] sm:$0xf]  ;;  %v5504_v24 = vld [vmem:[#allocation5 + $0x4d8] sm:$0xf0]  ;;  %v6426_v58 = vld [vmem:[#allocation5 + $0x3b4] sm:$0xf0] }
 0x320   : > { %v5507_v12 = vor.u32 %v6460_v8, %v5504_v24  ;;  %v6535_v8 = vld [vmem:[#allocation5 + $0x724] sm:$0xf]  ;;  %v5800_v24 = vld [vmem:[#allocation5 + $0x730] sm:$0xf0]  ;;  %v7576_v25 = vld [vmem:[%s7720_s7 + $0xa] sm:$0xf] }
 0x321   : > { %3696 = vmatpush.bf16.msrb.mxu0 %v4947_v52  ;;  %3709 = vmatpush.bf16.msrb.mxu1 %v5075_v16  ;;  %v5755_v52 = vor.u32 %v6523_v38, %v5752_v37  ;;  %v5883_v16 = vor.u32 %v6555_v22, %v5880_v55  ;;  %v5819_v37 = vor.u32 %v6539_v29, %v5816_v57  ;;  %v3373_v28 = vperm.slane %v7576_v25, 1  ;;  %v5966_v29 = vld [vmem:[#allocation7 + $0x70] sm:$0xf] }
 0x323   : > { %3515 = vmatpush.bf16.msra.mxu2 %v5179_v26  ;;  %3528 = vmatpush.bf16.msra.mxu3 %v5307_v45  ;;  %v6456_v26 = vld [vmem:[#allocation5 + $0x4ac] sm:$0xf]  ;;  %v5488_v45 = vld [vmem:[#allocation5 + $0x4b8] sm:$0xf0] }
 0x324   : > { %v5491_v51 = vor.u32 %v6456_v26, %v5488_v45  ;;  %v5784_v45 = vld [vmem:[#allocation5 + $0x710] sm:$0xf0] }
 0x325   : > { %3697 = vmatpush.bf16.msrb.mxu0 %v4931_v0  ;;  %3710 = vmatpush.bf16.msrb.mxu1 %v5059_v9  ;;  %v5739_v0 = vor.u32 %v6519_v1, %v5736_v10  ;;  %v5867_v9 = vor.u32 %v6551_v53, %v5864_v32  ;;  %v5803_v10 = vor.u32 %v6535_v8, %v5800_v24  ;;  %v6531_v53 = vld [vmem:[#allocation5 + $0x704] sm:$0xf]  ;;  %v5958_v24 = vld [vmem:[#allocation7 + $0x60] sm:$0xf] }
 0x326   : > { %v5427_v32 = vor.u32 %v6440_v5, %v5424_v30  ;;  %v6576_v5 = vld [vmem:[#allocation7 + $0x64] sm:$0xf0] }
 0x327   : > { %3516 = vmatpush.bf16.msra.mxu2 %v5163_v17  ;;  %3529 = vmatpush.bf16.msra.mxu3 %v5291_v3  ;;  %v5472_v17 = vld [vmem:[#allocation5 + $0x498] sm:$0xf0]  ;;  %v6484_v3 = vld [vmem:[#allocation5 + $0x58c] sm:$0xf]  ;;  %v5959_v30 = vor.u32 %v6576_v5, %v5958_v24 }
 0x329   : > { %3698 = vmatpush.bf16.msrb.mxu0 %v4915_v36  ;;  %3711 = vmatpush.bf16.msrb.mxu1 %v5043_v47  ;;  %v5475_v36 = vor.u32 %v6452_v63, %v5472_v17  ;;  %v5603_v47 = vor.u32 %v6484_v3, %v5600_v7  ;;  %v5411_v63 = vor.u32 %v6436_v27, %v5408_v49 }
 0x32b   : > { %3517 = vmatpush.bf16.msra.mxu2 %v5147_v21  ;;  %3530 = vmatpush.bf16.msra.mxu3 %v5275_v35  ;;  %v5688_v21 = vld [vmem:[#allocation5 + $0x650] sm:$0xf0]  ;;  %v5459_v35 = vor.u32 %v6448_v33, %v5456_v20  ;;  %v6394_v33 = vld [vmem:[#allocation5 + $0x2b4] sm:$0xf0]  ;;  %v5358_v20 = vld [vmem:[#allocation5 + $0x3a8] sm:$0xf] }
 0x32c   : > { %v5691_v38 = vor.u32 %v6507_v61, %v5688_v21  ;;  %v5214_v61 = vld [vmem:[#allocation5 + $0x288] sm:$0xf]  ;;  %v6390_v21 = vld [vmem:[#allocation5 + $0x294] sm:$0xf0] }
 0x32d   : > { %3699 = vmatpush.bf16.msrb.mxu0 %v4899_v44  ;;  %3712 = vmatpush.bf16.msrb.mxu1 %v5027_v2  ;;  %v6444_v44 = vld [vmem:[#allocation5 + $0x44c] sm:$0xf]  ;;  %v5440_v2 = vld [vmem:[#allocation5 + $0x458] sm:$0xf0] }
 0x32e   : > { %3518 = vmatmul.bf16.vlgmr.msra.gmra.mxu2 %v7543_v13  ;;  %3531 = vmatmul.bf16.vlgmr.msra.gmra.mxu3 %v7545_v34  ;;  %v5443_v22 = vor.u32 %v6444_v44, %v5440_v2  ;;  %v6578_v2 = vld [vmem:[#allocation7 + $0x74] sm:$0xf0] }
 0x32f   : > { %3562 = vmatpush.bf16.msrb.mxu2 %v5771_v39  ;;  %3575 = vmatpush.bf16.msrb.mxu3 %v5899_v19  ;;  %v6476_v39 = vld [vmem:[#allocation5 + $0x54c] sm:$0xf]  ;;  %v5568_v19 = vld [vmem:[#allocation5 + $0x558] sm:$0xf0] }
 0x330   : > { %3700 = vmatmul.bf16.vlgmr.msrb.gmra.mxu0 %v7531_v59  ;;  %3713 = vmatmul.bf16.vlgmr.msrb.gmra.mxu1 %v7533_v48  ;;  %v5723_v59 = vor.u32 %v6515_v46, %v5720_v11  ;;  %v5851_v48 = vor.u32 %v6547_v15, %v5848_v41  ;;  %v5571_v55 = vor.u32 %v6476_v39, %v5568_v19  ;;  %v5262_v46 = vld [vmem:[#allocation5 + $0x2e8] sm:$0xf]  ;;  %v6402_v11 = vld [vmem:[#allocation5 + $0x2f4] sm:$0xf0] }
 0x331   : > { %3744 = vmatpush.bf16.msra.mxu0 %v5523_v56  ;;  %3757 = vmatpush.bf16.msra.mxu1 %v5651_v4  ;;  %v6503_v56 = vld [vmem:[#allocation5 + $0x624] sm:$0xf]  ;;  %v5672_v4 = vld [vmem:[#allocation5 + $0x630] sm:$0xf0]  ;;  %v5787_v41 = vor.u32 %v6531_v53, %v5784_v45  ;;  %v5263_v3 = vor.u32 %v6402_v11, %v5262_v46  ;;  %v5967_v19 = vor.u32 %v6578_v2, %v5966_v29  ;;  %v6574_v45 = vld [vmem:[#allocation7 + $0x54] sm:$0xf0] }
 0x332   : > { %v5675_v1 = vor.u32 %v6503_v56, %v5672_v4  ;;  %v6386_v56 = vld [vmem:[#allocation5 + $0x274] sm:$0xf0]  ;;  %v5326_v4 = vld [vmem:[#allocation5 + $0x368] sm:$0xf] }
 0x333   : > { %3563 = vmatpush.bf16.msrb.mxu2 %v5755_v52  ;;  %3576 = vmatpush.bf16.msrb.mxu3 %v5883_v16  ;;  %v6472_v52 = vld [vmem:[#allocation5 + $0x52c] sm:$0xf]  ;;  %v5552_v16 = vld [vmem:[#allocation5 + $0x538] sm:$0xf0]  ;;  %v6378_v46 = vld [vmem:[#allocation5 + $0x234] sm:$0xf0] }
 0x334   : > { %v5555_v26 = vor.u32 %v6472_v52, %v5552_v16  ;;  %v5294_v11 = vld [vmem:[#allocation5 + $0x328] sm:$0xf]  ;;  %v6526_v2 = vld [vmem:[#allocation5 + $0x6d4] sm:$0xf0] }
 0x335   : > { %3745 = vmatpush.bf16.msra.mxu0 %v5507_v12  ;;  %3758 = vmatpush.bf16.msra.mxu1 %v5635_v54  ;;  %v6499_v12 = vld [vmem:[#allocation5 + $0x604] sm:$0xf]  ;;  %v5656_v54 = vld [vmem:[#allocation5 + $0x610] sm:$0xf0]  ;;  %v5758_v29 = vld [vmem:[#allocation5 + $0x6c8] sm:$0xf] }
 0x336   : > { %v5659_v15 = vor.u32 %v6499_v12, %v5656_v54  ;;  %v5310_v12 = vld [vmem:[#allocation5 + $0x348] sm:$0xf]  ;;  %v6414_v54 = vld [vmem:[#allocation5 + $0x354] sm:$0xf0] }
 0x337   : > { %3564 = vmatpush.bf16.msrb.mxu2 %v5739_v0  ;;  %3577 = vmatpush.bf16.msrb.mxu3 %v5867_v9  ;;  %v6468_v0 = vld [vmem:[#allocation5 + $0x50c] sm:$0xf]  ;;  %v5536_v9 = vld [vmem:[#allocation5 + $0x518] sm:$0xf0] }
 0x338   : > { %v5539_v17 = vor.u32 %v6468_v0, %v5536_v9  ;;  %v5311_v0 = vor.u32 %v6414_v54, %v5310_v12  ;;  %v5166_v9 = vld [vmem:[#allocation5 + $0x228] sm:$0xf] }
 0x339   : > { %3746 = vmatpush.bf16.msra.mxu0 %v5491_v51  ;;  %3759 = vmatpush.bf16.msra.mxu1 %v5619_v50  ;;  %v5390_v51 = vld [vmem:[#allocation5 + $0x3e8] sm:$0xf]  ;;  %v6434_v50 = vld [vmem:[#allocation5 + $0x3f4] sm:$0xf0] }
 0x33a   : > { %v5391_v7 = vor.u32 %v6434_v50, %v5390_v51  ;;  %v6410_v51 = vld [vmem:[#allocation5 + $0x334] sm:$0xf0]  ;;  %v5942_v50 = vld [vmem:[#allocation7 + $0x40] sm:$0xf] }
 0x33b   : > { %3565 = vmatpush.bf16.msrb.mxu2 %v5723_v59  ;;  %3578 = vmatpush.bf16.msrb.mxu3 %v5851_v48  ;;  %v5246_v59 = vld [vmem:[#allocation5 + $0x2c8] sm:$0xf]  ;;  %v6398_v48 = vld [vmem:[#allocation5 + $0x2d4] sm:$0xf0] }
 0x33d   : > { %3747 = vmatpush.bf16.msra.mxu0 %v5475_v36  ;;  %3760 = vmatpush.bf16.msra.mxu1 %v5603_v47  ;;  %v5247_v36 = vor.u32 %v6398_v48, %v5246_v59  ;;  %v5375_v47 = vor.u32 %v6430_v60, %v5374_v31  ;;  %v5295_v59 = vor.u32 %v6410_v51, %v5294_v11  ;;  %v6374_v48 = vld [vmem:[#allocation5 + $0x214] sm:$0xf0]  ;;  %v5278_v31 = vld [vmem:[#allocation5 + $0x308] sm:$0xf] }
 0x33e   : > { %v6406_v60 = vld [vmem:[#allocation5 + $0x314] sm:$0xf0]  ;;  %v6564_v11 = vld [vmem:[#allocation7 + $0x4] sm:$0xf0] }
 0x33f   : > { %3566 = vmatpush.bf16.msrb.mxu2 %v5707_v18  ;;  %3579 = vmatpush.bf16.msrb.mxu3 %v5835_v23  ;;  %v5231_v18 = vor.u32 %v6394_v33, %v5230_v43  ;;  %v5359_v23 = vor.u32 %v6426_v58, %v5358_v20  ;;  %v5934_v43 = vld [vmem:[#allocation7 + $0x30] sm:$0xf]  ;;  %v5902_v58 = vld [vmem:[#allocation5 + $0x7e8] sm:$0xf] }
 0x341   : > { %3748 = vmatpush.bf16.msra.mxu0 %v5459_v35  ;;  %3761 = vmatpush.bf16.msra.mxu1 %v5587_v40  ;;  %v5342_v35 = vld [vmem:[#allocation5 + $0x388] sm:$0xf]  ;;  %v6422_v40 = vld [vmem:[#allocation5 + $0x394] sm:$0xf0] }
 0x343   : > { %3567 = vmatpush.bf16.msrb.mxu2 %v5691_v38  ;;  %3580 = vmatpush.bf16.msrb.mxu3 %v5819_v37  ;;  %v5198_v38 = vld [vmem:[#allocation5 + $0x268] sm:$0xf] }
 0x344   : > { %v5199_v52 = vor.u32 %v6386_v56, %v5198_v38  ;;  %v5759_v38 = vor.u32 %v6526_v2, %v5758_v29 }
 0x345   : > { %3749 = vmatpush.bf16.msra.mxu0 %v5443_v22  ;;  %3762 = vmatpush.bf16.msra.mxu1 %v5571_v55  ;;  %v6418_v22 = vld [vmem:[#allocation5 + $0x374] sm:$0xf0] }
 0x346   : > { %v5327_v16 = vor.u32 %v6418_v22, %v5326_v4  ;;  %v5742_v4 = vld [vmem:[#allocation5 + $0x6a8] sm:$0xf]  ;;  %v6522_v22 = vld [vmem:[#allocation5 + $0x6b4] sm:$0xf0] }
 0x347   : > { %3568 = vmatpush.bf16.msrb.mxu2 %v5675_v1  ;;  %3581 = vmatpush.bf16.msrb.mxu3 %v5803_v10  ;;  %v5182_v1 = vld [vmem:[#allocation5 + $0x248] sm:$0xf]  ;;  %v6382_v10 = vld [vmem:[#allocation5 + $0x254] sm:$0xf0]  ;;  %v5743_v54 = vor.u32 %v6522_v22, %v5742_v4 }
 0x348   : > { %v5183_v49 = vor.u32 %v6382_v10, %v5182_v1  ;;  %v5918_v1 = vld [vmem:[#allocation7 + $0x10] sm:$0xf]  ;;  %v6566_v10 = vld [vmem:[#allocation7 + $0x14] sm:$0xf0]  ;;  %v5806_v4 = vld [vmem:[#allocation5 + $0x728] sm:$0xf] }
 0x349   : > { %3750 = vmatpush.bf16.msra.mxu0 %v5427_v32  ;;  %3763 = vmatpush.bf16.msra.mxu1 %v5555_v26  ;;  %v5950_v26 = vld [vmem:[#allocation7 + $0x50] sm:$0xf]  ;;  %v5919_v12 = vor.u32 %v6566_v10, %v5918_v1  ;;  %v6538_v22 = vld [vmem:[#allocation5 + $0x734] sm:$0xf0]  ;;  %v5790_v10 = vld [vmem:[#allocation5 + $0x708] sm:$0xf] }
 0x34a   : > { %v5951_v27 = vor.u32 %v6574_v45, %v5950_v26  ;;  %v6518_v26 = vld [vmem:[#allocation5 + $0x694] sm:$0xf0] }
 0x34b   : > { %3569 = vmatpush.bf16.msrb.mxu2 %v5659_v15  ;;  %3582 = vmatpush.bf16.msrb.mxu3 %v5787_v41  ;;  %v6502_v1 = vld [vmem:[#allocation5 + $0x614] sm:$0xf0] }
 0x34d   : > { %3751 = vmatpush.bf16.msra.mxu0 %v5411_v63  ;;  %3764 = vmatpush.bf16.msra.mxu1 %v5539_v17  ;;  %v3493_v57 = vpop.f32.mrf.mxu0  ;;  %v3506_v44 = vpop.f32.mrf.mxu1  ;;  %v6572_v63 = vld [vmem:[#allocation7 + $0x44] sm:$0xf0] }
 0x34e   : > { %3570 = vmatmul.bf16.vlgmr.msrb.gmra.mxu2 %v7561_v42  ;;  %3583 = vmatmul.bf16.vlgmr.msrb.gmra.mxu3 %v7563_v62  ;;  %v3494_v39 = vadd.f32 %v3493_v57, %v3373_v28  ;;  %v5150_v17 = vld [vmem:[#allocation5 + $0x208] sm:$0xf]  ;;  %v6562_v28 = vld [vmem:[#allocation5 + $0x7f4] sm:$0xf0] }
 0x34f   : > { %3614 = vmatpush.bf16.msra.mxu2 %v5263_v3  ;;  %3627 = vmatpush.bf16.msra.mxu3 %v5391_v7  ;;  %v5943_v3 = vor.u32 %v6572_v63, %v5942_v50  ;;  %v5167_v7 = vor.u32 %v6378_v46, %v5166_v9  ;;  %v5910_v9 = vld [vmem:[#allocation7] sm:$0xf]  ;;  %v3374_v46 = vperm.slane %v7576_v25, 2  ;;  %v6577_v50 = vld [vmem:[#allocation7 + $0x74] sm:$0xf] }
 0x350   : > { %3752 = vmatmul.bf16.vlgmr.msra.gmra.mxu0 %v7549_v14  ;;  %3765 = vmatmul.bf16.vlgmr.msra.gmra.mxu1 %v7551_v6  ;;  %v5215_v14 = vor.u32 %v6390_v21, %v5214_v61  ;;  %v5343_v6 = vor.u32 %v6422_v40, %v5342_v35  ;;  %v7583_v37 = vadd.f32 %v3506_v44, %v3494_v39  ;;  %v5886_v39 = vld [vmem:[#allocation5 + $0x7c8] sm:$0xf] }
 0x351   : > { %4194 = vmatpush.bf16.msrb.mxu0 %v5967_v19  ;;  %v7585_v55 = vpop.f32.mrf.mxu2  ;;  %v7587_v8 = vpop.f32.mrf.mxu3  ;;  %v5151_v61 = vor.u32 %v6374_v48, %v5150_v17  ;;  %v5279_v21 = vor.u32 %v6406_v60, %v5278_v31  ;;  %v5903_v40 = vor.u32 %v6562_v28, %v5902_v58  ;;  %v6558_v19 = vld [vmem:[#allocation5 + $0x7d4] sm:$0xf0]  ;;  %v5911_v51 = vor.u32 %v6564_v11, %v5910_v9  ;;  %v5710_v17 = vld [vmem:[#allocation5 + $0x668] sm:$0xf]  ;;  %v5392_v9 = vld [vmem:[#allocation5 + $0x3f8] sm:$0xf0] }
 0x352   : > { %v5887_v56 = vor.u32 %v6558_v19, %v5886_v39  ;;  %v5838_v48 = vld [vmem:[#allocation5 + $0x768] sm:$0xf]  ;;  %v6546_v31 = vld [vmem:[#allocation5 + $0x774] sm:$0xf0]  ;;  %v3372_v11 = vperm.slane %v7576_v25, 0 }
 0x353   : > { %3615 = vmatpush.bf16.msra.mxu2 %v5247_v36  ;;  %3628 = vmatpush.bf16.msra.mxu3 %v5375_v47  ;;  %v5774_v36 = vld [vmem:[#allocation5 + $0x6e8] sm:$0xf]  ;;  %v6530_v47 = vld [vmem:[#allocation5 + $0x6f4] sm:$0xf0] }
 0x354   : > { %v5775_v35 = vor.u32 %v6530_v47, %v5774_v36  ;;  %v6575_v47 = vld [vmem:[#allocation7 + $0x64] sm:$0xf] }
 0x355   : > { %4195 = vmatpush.bf16.msrb.mxu0 %v5959_v30  ;;  %v3495_v53 = vpop.f32.mrf.mxu0  ;;  %v3508_v32 = vpop.f32.mrf.mxu1 }
 0x356   : > { %v5726_v32 = vld [vmem:[#allocation5 + $0x688] sm:$0xf] }
 0x357   : > { %3616 = vmatpush.bf16.msra.mxu2 %v5231_v18  ;;  %3629 = vmatpush.bf16.msra.mxu3 %v5359_v23  ;;  %v6570_v18 = vld [vmem:[#allocation7 + $0x34] sm:$0xf0] }
 0x358   : > { %v5935_v23 = vor.u32 %v6570_v18, %v5934_v43  ;;  %v5960_v43 = vld [vmem:[#allocation7 + $0x68] sm:$0xf0]  ;;  %v5839_v18 = vor.u32 %v6546_v31, %v5838_v48  ;;  %v5376_v48 = vld [vmem:[#allocation5 + $0x3d8] sm:$0xf0] }
 0x359   : > { %4196 = vmatpush.bf16.msrb.mxu0 %v5951_v27  ;;  %v3391_v15 = vpop.f32.mrf.mxu2  ;;  %v3404_v41 = vpop.f32.mrf.mxu3 }
 0x35a   : > { %v5968_v15 = vld [vmem:[#allocation7 + $0x78] sm:$0xf0]  ;;  %v5727_v41 = vor.u32 %v6518_v26, %v5726_v32  ;;  %v6571_v32 = vld [vmem:[#allocation7 + $0x44] sm:$0xf]  ;;  %v5944_v26 = vld [vmem:[#allocation7 + $0x48] sm:$0xf0] }
 0x35b   : > { %3617 = vmatpush.bf16.msra.mxu2 %v5215_v14  ;;  %3630 = vmatpush.bf16.msra.mxu3 %v5343_v6  ;;  %v5926_v14 = vld [vmem:[#allocation7 + $0x20] sm:$0xf]  ;;  %v6568_v6 = vld [vmem:[#allocation7 + $0x24] sm:$0xf0]  ;;  %v5971_v60 = vor.u32 %v6577_v50, %v5968_v15  ;;  %v5936_v50 = vld [vmem:[#allocation7 + $0x38] sm:$0xf0] }
 0x35c   : > { %v5927_v24 = vor.u32 %v6568_v6, %v5926_v14  ;;  %v5678_v14 = vld [vmem:[#allocation5 + $0x628] sm:$0xf] }
 0x35d   : > { %4197 = vmatpush.bf16.msrb.mxu0 %v5943_v3  ;;  %v7589_v33 = vpop.f32.mrf.mxu0  ;;  %v7591_v20 = vpop.f32.mrf.mxu1 }
 0x35f   : > { %3618 = vmatpush.bf16.msra.mxu2 %v5199_v52  ;;  %3631 = vmatpush.bf16.msra.mxu3 %v5327_v16  ;;  %v5870_v52 = vld [vmem:[#allocation5 + $0x7a8] sm:$0xf]  ;;  %v6554_v16 = vld [vmem:[#allocation5 + $0x7b4] sm:$0xf0] }
 0x360   : > { %v5871_v53 = vor.u32 %v6554_v16, %v5870_v52  ;;  %v5807_v16 = vor.u32 %v6538_v22, %v5806_v4  ;;  %v6420_v4 = vld [vmem:[#allocation5 + $0x38c] sm:$0xf]  ;;  %v5344_v22 = vld [vmem:[#allocation5 + $0x398] sm:$0xf0] }
 0x361   : > { %4198 = vmatpush.bf16.msrb.mxu0 %v5935_v23  ;;  %v7593_v57 = vpop.f32.mrf.mxu2  ;;  %v7595_v44 = vpop.f32.mrf.mxu3  ;;  %v5694_v23 = vld [vmem:[#allocation5 + $0x648] sm:$0xf] }
 0x363   : > { %3619 = vmatpush.bf16.msra.mxu2 %v5183_v49  ;;  %3632 = vmatpush.bf16.msra.mxu3 %v5311_v0  ;;  %v5854_v49 = vld [vmem:[#allocation5 + $0x788] sm:$0xf]  ;;  %v6550_v0 = vld [vmem:[#allocation5 + $0x794] sm:$0xf0] }
 0x364   : > { %v5855_v63 = vor.u32 %v6550_v0, %v5854_v49  ;;  %v5264_v49 = vld [vmem:[#allocation5 + $0x2f8] sm:$0xf0]  ;;  %v6432_v0 = vld [vmem:[#allocation5 + $0x3ec] sm:$0xf] }
 0x365   : > { %v3547_v5 = vpop.f32.mrf.mxu0  ;;  %v3560_v30 = vpop.f32.mrf.mxu1  ;;  %4199 = vmatpush.bf16.msrb.mxu0 %v5927_v24  ;;  %v5662_v24 = vld [vmem:[#allocation5 + $0x608] sm:$0xf] }
 0x366   : > { %v6573_v5 = vld [vmem:[#allocation7 + $0x54] sm:$0xf]  ;;  %v5952_v30 = vld [vmem:[#allocation7 + $0x58] sm:$0xf0]  ;;  %v5663_v15 = vor.u32 %v6502_v1, %v5662_v24  ;;  %v6384_v1 = vld [vmem:[#allocation5 + $0x26c] sm:$0xf] }
 0x367   : > { %3620 = vmatpush.bf16.msra.mxu2 %v5167_v7  ;;  %3633 = vmatpush.bf16.msra.mxu3 %v5295_v59  ;;  %v6514_v59 = vld [vmem:[#allocation5 + $0x674] sm:$0xf0] }
 0x368   : > { %v5711_v28 = vor.u32 %v6514_v59, %v5710_v17  ;;  %v5395_v17 = vor.u32 %v6432_v0, %v5392_v9  ;;  %v6428_v59 = vld [vmem:[#allocation5 + $0x3cc] sm:$0xf]  ;;  %v5184_v9 = vld [vmem:[#allocation5 + $0x258] sm:$0xf0] }
 0x369   : > { %v3417_v45 = vpop.f32.mrf.mxu2  ;;  %v3430_v27 = vpop.f32.mrf.mxu3  ;;  %4200 = vmatpush.bf16.msrb.mxu0 %v5919_v12  ;;  %v6534_v12 = vld [vmem:[#allocation5 + $0x714] sm:$0xf0]  ;;  %v6380_v0 = vld [vmem:[#allocation5 + $0x24c] sm:$0xf] }
 0x36b   : > { %3621 = vmatpush.bf16.msra.mxu2 %v5151_v61  ;;  %3634 = vmatpush.bf16.msra.mxu3 %v5279_v21  ;;  %v6510_v61 = vld [vmem:[#allocation5 + $0x654] sm:$0xf0]  ;;  %v5822_v21 = vld [vmem:[#allocation5 + $0x748] sm:$0xf] }
 0x36c   : > { %v5695_v39 = vor.u32 %v6510_v61, %v5694_v23  ;;  %v5232_v23 = vld [vmem:[#allocation5 + $0x2b8] sm:$0xf0]  ;;  %v6424_v61 = vld [vmem:[#allocation5 + $0x3ac] sm:$0xf] }
 0x36d   : > { %v3597_v3 = vpop.f32.mrf.mxu0  ;;  %v3610_v7 = vpop.f32.mrf.mxu1  ;;  %4201 = vmatpush.bf16.msrb.mxu0 %v5911_v51  ;;  %v6569_v51 = vld [vmem:[#allocation7 + $0x34] sm:$0xf] }
 0x36e   : > { %3622 = vmatmul.bf16.vlgmr.msra.gmra.mxu2 %v7543_v13  ;;  %3635 = vmatmul.bf16.vlgmr.msra.gmra.mxu3 %v7545_v34  ;;  %v3598_v36 = vadd.f32 %v3597_v3, %v3374_v46  ;;  %v5947_v46 = vor.u32 %v6571_v32, %v5944_v26  ;;  %v6396_v3 = vld [vmem:[#allocation5 + $0x2cc] sm:$0xf]  ;;  %v5939_v31 = vor.u32 %v6569_v51, %v5936_v50  ;;  %v5312_v51 = vld [vmem:[#allocation5 + $0x358] sm:$0xf0]  ;;  %v6022_v50 = vld [vmem:[#allocation7 + $0xe0] sm:$0xf] }
 0x36f   : > { %3666 = vmatpush.bf16.msrb.mxu2 %v5775_v35  ;;  %3679 = vmatpush.bf16.msrb.mxu3 %v5903_v40  ;;  %v6542_v35 = vld [vmem:[#allocation5 + $0x754] sm:$0xf0]  ;;  %v5963_v40 = vor.u32 %v6575_v47, %v5960_v43  ;;  %v5928_v47 = vld [vmem:[#allocation7 + $0x28] sm:$0xf0] }
 0x370   : > { %v7600_v58 = vadd.f32 %v3610_v7, %v3598_v36  ;;  %v5823_v19 = vor.u32 %v6542_v35, %v5822_v21  ;;  %v5248_v7 = vld [vmem:[#allocation5 + $0x2d8] sm:$0xf0]  ;;  %v6567_v36 = vld [vmem:[#allocation7 + $0x24] sm:$0xf] }
 0x371   : > { %4246 = vmatpush.bf16.msra.mxu0 %v5971_v60  ;;  %v7602_v29 = vpop.f32.mrf.mxu2  ;;  %v7604_v2 = vpop.f32.mrf.mxu3  ;;  %v3390_v60 = vadd.f32 %v7585_v55, %v3372_v11  ;;  %v5251_v43 = vor.u32 %v6396_v3, %v5248_v7  ;;  %v5360_v21 = vld [vmem:[#allocation5 + $0x3b8] sm:$0xf0]  ;;  %v5931_v35 = vor.u32 %v6567_v36, %v5928_v47  ;;  %v6565_v55 = vld [vmem:[#allocation7 + $0x14] sm:$0xf]  ;;  %v5187_v7 = vor.u32 %v6380_v0, %v5184_v9  ;;  %v6584_v0 = vld [vmem:[#allocation7 + $0xa4] sm:$0xf0] }
 0x372   : > { %v5296_v36 = vld [vmem:[#allocation5 + $0x338] sm:$0xf0] }
 0x373   : > { %3667 = vmatpush.bf16.msrb.mxu2 %v5759_v38  ;;  %3680 = vmatpush.bf16.msrb.mxu3 %v5887_v56  ;;  %v6506_v56 = vld [vmem:[#allocation5 + $0x634] sm:$0xf0] }
 0x374   : > { %v5679_v52 = vor.u32 %v6506_v56, %v5678_v14  ;;  %v5216_v56 = vld [vmem:[#allocation5 + $0x298] sm:$0xf0] }
 0x375   : > { %v3599_v6 = vpop.f32.mrf.mxu0  ;;  %v3612_v38 = vpop.f32.mrf.mxu1  ;;  %4247 = vmatpush.bf16.msra.mxu0 %v5963_v40  ;;  %v3403_v40 = vadd.f32 %v7587_v8, %v3390_v60  ;;  %v5912_v8 = vld [vmem:[#allocation7 + $0x8] sm:$0xf0] }
 0x376   : > { %v5363_v6 = vor.u32 %v6424_v61, %v5360_v21  ;;  %v6388_v38 = vld [vmem:[#allocation5 + $0x28c] sm:$0xf]  ;;  %v5152_v61 = vld [vmem:[#allocation5 + $0x218] sm:$0xf0] }
 0x377   : > { %3668 = vmatpush.bf16.msrb.mxu2 %v5743_v54  ;;  %3681 = vmatpush.bf16.msrb.mxu3 %v5871_v53  ;;  %v5955_v54 = vor.u32 %v6573_v5, %v5952_v30  ;;  %v6400_v53 = vld [vmem:[#allocation5 + $0x2ec] sm:$0xf]  ;;  %v6563_v5 = vld [vmem:[#allocation7 + $0x4] sm:$0xf] }
 0x378   : > { %v6408_v60 = vld [vmem:[#allocation5 + $0x32c] sm:$0xf] }
 0x379   : > { %v3443_v45 = vpop.f32.mrf.mxu2  ;;  %v3456_v27 = vpop.f32.mrf.mxu3  ;;  %4248 = vmatpush.bf16.msra.mxu0 %v5955_v54  ;;  %v5915_v54 = vor.u32 %v6563_v5, %v5912_v8 }
 0x37a   : > { %v6030_v45 = vld [vmem:[#allocation7 + $0xf0] sm:$0xf]  ;;  %v6594_v27 = vld [vmem:[#allocation7 + $0xf4] sm:$0xf0] }
 0x37b   : > { %3669 = vmatpush.bf16.msrb.mxu2 %v5727_v41  ;;  %3682 = vmatpush.bf16.msrb.mxu3 %v5855_v63  ;;  %v5791_v41 = vor.u32 %v6534_v12, %v5790_v10  ;;  %v5267_v63 = vor.u32 %v6400_v53, %v5264_v49  ;;  %v6416_v10 = vld [vmem:[#allocation5 + $0x36c] sm:$0xf]  ;;  %v5328_v12 = vld [vmem:[#allocation5 + $0x378] sm:$0xf0]  ;;  %v6031_v11 = vor.u32 %v6594_v27, %v6030_v45 }
 0x37c   : > { %v5331_v49 = vor.u32 %v6416_v10, %v5328_v12  ;;  %v6556_v45 = vld [vmem:[#allocation5 + $0x7cc] sm:$0xf]  ;;  %v5888_v27 = vld [vmem:[#allocation5 + $0x7d8] sm:$0xf0] }
 0x37d   : > { %4249 = vmatpush.bf16.msra.mxu0 %v5947_v46  ;;  %v6412_v46 = vld [vmem:[#allocation5 + $0x34c] sm:$0xf]  ;;  %4207 = vmatpush.bf16.msrb.mxu1 %v6031_v11 }
 0x37e   : > { %v6520_v11 = vld [vmem:[#allocation5 + $0x6ac] sm:$0xf] }
 0x37f   : > { %3670 = vmatpush.bf16.msrb.mxu2 %v5711_v28  ;;  %3683 = vmatpush.bf16.msrb.mxu3 %v5839_v18  ;;  %v5379_v28 = vor.u32 %v6428_v59, %v5376_v48  ;;  %v6392_v18 = vld [vmem:[#allocation5 + $0x2ac] sm:$0xf]  ;;  %v5315_v59 = vor.u32 %v6412_v46, %v5312_v51  ;;  %v5891_v46 = vor.u32 %v6556_v45, %v5888_v27  ;;  %v5744_v51 = vld [vmem:[#allocation5 + $0x6b8] sm:$0xf0]  ;;  %v6589_v27 = vld [vmem:[#allocation7 + $0xd4] sm:$0xf] }
 0x380   : > { %v5235_v14 = vor.u32 %v6392_v18, %v5232_v23  ;;  %v6376_v48 = vld [vmem:[#allocation5 + $0x22c] sm:$0xf]  ;;  %v6014_v18 = vld [vmem:[#allocation7 + $0xd0] sm:$0xf]  ;;  %v6590_v23 = vld [vmem:[#allocation7 + $0xd4] sm:$0xf0] }
 0x381   : > { %4250 = vmatpush.bf16.msra.mxu0 %v5939_v31  ;;  %v5168_v31 = vld [vmem:[#allocation5 + $0x238] sm:$0xf0]  ;;  %v6015_v21 = vor.u32 %v6590_v23, %v6014_v18  ;;  %v6593_v18 = vld [vmem:[#allocation7 + $0xf4] sm:$0xf] }
 0x382   : > { %v6032_v23 = vld [vmem:[#allocation7 + $0xf8] sm:$0xf0] }
 0x383   : > { %3671 = vmatpush.bf16.msrb.mxu2 %v5695_v39  ;;  %3684 = vmatpush.bf16.msrb.mxu3 %v5823_v19  ;;  %v5920_v39 = vld [vmem:[#allocation7 + $0x18] sm:$0xf0]  ;;  %v3416_v19 = vadd.f32 %v7593_v57, %v3403_v40  ;;  %v5171_v40 = vor.u32 %v6376_v48, %v5168_v31  ;;  %v6548_v48 = vld [vmem:[#allocation5 + $0x78c] sm:$0xf] }
 0x384   : > { %v5923_v24 = vor.u32 %v6565_v55, %v5920_v39  ;;  %v5200_v57 = vld [vmem:[#allocation5 + $0x278] sm:$0xf0]  ;;  %v5299_v55 = vor.u32 %v6408_v60, %v5296_v36  ;;  %v6006_v39 = vld [vmem:[#allocation7 + $0xc0] sm:$0xf] }
 0x385   : > { %4251 = vmatpush.bf16.msra.mxu0 %v5931_v35  ;;  %v3429_v30 = vadd.f32 %v7595_v44, %v3416_v19  ;;  %v5203_v44 = vor.u32 %v6384_v1, %v5200_v57  ;;  %v6588_v19 = vld [vmem:[#allocation7 + $0xc4] sm:$0xf0]  ;;  %v5856_v31 = vld [vmem:[#allocation5 + $0x798] sm:$0xf0]  ;;  %v5974_v36 = vld [vmem:[#allocation7 + $0x80] sm:$0xf] }
 0x386   : > { %v6007_v5 = vor.u32 %v6588_v19, %v6006_v39  ;;  %v6591_v19 = vld [vmem:[#allocation7 + $0xe4] sm:$0xf] }
 0x387   : > { %3672 = vmatpush.bf16.msrb.mxu2 %v5679_v52  ;;  %3685 = vmatpush.bf16.msrb.mxu3 %v5807_v16  ;;  %v5219_v52 = vor.u32 %v6388_v38, %v5216_v56  ;;  %v5347_v16 = vor.u32 %v6420_v4, %v5344_v22  ;;  %v3442_v53 = vadd.f32 %v7602_v29, %v3429_v30  ;;  %v6528_v38 = vld [vmem:[#allocation5 + $0x6ec] sm:$0xf]  ;;  %v5776_v4 = vld [vmem:[#allocation5 + $0x6f8] sm:$0xf0] }
 0x388   : > { %v6560_v22 = vld [vmem:[#allocation5 + $0x7ec] sm:$0xf]  ;;  %v5779_v10 = vor.u32 %v6528_v38, %v5776_v4 }
 0x389   : > { %4252 = vmatpush.bf16.msra.mxu0 %v5923_v24  ;;  %v3455_v29 = vadd.f32 %v7604_v2, %v3442_v53  ;;  %v6372_v2 = vld [vmem:[#allocation5 + $0x20c] sm:$0xf]  ;;  %v5904_v24 = vld [vmem:[#allocation5 + $0x7f8] sm:$0xf0] }
 0x38a   : > { %v5155_v1 = vor.u32 %v6372_v2, %v5152_v61  ;;  %v5907_v12 = vor.u32 %v6560_v22, %v5904_v24  ;;  %v5760_v53 = vld [vmem:[#allocation5 + $0x6d8] sm:$0xf0]  ;;  %v6544_v61 = vld [vmem:[#allocation5 + $0x76c] sm:$0xf] }
 0x38b   : > { %3673 = vmatpush.bf16.msrb.mxu2 %v5663_v15  ;;  %3686 = vmatpush.bf16.msrb.mxu3 %v5791_v41  ;;  %v6592_v15 = vld [vmem:[#allocation7 + $0xe4] sm:$0xf0]  ;;  %v5712_v2 = vld [vmem:[#allocation5 + $0x678] sm:$0xf0]  ;;  %v6508_v4 = vld [vmem:[#allocation5 + $0x64c] sm:$0xf] }
 0x38c   : > { %v6023_v41 = vor.u32 %v6592_v15, %v6022_v50  ;;  %v6552_v50 = vld [vmem:[#allocation5 + $0x7ac] sm:$0xf]  ;;  %v5872_v15 = vld [vmem:[#allocation5 + $0x7b8] sm:$0xf0] }
 0x38d   : > { %v7614_v32 = vpop.f32.mrf.mxu0  ;;  %v7616_v26 = vpop.f32.mrf.mxu1  ;;  %4253 = vmatpush.bf16.msra.mxu0 %v5915_v54  ;;  %v6524_v54 = vld [vmem:[#allocation5 + $0x6cc] sm:$0xf]  ;;  %v5696_v22 = vld [vmem:[#allocation5 + $0x658] sm:$0xf0] }
 0x38e   : > { %3674 = vmatmul.bf16.vlgmr.msrb.gmra.mxu2 %v7561_v42  ;;  %3687 = vmatmul.bf16.vlgmr.msrb.gmra.mxu3 %v7563_v62  ;;  %v5763_v9 = vor.u32 %v6524_v54, %v5760_v53  ;;  %v6540_v24 = vld [vmem:[#allocation5 + $0x74c] sm:$0xf]  ;;  %v5808_v53 = vld [vmem:[#allocation5 + $0x738] sm:$0xf0] }
 0x38f   : > { %3718 = vmatpush.bf16.msra.mxu2 %v5267_v63  ;;  %3731 = vmatpush.bf16.msra.mxu3 %v5395_v17  ;;  %v6536_v54 = vld [vmem:[#allocation5 + $0x72c] sm:$0xf] }
 0x390   : > { %4208 = vmatpush.bf16.msrb.mxu1 %v6023_v41  ;;  %v5982_v41 = vld [vmem:[#allocation7 + $0x90] sm:$0xf] }
 0x391   : > { %v3467_v63 = vpop.f32.mrf.mxu2  ;;  %v3480_v17 = vpop.f32.mrf.mxu3 }
 0x392   : > { %v3468_v3 = vadd.f32 %v3467_v63, %v3455_v29  ;;  %v6582_v63 = vld [vmem:[#allocation7 + $0x94] sm:$0xf0] }
 0x393   : > { %3719 = vmatpush.bf16.msra.mxu2 %v5251_v43  ;;  %3732 = vmatpush.bf16.msra.mxu3 %v5379_v28  ;;  %v5983_v60 = vor.u32 %v6582_v63, %v5982_v41  ;;  %v6585_v63 = vld [vmem:[#allocation7 + $0xb4] sm:$0xf] }
 0x394   : > { %v3481_v47 = vadd.f32 %v3480_v17, %v3468_v3  ;;  %4209 = vmatpush.bf16.msrb.mxu1 %v6015_v21  ;;  %v5747_v17 = vor.u32 %v6520_v11, %v5744_v51  ;;  %v5875_v3 = vor.u32 %v6552_v50, %v5872_v15  ;;  %v5840_v21 = vld [vmem:[#allocation5 + $0x778] sm:$0xf0]  ;;  %v6587_v11 = vld [vmem:[#allocation7 + $0xc4] sm:$0xf]  ;;  %v6008_v51 = vld [vmem:[#allocation7 + $0xc8] sm:$0xf0] }
 0x395   : > { %v3651_v43 = vpop.f32.mrf.mxu0  ;;  %v3664_v28 = vpop.f32.mrf.mxu1  ;;  %v5843_v38 = vor.u32 %v6544_v61, %v5840_v21  ;;  %v5664_v50 = vld [vmem:[#allocation5 + $0x618] sm:$0xf0]  ;;  %v6532_v15 = vld [vmem:[#allocation5 + $0x70c] sm:$0xf]  ;;  %v6011_v41 = vor.u32 %v6587_v11, %v6008_v51  ;;  %v6579_v61 = vld [vmem:[#allocation7 + $0x84] sm:$0xf] }
 0x396   : > { %v3796_v35 = vmax.f32 %v3481_v47, 0.0  ;;  %v6580_v47 = vld [vmem:[#allocation7 + $0x84] sm:$0xf0]  ;;  %v3375_v43 = vperm.slane %v7576_v25, 3  ;;  %v6512_v28 = vld [vmem:[#allocation5 + $0x66c] sm:$0xf] }
 0x397   : > { %3720 = vmatpush.bf16.msra.mxu2 %v5235_v14  ;;  %3733 = vmatpush.bf16.msra.mxu3 %v5363_v6  ;;  %v6404_v14 = vld [vmem:[#allocation5 + $0x30c] sm:$0xf]  ;;  %v5280_v6 = vld [vmem:[#allocation5 + $0x318] sm:$0xf0]  ;;  %v5715_v25 = vor.u32 %v6512_v28, %v5712_v2  ;;  %v6581_v28 = vld [vmem:[#allocation7 + $0x94] sm:$0xf] }
 0x398   : > { %v7619_v56 = vpack.c.bf16 %v3796_v35, %v3796_v35  ;;  %v5283_v57 = vor.u32 %v6404_v14, %v5280_v6  ;;  %4210 = vmatpush.bf16.msrb.mxu1 %v6007_v5  ;;  %v5975_v35 = vor.u32 %v6580_v47, %v5974_v36  ;;  %v6024_v14 = vld [vmem:[#allocation7 + $0xe8] sm:$0xf0]  ;;  %v5824_v5 = vld [vmem:[#allocation5 + $0x758] sm:$0xf0]  ;;  %v6596_v11 = vld [vmem:[#allocation7 + $0x104] sm:$0xf0] }
 0x399   : > { %v3469_v8 = vpop.f32.mrf.mxu2  ;;  %v3482_v30 = vpop.f32.mrf.mxu3  ;;  %v5976_v21 = vld [vmem:[#allocation7 + $0x88] sm:$0xf0]  ;;  %v6609_v51 = vld [vmem:[#allocation7 + $0x174] sm:$0xf] }
 0x39a   : > { %4202 = vmatmul.bf16.vlgmr.msrb.gmra.mxu0 %v7619_v56  ;;  %v6027_v30 = vor.u32 %v6591_v19, %v6024_v14 }
 0x39b   : > { %3721 = vmatpush.bf16.msra.mxu2 %v5219_v52  ;;  %3734 = vmatpush.bf16.msra.mxu3 %v5347_v16  ;;  %v5998_v52 = vld [vmem:[#allocation7 + $0xb0] sm:$0xf]  ;;  %v6586_v16 = vld [vmem:[#allocation7 + $0xb4] sm:$0xf0] }
 0x39f   : > { %3722 = vmatpush.bf16.msra.mxu2 %v5203_v44  ;;  %3735 = vmatpush.bf16.msra.mxu3 %v5331_v49  ;;  %v5999_v44 = vor.u32 %v6586_v16, %v5998_v52  ;;  %v5990_v49 = vld [vmem:[#allocation7 + $0xa0] sm:$0xf] }
 0x3a0   : > { %v5991_v29 = vor.u32 %v6584_v0, %v5990_v49  ;;  %v5811_v0 = vor.u32 %v6536_v54, %v5808_v53  ;;  %v6602_v54 = vld [vmem:[#allocation7 + $0x134] sm:$0xf0] }
 0x3a1   : > { %4211 = vmatpush.bf16.msrb.mxu1 %v5999_v44  ;;  %v6016_v44 = vld [vmem:[#allocation7 + $0xd8] sm:$0xf0] }
 0x3a3   : > { %3723 = vmatpush.bf16.msra.mxu2 %v5187_v7  ;;  %3736 = vmatpush.bf16.msra.mxu3 %v5315_v59  ;;  %v6516_v7 = vld [vmem:[#allocation5 + $0x68c] sm:$0xf]  ;;  %v5728_v59 = vld [vmem:[#allocation5 + $0x698] sm:$0xf0] }
 0x3a5   : > { %4212 = vmatpush.bf16.msrb.mxu1 %v5991_v29  ;;  %v5792_v29 = vld [vmem:[#allocation5 + $0x718] sm:$0xf0] }
 0x3a7   : > { %3724 = vmatpush.bf16.msra.mxu2 %v5171_v40  ;;  %3737 = vmatpush.bf16.msra.mxu3 %v5299_v55  ;;  %v6035_v40 = vor.u32 %v6593_v18, %v6032_v23  ;;  %v5984_v18 = vld [vmem:[#allocation7 + $0x98] sm:$0xf0] }
 0x3a8   : > { %v5987_v2 = vor.u32 %v6581_v28, %v5984_v18 }
 0x3a9   : > { %4213 = vmatpush.bf16.msrb.mxu1 %v5983_v60  ;;  %v6610_v60 = vld [vmem:[#allocation7 + $0x174] sm:$0xf0] }
 0x3aa   : > { %4254 = vmatmul.bf16.vlgmr.msra.gmra.mxu0 %v7619_v56 }
 0x3ab   : > { %3725 = vmatpush.bf16.msra.mxu2 %v5155_v1  ;;  %3738 = vmatpush.bf16.msra.mxu3 %v5283_v57  ;;  %v5699_v1 = vor.u32 %v6508_v4, %v5696_v22  ;;  %v5827_v57 = vor.u32 %v6540_v24, %v5824_v5  ;;  %v6078_v5 = vld [vmem:[#allocation7 + $0x150] sm:$0xf] }
 0x3ad   : > { %v3701_v55 = vpop.f32.mrf.mxu0  ;;  %v3714_v39 = vpop.f32.mrf.mxu1  ;;  %4214 = vmatpush.bf16.msrb.mxu1 %v5975_v35 }
 0x3ae   : > { %3726 = vmatmul.bf16.vlgmr.msra.gmra.mxu2 %v7543_v13  ;;  %3739 = vmatmul.bf16.vlgmr.msra.gmra.mxu3 %v7545_v34  ;;  %v5731_v13 = vor.u32 %v6516_v7, %v5728_v59  ;;  %v5859_v34 = vor.u32 %v6548_v48, %v5856_v31  ;;  %v3702_v6 = vadd.f32 %v3701_v55, %v3375_v43  ;;  %v6094_v31 = vld [vmem:[#allocation7 + $0x170] sm:$0xf]  ;;  %v6583_v43 = vld [vmem:[#allocation7 + $0xa4] sm:$0xf]  ;;  %v6086_v55 = vld [vmem:[#allocation7 + $0x160] sm:$0xf] }
 0x3af   : > { %3770 = vmatpush.bf16.msrb.mxu2 %v5779_v10  ;;  %3783 = vmatpush.bf16.msrb.mxu3 %v5907_v12  ;;  %v6504_v10 = vld [vmem:[#allocation5 + $0x62c] sm:$0xf]  ;;  %v5680_v12 = vld [vmem:[#allocation5 + $0x638] sm:$0xf0]  ;;  %v5795_v48 = vor.u32 %v6532_v15, %v5792_v29  ;;  %v6095_v47 = vor.u32 %v6610_v60, %v6094_v31  ;;  %v6603_v60 = vld [vmem:[#allocation7 + $0x144] sm:$0xf] }
 0x3b0   : > { %v7626_v8 = vadd.f32 %v3714_v39, %v3702_v6  ;;  %v5683_v49 = vor.u32 %v6504_v10, %v5680_v12  ;;  %v6608_v39 = vld [vmem:[#allocation7 + $0x164] sm:$0xf0]  ;;  %v6062_v12 = vld [vmem:[#allocation7 + $0x130] sm:$0xf] }
 0x3b1   : > { %4259 = vmatpush.bf16.msra.mxu1 %v6035_v40  ;;  %v3519_v52 = vpop.f32.mrf.mxu2  ;;  %v3532_v16 = vpop.f32.mrf.mxu3  ;;  %v5979_v40 = vor.u32 %v6579_v61, %v5976_v21  ;;  %v6087_v19 = vor.u32 %v6608_v39, %v6086_v55  ;;  %v6597_v21 = vld [vmem:[#allocation7 + $0x114] sm:$0xf]  ;;  %v6158_v55 = vld [vmem:[#allocation7 + $0x1f0] sm:$0xf]  ;;  %v6626_v39 = vld [vmem:[#allocation7 + $0x1f4] sm:$0xf0] }
 0x3b2   : > { %v3520_v23 = vadd.f32 %v3519_v52, %v7583_v37  ;;  %v6070_v52 = vld [vmem:[#allocation7 + $0x140] sm:$0xf] }
 0x3b3   : > { %3771 = vmatpush.bf16.msrb.mxu2 %v5763_v9  ;;  %3784 = vmatpush.bf16.msrb.mxu3 %v5891_v46  ;;  %v6500_v9 = vld [vmem:[#allocation5 + $0x60c] sm:$0xf]  ;;  %v6019_v46 = vor.u32 %v6589_v27, %v6016_v44  ;;  %v6600_v27 = vld [vmem:[#allocation7 + $0x124] sm:$0xf0] }
 0x3b4   : > { %v5667_v59 = vor.u32 %v6500_v9, %v5664_v50  ;;  %v3533_v35 = vadd.f32 %v3532_v16, %v3520_v23  ;;  %v6096_v50 = vld [vmem:[#allocation7 + $0x178] sm:$0xf0]  ;;  %v6599_v23 = vld [vmem:[#allocation7 + $0x124] sm:$0xf] }
 0x3b5   : > { %4260 = vmatpush.bf16.msra.mxu1 %v6027_v30  ;;  %v3703_v56 = vpop.f32.mrf.mxu0  ;;  %v3716_v45 = vpop.f32.mrf.mxu1  ;;  %v6606_v30 = vld [vmem:[#allocation7 + $0x154] sm:$0xf0]  ;;  %v6099_v29 = vor.u32 %v6609_v51, %v6096_v50 }
 0x3b6   : > { %v3546_v14 = vadd.f32 %v7589_v33, %v3533_v35  ;;  %v6079_v16 = vor.u32 %v6606_v30, %v6078_v5  ;;  %v6054_v45 = vld [vmem:[#allocation7 + $0x120] sm:$0xf]  ;;  %v6048_v35 = vld [vmem:[#allocation7 + $0x118] sm:$0xf0] }
 0x3b7   : > { %3772 = vmatpush.bf16.msrb.mxu2 %v5747_v17  ;;  %3785 = vmatpush.bf16.msrb.mxu3 %v5875_v3  ;;  %v6000_v17 = vld [vmem:[#allocation7 + $0xb8] sm:$0xf0]  ;;  %v6055_v44 = vor.u32 %v6600_v27, %v6054_v45  ;;  %v6618_v45 = vld [vmem:[#allocation7 + $0x1b4] sm:$0xf0] }
 0x3b8   : > { %v6003_v36 = vor.u32 %v6585_v63, %v6000_v17  ;;  %v6088_v63 = vld [vmem:[#allocation7 + $0x168] sm:$0xf0] }
 0x3b9   : > { %4261 = vmatpush.bf16.msra.mxu1 %v6019_v46  ;;  %v3521_v3 = vpop.f32.mrf.mxu2  ;;  %v3534_v7 = vpop.f32.mrf.mxu3  ;;  %v6038_v46 = vld [vmem:[#allocation7 + $0x100] sm:$0xf] }
 0x3ba   : > { %v6039_v15 = vor.u32 %v6596_v11, %v6038_v46  ;;  %v6110_v46 = vld [vmem:[#allocation7 + $0x190] sm:$0xf]  ;;  %v6614_v11 = vld [vmem:[#allocation7 + $0x194] sm:$0xf0] }
 0x3bb   : > { %3773 = vmatpush.bf16.msrb.mxu2 %v5731_v13  ;;  %3786 = vmatpush.bf16.msrb.mxu3 %v5859_v34  ;;  %v5992_v13 = vld [vmem:[#allocation7 + $0xa8] sm:$0xf0]  ;;  %v6111_v50 = vor.u32 %v6614_v11, %v6110_v46  ;;  %v6641_v46 = vld [vmem:[%s7719_s6 + $0x70] sm:$0xff] }
 0x3bc   : > { %v5995_v34 = vor.u32 %v6583_v43, %v5992_v13  ;;  %v6601_v43 = vld [vmem:[#allocation7 + $0x134] sm:$0xf]  ;;  %v6064_v13 = vld [vmem:[#allocation7 + $0x138] sm:$0xf0]  ;;  %v6632_v11 = vld [vmem:[%s7719_s6 + $0x28] sm:$0xff] }
 0x3bd   : > { %4262 = vmatpush.bf16.msra.mxu1 %v6011_v41  ;;  %v6607_v41 = vld [vmem:[#allocation7 + $0x164] sm:$0xf]  ;;  %v6067_v18 = vor.u32 %v6601_v43, %v6064_v13  ;;  %v6144_v43 = vld [vmem:[#allocation7 + $0x1d8] sm:$0xf0] }
 0x3be   : > { %v6091_v17 = vor.u32 %v6607_v41, %v6088_v63  ;;  %v6625_v41 = vld [vmem:[#allocation7 + $0x1f4] sm:$0xf]  ;;  %v6160_v63 = vld [vmem:[#allocation7 + $0x1f8] sm:$0xf0] }
 0x3bf   : > { %3774 = vmatpush.bf16.msrb.mxu2 %v5715_v25  ;;  %3787 = vmatpush.bf16.msrb.mxu3 %v5843_v38 }
 0x3c1   : > { %4263 = vmatpush.bf16.msra.mxu1 %v6003_v36  ;;  %v6072_v36 = vld [vmem:[#allocation7 + $0x148] sm:$0xf0] }
 0x3c3   : > { %3775 = vmatpush.bf16.msrb.mxu2 %v5699_v1  ;;  %3788 = vmatpush.bf16.msrb.mxu3 %v5827_v57  ;;  %v6604_v1 = vld [vmem:[#allocation7 + $0x144] sm:$0xf0] }
 0x3c4   : > { %v6071_v57 = vor.u32 %v6604_v1, %v6070_v52  ;;  %v6142_v1 = vld [vmem:[#allocation7 + $0x1d0] sm:$0xf] }
 0x3c5   : > { %4264 = vmatpush.bf16.msra.mxu1 %v5995_v34 }
 0x3c7   : > { %3776 = vmatpush.bf16.msrb.mxu2 %v5683_v49  ;;  %3789 = vmatpush.bf16.msrb.mxu3 %v5811_v0  ;;  %v6046_v49 = vld [vmem:[#allocation7 + $0x110] sm:$0xf]  ;;  %v6598_v0 = vld [vmem:[#allocation7 + $0x114] sm:$0xf0] }
 0x3c8   : > { %v6047_v9 = vor.u32 %v6598_v0, %v6046_v49  ;;  %v6118_v49 = vld [vmem:[#allocation7 + $0x1a0] sm:$0xf]  ;;  %v6616_v0 = vld [vmem:[#allocation7 + $0x1a4] sm:$0xf0] }
 0x3c9   : > { %4265 = vmatpush.bf16.msra.mxu1 %v5987_v2  ;;  %v6056_v2 = vld [vmem:[#allocation7 + $0x128] sm:$0xf0] }
 0x3ca   : > { %v6059_v61 = vor.u32 %v6599_v23, %v6056_v2  ;;  %v6617_v2 = vld [vmem:[#allocation7 + $0x1b4] sm:$0xf] }
 0x3cb   : > { %3777 = vmatpush.bf16.msrb.mxu2 %v5667_v59  ;;  %3790 = vmatpush.bf16.msrb.mxu3 %v5795_v48  ;;  %v6605_v59 = vld [vmem:[#allocation7 + $0x154] sm:$0xf]  ;;  %v6080_v48 = vld [vmem:[#allocation7 + $0x158] sm:$0xf0] }
 0x3cc   : > { %v6083_v31 = vor.u32 %v6605_v59, %v6080_v48  ;;  %v6152_v59 = vld [vmem:[#allocation7 + $0x1e8] sm:$0xf0] }
 0x3cd   : > { %v7632_v6 = vpop.f32.mrf.mxu0  ;;  %4266 = vmatpush.bf16.msra.mxu1 %v5979_v40 }
 0x3ce   : > { %3778 = vmatmul.bf16.vlgmr.msrb.gmra.mxu2 %v7561_v42  ;;  %3791 = vmatmul.bf16.vlgmr.msrb.gmra.mxu3 %v7563_v62  ;;  %v7634_v42 = vpop.f32.mrf.mxu1  ;;  %v3559_v62 = vadd.f32 %v7591_v20, %v3546_v14  ;;  %v6063_v20 = vor.u32 %v6602_v54, %v6062_v12  ;;  %v6159_v14 = vor.u32 %v6626_v39, %v6158_v55  ;;  %v6134_v12 = vld [vmem:[#allocation7 + $0x1c0] sm:$0xf]  ;;  %v6620_v54 = vld [vmem:[#allocation7 + $0x1c4] sm:$0xf0]  ;;  %v6615_v55 = vld [vmem:[#allocation7 + $0x1a4] sm:$0xf] }
 0x3cf   : > { %4220 = vmatpush.bf16.msra.mxu2 %v6095_v47  ;;  %v6075_v47 = vor.u32 %v6603_v60, %v6072_v36  ;;  %v6120_v39 = vld [vmem:[#allocation7 + $0x1a8] sm:$0xf0] }
 0x3d0   : > { %4233 = vmatpush.bf16.msra.mxu3 %v6159_v14  ;;  %v6123_v14 = vor.u32 %v6615_v55, %v6120_v39 }
 0x3d1   : > { %v3571_v37 = vpop.f32.mrf.mxu2  ;;  %v3584_v25 = vpop.f32.mrf.mxu3 }
 0x3d2   : > { %v3572_v38 = vadd.f32 %v3571_v37, %v3559_v62  ;;  %v6595_v62 = vld [vmem:[#allocation7 + $0x104] sm:$0xf]  ;;  %v6040_v37 = vld [vmem:[#allocation7 + $0x108] sm:$0xf0] }
 0x3d3   : > { %4221 = vmatpush.bf16.msra.mxu2 %v6087_v19  ;;  %v6051_v19 = vor.u32 %v6597_v21, %v6048_v35 }
 0x3d4   : > { %v3585_v4 = vadd.f32 %v3584_v25, %v3572_v38  ;;  %v6043_v38 = vor.u32 %v6595_v62, %v6040_v37  ;;  %v6613_v62 = vld [vmem:[#allocation7 + $0x194] sm:$0xf]  ;;  %v6112_v37 = vld [vmem:[#allocation7 + $0x198] sm:$0xf0] }
 0x3d5   : > { %v3755_v22 = vpop.f32.mrf.mxu0 }
 0x3d6   : > { %v3768_v24 = vpop.f32.mrf.mxu1  ;;  %v3797_v33 = vmax.f32 %v3585_v4, 0.0  ;;  %v6150_v4 = vld [vmem:[#allocation7 + $0x1e0] sm:$0xf]  ;;  %v6624_v22 = vld [vmem:[#allocation7 + $0x1e4] sm:$0xf0] }
 0x3d7   : > { %4222 = vmatpush.bf16.msra.mxu2 %v6079_v16  ;;  %v6151_v24 = vor.u32 %v6624_v22, %v6150_v4  ;;  %v6611_v4 = vld [vmem:[#allocation7 + $0x184] sm:$0xf]  ;;  %v6104_v22 = vld [vmem:[#allocation7 + $0x188] sm:$0xf0] }
 0x3d8   : > { %v3801_v10 = vpack.c.bf16 %v3797_v33, %v3797_v33  ;;  %v6622_v33 = vld [vmem:[#allocation7 + $0x1d4] sm:$0xf0] }
 0x3d9   : > { %v3573_v53 = vpop.f32.mrf.mxu2  ;;  %v3586_v56 = vpop.f32.mrf.mxu3  ;;  %4234 = vmatpush.bf16.msra.mxu3 %v6151_v24 }
 0x3da   : > { %4215 = vmatmul.bf16.vlgmr.msrb.gmra.mxu1 %v3801_v10  ;;  %v6135_v56 = vor.u32 %v6620_v54, %v6134_v12  ;;  %v3868_v54 = vld [vmem:[%s7720_s7 + $0xe] sm:$0x3] }
 0x3db   : > { %4223 = vmatpush.bf16.msra.mxu2 %v6071_v57 }
 0x3df   : > { %4224 = vmatpush.bf16.msra.mxu2 %v6063_v20  ;;  %v6126_v20 = vld [vmem:[#allocation7 + $0x1b0] sm:$0xf] }
 0x3e3   : > { %4225 = vmatpush.bf16.msra.mxu2 %v6055_v44 }
 0x3e7   : > { %4226 = vmatpush.bf16.msra.mxu2 %v6047_v9  ;;  %v6119_v9 = vor.u32 %v6616_v0, %v6118_v49  ;;  %v6634_v49 = vld [vmem:[%s7719_s6 + $0x38] sm:$0xff] }
 0x3e8   : > { %v6642_v0 = vld [vmem:[%s7719_s6 + $0x78] sm:$0xff]  ;;  %4431 = vmatpush.bf16.msrb.mxu0 %v6634_v49 }
 0x3e9   : > { %4444 = vmatpush.bf16.msrb.mxu1 %v6642_v0 }
 0x3ea   : > { %4267 = vmatmul.bf16.vlgmr.msra.gmra.mxu1 %v3801_v10  ;;  %v6143_v10 = vor.u32 %v6622_v33, %v6142_v1 }
 0x3eb   : > { %4227 = vmatpush.bf16.msra.mxu2 %v6039_v15  ;;  %v6102_v15 = vld [vmem:[#allocation7 + $0x180] sm:$0xf] }
 0x3ec   : > { %4235 = vmatpush.bf16.msra.mxu3 %v6143_v10 }
 0x3ed   : > { %4445 = vmatpush.bf16.msrb.mxu1 %v6641_v46 }
 0x3ef   : > { %4272 = vmatpush.bf16.msrb.mxu2 %v6099_v29  ;;  %v6612_v29 = vld [vmem:[#allocation7 + $0x184] sm:$0xf0] }
 0x3f0   : > { %4236 = vmatpush.bf16.msra.mxu3 %v6135_v56 }
 0x3f1   : > { %v3623_v3 = vpop.f32.mrf.mxu2  ;;  %v3636_v7 = vpop.f32.mrf.mxu3 }
 0x3f2   : > { %v3624_v40 = vadd.f32 %v3623_v3, %v7600_v58  ;;  %v6163_v3 = vor.u32 %v6625_v41, %v6160_v63  ;;  %v6629_v41 = vld [vmem:[%s7719_s6 + $0x10] sm:$0xff] }
 0x3f3   : > { %4273 = vmatpush.bf16.msrb.mxu2 %v6091_v17  ;;  %v6103_v17 = vor.u32 %v6612_v29, %v6102_v15  ;;  %v6630_v15 = vld [vmem:[%s7719_s6 + $0x18] sm:$0xff] }
 0x3f4   : > { %v3637_v25 = vadd.f32 %v3636_v7, %v3624_v40  ;;  %v6623_v7 = vld [vmem:[#allocation7 + $0x1e4] sm:$0xf] }
 0x3f6   : > { %v3650_v5 = vadd.f32 %v7614_v32, %v3637_v25 }
 0x3f7   : > { %4274 = vmatpush.bf16.msrb.mxu2 %v6083_v31  ;;  %v6155_v31 = vor.u32 %v6623_v7, %v6152_v59  ;;  %v6640_v7 = vld [vmem:[%s7719_s6 + $0x68] sm:$0xff]  ;;  %v6627_v59 = vld [vmem:[%s7719_s6] sm:$0xff] }
 0x3f8   : > { %v3663_v58 = vadd.f32 %v7616_v26, %v3650_v5  ;;  %v6127_v26 = vor.u32 %v6618_v45, %v6126_v20  ;;  %v6107_v5 = vor.u32 %v6611_v4, %v6104_v22  ;;  %v4191_v45 = vperm.slane %v3868_v54, 1  ;;  %4446 = vmatpush.bf16.msrb.mxu1 %v6640_v7 }
 0x3f9   : > { %v3625_v34 = vpop.f32.mrf.mxu2  ;;  %v3638_v28 = vpop.f32.mrf.mxu3 }
 0x3fa   : > { %4237 = vmatpush.bf16.msra.mxu3 %v6127_v26  ;;  %v6619_v34 = vld [vmem:[#allocation7 + $0x1c4] sm:$0xf]  ;;  %v6136_v28 = vld [vmem:[#allocation7 + $0x1c8] sm:$0xf0] }
 0x3fb   : > { %4275 = vmatpush.bf16.msrb.mxu2 %v6075_v47  ;;  %v6621_v47 = vld [vmem:[#allocation7 + $0x1d4] sm:$0xf]  ;;  %v6139_v23 = vor.u32 %v6619_v34, %v6136_v28 }
 0x3fc   : > { %v6147_v13 = vor.u32 %v6621_v47, %v6144_v43  ;;  %v6635_v47 = vld [vmem:[%s7719_s6 + $0x40] sm:$0xff] }
 0x3fe   : > { %4238 = vmatpush.bf16.msra.mxu3 %v6119_v9  ;;  %v6633_v9 = vld [vmem:[%s7719_s6 + $0x30] sm:$0xff] }
 0x3ff   : > { %4276 = vmatpush.bf16.msrb.mxu2 %v6067_v18  ;;  %4432 = vmatpush.bf16.msrb.mxu0 %v6633_v9 }
 0x402   : > { %4239 = vmatpush.bf16.msra.mxu3 %v6111_v50  ;;  %v6631_v50 = vld [vmem:[%s7719_s6 + $0x20] sm:$0xff] }
 0x403   : > { %4277 = vmatpush.bf16.msrb.mxu2 %v6059_v61  ;;  %v6128_v61 = vld [vmem:[#allocation7 + $0x1b8] sm:$0xf0]  ;;  %4433 = vmatpush.bf16.msrb.mxu0 %v6632_v11 }
 0x404   : > { %v6131_v40 = vor.u32 %v6617_v2, %v6128_v61 }
 0x406   : > { %4240 = vmatpush.bf16.msra.mxu3 %v6103_v17 }
 0x407   : > { %4278 = vmatpush.bf16.msrb.mxu2 %v6051_v19  ;;  %4434 = vmatpush.bf16.msrb.mxu0 %v6631_v50 }
 0x40a   : > { %4285 = vmatpush.bf16.msrb.mxu3 %v6163_v3  ;;  %v6628_v3 = vld [vmem:[%s7719_s6 + $0x8] sm:$0xff] }
 0x40b   : > { %4279 = vmatpush.bf16.msrb.mxu2 %v6043_v38  ;;  %v6115_v38 = vor.u32 %v6613_v62, %v6112_v37  ;;  %4435 = vmatpush.bf16.msrb.mxu0 %v6630_v15 }
 0x40e   : > { %4286 = vmatpush.bf16.msrb.mxu3 %v6155_v31  ;;  %v6638_v31 = vld [vmem:[%s7719_s6 + $0x58] sm:$0xff] }
 0x40f   : > { %4436 = vmatpush.bf16.msrb.mxu0 %v6629_v41 }
 0x411   : > { %v3675_v30 = vpop.f32.mrf.mxu2  ;;  %v3688_v52 = vpop.f32.mrf.mxu3 }
 0x412   : > { %v3676_v16 = vadd.f32 %v3675_v30, %v3663_v58  ;;  %4287 = vmatpush.bf16.msrb.mxu3 %v6147_v13 }
 0x413   : > { %4437 = vmatpush.bf16.msrb.mxu0 %v6628_v3 }
 0x414   : > { %v3689_v57 = vadd.f32 %v3688_v52, %v3676_v16 }
 0x416   : > { %v3798_v53 = vmax.f32 %v3689_v57, 0.0  ;;  %4288 = vmatpush.bf16.msrb.mxu3 %v6139_v23 }
 0x417   : > { %v7640_v51 = vpop.f32.mrf.mxu0  ;;  %4438 = vmatpush.bf16.msrb.mxu0 %v6627_v59 }
 0x418   : > { %v3802_v27 = vpack.c.bf16 %v3798_v53, %v3798_v53  ;;  %v4190_v53 = vperm.slane %v3868_v54, 0 }
 0x419   : > { %v3677_v32 = vpop.f32.mrf.mxu2  ;;  %v3690_v44 = vpop.f32.mrf.mxu3 }
 0x41a   : > { %4228 = vmatmul.bf16.vlgmr.msra.gmra.mxu2 %v3802_v27  ;;  %4289 = vmatpush.bf16.msrb.mxu3 %v6131_v40  ;;  %v4204_v56 = vadd.f32 %v7640_v51, %v4190_v53 }
 0x41e   : > { %4290 = vmatpush.bf16.msrb.mxu3 %v6123_v14  ;;  %v4334_v14 = vld [vmem:[%s7720_s7 + $0x10] sm:$0x1] }
 0x41f   : > { %v4205_v48 = vpop.f32.mrf.mxu0 }
 0x420   : > { %v6639_v48 = vld [vmem:[%s7719_s6 + $0x60] sm:$0xff] }
 0x421   : > { %4447 = vmatpush.bf16.msrb.mxu1 %v6639_v48 }
 0x422   : > { %4291 = vmatpush.bf16.msrb.mxu3 %v6115_v38 }
 0x425   : > { %4448 = vmatpush.bf16.msrb.mxu1 %v6638_v31 }
 0x426   : > { %4292 = vmatpush.bf16.msrb.mxu3 %v6107_v5 }
 0x427   : > { %v4255_v18 = vpop.f32.mrf.mxu0 }
 0x42a   : > { %4280 = vmatmul.bf16.vlgmr.msrb.gmra.mxu2 %v3802_v27  ;;  %v4256_v27 = vadd.f32 %v4255_v18, %v4191_v45 }
 0x42f   : > { %v4257_v19 = vpop.f32.mrf.mxu0 }
 0x431   : > { %v3727_v60 = vpop.f32.mrf.mxu2  ;;  %v3740_v36 = vpop.f32.mrf.mxu3 }
 0x432   : > { %v3728_v25 = vadd.f32 %v3727_v60, %v7626_v8  ;;  %v6637_v60 = vld [vmem:[%s7719_s6 + $0x50] sm:$0xff] }
 0x433   : > { %4449 = vmatpush.bf16.msrb.mxu1 %v6637_v60 }
 0x434   : > { %v3741_v24 = vadd.f32 %v3740_v36, %v3728_v25  ;;  %v6636_v36 = vld [vmem:[%s7719_s6 + $0x48] sm:$0xff] }
 0x436   : > { %v3754_v58 = vadd.f32 %v7632_v6, %v3741_v24 }
 0x437   : > { %4450 = vmatpush.bf16.msrb.mxu1 %v6636_v36 }
 0x438   : > { %v3767_v30 = vadd.f32 %v7634_v42, %v3754_v58 }
 0x439   : > { %v3729_v21 = vpop.f32.mrf.mxu2  ;;  %v3742_v35 = vpop.f32.mrf.mxu3 }
 0x43b   : > { %4451 = vmatpush.bf16.msrb.mxu1 %v6635_v47 }
 0x451   : > { %v3779_v52 = vpop.f32.mrf.mxu2  ;;  %v3792_v16 = vpop.f32.mrf.mxu3 }
 0x452   : > { %v3780_v1 = vadd.f32 %v3779_v52, %v3767_v30 }
 0x454   : > { %v3793_v33 = vadd.f32 %v3792_v16, %v3780_v1 }
 0x456   : > { %v3799_v57 = vmax.f32 %v3793_v33, 0.0 }
 0x457   : > { %v4216_v6 = vpop.f32.mrf.mxu1 }
 0x458   : > { %v3803_v10 = vpack.c.bf16 %v3799_v57, %v3799_v57  ;;  %v4217_v20 = vadd.f32 %v4216_v6, %v4204_v56 }
 0x459   : > { %v3781_v12 = vpop.f32.mrf.mxu2  ;;  %v3794_v8 = vpop.f32.mrf.mxu3 }
 0x45a   : > { %4241 = vmatmul.bf16.vlgmr.msra.gmra.mxu3 %v3803_v10 }
 0x45f   : > { %v4218_v42 = vpop.f32.mrf.mxu1 }
 0x467   : > { %v4268_v32 = vpop.f32.mrf.mxu1 }
 0x468   : > { %v4269_v44 = vadd.f32 %v4268_v32, %v4256_v27 }
 0x46a   : > { %4293 = vmatmul.bf16.vlgmr.msrb.gmra.mxu3 %v3803_v10 }
 0x46f   : > { %v4270_v26 = vpop.f32.mrf.mxu1 }
 0x49d   : > { %v4229_v51 = vpop.f32.mrf.mxu2 }
 0x49e   : > { %v4230_v43 = vadd.f32 %v4229_v51, %v4217_v20 }
 0x4a5   : > { %v4231_v29 = vpop.f32.mrf.mxu2 }
 0x4ad   : > { %v4281_v63 = vpop.f32.mrf.mxu2 }
 0x4ae   : > { %v4282_v2 = vadd.f32 %v4281_v63, %v4269_v44 }
 0x4b5   : > { %v4283_v17 = vpop.f32.mrf.mxu2 }
 0x4dd   : > { %v4242_v13 = vpop.f32.mrf.mxu3 }
 0x4de   : > { %v4243_v34 = vadd.f32 %v4242_v13, %v4230_v43 }
 0x4e0   : > { %v4298_v28 = vmax.f32 %v4243_v34, 0.0 }
 0x4e2   : > { %v4300_v18 = vpack.c.bf16 %v4298_v28, %v4298_v28 }
 0x4e4   : > { %4439 = vmatmul.bf16.vlgmr.msrb.gmra.mxu0 %v4300_v18 }
 0x4e5   : > { %v4244_v23 = vpop.f32.mrf.mxu3 }
 0x4ed   : > { %v4294_v61 = vpop.f32.mrf.mxu3 }
 0x4ee   : > { %v4295_v21 = vadd.f32 %v4294_v61, %v4282_v2 }
 0x4f0   : > { %v4299_v35 = vmax.f32 %v4295_v21, 0.0 }
 0x4f2   : > { %v4301_v40 = vpack.c.bf16 %v4299_v35, %v4299_v35 }
 0x4f4   : > { %4452 = vmatmul.bf16.vlgmr.msrb.gmra.mxu1 %v4301_v40 }
 0x4f5   : > { %v4296_v55 = vpop.f32.mrf.mxu3 }
 0x561   : > { %v4440_v39 = vpop.f32.mrf.mxu0 }
 0x562   : > { %v4441_v62 = vadd.f32 %v4440_v39, %v4334_v14 }
 0x569   : > { %v4442_v19 = vpop.f32.mrf.mxu0 }
 0x571   : > { %v4453_v37 = vpop.f32.mrf.mxu1 }
 0x572   : > { %v4454_v25 = vadd.f32 %v4453_v37, %v4441_v62 }
 0x574   : > { %4457 = vst [vmem:[%s379_s12] sm:$0x1] %v4454_v25 }
 0x579   : > { %v4455_v38 = vpop.f32.mrf.mxu1 }
 0x57a PF: > { %s20_s29 = sadd.s32 1, %s6826_s29   ;;  %s7726_s27 = smov %s6822_s28 }
 0x57b   : > { %p17_p8 = scmp.ge.s32.totalorder %s20_s29, 4   ;;  %s7727_s28 = smov %s7729_s17 }
 0x57d   :  { %19 = sbr.rel (!%p17_p8) target bundleno = 3 (0x3), region = 103 }
 0x582   :  { %4475 = vsyncpa [#allocation4], 1 }
 0x583   :  { %4477 = vsyncpa [#allocation4 + $0x1], 1 }
 0x584   :  { %4478 = vsyncpa [#allocation6], 1 }

</bundles_post_ra>
